<compile_context>
chip_gen: v6e
topology: v6e:2x2x1
jax: 0.10.0
libtpu: 0.0.40
codegen_flags: <defaults>
</compile_context>

<pallas_src>
import jax
import jax.numpy as jnp
from jax import lax
from jax.experimental import pallas as pl
from jax.experimental.pallas import tpu as pltpu

LATENT = 2
HIDDEN = 25600            # Linear(2, 25600)
C_IMG, H_IMG = 64, 20     # 25600 = 64 * 20 * 20
C_MID = 32
K = 3
H_CT = (H_IMG - 1) * 2 + K + 1       # 42 : ConvTranspose2d output (output_padding=1)
H_OUT = H_CT - (K - 1)               # 40 : final Conv2d output
PHASE_S = H_CT // 2                  # 21 : per-parity-phase spatial side
PHASE_N = PHASE_S * PHASE_S          # 441: flattened (zero-padded) spatial lanes


# ------------------------------ lane-shift helpers ---------------------------
def _shift_right_lanes(x, s):
    """y[:, l] = x[:, l - s] (zero-fill for l < s)."""
    if s == 0:
        return x
    pad = jnp.zeros((x.shape[0], s), x.dtype)
    return jnp.concatenate([pad, x[:, : x.shape[1] - s]], axis=1)


def _shift_left_lanes(x, s):
    """y[:, l] = x[:, l + s] (zero-fill past the end)."""
    if s == 0:
        return x
    pad = jnp.zeros((x.shape[0], s), x.dtype)
    return jnp.concatenate([x[:, s:], pad], axis=1)


# Kernel taps (kh, kw) that contribute to ConvTranspose output parity (p, q).
_PHASE_TAPS = {
    (p, q): [(kh, kw) for kh in range(K) for kw in range(K)
             if kh % 2 == p and kw % 2 == q]
    for p in range(2) for q in range(2)
}


# --------------------------------- fused kernel ------------------------------
def _decoder_kernel(x_sm, b2_sm, wl_ref, bl_ref, w1_ref, b1_ref, w2_ref,
                    out_ref, xc_scr, t_scr, h_scr):
    # x_sm : (B, 2)  latent codes, SMEM
    # b2_sm: (1, 1)  Conv2d bias, SMEM
    # wl_ref: (2, 64, 441)  Linear weights, channel-planar, spatially zero-padded
    # bl_ref: (64, 441)     Linear bias, same layout
    # w1_ref: (288, 64)     ConvTranspose weights, row = (kh*3+kw)*32 + co
    # b1_ref: (32, 1)       ConvTranspose bias
    # w2_ref: (9, 32, 1)    Conv2d weights, row = kh*3+kw
    # out_ref: (4, 441)     output parity phases (r*2+s, u*21+v)
    # xc_scr: (64, 441)   relu(linear) activation
    # t_scr : (288, 441)  per-tap ConvTranspose partial products
    # h_scr : (4, 32, 441) ReLU'd ConvTranspose output, split by parity phase
    b = pl.program_id(0)
    x0 = x_sm[b, 0]
    x1 = x_sm[b, 1]
    b2 = b2_sm[0, 0]

    # ---- layer1: Linear(2, 25600) + ReLU as a 2-term VPU FMA -----------------
    xc_scr[...] = jnp.maximum(
        x0 * wl_ref[0] + x1 * wl_ref[1] + bl_ref[...], 0.0)

    # ---- ConvTranspose2d: all 9 kernel-tap planes with one MXU matmul --------
    # t[(kh*3+kw)*32 + co, lane(ih,iw)] = sum_ci W_ct[ci,co,kh,kw] * x[ci,ih,iw]
    t_scr[...] = jnp.dot(w1_ref[...], xc_scr[...],
                         preferred_element_type=jnp.float32)

    # ---- assemble the 4 sub-pixel phases of the 42x42x32 intermediate --------
    # h[2a+p, 2b+q, co] = b1[co] + sum_{taps} t_tap[co, lane(a-da, b-db)]
    bias1 = jnp.broadcast_to(b1_ref[...], (C_MID, PHASE_N))
    for p in range(2):
        for q in range(2):
            acc = bias1
            for (kh, kw) in _PHASE_TAPS[(p, q)]:
                tap = t_scr[pl.ds((kh * K + kw) * C_MID, C_MID), :]  # (32, 441)
                da, db = (kh - p) // 2, (kw - q) // 2
                acc = acc + _shift_right_lanes(tap, da * PHASE_S + db)
            h_scr[p * 2 + q] = jnp.maximum(acc, 0.0)                 # ReLU

    # ---- Conv2d(32, 1, 3) + Sigmoid on the VPU, phase-decomposed -------------
    # y[2u+r, 2v+s] = sum_{kh,kw,c} h_phase[(r+kh)%2,(s+kw)%2][c, lane(u+dh,v+dw)]
    #                 * w2[kh,kw,c] + b2
    outs = []
    for r in range(2):
        for s in range(2):
            acc = None
            for kw in range(K):
                q, dw = (s + kw) % 2, (s + kw) // 2
                inner = None
                for kh in range(K):
                    p, dh = (r + kh) % 2, (r + kh) // 2
                    term = h_scr[p * 2 + q] * w2_ref[kh * K + kw]    # (32,441)
                    term = _shift_left_lanes(term, dh * PHASE_S)
                    inner = term if inner is None else inner + term
                inner = _shift_left_lanes(inner, dw)
                acc = inner if acc is None else acc + inner
            outs.append(jnp.sum(acc, axis=0, keepdims=True))         # (1, 441)
    out_ref[...] = jax.nn.sigmoid(jnp.concatenate(outs, axis=0) + b2)


def _decoder_pallas(x, b2, wl, bl, w1, b1, w2):
    batch = x.shape[0]
    return pl.pallas_call(
        _decoder_kernel,
        out_shape=jax.ShapeDtypeStruct((batch, 4, PHASE_N), jnp.float32),
        grid=(batch,),
        in_specs=[
            pl.BlockSpec(memory_space=pltpu.MemorySpace.SMEM),        # x
            pl.BlockSpec(memory_space=pltpu.MemorySpace.SMEM),        # b2
            pl.BlockSpec((2, C_IMG, PHASE_N), lambda b: (0, 0, 0)),   # wl
            pl.BlockSpec((C_IMG, PHASE_N), lambda b: (0, 0)),         # bl
            pl.BlockSpec((K * K * C_MID, C_IMG), lambda b: (0, 0)),   # w1
            pl.BlockSpec((C_MID, 1), lambda b: (0, 0)),               # b1
            pl.BlockSpec((K * K, C_MID, 1), lambda b: (0, 0, 0)),     # w2
        ],
        out_specs=pl.BlockSpec((None, 4, PHASE_N), lambda b: (b, 0, 0)),
        scratch_shapes=[
            pltpu.VMEM((C_IMG, PHASE_N), jnp.float32),                # xc
            pltpu.VMEM((K * K * C_MID, PHASE_N), jnp.float32),        # taps
            pltpu.VMEM((4, C_MID, PHASE_N), jnp.float32),             # phases
        ],
        compiler_params=pltpu.CompilerParams(
            dimension_semantics=("parallel",)),
    )(x, b2, wl, bl, w1, b1, w2)


# ------------------------------- full forward --------------------------------
def decoder_forward(x, kparams):
    wl, bl, w1, b1, w2, b2 = kparams
    phases = _decoder_pallas(x, b2, wl, bl, w1, b1, w2)       # (B, 4, 441)
    batch = phases.shape[0]
    ph = phases.reshape(batch, 2, 2, PHASE_S, PHASE_S)[:, :, :, :H_IMG, :H_IMG]
    img = jnp.transpose(ph, (0, 3, 1, 4, 2)).reshape(batch, H_OUT, H_OUT)
    return img[:, None, :, :]                                 # NCHW (B,1,40,40)


# ------------------------------ parameter setup ------------------------------
def init_torch_params(key):
    ks = jax.random.split(key, 6)
    w_lin = jax.random.normal(ks[0], (HIDDEN, LATENT), jnp.float32) * 0.05
    b_lin = jax.random.normal(ks[1], (HIDDEN,), jnp.float32) * 0.05
    w_ct = jax.random.normal(ks[2], (C_IMG, C_MID, K, K), jnp.float32) * 0.05
    b_ct = jax.random.normal(ks[3], (C_MID,), jnp.float32) * 0.05
    w_c = jax.random.normal(ks[4], (1, C_MID, K, K), jnp.float32) * 0.05
    b_c = jax.random.normal(ks[5], (1,), jnp.float32) * 0.05
    return (w_lin, b_lin, w_ct, b_ct, w_c, b_c)


def prepare_kernel_params(torch_params):
    w_lin, b_lin, w_ct, b_ct, w_c, b_c = torch_params
    # Linear weights permuted to channel-planar layout (k, c, ih*21+iw) with
    # zeros in the (ih==20 | iw==20) pad lanes (makes boundary shifts free).
    wl4 = jnp.transpose(w_lin.reshape(C_IMG, H_IMG, H_IMG, LATENT), (3, 0, 1, 2))
    wl = jnp.zeros((LATENT, C_IMG, PHASE_S, PHASE_S), jnp.float32)
    wl = wl.at[:, :, :H_IMG, :H_IMG].set(wl4).reshape(LATENT, C_IMG, PHASE_N)
    bl = jnp.zeros((C_IMG, PHASE_S, PHASE_S), jnp.float32)
    bl = bl.at[:, :H_IMG, :H_IMG].set(
        b_lin.reshape(C_IMG, H_IMG, H_IMG)).reshape(C_IMG, PHASE_N)
    # ConvTranspose2d weight (ci, co, kh, kw) -> (9*32, 64), row=(kh*3+kw)*32+co
    w1 = jnp.transpose(w_ct, (2, 3, 1, 0)).reshape(K * K * C_MID, C_IMG)
    b1 = b_ct.reshape(C_MID, 1)
    # Conv2d(32, 1, 3) weight (1, c, kh, kw) -> (9, 32, 1), row = kh*3+kw
    w2 = jnp.transpose(w_c[0], (1, 2, 0)).reshape(K * K, C_MID, 1)
    b2 = b_c.reshape(1, 1)
    return (wl, bl, w1, b1, w2, b2)


# ------------------------- pure-JAX reference (for check) --------------------
def decoder_reference(x, torch_params):
    w_lin, b_lin, w_ct, b_ct, w_c, b_c = torch_params
    h = jax.nn.relu(x @ w_lin.T + b_lin)                       # (B, 25600)
    img = h.reshape(-1, C_IMG, H_IMG, H_IMG)                   # NCHW
    # ConvTranspose2d(stride=2, output_padding=1) == conv over the
    # interior-dilated input padded (2,3) with spatially flipped weights.
    w_flip = jnp.transpose(jnp.flip(w_ct, (2, 3)), (1, 0, 2, 3))  # OIHW (32,64,3,3)
    y = lax.conv_general_dilated(
        img, w_flip, window_strides=(1, 1), padding=((2, 3), (2, 3)),
        lhs_dilation=(2, 2), dimension_numbers=("NCHW", "OIHW", "NCHW"))
    y = jax.nn.relu(y + b_ct[None, :, None, None])             # (B,32,42,42)
    z = lax.conv_general_dilated(
        y, w_c, window_strides=(1, 1), padding="VALID",
        dimension_numbers=("NCHW", "OIHW", "NCHW"))
    return jax.nn.sigmoid(z + b_c[None, :, None, None])        # (B,1,40,40)


if __name__ == "__main__":
    key = jax.random.PRNGKey(0)
    pkey, xkey = jax.random.split(key)
    tparams = init_torch_params(pkey)
    kparams = prepare_kernel_params(tparams)
    x = jax.random.normal(xkey, (2, LATENT), jnp.float32)      # batch=2, latent=2

    out = jax.jit(decoder_forward)(x, kparams)
    out = jax.block_until_ready(out)

    assert out.shape == (2, 1, H_OUT, H_OUT), out.shape
    assert bool(jnp.all(jnp.isfinite(out)))

    ref = decoder_reference(x, tparams)
    err = float(jnp.max(jnp.abs(out - ref)))
    assert err < 1e-4, f"max abs err vs reference: {err}"
    print("KERNEL_OK")
</pallas_src>

<mosaic_0001>
module attributes {stable_mosaic.version = 11 : i64} {
  func.func @_decoder_kernel(%arg0: i32, %arg1: memref<2x2xf32, #tpu.memory_space<smem>>, %arg2: memref<1x1xf32, #tpu.memory_space<smem>>, %arg3: memref<2x64x441xf32, #tpu.memory_space<vmem>>, %arg4: memref<64x441xf32, #tpu.memory_space<vmem>>, %arg5: memref<288x64xf32, #tpu.memory_space<vmem>>, %arg6: memref<32x1xf32, #tpu.memory_space<vmem>>, %arg7: memref<9x32x1xf32, #tpu.memory_space<vmem>>, %arg8: memref<1x4x441xf32, #tpu.memory_space<vmem>>, %arg9: memref<64x441xf32, #tpu.memory_space<vmem>>, %arg10: memref<288x441xf32, #tpu.memory_space<vmem>>, %arg11: memref<4x32x441xf32, #tpu.memory_space<vmem>>) attributes {dimension_semantics = [#tpu.dimension_semantics<parallel>], iteration_bounds = array<i64: 2>, scalar_prefetch = 0 : i64, scratch_operands = 3 : i64, tpu.core_type = #tpu.core_type<tc>, window_params = [{transform_indices = @transform_0, window_bounds = array<i64: 2, 2>}, {transform_indices = @transform_1, window_bounds = array<i64: 1, 1>}, {pipeline_mode = #tpu.pipeline_mode<synchronous>, transform_indices = @transform_2, window_bounds = array<i64: 2, 64, 441>}, {pipeline_mode = #tpu.pipeline_mode<synchronous>, transform_indices = @transform_3, window_bounds = array<i64: 64, 441>}, {pipeline_mode = #tpu.pipeline_mode<synchronous>, transform_indices = @transform_4, window_bounds = array<i64: 288, 64>}, {pipeline_mode = #tpu.pipeline_mode<synchronous>, transform_indices = @transform_5, window_bounds = array<i64: 32, 1>}, {pipeline_mode = #tpu.pipeline_mode<synchronous>, transform_indices = @transform_6, window_bounds = array<i64: 9, 32, 1>}, {transform_indices = @transform_7, window_bounds = array<i64: 1, 4, 441>}]} {
    %0 = arith.index_cast %arg0 : i32 to index
    %c0 = arith.constant 0 : index
    %1 = memref.load %arg1[%0, %c0] : memref<2x2xf32, #tpu.memory_space<smem>>
    %2 = arith.index_cast %arg0 : i32 to index
    %c1 = arith.constant 1 : index
    %3 = memref.load %arg1[%2, %c1] : memref<2x2xf32, #tpu.memory_space<smem>>
    %c0_0 = arith.constant 0 : index
    %c0_1 = arith.constant 0 : index
    %4 = memref.load %arg2[%c0_0, %c0_1] : memref<1x1xf32, #tpu.memory_space<smem>>
    %c0_2 = arith.constant 0 : index
    %c0_3 = arith.constant 0 : index
    %c0_4 = arith.constant 0 : index
    %5 = vector.load %arg3[%c0_2, %c0_3, %c0_4] : memref<2x64x441xf32, #tpu.memory_space<vmem>>, vector<1x64x441xf32>
    %6 = vector.shape_cast %5 : vector<1x64x441xf32> to vector<64x441xf32>
    %7 = vector.broadcast %1 : f32 to vector<64x441xf32>
    %8 = arith.mulf %7, %6 : vector<64x441xf32>
    %c1_5 = arith.constant 1 : index
    %c0_6 = arith.constant 0 : index
    %c0_7 = arith.constant 0 : index
    %9 = vector.load %arg3[%c1_5, %c0_6, %c0_7] : memref<2x64x441xf32, #tpu.memory_space<vmem>>, vector<1x64x441xf32>
    %10 = vector.shape_cast %9 : vector<1x64x441xf32> to vector<64x441xf32>
    %11 = vector.broadcast %3 : f32 to vector<64x441xf32>
    %12 = arith.mulf %11, %10 : vector<64x441xf32>
    %13 = arith.addf %8, %12 : vector<64x441xf32>
    %c0_8 = arith.constant 0 : index
    %c0_9 = arith.constant 0 : index
    %14 = vector.load %arg4[%c0_8, %c0_9] : memref<64x441xf32, #tpu.memory_space<vmem>>, vector<64x441xf32>
    %15 = arith.addf %13, %14 : vector<64x441xf32>
    %cst = arith.constant 0.000000e+00 : f32
    %16 = vector.broadcast %cst : f32 to vector<64x441xf32>
    %17 = arith.maximumf %15, %16 : vector<64x441xf32>
    %c0_10 = arith.constant 0 : index
    %c0_11 = arith.constant 0 : index
    %18 = vector.load %arg9[%c0_10, %c0_11] : memref<64x441xf32, #tpu.memory_space<vmem>>, vector<64x441xf32>
    tpu.vector_store %arg9[%c0_10, %c0_11], %17 {strides = array<i32>} : memref<64x441xf32, #tpu.memory_space<vmem>>, vector<64x441xf32>,
    %c0_12 = arith.constant 0 : index
    %c0_13 = arith.constant 0 : index
    %19 = vector.load %arg5[%c0_12, %c0_13] : memref<288x64xf32, #tpu.memory_space<vmem>>, vector<288x64xf32>
    %c0_14 = arith.constant 0 : index
    %c0_15 = arith.constant 0 : index
    %20 = vector.load %arg9[%c0_14, %c0_15] : memref<64x441xf32, #tpu.memory_space<vmem>>, vector<64x441xf32>
    %cst_16 = arith.constant dense<0.000000e+00> : vector<288x441xf32>
    %21 = tpu.matmul %19, %20, %cst_16 {dimension_numbers = #tpu.dot_dimension_numbers<[1], [0], [0], [1], [0, 0, 1, 1], [], []>} : vector<288x64xf32>, vector<64x441xf32>, vector<288x441xf32> -> vector<288x441xf32>
    %c0_17 = arith.constant 0 : index
    %c0_18 = arith.constant 0 : index
    %22 = vector.load %arg10[%c0_17, %c0_18] : memref<288x441xf32, #tpu.memory_space<vmem>>, vector<288x441xf32>
    tpu.vector_store %arg10[%c0_17, %c0_18], %21 {strides = array<i32>} : memref<288x441xf32, #tpu.memory_space<vmem>>, vector<288x441xf32>,
    %c0_19 = arith.constant 0 : index
    %c0_20 = arith.constant 0 : index
    %23 = vector.load %arg6[%c0_19, %c0_20] : memref<32x1xf32, #tpu.memory_space<vmem>>, vector<32x1xf32>
    %24 = vector.shape_cast %23 : vector<32x1xf32> to vector<32x1xf32>
    %25 = vector.broadcast %24 : vector<32x1xf32> to vector<32x441xf32>
    %c0_21 = arith.constant 0 : index
    %c0_22 = arith.constant 0 : index
    %26 = vector.load %arg10[%c0_21, %c0_22] : memref<288x441xf32, #tpu.memory_space<vmem>>, vector<32x441xf32>
    %27 = arith.addf %25, %26 : vector<32x441xf32>
    %c64 = arith.constant 64 : index
    %c0_23 = arith.constant 0 : index
    %28 = vector.load %arg10[%c64, %c0_23] : memref<288x441xf32, #tpu.memory_space<vmem>>, vector<32x441xf32>
    %cst_24 = arith.constant 0.000000e+00 : f32
    %29 = vector.broadcast %cst_24 : f32 to vector<32x1xf32>
    %30 = vector.extract_strided_slice %28 {offsets = [0, 0], sizes = [32, 440], strides = [1, 1]} : vector<32x441xf32> to vector<32x440xf32>
    %31 = tpu.concatenate %29, %30 in 1 : vector<32x1xf32>, vector<32x440xf32> -> vector<32x441xf32>
    %32 = arith.addf %27, %31 : vector<32x441xf32>
    %c192 = arith.constant 192 : index
    %c0_25 = arith.constant 0 : index
    %33 = vector.load %arg10[%c192, %c0_25] : memref<288x441xf32, #tpu.memory_space<vmem>>, vector<32x441xf32>
    %cst_26 = arith.constant 0.000000e+00 : f32
    %34 = vector.broadcast %cst_26 : f32 to vector<32x21xf32>
    %35 = vector.extract_strided_slice %33 {offsets = [0, 0], sizes = [32, 420], strides = [1, 1]} : vector<32x441xf32> to vector<32x420xf32>
    %36 = tpu.concatenate %34, %35 in 1 : vector<32x21xf32>, vector<32x420xf32> -> vector<32x441xf32>
    %37 = arith.addf %32, %36 : vector<32x441xf32>
    %c256 = arith.constant 256 : index
    %c0_27 = arith.constant 0 : index
    %38 = vector.load %arg10[%c256, %c0_27] : memref<288x441xf32, #tpu.memory_space<vmem>>, vector<32x441xf32>
    %cst_28 = arith.constant 0.000000e+00 : f32
    %39 = vector.broadcast %cst_28 : f32 to vector<32x22xf32>
    %40 = vector.extract_strided_slice %38 {offsets = [0, 0], sizes = [32, 419], strides = [1, 1]} : vector<32x441xf32> to vector<32x419xf32>
    %41 = tpu.concatenate %39, %40 in 1 : vector<32x22xf32>, vector<32x419xf32> -> vector<32x441xf32>
    %42 = arith.addf %37, %41 : vector<32x441xf32>
    %cst_29 = arith.constant 0.000000e+00 : f32
    %43 = vector.broadcast %cst_29 : f32 to vector<32x441xf32>
    %44 = arith.maximumf %42, %43 : vector<32x441xf32>
    %c0_30 = arith.constant 0 : index
    %c0_31 = arith.constant 0 : index
    %c0_32 = arith.constant 0 : index
    %45 = vector.load %arg11[%c0_30, %c0_31, %c0_32] : memref<4x32x441xf32, #tpu.memory_space<vmem>>, vector<1x32x441xf32>
    %46 = vector.shape_cast %45 : vector<1x32x441xf32> to vector<32x441xf32>
    %47 = vector.shape_cast %44 : vector<32x441xf32> to vector<1x32x441xf32>
    tpu.vector_store %arg11[%c0_30, %c0_31, %c0_32], %47 {strides = array<i32>} : memref<4x32x441xf32, #tpu.memory_space<vmem>>, vector<1x32x441xf32>,
    %c32 = arith.constant 32 : index
    %c0_33 = arith.constant 0 : index
    %48 = vector.load %arg10[%c32, %c0_33] : memref<288x441xf32, #tpu.memory_space<vmem>>, vector<32x441xf32>
    %49 = arith.addf %25, %48 : vector<32x441xf32>
    %c224 = arith.constant 224 : index
    %c0_34 = arith.constant 0 : index
    %50 = vector.load %arg10[%c224, %c0_34] : memref<288x441xf32, #tpu.memory_space<vmem>>, vector<32x441xf32>
    %cst_35 = arith.constant 0.000000e+00 : f32
    %51 = vector.broadcast %cst_35 : f32 to vector<32x21xf32>
    %52 = vector.extract_strided_slice %50 {offsets = [0, 0], sizes = [32, 420], strides = [1, 1]} : vector<32x441xf32> to vector<32x420xf32>
    %53 = tpu.concatenate %51, %52 in 1 : vector<32x21xf32>, vector<32x420xf32> -> vector<32x441xf32>
    %54 = arith.addf %49, %53 : vector<32x441xf32>
    %cst_36 = arith.constant 0.000000e+00 : f32
    %55 = vector.broadcast %cst_36 : f32 to vector<32x441xf32>
    %56 = arith.maximumf %54, %55 : vector<32x441xf32>
    %c1_37 = arith.constant 1 : index
    %c0_38 = arith.constant 0 : index
    %c0_39 = arith.constant 0 : index
    %57 = vector.load %arg11[%c1_37, %c0_38, %c0_39] : memref<4x32x441xf32, #tpu.memory_space<vmem>>, vector<1x32x441xf32>
    %58 = vector.shape_cast %57 : vector<1x32x441xf32> to vector<32x441xf32>
    %59 = vector.shape_cast %56 : vector<32x441xf32> to vector<1x32x441xf32>
    tpu.vector_store %arg11[%c1_37, %c0_38, %c0_39], %59 {strides = array<i32>} : memref<4x32x441xf32, #tpu.memory_space<vmem>>, vector<1x32x441xf32>,
    %c96 = arith.constant 96 : index
    %c0_40 = arith.constant 0 : index
    %60 = vector.load %arg10[%c96, %c0_40] : memref<288x441xf32, #tpu.memory_space<vmem>>, vector<32x441xf32>
    %61 = arith.addf %25, %60 : vector<32x441xf32>
    %c160 = arith.constant 160 : index
    %c0_41 = arith.constant 0 : index
    %62 = vector.load %arg10[%c160, %c0_41] : memref<288x441xf32, #tpu.memory_space<vmem>>, vector<32x441xf32>
    %cst_42 = arith.constant 0.000000e+00 : f32
    %63 = vector.broadcast %cst_42 : f32 to vector<32x1xf32>
    %64 = vector.extract_strided_slice %62 {offsets = [0, 0], sizes = [32, 440], strides = [1, 1]} : vector<32x441xf32> to vector<32x440xf32>
    %65 = tpu.concatenate %63, %64 in 1 : vector<32x1xf32>, vector<32x440xf32> -> vector<32x441xf32>
    %66 = arith.addf %61, %65 : vector<32x441xf32>
    %cst_43 = arith.constant 0.000000e+00 : f32
    %67 = vector.broadcast %cst_43 : f32 to vector<32x441xf32>
    %68 = arith.maximumf %66, %67 : vector<32x441xf32>
    %c2 = arith.constant 2 : index
    %c0_44 = arith.constant 0 : index
    %c0_45 = arith.constant 0 : index
    %69 = vector.load %arg11[%c2, %c0_44, %c0_45] : memref<4x32x441xf32, #tpu.memory_space<vmem>>, vector<1x32x441xf32>
    %70 = vector.shape_cast %69 : vector<1x32x441xf32> to vector<32x441xf32>
    %71 = vector.shape_cast %68 : vector<32x441xf32> to vector<1x32x441xf32>
    tpu.vector_store %arg11[%c2, %c0_44, %c0_45], %71 {strides = array<i32>} : memref<4x32x441xf32, #tpu.memory_space<vmem>>, vector<1x32x441xf32>,
    %c128 = arith.constant 128 : index
    %c0_46 = arith.constant 0 : index
    %72 = vector.load %arg10[%c128, %c0_46] : memref<288x441xf32, #tpu.memory_space<vmem>>, vector<32x441xf32>
    %73 = arith.addf %25, %72 : vector<32x441xf32>
    %cst_47 = arith.constant 0.000000e+00 : f32
    %74 = vector.broadcast %cst_47 : f32 to vector<32x441xf32>
    %75 = arith.maximumf %73, %74 : vector<32x441xf32>
    %c3 = arith.constant 3 : index
    %c0_48 = arith.constant 0 : index
    %c0_49 = arith.constant 0 : index
    %76 = vector.load %arg11[%c3, %c0_48, %c0_49] : memref<4x32x441xf32, #tpu.memory_space<vmem>>, vector<1x32x441xf32>
    %77 = vector.shape_cast %76 : vector<1x32x441xf32> to vector<32x441xf32>
    %78 = vector.shape_cast %75 : vector<32x441xf32> to vector<1x32x441xf32>
    tpu.vector_store %arg11[%c3, %c0_48, %c0_49], %78 {strides = array<i32>} : memref<4x32x441xf32, #tpu.memory_space<vmem>>, vector<1x32x441xf32>,
    %c0_50 = arith.constant 0 : index
    %c0_51 = arith.constant 0 : index
    %c0_52 = arith.constant 0 : index
    %79 = vector.load %arg11[%c0_50, %c0_51, %c0_52] : memref<4x32x441xf32, #tpu.memory_space<vmem>>, vector<1x32x441xf32>
    %80 = vector.shape_cast %79 : vector<1x32x441xf32> to vector<32x441xf32>
    %c0_53 = arith.constant 0 : index
    %c0_54 = arith.constant 0 : index
    %c0_55 = arith.constant 0 : index
    %81 = vector.load %arg7[%c0_53, %c0_54, %c0_55] : memref<9x32x1xf32, #tpu.memory_space<vmem>>, vector<1x32x1xf32>
    %82 = vector.shape_cast %81 : vector<1x32x1xf32> to vector<32x1xf32>
    %83 = vector.broadcast %82 : vector<32x1xf32> to vector<32x441xf32>
    %84 = arith.mulf %80, %83 : vector<32x441xf32>
    %c2_56 = arith.constant 2 : index
    %c0_57 = arith.constant 0 : index
    %c0_58 = arith.constant 0 : index
    %85 = vector.load %arg11[%c2_56, %c0_57, %c0_58] : memref<4x32x441xf32, #tpu.memory_space<vmem>>, vector<1x32x441xf32>
    %86 = vector.shape_cast %85 : vector<1x32x441xf32> to vector<32x441xf32>
    %c3_59 = arith.constant 3 : index
    %c0_60 = arith.constant 0 : index
    %c0_61 = arith.constant 0 : index
    %87 = vector.load %arg7[%c3_59, %c0_60, %c0_61] : memref<9x32x1xf32, #tpu.memory_space<vmem>>, vector<1x32x1xf32>
    %88 = vector.shape_cast %87 : vector<1x32x1xf32> to vector<32x1xf32>
    %89 = vector.broadcast %88 : vector<32x1xf32> to vector<32x441xf32>
    %90 = arith.mulf %86, %89 : vector<32x441xf32>
    %91 = arith.addf %84, %90 : vector<32x441xf32>
    %c0_62 = arith.constant 0 : index
    %c0_63 = arith.constant 0 : index
    %c0_64 = arith.constant 0 : index
    %92 = vector.load %arg11[%c0_62, %c0_63, %c0_64] : memref<4x32x441xf32, #tpu.memory_space<vmem>>, vector<1x32x441xf32>
    %93 = vector.shape_cast %92 : vector<1x32x441xf32> to vector<32x441xf32>
    %c6 = arith.constant 6 : index
    %c0_65 = arith.constant 0 : index
    %c0_66 = arith.constant 0 : index
    %94 = vector.load %arg7[%c6, %c0_65, %c0_66] : memref<9x32x1xf32, #tpu.memory_space<vmem>>, vector<1x32x1xf32>
    %95 = vector.shape_cast %94 : vector<1x32x1xf32> to vector<32x1xf32>
    %96 = vector.broadcast %95 : vector<32x1xf32> to vector<32x441xf32>
    %97 = arith.mulf %93, %96 : vector<32x441xf32>
    %cst_67 = arith.constant 0.000000e+00 : f32
    %98 = vector.broadcast %cst_67 : f32 to vector<32x21xf32>
    %99 = vector.extract_strided_slice %97 {offsets = [0, 21], sizes = [32, 420], strides = [1, 1]} : vector<32x441xf32> to vector<32x420xf32>
    %100 = tpu.concatenate %99, %98 in 1 : vector<32x420xf32>, vector<32x21xf32> -> vector<32x441xf32>
    %101 = arith.addf %91, %100 : vector<32x441xf32>
    %c1_68 = arith.constant 1 : index
    %c0_69 = arith.constant 0 : index
    %c0_70 = arith.constant 0 : index
    %102 = vector.load %arg11[%c1_68, %c0_69, %c0_70] : memref<4x32x441xf32, #tpu.memory_space<vmem>>, vector<1x32x441xf32>
    %103 = vector.shape_cast %102 : vector<1x32x441xf32> to vector<32x441xf32>
    %c1_71 = arith.constant 1 : index
    %c0_72 = arith.constant 0 : index
    %c0_73 = arith.constant 0 : index
    %104 = vector.load %arg7[%c1_71, %c0_72, %c0_73] : memref<9x32x1xf32, #tpu.memory_space<vmem>>, vector<1x32x1xf32>
    %105 = vector.shape_cast %104 : vector<1x32x1xf32> to vector<32x1xf32>
    %106 = vector.broadcast %105 : vector<32x1xf32> to vector<32x441xf32>
    %107 = arith.mulf %103, %106 : vector<32x441xf32>
    %c3_74 = arith.constant 3 : index
    %c0_75 = arith.constant 0 : index
    %c0_76 = arith.constant 0 : index
    %108 = vector.load %arg11[%c3_74, %c0_75, %c0_76] : memref<4x32x441xf32, #tpu.memory_space<vmem>>, vector<1x32x441xf32>
    %109 = vector.shape_cast %108 : vector<1x32x441xf32> to vector<32x441xf32>
    %c4 = arith.constant 4 : index
    %c0_77 = arith.constant 0 : index
    %c0_78 = arith.constant 0 : index
    %110 = vector.load %arg7[%c4, %c0_77, %c0_78] : memref<9x32x1xf32, #tpu.memory_space<vmem>>, vector<1x32x1xf32>
    %111 = vector.shape_cast %110 : vector<1x32x1xf32> to vector<32x1xf32>
    %112 = vector.broadcast %111 : vector<32x1xf32> to vector<32x441xf32>
    %113 = arith.mulf %109, %112 : vector<32x441xf32>
    %114 = arith.addf %107, %113 : vector<32x441xf32>
    %c1_79 = arith.constant 1 : index
    %c0_80 = arith.constant 0 : index
    %c0_81 = arith.constant 0 : index
    %115 = vector.load %arg11[%c1_79, %c0_80, %c0_81] : memref<4x32x441xf32, #tpu.memory_space<vmem>>, vector<1x32x441xf32>
    %116 = vector.shape_cast %115 : vector<1x32x441xf32> to vector<32x441xf32>
    %c7 = arith.constant 7 : index
    %c0_82 = arith.constant 0 : index
    %c0_83 = arith.constant 0 : index
    %117 = vector.load %arg7[%c7, %c0_82, %c0_83] : memref<9x32x1xf32, #tpu.memory_space<vmem>>, vector<1x32x1xf32>
    %118 = vector.shape_cast %117 : vector<1x32x1xf32> to vector<32x1xf32>
    %119 = vector.broadcast %118 : vector<32x1xf32> to vector<32x441xf32>
    %120 = arith.mulf %116, %119 : vector<32x441xf32>
    %cst_84 = arith.constant 0.000000e+00 : f32
    %121 = vector.broadcast %cst_84 : f32 to vector<32x21xf32>
    %122 = vector.extract_strided_slice %120 {offsets = [0, 21], sizes = [32, 420], strides = [1, 1]} : vector<32x441xf32> to vector<32x420xf32>
    %123 = tpu.concatenate %122, %121 in 1 : vector<32x420xf32>, vector<32x21xf32> -> vector<32x441xf32>
    %124 = arith.addf %114, %123 : vector<32x441xf32>
    %125 = arith.addf %101, %124 : vector<32x441xf32>
    %c0_85 = arith.constant 0 : index
    %c0_86 = arith.constant 0 : index
    %c0_87 = arith.constant 0 : index
    %126 = vector.load %arg11[%c0_85, %c0_86, %c0_87] : memref<4x32x441xf32, #tpu.memory_space<vmem>>, vector<1x32x441xf32>
    %127 = vector.shape_cast %126 : vector<1x32x441xf32> to vector<32x441xf32>
    %c2_88 = arith.constant 2 : index
    %c0_89 = arith.constant 0 : index
    %c0_90 = arith.constant 0 : index
    %128 = vector.load %arg7[%c2_88, %c0_89, %c0_90] : memref<9x32x1xf32, #tpu.memory_space<vmem>>, vector<1x32x1xf32>
    %129 = vector.shape_cast %128 : vector<1x32x1xf32> to vector<32x1xf32>
    %130 = vector.broadcast %129 : vector<32x1xf32> to vector<32x441xf32>
    %131 = arith.mulf %127, %130 : vector<32x441xf32>
    %c2_91 = arith.constant 2 : index
    %c0_92 = arith.constant 0 : index
    %c0_93 = arith.constant 0 : index
    %132 = vector.load %arg11[%c2_91, %c0_92, %c0_93] : memref<4x32x441xf32, #tpu.memory_space<vmem>>, vector<1x32x441xf32>
    %133 = vector.shape_cast %132 : vector<1x32x441xf32> to vector<32x441xf32>
    %c5 = arith.constant 5 : index
    %c0_94 = arith.constant 0 : index
    %c0_95 = arith.constant 0 : index
    %134 = vector.load %arg7[%c5, %c0_94, %c0_95] : memref<9x32x1xf32, #tpu.memory_space<vmem>>, vector<1x32x1xf32>
    %135 = vector.shape_cast %134 : vector<1x32x1xf32> to vector<32x1xf32>
    %136 = vector.broadcast %135 : vector<32x1xf32> to vector<32x441xf32>
    %137 = arith.mulf %133, %136 : vector<32x441xf32>
    %138 = arith.addf %131, %137 : vector<32x441xf32>
    %c0_96 = arith.constant 0 : index
    %c0_97 = arith.constant 0 : index
    %c0_98 = arith.constant 0 : index
    %139 = vector.load %arg11[%c0_96, %c0_97, %c0_98] : memref<4x32x441xf32, #tpu.memory_space<vmem>>, vector<1x32x441xf32>
    %140 = vector.shape_cast %139 : vector<1x32x441xf32> to vector<32x441xf32>
    %c8 = arith.constant 8 : index
    %c0_99 = arith.constant 0 : index
    %c0_100 = arith.constant 0 : index
    %141 = vector.load %arg7[%c8, %c0_99, %c0_100] : memref<9x32x1xf32, #tpu.memory_space<vmem>>, vector<1x32x1xf32>
    %142 = vector.shape_cast %141 : vector<1x32x1xf32> to vector<32x1xf32>
    %143 = vector.broadcast %142 : vector<32x1xf32> to vector<32x441xf32>
    %144 = arith.mulf %140, %143 : vector<32x441xf32>
    %cst_101 = arith.constant 0.000000e+00 : f32
    %145 = vector.broadcast %cst_101 : f32 to vector<32x21xf32>
    %146 = vector.extract_strided_slice %144 {offsets = [0, 21], sizes = [32, 420], strides = [1, 1]} : vector<32x441xf32> to vector<32x420xf32>
    %147 = tpu.concatenate %146, %145 in 1 : vector<32x420xf32>, vector<32x21xf32> -> vector<32x441xf32>
    %148 = arith.addf %138, %147 : vector<32x441xf32>
    %cst_102 = arith.constant 0.000000e+00 : f32
    %149 = vector.broadcast %cst_102 : f32 to vector<32x1xf32>
    %150 = vector.extract_strided_slice %148 {offsets = [0, 1], sizes = [32, 440], strides = [1, 1]} : vector<32x441xf32> to vector<32x440xf32>
    %151 = tpu.concatenate %150, %149 in 1 : vector<32x440xf32>, vector<32x1xf32> -> vector<32x441xf32>
    %152 = arith.addf %125, %151 : vector<32x441xf32>
    %cst_103 = arith.constant dense<0.000000e+00> : vector<441xf32>
    %153 = vector.multi_reduction <add>, %152, %cst_103 [0] : vector<32x441xf32> to vector<441xf32>
    %154 = vector.shape_cast %153 : vector<441xf32> to vector<1x441xf32>
    %c1_104 = arith.constant 1 : index
    %c0_105 = arith.constant 0 : index
    %c0_106 = arith.constant 0 : index
    %155 = vector.load %arg11[%c1_104, %c0_105, %c0_106] : memref<4x32x441xf32, #tpu.memory_space<vmem>>, vector<1x32x441xf32>
    %156 = vector.shape_cast %155 : vector<1x32x441xf32> to vector<32x441xf32>
    %c0_107 = arith.constant 0 : index
    %c0_108 = arith.constant 0 : index
    %c0_109 = arith.constant 0 : index
    %157 = vector.load %arg7[%c0_107, %c0_108, %c0_109] : memref<9x32x1xf32, #tpu.memory_space<vmem>>, vector<1x32x1xf32>
    %158 = vector.shape_cast %157 : vector<1x32x1xf32> to vector<32x1xf32>
    %159 = vector.broadcast %158 : vector<32x1xf32> to vector<32x441xf32>
    %160 = arith.mulf %156, %159 : vector<32x441xf32>
    %c3_110 = arith.constant 3 : index
    %c0_111 = arith.constant 0 : index
    %c0_112 = arith.constant 0 : index
    %161 = vector.load %arg11[%c3_110, %c0_111, %c0_112] : memref<4x32x441xf32, #tpu.memory_space<vmem>>, vector<1x32x441xf32>
    %162 = vector.shape_cast %161 : vector<1x32x441xf32> to vector<32x441xf32>
    %c3_113 = arith.constant 3 : index
    %c0_114 = arith.constant 0 : index
    %c0_115 = arith.constant 0 : index
    %163 = vector.load %arg7[%c3_113, %c0_114, %c0_115] : memref<9x32x1xf32, #tpu.memory_space<vmem>>, vector<1x32x1xf32>
    %164 = vector.shape_cast %163 : vector<1x32x1xf32> to vector<32x1xf32>
    %165 = vector.broadcast %164 : vector<32x1xf32> to vector<32x441xf32>
    %166 = arith.mulf %162, %165 : vector<32x441xf32>
    %167 = arith.addf %160, %166 : vector<32x441xf32>
    %c1_116 = arith.constant 1 : index
    %c0_117 = arith.constant 0 : index
    %c0_118 = arith.constant 0 : index
    %168 = vector.load %arg11[%c1_116, %c0_117, %c0_118] : memref<4x32x441xf32, #tpu.memory_space<vmem>>, vector<1x32x441xf32>
    %169 = vector.shape_cast %168 : vector<1x32x441xf32> to vector<32x441xf32>
    %c6_119 = arith.constant 6 : index
    %c0_120 = arith.constant 0 : index
    %c0_121 = arith.constant 0 : index
    %170 = vector.load %arg7[%c6_119, %c0_120, %c0_121] : memref<9x32x1xf32, #tpu.memory_space<vmem>>, vector<1x32x1xf32>
    %171 = vector.shape_cast %170 : vector<1x32x1xf32> to vector<32x1xf32>
    %172 = vector.broadcast %171 : vector<32x1xf32> to vector<32x441xf32>
    %173 = arith.mulf %169, %172 : vector<32x441xf32>
    %cst_122 = arith.constant 0.000000e+00 : f32
    %174 = vector.broadcast %cst_122 : f32 to vector<32x21xf32>
    %175 = vector.extract_strided_slice %173 {offsets = [0, 21], sizes = [32, 420], strides = [1, 1]} : vector<32x441xf32> to vector<32x420xf32>
    %176 = tpu.concatenate %175, %174 in 1 : vector<32x420xf32>, vector<32x21xf32> -> vector<32x441xf32>
    %177 = arith.addf %167, %176 : vector<32x441xf32>
    %c0_123 = arith.constant 0 : index
    %c0_124 = arith.constant 0 : index
    %c0_125 = arith.constant 0 : index
    %178 = vector.load %arg11[%c0_123, %c0_124, %c0_125] : memref<4x32x441xf32, #tpu.memory_space<vmem>>, vector<1x32x441xf32>
    %179 = vector.shape_cast %178 : vector<1x32x441xf32> to vector<32x441xf32>
    %c1_126 = arith.constant 1 : index
    %c0_127 = arith.constant 0 : index
    %c0_128 = arith.constant 0 : index
    %180 = vector.load %arg7[%c1_126, %c0_127, %c0_128] : memref<9x32x1xf32, #tpu.memory_space<vmem>>, vector<1x32x1xf32>
    %181 = vector.shape_cast %180 : vector<1x32x1xf32> to vector<32x1xf32>
    %182 = vector.broadcast %181 : vector<32x1xf32> to vector<32x441xf32>
    %183 = arith.mulf %179, %182 : vector<32x441xf32>
    %c2_129 = arith.constant 2 : index
    %c0_130 = arith.constant 0 : index
    %c0_131 = arith.constant 0 : index
    %184 = vector.load %arg11[%c2_129, %c0_130, %c0_131] : memref<4x32x441xf32, #tpu.memory_space<vmem>>, vector<1x32x441xf32>
    %185 = vector.shape_cast %184 : vector<1x32x441xf32> to vector<32x441xf32>
    %c4_132 = arith.constant 4 : index
    %c0_133 = arith.constant 0 : index
    %c0_134 = arith.constant 0 : index
    %186 = vector.load %arg7[%c4_132, %c0_133, %c0_134] : memref<9x32x1xf32, #tpu.memory_space<vmem>>, vector<1x32x1xf32>
    %187 = vector.shape_cast %186 : vector<1x32x1xf32> to vector<32x1xf32>
    %188 = vector.broadcast %187 : vector<32x1xf32> to vector<32x441xf32>
    %189 = arith.mulf %185, %188 : vector<32x441xf32>
    %190 = arith.addf %183, %189 : vector<32x441xf32>
    %c0_135 = arith.constant 0 : index
    %c0_136 = arith.constant 0 : index
    %c0_137 = arith.constant 0 : index
    %191 = vector.load %arg11[%c0_135, %c0_136, %c0_137] : memref<4x32x441xf32, #tpu.memory_space<vmem>>, vector<1x32x441xf32>
    %192 = vector.shape_cast %191 : vector<1x32x441xf32> to vector<32x441xf32>
    %c7_138 = arith.constant 7 : index
    %c0_139 = arith.constant 0 : index
    %c0_140 = arith.constant 0 : index
    %193 = vector.load %arg7[%c7_138, %c0_139, %c0_140] : memref<9x32x1xf32, #tpu.memory_space<vmem>>, vector<1x32x1xf32>
    %194 = vector.shape_cast %193 : vector<1x32x1xf32> to vector<32x1xf32>
    %195 = vector.broadcast %194 : vector<32x1xf32> to vector<32x441xf32>
    %196 = arith.mulf %192, %195 : vector<32x441xf32>
    %cst_141 = arith.constant 0.000000e+00 : f32
    %197 = vector.broadcast %cst_141 : f32 to vector<32x21xf32>
    %198 = vector.extract_strided_slice %196 {offsets = [0, 21], sizes = [32, 420], strides = [1, 1]} : vector<32x441xf32> to vector<32x420xf32>
    %199 = tpu.concatenate %198, %197 in 1 : vector<32x420xf32>, vector<32x21xf32> -> vector<32x441xf32>
    %200 = arith.addf %190, %199 : vector<32x441xf32>
    %cst_142 = arith.constant 0.000000e+00 : f32
    %201 = vector.broadcast %cst_142 : f32 to vector<32x1xf32>
    %202 = vector.extract_strided_slice %200 {offsets = [0, 1], sizes = [32, 440], strides = [1, 1]} : vector<32x441xf32> to vector<32x440xf32>
    %203 = tpu.concatenate %202, %201 in 1 : vector<32x440xf32>, vector<32x1xf32> -> vector<32x441xf32>
    %204 = arith.addf %177, %203 : vector<32x441xf32>
    %c1_143 = arith.constant 1 : index
    %c0_144 = arith.constant 0 : index
    %c0_145 = arith.constant 0 : index
    %205 = vector.load %arg11[%c1_143, %c0_144, %c0_145] : memref<4x32x441xf32, #tpu.memory_space<vmem>>, vector<1x32x441xf32>
    %206 = vector.shape_cast %205 : vector<1x32x441xf32> to vector<32x441xf32>
    %c2_146 = arith.constant 2 : index
    %c0_147 = arith.constant 0 : index
    %c0_148 = arith.constant 0 : index
    %207 = vector.load %arg7[%c2_146, %c0_147, %c0_148] : memref<9x32x1xf32, #tpu.memory_space<vmem>>, vector<1x32x1xf32>
    %208 = vector.shape_cast %207 : vector<1x32x1xf32> to vector<32x1xf32>
    %209 = vector.broadcast %208 : vector<32x1xf32> to vector<32x441xf32>
    %210 = arith.mulf %206, %209 : vector<32x441xf32>
    %c3_149 = arith.constant 3 : index
    %c0_150 = arith.constant 0 : index
    %c0_151 = arith.constant 0 : index
    %211 = vector.load %arg11[%c3_149, %c0_150, %c0_151] : memref<4x32x441xf32, #tpu.memory_space<vmem>>, vector<1x32x441xf32>
    %212 = vector.shape_cast %211 : vector<1x32x441xf32> to vector<32x441xf32>
    %c5_152 = arith.constant 5 : index
    %c0_153 = arith.constant 0 : index
    %c0_154 = arith.constant 0 : index
    %213 = vector.load %arg7[%c5_152, %c0_153, %c0_154] : memref<9x32x1xf32, #tpu.memory_space<vmem>>, vector<1x32x1xf32>
    %214 = vector.shape_cast %213 : vector<1x32x1xf32> to vector<32x1xf32>
    %215 = vector.broadcast %214 : vector<32x1xf32> to vector<32x441xf32>
    %216 = arith.mulf %212, %215 : vector<32x441xf32>
    %217 = arith.addf %210, %216 : vector<32x441xf32>
    %c1_155 = arith.constant 1 : index
    %c0_156 = arith.constant 0 : index
    %c0_157 = arith.constant 0 : index
    %218 = vector.load %arg11[%c1_155, %c0_156, %c0_157] : memref<4x32x441xf32, #tpu.memory_space<vmem>>, vector<1x32x441xf32>
    %219 = vector.shape_cast %218 : vector<1x32x441xf32> to vector<32x441xf32>
    %c8_158 = arith.constant 8 : index
    %c0_159 = arith.constant 0 : index
    %c0_160 = arith.constant 0 : index
    %220 = vector.load %arg7[%c8_158, %c0_159, %c0_160] : memref<9x32x1xf32, #tpu.memory_space<vmem>>, vector<1x32x1xf32>
    %221 = vector.shape_cast %220 : vector<1x32x1xf32> to vector<32x1xf32>
    %222 = vector.broadcast %221 : vector<32x1xf32> to vector<32x441xf32>
    %223 = arith.mulf %219, %222 : vector<32x441xf32>
    %cst_161 = arith.constant 0.000000e+00 : f32
    %224 = vector.broadcast %cst_161 : f32 to vector<32x21xf32>
    %225 = vector.extract_strided_slice %223 {offsets = [0, 21], sizes = [32, 420], strides = [1, 1]} : vector<32x441xf32> to vector<32x420xf32>
    %226 = tpu.concatenate %225, %224 in 1 : vector<32x420xf32>, vector<32x21xf32> -> vector<32x441xf32>
    %227 = arith.addf %217, %226 : vector<32x441xf32>
    %cst_162 = arith.constant 0.000000e+00 : f32
    %228 = vector.broadcast %cst_162 : f32 to vector<32x1xf32>
    %229 = vector.extract_strided_slice %227 {offsets = [0, 1], sizes = [32, 440], strides = [1, 1]} : vector<32x441xf32> to vector<32x440xf32>
    %230 = tpu.concatenate %229, %228 in 1 : vector<32x440xf32>, vector<32x1xf32> -> vector<32x441xf32>
    %231 = arith.addf %204, %230 : vector<32x441xf32>
    %cst_163 = arith.constant dense<0.000000e+00> : vector<441xf32>
    %232 = vector.multi_reduction <add>, %231, %cst_163 [0] : vector<32x441xf32> to vector<441xf32>
    %233 = vector.shape_cast %232 : vector<441xf32> to vector<1x441xf32>
    %c2_164 = arith.constant 2 : index
    %c0_165 = arith.constant 0 : index
    %c0_166 = arith.constant 0 : index
    %234 = vector.load %arg11[%c2_164, %c0_165, %c0_166] : memref<4x32x441xf32, #tpu.memory_space<vmem>>, vector<1x32x441xf32>
    %235 = vector.shape_cast %234 : vector<1x32x441xf32> to vector<32x441xf32>
    %c0_167 = arith.constant 0 : index
    %c0_168 = arith.constant 0 : index
    %c0_169 = arith.constant 0 : index
    %236 = vector.load %arg7[%c0_167, %c0_168, %c0_169] : memref<9x32x1xf32, #tpu.memory_space<vmem>>, vector<1x32x1xf32>
    %237 = vector.shape_cast %236 : vector<1x32x1xf32> to vector<32x1xf32>
    %238 = vector.broadcast %237 : vector<32x1xf32> to vector<32x441xf32>
    %239 = arith.mulf %235, %238 : vector<32x441xf32>
    %c0_170 = arith.constant 0 : index
    %c0_171 = arith.constant 0 : index
    %c0_172 = arith.constant 0 : index
    %240 = vector.load %arg11[%c0_170, %c0_171, %c0_172] : memref<4x32x441xf32, #tpu.memory_space<vmem>>, vector<1x32x441xf32>
    %241 = vector.shape_cast %240 : vector<1x32x441xf32> to vector<32x441xf32>
    %c3_173 = arith.constant 3 : index
    %c0_174 = arith.constant 0 : index
    %c0_175 = arith.constant 0 : index
    %242 = vector.load %arg7[%c3_173, %c0_174, %c0_175] : memref<9x32x1xf32, #tpu.memory_space<vmem>>, vector<1x32x1xf32>
    %243 = vector.shape_cast %242 : vector<1x32x1xf32> to vector<32x1xf32>
    %244 = vector.broadcast %243 : vector<32x1xf32> to vector<32x441xf32>
    %245 = arith.mulf %241, %244 : vector<32x441xf32>
    %cst_176 = arith.constant 0.000000e+00 : f32
    %246 = vector.broadcast %cst_176 : f32 to vector<32x21xf32>
    %247 = vector.extract_strided_slice %245 {offsets = [0, 21], sizes = [32, 420], strides = [1, 1]} : vector<32x441xf32> to vector<32x420xf32>
    %248 = tpu.concatenate %247, %246 in 1 : vector<32x420xf32>, vector<32x21xf32> -> vector<32x441xf32>
    %249 = arith.addf %239, %248 : vector<32x441xf32>
    %c2_177 = arith.constant 2 : index
    %c0_178 = arith.constant 0 : index
    %c0_179 = arith.constant 0 : index
    %250 = vector.load %arg11[%c2_177, %c0_178, %c0_179] : memref<4x32x441xf32, #tpu.memory_space<vmem>>, vector<1x32x441xf32>
    %251 = vector.shape_cast %250 : vector<1x32x441xf32> to vector<32x441xf32>
    %c6_180 = arith.constant 6 : index
    %c0_181 = arith.constant 0 : index
    %c0_182 = arith.constant 0 : index
    %252 = vector.load %arg7[%c6_180, %c0_181, %c0_182] : memref<9x32x1xf32, #tpu.memory_space<vmem>>, vector<1x32x1xf32>
    %253 = vector.shape_cast %252 : vector<1x32x1xf32> to vector<32x1xf32>
    %254 = vector.broadcast %253 : vector<32x1xf32> to vector<32x441xf32>
    %255 = arith.mulf %251, %254 : vector<32x441xf32>
    %cst_183 = arith.constant 0.000000e+00 : f32
    %256 = vector.broadcast %cst_183 : f32 to vector<32x21xf32>
    %257 = vector.extract_strided_slice %255 {offsets = [0, 21], sizes = [32, 420], strides = [1, 1]} : vector<32x441xf32> to vector<32x420xf32>
    %258 = tpu.concatenate %257, %256 in 1 : vector<32x420xf32>, vector<32x21xf32> -> vector<32x441xf32>
    %259 = arith.addf %249, %258 : vector<32x441xf32>
    %c3_184 = arith.constant 3 : index
    %c0_185 = arith.constant 0 : index
    %c0_186 = arith.constant 0 : index
    %260 = vector.load %arg11[%c3_184, %c0_185, %c0_186] : memref<4x32x441xf32, #tpu.memory_space<vmem>>, vector<1x32x441xf32>
    %261 = vector.shape_cast %260 : vector<1x32x441xf32> to vector<32x441xf32>
    %c1_187 = arith.constant 1 : index
    %c0_188 = arith.constant 0 : index
    %c0_189 = arith.constant 0 : index
    %262 = vector.load %arg7[%c1_187, %c0_188, %c0_189] : memref<9x32x1xf32, #tpu.memory_space<vmem>>, vector<1x32x1xf32>
    %263 = vector.shape_cast %262 : vector<1x32x1xf32> to vector<32x1xf32>
    %264 = vector.broadcast %263 : vector<32x1xf32> to vector<32x441xf32>
    %265 = arith.mulf %261, %264 : vector<32x441xf32>
    %c1_190 = arith.constant 1 : index
    %c0_191 = arith.constant 0 : index
    %c0_192 = arith.constant 0 : index
    %266 = vector.load %arg11[%c1_190, %c0_191, %c0_192] : memref<4x32x441xf32, #tpu.memory_space<vmem>>, vector<1x32x441xf32>
    %267 = vector.shape_cast %266 : vector<1x32x441xf32> to vector<32x441xf32>
    %c4_193 = arith.constant 4 : index
    %c0_194 = arith.constant 0 : index
    %c0_195 = arith.constant 0 : index
    %268 = vector.load %arg7[%c4_193, %c0_194, %c0_195] : memref<9x32x1xf32, #tpu.memory_space<vmem>>, vector<1x32x1xf32>
    %269 = vector.shape_cast %268 : vector<1x32x1xf32> to vector<32x1xf32>
    %270 = vector.broadcast %269 : vector<32x1xf32> to vector<32x441xf32>
    %271 = arith.mulf %267, %270 : vector<32x441xf32>
    %cst_196 = arith.constant 0.000000e+00 : f32
    %272 = vector.broadcast %cst_196 : f32 to vector<32x21xf32>
    %273 = vector.extract_strided_slice %271 {offsets = [0, 21], sizes = [32, 420], strides = [1, 1]} : vector<32x441xf32> to vector<32x420xf32>
    %274 = tpu.concatenate %273, %272 in 1 : vector<32x420xf32>, vector<32x21xf32> -> vector<32x441xf32>
    %275 = arith.addf %265, %274 : vector<32x441xf32>
    %c3_197 = arith.constant 3 : index
    %c0_198 = arith.constant 0 : index
    %c0_199 = arith.constant 0 : index
    %276 = vector.load %arg11[%c3_197, %c0_198, %c0_199] : memref<4x32x441xf32, #tpu.memory_space<vmem>>, vector<1x32x441xf32>
    %277 = vector.shape_cast %276 : vector<1x32x441xf32> to vector<32x441xf32>
    %c7_200 = arith.constant 7 : index
    %c0_201 = arith.constant 0 : index
    %c0_202 = arith.constant 0 : index
    %278 = vector.load %arg7[%c7_200, %c0_201, %c0_202] : memref<9x32x1xf32, #tpu.memory_space<vmem>>, vector<1x32x1xf32>
    %279 = vector.shape_cast %278 : vector<1x32x1xf32> to vector<32x1xf32>
    %280 = vector.broadcast %279 : vector<32x1xf32> to vector<32x441xf32>
    %281 = arith.mulf %277, %280 : vector<32x441xf32>
    %cst_203 = arith.constant 0.000000e+00 : f32
    %282 = vector.broadcast %cst_203 : f32 to vector<32x21xf32>
    %283 = vector.extract_strided_slice %281 {offsets = [0, 21], sizes = [32, 420], strides = [1, 1]} : vector<32x441xf32> to vector<32x420xf32>
    %284 = tpu.concatenate %283, %282 in 1 : vector<32x420xf32>, vector<32x21xf32> -> vector<32x441xf32>
    %285 = arith.addf %275, %284 : vector<32x441xf32>
    %286 = arith.addf %259, %285 : vector<32x441xf32>
    %c2_204 = arith.constant 2 : index
    %c0_205 = arith.constant 0 : index
    %c0_206 = arith.constant 0 : index
    %287 = vector.load %arg11[%c2_204, %c0_205, %c0_206] : memref<4x32x441xf32, #tpu.memory_space<vmem>>, vector<1x32x441xf32>
    %288 = vector.shape_cast %287 : vector<1x32x441xf32> to vector<32x441xf32>
    %c2_207 = arith.constant 2 : index
    %c0_208 = arith.constant 0 : index
    %c0_209 = arith.constant 0 : index
    %289 = vector.load %arg7[%c2_207, %c0_208, %c0_209] : memref<9x32x1xf32, #tpu.memory_space<vmem>>, vector<1x32x1xf32>
    %290 = vector.shape_cast %289 : vector<1x32x1xf32> to vector<32x1xf32>
    %291 = vector.broadcast %290 : vector<32x1xf32> to vector<32x441xf32>
    %292 = arith.mulf %288, %291 : vector<32x441xf32>
    %c0_210 = arith.constant 0 : index
    %c0_211 = arith.constant 0 : index
    %c0_212 = arith.constant 0 : index
    %293 = vector.load %arg11[%c0_210, %c0_211, %c0_212] : memref<4x32x441xf32, #tpu.memory_space<vmem>>, vector<1x32x441xf32>
    %294 = vector.shape_cast %293 : vector<1x32x441xf32> to vector<32x441xf32>
    %c5_213 = arith.constant 5 : index
    %c0_214 = arith.constant 0 : index
    %c0_215 = arith.constant 0 : index
    %295 = vector.load %arg7[%c5_213, %c0_214, %c0_215] : memref<9x32x1xf32, #tpu.memory_space<vmem>>, vector<1x32x1xf32>
    %296 = vector.shape_cast %295 : vector<1x32x1xf32> to vector<32x1xf32>
    %297 = vector.broadcast %296 : vector<32x1xf32> to vector<32x441xf32>
    %298 = arith.mulf %294, %297 : vector<32x441xf32>
    %cst_216 = arith.constant 0.000000e+00 : f32
    %299 = vector.broadcast %cst_216 : f32 to vector<32x21xf32>
    %300 = vector.extract_strided_slice %298 {offsets = [0, 21], sizes = [32, 420], strides = [1, 1]} : vector<32x441xf32> to vector<32x420xf32>
    %301 = tpu.concatenate %300, %299 in 1 : vector<32x420xf32>, vector<32x21xf32> -> vector<32x441xf32>
    %302 = arith.addf %292, %301 : vector<32x441xf32>
    %c2_217 = arith.constant 2 : index
    %c0_218 = arith.constant 0 : index
    %c0_219 = arith.constant 0 : index
    %303 = vector.load %arg11[%c2_217, %c0_218, %c0_219] : memref<4x32x441xf32, #tpu.memory_space<vmem>>, vector<1x32x441xf32>
    %304 = vector.shape_cast %303 : vector<1x32x441xf32> to vector<32x441xf32>
    %c8_220 = arith.constant 8 : index
    %c0_221 = arith.constant 0 : index
    %c0_222 = arith.constant 0 : index
    %305 = vector.load %arg7[%c8_220, %c0_221, %c0_222] : memref<9x32x1xf32, #tpu.memory_space<vmem>>, vector<1x32x1xf32>
    %306 = vector.shape_cast %305 : vector<1x32x1xf32> to vector<32x1xf32>
    %307 = vector.broadcast %306 : vector<32x1xf32> to vector<32x441xf32>
    %308 = arith.mulf %304, %307 : vector<32x441xf32>
    %cst_223 = arith.constant 0.000000e+00 : f32
    %309 = vector.broadcast %cst_223 : f32 to vector<32x21xf32>
    %310 = vector.extract_strided_slice %308 {offsets = [0, 21], sizes = [32, 420], strides = [1, 1]} : vector<32x441xf32> to vector<32x420xf32>
    %311 = tpu.concatenate %310, %309 in 1 : vector<32x420xf32>, vector<32x21xf32> -> vector<32x441xf32>
    %312 = arith.addf %302, %311 : vector<32x441xf32>
    %cst_224 = arith.constant 0.000000e+00 : f32
    %313 = vector.broadcast %cst_224 : f32 to vector<32x1xf32>
    %314 = vector.extract_strided_slice %312 {offsets = [0, 1], sizes = [32, 440], strides = [1, 1]} : vector<32x441xf32> to vector<32x440xf32>
    %315 = tpu.concatenate %314, %313 in 1 : vector<32x440xf32>, vector<32x1xf32> -> vector<32x441xf32>
    %316 = arith.addf %286, %315 : vector<32x441xf32>
    %cst_225 = arith.constant dense<0.000000e+00> : vector<441xf32>
    %317 = vector.multi_reduction <add>, %316, %cst_225 [0] : vector<32x441xf32> to vector<441xf32>
    %318 = vector.shape_cast %317 : vector<441xf32> to vector<1x441xf32>
    %c3_226 = arith.constant 3 : index
    %c0_227 = arith.constant 0 : index
    %c0_228 = arith.constant 0 : index
    %319 = vector.load %arg11[%c3_226, %c0_227, %c0_228] : memref<4x32x441xf32, #tpu.memory_space<vmem>>, vector<1x32x441xf32>
    %320 = vector.shape_cast %319 : vector<1x32x441xf32> to vector<32x441xf32>
    %c0_229 = arith.constant 0 : index
    %c0_230 = arith.constant 0 : index
    %c0_231 = arith.constant 0 : index
    %321 = vector.load %arg7[%c0_229, %c0_230, %c0_231] : memref<9x32x1xf32, #tpu.memory_space<vmem>>, vector<1x32x1xf32>
    %322 = vector.shape_cast %321 : vector<1x32x1xf32> to vector<32x1xf32>
    %323 = vector.broadcast %322 : vector<32x1xf32> to vector<32x441xf32>
    %324 = arith.mulf %320, %323 : vector<32x441xf32>
    %c1_232 = arith.constant 1 : index
    %c0_233 = arith.constant 0 : index
    %c0_234 = arith.constant 0 : index
    %325 = vector.load %arg11[%c1_232, %c0_233, %c0_234] : memref<4x32x441xf32, #tpu.memory_space<vmem>>, vector<1x32x441xf32>
    %326 = vector.shape_cast %325 : vector<1x32x441xf32> to vector<32x441xf32>
    %c3_235 = arith.constant 3 : index
    %c0_236 = arith.constant 0 : index
    %c0_237 = arith.constant 0 : index
    %327 = vector.load %arg7[%c3_235, %c0_236, %c0_237] : memref<9x32x1xf32, #tpu.memory_space<vmem>>, vector<1x32x1xf32>
    %328 = vector.shape_cast %327 : vector<1x32x1xf32> to vector<32x1xf32>
    %329 = vector.broadcast %328 : vector<32x1xf32> to vector<32x441xf32>
    %330 = arith.mulf %326, %329 : vector<32x441xf32>
    %cst_238 = arith.constant 0.000000e+00 : f32
    %331 = vector.broadcast %cst_238 : f32 to vector<32x21xf32>
    %332 = vector.extract_strided_slice %330 {offsets = [0, 21], sizes = [32, 420], strides = [1, 1]} : vector<32x441xf32> to vector<32x420xf32>
    %333 = tpu.concatenate %332, %331 in 1 : vector<32x420xf32>, vector<32x21xf32> -> vector<32x441xf32>
    %334 = arith.addf %324, %333 : vector<32x441xf32>
    %c3_239 = arith.constant 3 : index
    %c0_240 = arith.constant 0 : index
    %c0_241 = arith.constant 0 : index
    %335 = vector.load %arg11[%c3_239, %c0_240, %c0_241] : memref<4x32x441xf32, #tpu.memory_space<vmem>>, vector<1x32x441xf32>
    %336 = vector.shape_cast %335 : vector<1x32x441xf32> to vector<32x441xf32>
    %c6_242 = arith.constant 6 : index
    %c0_243 = arith.constant 0 : index
    %c0_244 = arith.constant 0 : index
    %337 = vector.load %arg7[%c6_242, %c0_243, %c0_244] : memref<9x32x1xf32, #tpu.memory_space<vmem>>, vector<1x32x1xf32>
    %338 = vector.shape_cast %337 : vector<1x32x1xf32> to vector<32x1xf32>
    %339 = vector.broadcast %338 : vector<32x1xf32> to vector<32x441xf32>
    %340 = arith.mulf %336, %339 : vector<32x441xf32>
    %cst_245 = arith.constant 0.000000e+00 : f32
    %341 = vector.broadcast %cst_245 : f32 to vector<32x21xf32>
    %342 = vector.extract_strided_slice %340 {offsets = [0, 21], sizes = [32, 420], strides = [1, 1]} : vector<32x441xf32> to vector<32x420xf32>
    %343 = tpu.concatenate %342, %341 in 1 : vector<32x420xf32>, vector<32x21xf32> -> vector<32x441xf32>
    %344 = arith.addf %334, %343 : vector<32x441xf32>
    %c2_246 = arith.constant 2 : index
    %c0_247 = arith.constant 0 : index
    %c0_248 = arith.constant 0 : index
    %345 = vector.load %arg11[%c2_246, %c0_247, %c0_248] : memref<4x32x441xf32, #tpu.memory_space<vmem>>, vector<1x32x441xf32>
    %346 = vector.shape_cast %345 : vector<1x32x441xf32> to vector<32x441xf32>
    %c1_249 = arith.constant 1 : index
    %c0_250 = arith.constant 0 : index
    %c0_251 = arith.constant 0 : index
    %347 = vector.load %arg7[%c1_249, %c0_250, %c0_251] : memref<9x32x1xf32, #tpu.memory_space<vmem>>, vector<1x32x1xf32>
    %348 = vector.shape_cast %347 : vector<1x32x1xf32> to vector<32x1xf32>
    %349 = vector.broadcast %348 : vector<32x1xf32> to vector<32x441xf32>
    %350 = arith.mulf %346, %349 : vector<32x441xf32>
    %c0_252 = arith.constant 0 : index
    %c0_253 = arith.constant 0 : index
    %c0_254 = arith.constant 0 : index
    %351 = vector.load %arg11[%c0_252, %c0_253, %c0_254] : memref<4x32x441xf32, #tpu.memory_space<vmem>>, vector<1x32x441xf32>
    %352 = vector.shape_cast %351 : vector<1x32x441xf32> to vector<32x441xf32>
    %c4_255 = arith.constant 4 : index
    %c0_256 = arith.constant 0 : index
    %c0_257 = arith.constant 0 : index
    %353 = vector.load %arg7[%c4_255, %c0_256, %c0_257] : memref<9x32x1xf32, #tpu.memory_space<vmem>>, vector<1x32x1xf32>
    %354 = vector.shape_cast %353 : vector<1x32x1xf32> to vector<32x1xf32>
    %355 = vector.broadcast %354 : vector<32x1xf32> to vector<32x441xf32>
    %356 = arith.mulf %352, %355 : vector<32x441xf32>
    %cst_258 = arith.constant 0.000000e+00 : f32
    %357 = vector.broadcast %cst_258 : f32 to vector<32x21xf32>
    %358 = vector.extract_strided_slice %356 {offsets = [0, 21], sizes = [32, 420], strides = [1, 1]} : vector<32x441xf32> to vector<32x420xf32>
    %359 = tpu.concatenate %358, %357 in 1 : vector<32x420xf32>, vector<32x21xf32> -> vector<32x441xf32>
    %360 = arith.addf %350, %359 : vector<32x441xf32>
    %c2_259 = arith.constant 2 : index
    %c0_260 = arith.constant 0 : index
    %c0_261 = arith.constant 0 : index
    %361 = vector.load %arg11[%c2_259, %c0_260, %c0_261] : memref<4x32x441xf32, #tpu.memory_space<vmem>>, vector<1x32x441xf32>
    %362 = vector.shape_cast %361 : vector<1x32x441xf32> to vector<32x441xf32>
    %c7_262 = arith.constant 7 : index
    %c0_263 = arith.constant 0 : index
    %c0_264 = arith.constant 0 : index
    %363 = vector.load %arg7[%c7_262, %c0_263, %c0_264] : memref<9x32x1xf32, #tpu.memory_space<vmem>>, vector<1x32x1xf32>
    %364 = vector.shape_cast %363 : vector<1x32x1xf32> to vector<32x1xf32>
    %365 = vector.broadcast %364 : vector<32x1xf32> to vector<32x441xf32>
    %366 = arith.mulf %362, %365 : vector<32x441xf32>
    %cst_265 = arith.constant 0.000000e+00 : f32
    %367 = vector.broadcast %cst_265 : f32 to vector<32x21xf32>
    %368 = vector.extract_strided_slice %366 {offsets = [0, 21], sizes = [32, 420], strides = [1, 1]} : vector<32x441xf32> to vector<32x420xf32>
    %369 = tpu.concatenate %368, %367 in 1 : vector<32x420xf32>, vector<32x21xf32> -> vector<32x441xf32>
    %370 = arith.addf %360, %369 : vector<32x441xf32>
    %cst_266 = arith.constant 0.000000e+00 : f32
    %371 = vector.broadcast %cst_266 : f32 to vector<32x1xf32>
    %372 = vector.extract_strided_slice %370 {offsets = [0, 1], sizes = [32, 440], strides = [1, 1]} : vector<32x441xf32> to vector<32x440xf32>
    %373 = tpu.concatenate %372, %371 in 1 : vector<32x440xf32>, vector<32x1xf32> -> vector<32x441xf32>
    %374 = arith.addf %344, %373 : vector<32x441xf32>
    %c3_267 = arith.constant 3 : index
    %c0_268 = arith.constant 0 : index
    %c0_269 = arith.constant 0 : index
    %375 = vector.load %arg11[%c3_267, %c0_268, %c0_269] : memref<4x32x441xf32, #tpu.memory_space<vmem>>, vector<1x32x441xf32>
    %376 = vector.shape_cast %375 : vector<1x32x441xf32> to vector<32x441xf32>
    %c2_270 = arith.constant 2 : index
    %c0_271 = arith.constant 0 : index
    %c0_272 = arith.constant 0 : index
    %377 = vector.load %arg7[%c2_270, %c0_271, %c0_272] : memref<9x32x1xf32, #tpu.memory_space<vmem>>, vector<1x32x1xf32>
    %378 = vector.shape_cast %377 : vector<1x32x1xf32> to vector<32x1xf32>
    %379 = vector.broadcast %378 : vector<32x1xf32> to vector<32x441xf32>
    %380 = arith.mulf %376, %379 : vector<32x441xf32>
    %c1_273 = arith.constant 1 : index
    %c0_274 = arith.constant 0 : index
    %c0_275 = arith.constant 0 : index
    %381 = vector.load %arg11[%c1_273, %c0_274, %c0_275] : memref<4x32x441xf32, #tpu.memory_space<vmem>>, vector<1x32x441xf32>
    %382 = vector.shape_cast %381 : vector<1x32x441xf32> to vector<32x441xf32>
    %c5_276 = arith.constant 5 : index
    %c0_277 = arith.constant 0 : index
    %c0_278 = arith.constant 0 : index
    %383 = vector.load %arg7[%c5_276, %c0_277, %c0_278] : memref<9x32x1xf32, #tpu.memory_space<vmem>>, vector<1x32x1xf32>
    %384 = vector.shape_cast %383 : vector<1x32x1xf32> to vector<32x1xf32>
    %385 = vector.broadcast %384 : vector<32x1xf32> to vector<32x441xf32>
    %386 = arith.mulf %382, %385 : vector<32x441xf32>
    %cst_279 = arith.constant 0.000000e+00 : f32
    %387 = vector.broadcast %cst_279 : f32 to vector<32x21xf32>
    %388 = vector.extract_strided_slice %386 {offsets = [0, 21], sizes = [32, 420], strides = [1, 1]} : vector<32x441xf32> to vector<32x420xf32>
    %389 = tpu.concatenate %388, %387 in 1 : vector<32x420xf32>, vector<32x21xf32> -> vector<32x441xf32>
    %390 = arith.addf %380, %389 : vector<32x441xf32>
    %c3_280 = arith.constant 3 : index
    %c0_281 = arith.constant 0 : index
    %c0_282 = arith.constant 0 : index
    %391 = vector.load %arg11[%c3_280, %c0_281, %c0_282] : memref<4x32x441xf32, #tpu.memory_space<vmem>>, vector<1x32x441xf32>
    %392 = vector.shape_cast %391 : vector<1x32x441xf32> to vector<32x441xf32>
    %c8_283 = arith.constant 8 : index
    %c0_284 = arith.constant 0 : index
    %c0_285 = arith.constant 0 : index
    %393 = vector.load %arg7[%c8_283, %c0_284, %c0_285] : memref<9x32x1xf32, #tpu.memory_space<vmem>>, vector<1x32x1xf32>
    %394 = vector.shape_cast %393 : vector<1x32x1xf32> to vector<32x1xf32>
    %395 = vector.broadcast %394 : vector<32x1xf32> to vector<32x441xf32>
    %396 = arith.mulf %392, %395 : vector<32x441xf32>
    %cst_286 = arith.constant 0.000000e+00 : f32
    %397 = vector.broadcast %cst_286 : f32 to vector<32x21xf32>
    %398 = vector.extract_strided_slice %396 {offsets = [0, 21], sizes = [32, 420], strides = [1, 1]} : vector<32x441xf32> to vector<32x420xf32>
    %399 = tpu.concatenate %398, %397 in 1 : vector<32x420xf32>, vector<32x21xf32> -> vector<32x441xf32>
    %400 = arith.addf %390, %399 : vector<32x441xf32>
    %cst_287 = arith.constant 0.000000e+00 : f32
    %401 = vector.broadcast %cst_287 : f32 to vector<32x1xf32>
    %402 = vector.extract_strided_slice %400 {offsets = [0, 1], sizes = [32, 440], strides = [1, 1]} : vector<32x441xf32> to vector<32x440xf32>
    %403 = tpu.concatenate %402, %401 in 1 : vector<32x440xf32>, vector<32x1xf32> -> vector<32x441xf32>
    %404 = arith.addf %374, %403 : vector<32x441xf32>
    %cst_288 = arith.constant dense<0.000000e+00> : vector<441xf32>
    %405 = vector.multi_reduction <add>, %404, %cst_288 [0] : vector<32x441xf32> to vector<441xf32>
    %406 = vector.shape_cast %405 : vector<441xf32> to vector<1x441xf32>
    %407 = tpu.concatenate %154, %233, %318, %406 in 0 : vector<1x441xf32>, vector<1x441xf32>, vector<1x441xf32>, vector<1x441xf32> -> vector<4x441xf32>
    %408 = vector.broadcast %4 : f32 to vector<4x441xf32>
    %409 = arith.addf %407, %408 : vector<4x441xf32>
    %410 = arith.negf %409 : vector<4x441xf32>
    %411 = math.exp %410 : vector<4x441xf32>
    %cst_289 = arith.constant 1.000000e+00 : f32
    %412 = vector.broadcast %cst_289 : f32 to vector<4x441xf32>
    %413 = arith.addf %412, %411 : vector<4x441xf32>
    %414 = arith.divf %412, %413 : vector<4x441xf32>
    %c0_290 = arith.constant 0 : index
    %c0_291 = arith.constant 0 : index
    %c0_292 = arith.constant 0 : index
    %415 = vector.load %arg8[%c0_290, %c0_291, %c0_292] : memref<1x4x441xf32, #tpu.memory_space<vmem>>, vector<1x4x441xf32>
    %416 = vector.shape_cast %415 : vector<1x4x441xf32> to vector<4x441xf32>
    %417 = vector.shape_cast %414 : vector<4x441xf32> to vector<1x4x441xf32>
    tpu.vector_store %arg8[%c0_290, %c0_291, %c0_292], %417 {strides = array<i32>} : memref<1x4x441xf32, #tpu.memory_space<vmem>>, vector<1x4x441xf32>,
    return
  }
  func.func @transform_0(%arg0: i32) -> (i32, i32) {
    %c0_i32 = arith.constant 0 : i32
    %c0_i32_0 = arith.constant 0 : i32
    %c0_i32_1 = arith.constant 0 : i32
    return %c0_i32, %c0_i32_0 : i32, i32
  }
  func.func @transform_1(%arg0: i32) -> (i32, i32) {
    %c0_i32 = arith.constant 0 : i32
    %c0_i32_0 = arith.constant 0 : i32
    %c0_i32_1 = arith.constant 0 : i32
    return %c0_i32, %c0_i32_0 : i32, i32
  }
  func.func @transform_2(%arg0: i32) -> (i32, i32, i32) {
    %c0_i32 = arith.constant 0 : i32
    %c0_i32_0 = arith.constant 0 : i32
    %c0_i32_1 = arith.constant 0 : i32
    %c0_i32_2 = arith.constant 0 : i32
    return %c0_i32, %c0_i32_0, %c0_i32_1 : i32, i32, i32
  }
  func.func @transform_3(%arg0: i32) -> (i32, i32) {
    %c0_i32 = arith.constant 0 : i32
    %c0_i32_0 = arith.constant 0 : i32
    %c0_i32_1 = arith.constant 0 : i32
    return %c0_i32, %c0_i32_0 : i32, i32
  }
  func.func @transform_4(%arg0: i32) -> (i32, i32) {
    %c0_i32 = arith.constant 0 : i32
    %c0_i32_0 = arith.constant 0 : i32
    %c0_i32_1 = arith.constant 0 : i32
    return %c0_i32, %c0_i32_0 : i32, i32
  }
  func.func @transform_5(%arg0: i32) -> (i32, i32) {
    %c0_i32 = arith.constant 0 : i32
    %c0_i32_0 = arith.constant 0 : i32
    %c0_i32_1 = arith.constant 0 : i32
    return %c0_i32, %c0_i32_0 : i32, i32
  }
  func.func @transform_6(%arg0: i32) -> (i32, i32, i32) {
    %c0_i32 = arith.constant 0 : i32
    %c0_i32_0 = arith.constant 0 : i32
    %c0_i32_1 = arith.constant 0 : i32
    %c0_i32_2 = arith.constant 0 : i32
    return %c0_i32, %c0_i32_0, %c0_i32_1 : i32, i32, i32
  }
  func.func @transform_7(%arg0: i32) -> (i32, i32, i32) {
    %c0_i32 = arith.constant 0 : i32
    %c0_i32_0 = arith.constant 0 : i32
    %c0_i32_1 = arith.constant 0 : i32
    return %arg0, %c0_i32, %c0_i32_0 : i32, i32, i32
  }
}

</mosaic_0001>

<bundles_post_ra>
// kernel: decoder_forward.1
= control target key start
LH: loop header
LB: loop body
LE: loop exit
PB: predicated region body
PF: predicated region fallthrough
CT: control target
= control target key end

     0   :  { %s11393_s0 = inlined_call_operand.vmem [shape: f32[2,2], index: 0, kind: input, shape index: {}]   ;;  %s11394_s1 = inlined_call_operand.<no memory space> [shape: f32[1,1], index: 1, kind: input, shape index: {}]   ;;  %s11395_s2 = inlined_call_operand.vmem [shape: f32[2,64,441], index: 2, kind: input, shape index: {}]   ;;  %s11396_s3 = inlined_call_operand.vmem [shape: f32[64,441], index: 3, kind: input, shape index: {}]   ;;  %s11397_s4 = inlined_call_operand.vmem [shape: f32[288,64], index: 4, kind: input, shape index: {}]   ;;  %s11398_s5 = inlined_call_operand.vmem [shape: f32[32,1], index: 5, kind: input, shape index: {}]   ;;  %s11399_s6 = inlined_call_operand.vmem [shape: f32[9,32,1], index: 6, kind: input, shape index: {}]   ;;  %s11400_s7 = inlined_call_operand.vmem [shape: f32[2,4,441], index: 7, kind: output, shape index: {}]  }
   0x1   :  { %12 = sst [smem:[#allocation5]] %s11394_s1 }
   0x2   :  { %13 = vsyncpa [#allocation7], 0  ;;  %s6314_s26 = smov 0  }
   0x3 LB: > { %s6320_s27 = sadd.s32 4294967295, %s6261_s26   ;;  %p5874_p0 = scmp.ge.s32.totalorder %s6261_s26, 1  ;;  %s6261_s26 = sphi %s6314_s26, %s19_s26  }
   0x4   : > { %p197_p1 = scmp.lt.s32.totalorder %s6261_s26, 3  ;;  %s210_s1 = sshll.u32 %s11393_s0, 4  ;;  %s211_s1 = int_to_ptr.vmem [resolvable:$true] %s210_s1 }
   0x5   : > { %p6032_p3 = scmp.eq.s32.totalorder %s6320_s27, 0  ;;  %s6236_s8 = scalar_lea.vmem %s211_s1, 32 }
   0x6   : > { %p6327_p2 = pnand %p5874_p0, %p197_p1  ;;  %p6237_p6 = scmp.ne.s32.totalorder %s211_s1, %s6236_s8 }
   0x7   : > { %p6244_p10 = scmp.lt.s32.totalorder %s211_s1, %s211_s1  ;;  %p6245_p11 = scmp.lt.s32.totalorder %s6236_s8, %s6236_s8 }
   0x8   : > { %p6028_p4 = pneg %p6327_p2 }
   0x9   : > { %p6246_p12 = por %p6245_p11, %p6244_p10 }
   0xa   : > { %p6029_p5 = pnand %p6032_p3, %p6028_p4 }
   0xc   : > { %p6238_p7 = pneg %p6029_p5 }
   0xe   : > { %p6239_p8 = pnand %p6238_p7, %p6237_p6 }
  0x10   : > { %p6240_p9 = pneg %p6239_p8 }
  0x12   : > { %p6247_p13 = pnand %p6246_p12, %p6240_p9 }
  0x14   : > { %6250 = shalt.err (!%p6247_p13)
}
  0x15   : > { %s6263_s9 = smov [#allocation6]   ;;  %241 = sbr.rel (%p6327_p2) target bundleno = 1610 (0x64a), region = 48 }
  0x16   : > { %6031 = dma.vmem_to_smem (!%p6029_p5), %s211_s1, 32, %s6263_s9, [#allocation7]  }
  0x1a   : > { %6256 = dma.done.wait (%p6032_p3), [#allocation7], 32  }
  0x1b   : > { %6258 = vsyncadd (%p6032_p3), [#allocation7], 4294967264 }
  0x1c   : > { %247 = sfence }
  0x1d   : > { %s5880_s10 = sshll.u32 %s6320_s27, 7  ;;  %v6264_v0 = vmov 0.0   ;;  %v6265_v1 = vmov 0   ;;  %v308_v2 = vld [vmem:[%s11395_s2 + $0xe8] sm:$0xff]  ;;  %v310_v4 = vld [vmem:[%s11395_s2 + $0xf8] sm:$0xff]  ;;  %v307_v6 = vld [vmem:[%s11395_s2 + $0xe0] sm:$0xff] }
  0x1e   : > { %s275_s11 = sld [smem:[#allocation6 + %s5880_s10]]  ;;  %s276_s12 = sadd.s32 1, %s5880_s10  ;;  %812 = vmatprep.mubr.f32.mxu0 %v6264_v0  ;;  %1093 = vmatprep.mubr.f32.mxu1 %v6264_v0  ;;  %v5910_v3 = vld [vmem:[%s11395_s2 + $0x1e8] sm:$0xff]  ;;  %v5912_v5 = vld [vmem:[%s11395_s2 + $0x1f8] sm:$0xff]  ;;  %v5909_v7 = vld [vmem:[%s11395_s2 + $0x1e0] sm:$0xff]  ;;  %vm541_vm0 = vcmask 465920  }
  0x1f   : > { %s277_s13 = sld [smem:[#allocation6 + %s276_s12]]  ;;  %6050 = vset.pattern.permute.xlu0 %v6265_v1  ;;  %6051 = vset.pattern.permute.xlu1 %v6265_v1  ;;  %v309_v8 = vld [vmem:[%s11395_s2 + $0xf0] sm:$0xff]  ;;  %v304_v11 = vld [vmem:[%s11395_s2 + $0xc8] sm:$0xff]  ;;  %v306_v13 = vld [vmem:[%s11395_s2 + $0xd8] sm:$0xff]  ;;  %vm639_vm1 = vcmask 523264   ;;  %s6266_s1 = smov 1  }
  0x20   : > { %v5911_v9 = vld [vmem:[%s11395_s2 + $0x1f0] sm:$0xff]  ;;  %v5906_v12 = vld [vmem:[%s11395_s2 + $0x1c8] sm:$0xff]  ;;  %v5908_v18 = vld [vmem:[%s11395_s2 + $0x1d8] sm:$0xff]  ;;  %s6267_s30 = smov 21   ;;  %s6268_s8 = smov 22   ;;  %vm1574_vm2 = vcmask 7168  }
  0x21   : > { %v303_v23 = vld [vmem:[%s11395_s2 + $0xc0] sm:$0xff]  ;;  %v471_v25 = vld [vmem:[%s11396_s3 + $0xe8] sm:$0xff]  ;;  %v473_v26 = vld [vmem:[%s11396_s3 + $0xf8] sm:$0xff]  ;;  %s6269_s9 = smov 107   ;;  %vm1687_vm3 = vcmask 171008   ;;  %vm1800_vm4 = vcmask 179200  }
  0x22   : > { %v5905_v24 = vld [vmem:[%s11395_s2 + $0x1c0] sm:$0xff]  ;;  %v472_v35 = vld [vmem:[%s11396_s3 + $0xf0] sm:$0xff]  ;;  %v467_v36 = vld [vmem:[%s11396_s3 + $0xc8] sm:$0xff]  ;;  %vm2518_vm5 = vcmask 875520   ;;  %vm2547_vm6 = vcmask 293888   ;;  %s6270_s10 = smov 127  }
  0x23   : > { %v470_v27 = vld [vmem:[%s11396_s3 + $0xe0] sm:$0xff]  ;;  %v305_v38 = vld [vmem:[%s11395_s2 + $0xd0] sm:$0xff]  ;;  %v469_v41 = vld [vmem:[%s11396_s3 + $0xd8] sm:$0xff]  ;;  %vm3134_vm7 = vcmask 1039360   ;;  %vm3163_vm8 = vcmask 457728   ;;  %vm5760_vm9 = vcmask 1040384  }
  0x24   : > { %v6369_v10 = vstv %s275_s11  ;;  %v466_v48 = vld [vmem:[%s11396_s3 + $0xc0] sm:$0xff]  ;;  %v5907_v49 = vld [vmem:[%s11395_s2 + $0x1d0] sm:$0xff]  ;;  %v300_v54 = vld [vmem:[%s11395_s2 + $0xa8] sm:$0xff]  ;;  %vm5765_vm10 = vcmask 1041408   ;;  %s278_s12 = sld [smem:[#allocation5]]  ;;  %vm5770_vm11 = vcmask 1042432  }
  0x25   : > { %v341_v14 = vmul.f32 %v6369_v10, %v308_v2  ;;  %v6381_v15 = vstv %s277_s13  ;;  %v343_v16 = vmul.f32 %v6369_v10, %v310_v4  ;;  %v340_v17 = vmul.f32 %v6369_v10, %v307_v6  ;;  %v5902_v55 = vld [vmem:[%s11395_s2 + $0x1a8] sm:$0xff]  ;;  %v302_v56 = vld [vmem:[%s11395_s2 + $0xb8] sm:$0xff]  ;;  %v299_v62 = vld [vmem:[%s11395_s2 + $0xa0] sm:$0xff]  ;;  %p269_p0 = scmp.lt.s32.totalorder %s6320_s27, 1 }
  0x26   : > { %v407_v19 = vmul.f32 %v5910_v3, %v6381_v15  ;;  %v409_v20 = vmul.f32 %v5912_v5, %v6381_v15  ;;  %v406_v21 = vmul.f32 %v5909_v7, %v6381_v15  ;;  %v342_v22 = vmul.f32 %v6369_v10, %v309_v8  ;;  %v5904_v61 = vld [vmem:[%s11395_s2 + $0x1b8] sm:$0xff]  ;;  %v5901_v4 = vld [vmem:[%s11395_s2 + $0x1a0] sm:$0xff]  ;;  %v301_v5 = vld [vmem:[%s11395_s2 + $0xb0] sm:$0xff] }
  0x27   : > { %v408_v28 = vmul.f32 %v5911_v9, %v6381_v15  ;;  %v337_v29 = vmul.f32 %v6369_v10, %v304_v11  ;;  %v403_v30 = vmul.f32 %v5906_v12, %v6381_v15  ;;  %v339_v31 = vmul.f32 %v6369_v10, %v306_v13  ;;  %v5903_v6 = vld [vmem:[%s11395_s2 + $0x1b0] sm:$0xff]  ;;  %v296_v13 = vld [vmem:[%s11395_s2 + $0x88] sm:$0xff]  ;;  %s12466_s27 = smov (!%p269_p0, %s6320_s27), 1 }
  0x28   : > { %v439_v32 = vadd.f32 %v407_v19, %v341_v14  ;;  %v441_v33 = vadd.f32 %v409_v20, %v343_v16  ;;  %v438_v34 = vadd.f32 %v406_v21, %v340_v17  ;;  %v405_v37 = vmul.f32 %v5908_v18, %v6381_v15  ;;  %v468_v8 = vld [vmem:[%s11396_s3 + $0xd0] sm:$0xff]  ;;  %v5898_v14 = vld [vmem:[%s11395_s2 + $0x188] sm:$0xff]  ;;  %v298_v21 = vld [vmem:[%s11395_s2 + $0x98] sm:$0xff]  ;;  %s6023_s14 = sshll.u32 %s12466_s27, 4 }
  0x29   : > { %v440_v39 = vadd.f32 %v408_v28, %v342_v22  ;;  %v435_v40 = vadd.f32 %v403_v30, %v337_v29  ;;  %v336_v42 = vmul.f32 %v6369_v10, %v303_v23  ;;  %v402_v43 = vmul.f32 %v5905_v24, %v6381_v15  ;;  %v463_v18 = vld [vmem:[%s11396_s3 + $0xa8] sm:$0xff]  ;;  %v465_v23 = vld [vmem:[%s11396_s3 + $0xb8] sm:$0xff]  ;;  %v462_v30 = vld [vmem:[%s11396_s3 + $0xa0] sm:$0xff]  ;;  %s273_s16 = scalar_lea.vmem %s11400_s7, %s6023_s14 }
  0x2a   : > { %v503_v44 = vadd.f32 %v471_v25, %v439_v32  ;;  %v505_v45 = vadd.f32 %v473_v26, %v441_v33  ;;  %v502_v46 = vadd.f32 %v470_v27, %v438_v34  ;;  %v437_v47 = vadd.f32 %v405_v37, %v339_v31  ;;  %v5900_v27 = vld [vmem:[%s11395_s2 + $0x198] sm:$0xff]  ;;  %v464_v31 = vld [vmem:[%s11396_s3 + $0xb0] sm:$0xff]  ;;  %v295_v34 = vld [vmem:[%s11395_s2 + $0x80] sm:$0xff] }
  0x2b   : > { %v6432_v50 = vadd.f32 %v472_v35, %v440_v39  ;;  %v499_v51 = vadd.f32 %v467_v36, %v435_v40  ;;  %v434_v52 = vadd.f32 %v402_v43, %v336_v42  ;;  %v338_v53 = vmul.f32 %v6369_v10, %v305_v38  ;;  %v459_v38 = vld [vmem:[%s11396_s3 + $0x88] sm:$0xff]  ;;  %v5897_v40 = vld [vmem:[%s11395_s2 + $0x180] sm:$0xff] }
  0x2c   : > { %v535_v57 = vmax.f32 %v503_v44, 0.0  ;;  %v537_v58 = vmax.f32 %v505_v45, 0.0  ;;  %v534_v59 = vmax.f32 %v502_v46, 0.0  ;;  %v501_v60 = vadd.f32 %v469_v41, %v437_v47  ;;  %v297_v45 = vld [vmem:[%s11395_s2 + $0x90] sm:$0xff] }
  0x2d   : > { %v536_v63 = vmax.f32 %v6432_v50, 0.0  ;;  %v531_v1 = vmax.f32 %v499_v51, 0.0  ;;  %v498_v2 = vadd.f32 %v466_v48, %v434_v52  ;;  %v404_v3 = vmul.f32 %v5907_v49, %v6381_v15  ;;  %v5899_v46 = vld [vmem:[%s11395_s2 + $0x190] sm:$0xff]  ;;  %v461_v51 = vld [vmem:[%s11396_s3 + $0x98] sm:$0xff] }
  0x2e   : > { %764 = vmatprep.subr.mxu0 %v535_v57  ;;  %570 = vst.msk [vmem:[#allocation2 + $0xf8] sm:$0xff] %vm541_vm0, %v537_v58  ;;  %v533_v7 = vmax.f32 %v501_v60, 0.0  ;;  %v333_v9 = vmul.f32 %v6369_v10, %v300_v54  ;;  %v399_v11 = vmul.f32 %v5902_v55, %v6381_v15  ;;  %v335_v12 = vmul.f32 %v6369_v10, %v302_v56  ;;  %v292_v54 = vld [vmem:[%s11395_s2 + $0x68] sm:$0xff] }
  0x2f   : > { %765 = vmatpush1.msra.mxu0 %v534_v59  ;;  %v530_v16 = vmax.f32 %v498_v2, 0.0  ;;  %v436_v17 = vadd.f32 %v404_v3, %v338_v53  ;;  %v401_v19 = vmul.f32 %v5904_v61, %v6381_v15  ;;  %v332_v20 = vmul.f32 %v6369_v10, %v299_v62  ;;  %v458_v53 = vld [vmem:[%s11396_s3 + $0x80] sm:$0xff]  ;;  %v5894_v60 = vld [vmem:[%s11395_s2 + $0x168] sm:$0xff]  ;;  %v294_v61 = vld [vmem:[%s11395_s2 + $0x78] sm:$0xff] }
  0x30   : > { %766 = vmatprep.subr.mxu0 %v531_v1  ;;  %566 = vst.msk [vmem:[#allocation2 + $0xd8] sm:$0xff] %vm541_vm0, %v533_v7  ;;  %v431_v22 = vadd.f32 %v399_v11, %v333_v9  ;;  %v398_v24 = vmul.f32 %v5901_v4, %v6381_v15  ;;  %v334_v25 = vmul.f32 %v6369_v10, %v301_v5  ;;  %v460_v4 = vld [vmem:[%s11396_s3 + $0x90] sm:$0xff]  ;;  %v5896_v5 = vld [vmem:[%s11395_s2 + $0x178] sm:$0xff]  ;;  %vm5813_vm12 = vcmask 1043456  }
  0x31   : > { %v400_v26 = vmul.f32 %v5903_v6, %v6381_v15  ;;  %767 = vmatpush1.msra.mxu0 %v530_v16  ;;  %v500_v28 = vadd.f32 %v468_v8, %v436_v17  ;;  %v433_v29 = vadd.f32 %v401_v19, %v335_v12  ;;  %v329_v32 = vmul.f32 %v6369_v10, %v296_v13  ;;  %v291_v6 = vld [vmem:[%s11395_s2 + $0x60] sm:$0xff]  ;;  %v5895_v17 = vld [vmem:[%s11395_s2 + $0x170] sm:$0xff] }
  0x32   : > { %v395_v33 = vmul.f32 %v5898_v14, %v6381_v15  ;;  %v495_v35 = vadd.f32 %v463_v18, %v431_v22  ;;  %v430_v36 = vadd.f32 %v398_v24, %v332_v20  ;;  %v331_v39 = vmul.f32 %v6369_v10, %v298_v21  ;;  %v5893_v13 = vld [vmem:[%s11395_s2 + $0x160] sm:$0xff]  ;;  %v293_v14 = vld [vmem:[%s11395_s2 + $0x70] sm:$0xff]  ;;  %v288_v18 = vld [vmem:[%s11395_s2 + $0x48] sm:$0xff] }
  0x33   : > { %v432_v37 = vadd.f32 %v400_v26, %v334_v25  ;;  %v532_v41 = vmax.f32 %v500_v28, 0.0  ;;  %v497_v42 = vadd.f32 %v465_v23, %v433_v29  ;;  %v397_v44 = vmul.f32 %v5900_v27, %v6381_v15  ;;  %v455_v21 = vld [vmem:[%s11396_s3 + $0x68] sm:$0xff]  ;;  %v457_v27 = vld [vmem:[%s11396_s3 + $0x78] sm:$0xff] }
  0x34   : > { %v427_v43 = vadd.f32 %v395_v33, %v329_v32  ;;  %v527_v47 = vmax.f32 %v495_v35, 0.0  ;;  %v494_v48 = vadd.f32 %v462_v30, %v430_v36  ;;  %v328_v52 = vmul.f32 %v6369_v10, %v295_v34  ;;  %v5890_v24 = vld [vmem:[%s11395_s2 + $0x148] sm:$0xff]  ;;  %v290_v30 = vld [vmem:[%s11395_s2 + $0x58] sm:$0xff]  ;;  %v454_v34 = vld [vmem:[%s11396_s3 + $0x60] sm:$0xff] }
  0x35   : > { %v6517_v49 = vadd.f32 %v464_v31, %v432_v37  ;;  %v638_v55 = vld [vmem:[#allocation2 + $0xf8] sm:$0xff]  ;;  %v529_v56 = vmax.f32 %v497_v42, 0.0  ;;  %v429_v58 = vadd.f32 %v397_v44, %v331_v39  ;;  %v394_v59 = vmul.f32 %v5897_v40, %v6381_v15  ;;  %v287_v37 = vld [vmem:[%s11395_s2 + $0x40] sm:$0xff] }
  0x36   : > { %v491_v57 = vadd.f32 %v459_v38, %v427_v43  ;;  %1045 = vmatprep.subr.mxu1 %v638_v55  ;;  %768 = vmatprep.subr.mxu0 %v527_v47  ;;  %v526_v62 = vmax.f32 %v494_v48, 0.0  ;;  %v330_v2 = vmul.f32 %v6369_v10, %v297_v45  ;;  %v396_v3 = vmul.f32 %v5899_v46, %v6381_v15  ;;  %v5892_v31 = vld [vmem:[%s11395_s2 + $0x158] sm:$0xff]  ;;  %v5889_v43 = vld [vmem:[%s11395_s2 + $0x140] sm:$0xff]  ;;  %v451_v46 = vld [vmem:[%s11396_s3 + $0x48] sm:$0xff] }
  0x37   : > { %v528_v1 = vmax.f32 %v6517_v49, 0.0  ;;  %1046 = vmatpush1.msra.mxu1 %v536_v63  ;;  %v634_v7 = vld [vmem:[#allocation2 + $0xd8] sm:$0xff]  ;;  %562 = vst.msk [vmem:[#allocation2 + $0xb8] sm:$0xff] %vm541_vm0, %v529_v56  ;;  %v493_v9 = vadd.f32 %v461_v51, %v429_v58  ;;  %v426_v11 = vadd.f32 %v394_v59, %v328_v52  ;;  %v325_v12 = vmul.f32 %v6369_v10, %v292_v54  ;;  %v289_v51 = vld [vmem:[%s11395_s2 + $0x50] sm:$0xff]  ;;  %v284_v59 = vld [vmem:[%s11395_s2 + $0x28] sm:$0xff] }
  0x38   : > { %v523_v8 = vmax.f32 %v491_v57, 0.0  ;;  %1047 = vmatprep.subr.mxu1 %v634_v7  ;;  %769 = vmatpush1.msra.mxu0 %v526_v62  ;;  %v428_v50 = vadd.f32 %v396_v3, %v330_v2  ;;  %v391_v63 = vmul.f32 %v5894_v60, %v6381_v15  ;;  %v327_v16 = vmul.f32 %v6369_v10, %v294_v61  ;;  %v5891_v52 = vld [vmem:[%s11395_s2 + $0x150] sm:$0xff]  ;;  %v453_v57 = vld [vmem:[%s11396_s3 + $0x58] sm:$0xff]  ;;  %v5886_v3 = vld [vmem:[%s11395_s2 + $0x128] sm:$0xff] }
  0x39   : > { %1048 = vmatpush1.msra.mxu1 %v532_v41  ;;  %v525_v19 = vmax.f32 %v493_v9, 0.0  ;;  %v490_v20 = vadd.f32 %v458_v53, %v426_v11  ;;  %v393_v22 = vmul.f32 %v5896_v5, %v6381_v15  ;;  %v324_v23 = vmul.f32 %v6369_v10, %v291_v6  ;;  %v456_v41 = vld [vmem:[%s11396_s3 + $0x70] sm:$0xff]  ;;  %v450_v7 = vld [vmem:[%s11396_s3 + $0x40] sm:$0xff]  ;;  %v5888_v11 = vld [vmem:[%s11395_s2 + $0x138] sm:$0xff] }
  0x3a   : > { %770 = vmatprep.subr.mxu0 %v523_v8  ;;  %v6574_v25 = vadd.f32 %v460_v4, %v428_v50  ;;  %v423_v26 = vadd.f32 %v391_v63, %v325_v12  ;;  %v390_v28 = vmul.f32 %v5893_v13, %v6381_v15  ;;  %v326_v29 = vmul.f32 %v6369_v10, %v293_v14  ;;  %v286_v4 = vld [vmem:[%s11395_s2 + $0x38] sm:$0xff]  ;;  %v283_v49 = vld [vmem:[%s11395_s2 + $0x20] sm:$0xff]  ;;  %v452_v14 = vld [vmem:[%s11396_s3 + $0x50] sm:$0xff] }
  0x3b   : > { %558 = vst.msk [vmem:[#allocation2 + $0x98] sm:$0xff] %vm541_vm0, %v525_v19  ;;  %v522_v32 = vmax.f32 %v490_v20, 0.0  ;;  %v425_v33 = vadd.f32 %v393_v22, %v327_v16  ;;  %v392_v35 = vmul.f32 %v5895_v17, %v6381_v15  ;;  %v321_v36 = vmul.f32 %v6369_v10, %v288_v18  ;;  %v5885_v63 = vld [vmem:[%s11395_s2 + $0x120] sm:$0xff]  ;;  %v5887_v22 = vld [vmem:[%s11395_s2 + $0x130] sm:$0xff] }
  0x3c   : > { %v524_v38 = vmax.f32 %v6574_v25, 0.0  ;;  %v487_v39 = vadd.f32 %v455_v21, %v423_v26  ;;  %v422_v40 = vadd.f32 %v390_v28, %v324_v23  ;;  %v387_v42 = vmul.f32 %v5890_v24, %v6381_v15  ;;  %v285_v21 = vld [vmem:[%s11395_s2 + $0x30] sm:$0xff]  ;;  %v447_v25 = vld [vmem:[%s11396_s3 + $0x28] sm:$0xff] }
  0x3d   : > { %771 = vmatpush1.msra.mxu0 %v522_v32  ;;  %v489_v44 = vadd.f32 %v457_v27, %v425_v33  ;;  %v424_v45 = vadd.f32 %v392_v35, %v326_v29  ;;  %v323_v47 = vmul.f32 %v6369_v10, %v290_v30  ;;  %v389_v48 = vmul.f32 %v5892_v31, %v6381_v15  ;;  %v449_v27 = vld [vmem:[%s11396_s3 + $0x38] sm:$0xff]  ;;  %v280_v29 = vld [vmem:[%s11395_s2 + $0x8] sm:$0xff]  ;;  %v446_v33 = vld [vmem:[%s11396_s3 + $0x20] sm:$0xff] }
  0x3e   : > { %v630_v53 = vld [vmem:[#allocation2 + $0xb8] sm:$0xff]  ;;  %v519_v54 = vmax.f32 %v487_v39, 0.0  ;;  %v486_v55 = vadd.f32 %v454_v34, %v422_v40  ;;  %v419_v56 = vadd.f32 %v387_v42, %v321_v36  ;;  %v320_v58 = vmul.f32 %v6369_v10, %v287_v37  ;;  %v5882_v34 = vld [vmem:[%s11395_s2 + $0x108] sm:$0xff]  ;;  %v1454_v42 = vld [vmem:[%s11398_s5] sm:$0xff] }
  0x3f   : > { %1049 = vmatprep.subr.mxu1 %v630_v53  ;;  %v521_v60 = vmax.f32 %v489_v44, 0.0  ;;  %v6622_v61 = vadd.f32 %v456_v41, %v424_v45  ;;  %v421_v62 = vadd.f32 %v389_v48, %v323_v47  ;;  %v386_v2 = vmul.f32 %v5889_v43, %v6381_v15  ;;  %v282_v35 = vld [vmem:[%s11395_s2 + $0x18] sm:$0xff]  ;;  %v279_v41 = vld [vmem:[%s11395_s2] sm:$0xff]  ;;  %1460 = vperm.xlu0 %6050, %v1454_v42  }
  0x40   : > { %1050 = vmatpush1.msra.mxu1 %v528_v1  ;;  %772 = vmatprep.subr.mxu0 %v519_v54  ;;  %v518_v5 = vmax.f32 %v486_v55, 0.0  ;;  %v483_v6 = vadd.f32 %v451_v46, %v419_v56  ;;  %v322_v8 = vmul.f32 %v6369_v10, %v289_v51  ;;  %v388_v9 = vmul.f32 %v5891_v52, %v6381_v15  ;;  %v5884_v40 = vld [vmem:[%s11395_s2 + $0x118] sm:$0xff]  ;;  %v448_v46 = vld [vmem:[%s11396_s3 + $0x30] sm:$0xff]  ;;  %v5881_v48 = vld [vmem:[%s11395_s2 + $0x100] sm:$0xff] }
  0x41   : > { %554 = vst.msk [vmem:[#allocation2 + $0x78] sm:$0xff] %vm541_vm0, %v521_v60  ;;  %v520_v1 = vmax.f32 %v6622_v61, 0.0  ;;  %v485_v12 = vadd.f32 %v453_v57, %v421_v62  ;;  %v418_v13 = vadd.f32 %v386_v2, %v320_v58  ;;  %v317_v50 = vmul.f32 %v6369_v10, %v284_v59  ;;  %v1456_v51 = vld [vmem:[%s11398_s5 + $0x10] sm:$0xff]  ;;  %v443_v62 = vld [vmem:[%s11396_s3 + $0x8] sm:$0xff]  ;;  %v5992_v42 = vld [vmem:[%s11399_s6 + $0xd8] sm:$0xff] }
  0x42   : > { %v626_v16 = vld [vmem:[#allocation2 + $0x98] sm:$0xff]  ;;  %773 = vmatpush1.msra.mxu0 %v518_v5  ;;  %v515_v17 = vmax.f32 %v483_v6, 0.0  ;;  %v420_v18 = vadd.f32 %v388_v9, %v322_v8  ;;  %v383_v19 = vmul.f32 %v5886_v3, %v6381_v15  ;;  %v319_v20 = vmul.f32 %v6369_v10, %v286_v4  ;;  %v281_v56 = vld [vmem:[%s11395_s2 + $0x10] sm:$0xff]  ;;  %v1455_v4 = vld [vmem:[%s11398_s5 + $0x8] sm:$0xff]  ;;  %1470 = vperm.xlu1 %6051, %v1456_v51  }
  0x43   : > { %1051 = vmatprep.subr.mxu1 %v626_v16  ;;  %v517_v23 = vmax.f32 %v485_v12, 0.0  ;;  %v482_v24 = vadd.f32 %v450_v7, %v418_v13  ;;  %v385_v26 = vmul.f32 %v5888_v11, %v6381_v15  ;;  %v316_v28 = vmul.f32 %v6369_v10, %v283_v49  ;;  %v5883_v57 = vld [vmem:[%s11395_s2 + $0x110] sm:$0xff]  ;;  %v445_v8 = vld [vmem:[%s11396_s3 + $0x18] sm:$0xff]  ;;  %v442_v13 = vld [vmem:[%s11396_s3] sm:$0xff]  ;;  %1465 = vperm.xlu0 %6050, %v1455_v4  }
  0x44   : > { %1052 = vmatpush1.msra.mxu1 %v524_v38  ;;  %774 = vmatprep.subr.mxu0 %v515_v17  ;;  %v6672_v30 = vadd.f32 %v452_v14, %v420_v18  ;;  %v415_v31 = vadd.f32 %v383_v19, %v317_v50  ;;  %v382_v32 = vmul.f32 %v5885_v63, %v6381_v15  ;;  %v1457_v11 = vld [vmem:[%s11398_s5 + $0x18] sm:$0xff]  ;;  %v444_v61 = vld [vmem:[%s11396_s3 + $0x10] sm:$0xff]  ;;  %v6005_v4 = vld [vmem:[%s11399_s6 + $0x40] sm:$0xff]  ;;  %vm5814_vm13 = vcmask 465924  }
  0x45   : > { %550 = vst.msk [vmem:[#allocation2 + $0x58] sm:$0xff] %vm541_vm0, %v517_v23  ;;  %v514_v36 = vmax.f32 %v482_v24, 0.0  ;;  %v417_v37 = vadd.f32 %v385_v26, %v319_v20  ;;  %v318_v38 = vmul.f32 %v6369_v10, %v285_v21  ;;  %v384_v39 = vmul.f32 %v5887_v22, %v6381_v15  ;;  %v2317_v21 = vld [vmem:[%s11399_s6 + $0x8] sm:$0xff]  ;;  %v578_v51 = vld [vmem:[%s11397_s4 + $0x38] sm:$0xff]  ;;  %vm5815_vm14 = vmor %vm5814_vm13, %vm5813_vm12 }
  0x46   : > { %v516_v43 = vmax.f32 %v6672_v30, 0.0  ;;  %v479_v44 = vadd.f32 %v447_v25, %v415_v31  ;;  %v414_v45 = vadd.f32 %v382_v32, %v316_v28  ;;  %v313_v47 = vmul.f32 %v6369_v10, %v280_v29  ;;  %1475 = vperm.xlu1 %6051, %v1457_v11   ;;  %v571_v25 = vld [vmem:[%s11397_s4] sm:$0xff]  ;;  %v2319_v29 = vld [vmem:[%s11399_s6 + $0x18] sm:$0xff]  ;;  %v572_v30 = vld [vmem:[%s11397_s4 + $0x8] sm:$0xff] }
  0x47   : > { %775 = vmatpush1.msra.mxu0 %v514_v36  ;;  %v481_v52 = vadd.f32 %v449_v27, %v417_v37  ;;  %v416_v53 = vadd.f32 %v384_v39, %v318_v38  ;;  %v379_v54 = vmul.f32 %v5882_v34, %v6381_v15  ;;  %v315_v55 = vmul.f32 %v6369_v10, %v282_v35  ;;  %v2318_v27 = vld [vmem:[%s11399_s6 + $0x10] sm:$0xff]  ;;  %v5985_v31 = vld [vmem:[%s11399_s6 + $0x60] sm:$0xff]  ;;  %v5986_v32 = vld [vmem:[%s11399_s6 + $0x68] sm:$0xff] }
  0x48   : > { %v622_v58 = vld [vmem:[#allocation2 + $0x78] sm:$0xff]  ;;  %v511_v59 = vmax.f32 %v479_v44, 0.0  ;;  %v478_v60 = vadd.f32 %v446_v33, %v414_v45  ;;  %v381_v2 = vmul.f32 %v5884_v40, %v6381_v15  ;;  %v312_v3 = vmul.f32 %v6369_v10, %v279_v41  ;;  %v573_v34 = vld [vmem:[%s11397_s4 + $0x10] sm:$0xff]  ;;  %v5989_v38 = vld [vmem:[%s11399_s6 + $0xc0] sm:$0xff] }
  0x49   : > { %1053 = vmatprep.subr.mxu1 %v622_v58  ;;  %v513_v5 = vmax.f32 %v481_v52, 0.0  ;;  %v480_v6 = vadd.f32 %v448_v46, %v416_v53  ;;  %v411_v7 = vadd.f32 %v379_v54, %v313_v47  ;;  %v378_v9 = vmul.f32 %v5881_v48, %v6381_v15  ;;  %v5987_v35 = vld [vmem:[%s11399_s6 + $0x70] sm:$0xff]  ;;  %v5988_v36 = vld [vmem:[%s11399_s6 + $0x78] sm:$0xff]  ;;  %v5990_v39 = vld [vmem:[%s11399_s6 + $0xc8] sm:$0xff] }
  0x4a   : > { %1054 = vmatpush1.msra.mxu1 %v520_v1  ;;  %776 = vmatprep.subr.mxu0 %v511_v59  ;;  %v510_v49 = vmax.f32 %v478_v60, 0.0  ;;  %v413_v12 = vadd.f32 %v381_v2, %v315_v55  ;;  %v314_v14 = vmul.f32 %v6369_v10, %v281_v56  ;;  %v380_v50 = vmul.f32 %v5883_v57, %v6381_v15  ;;  %v2316_v10 = vld [vmem:[%s11399_s6] sm:$0xff]  ;;  %v574_v37 = vld [vmem:[%s11397_s4 + $0x18] sm:$0xff]  ;;  %v5991_v41 = vld [vmem:[%s11399_s6 + $0xd0] sm:$0xff] }
  0x4b   : > { %546 = vst.msk [vmem:[#allocation2 + $0x38] sm:$0xff] %vm541_vm0, %v513_v5  ;;  %v512_v63 = vmax.f32 %v480_v6, 0.0  ;;  %v475_v16 = vadd.f32 %v443_v62, %v411_v7  ;;  %v410_v17 = vadd.f32 %v378_v9, %v312_v3  ;;  %2322 = vperm.xlu0 %6050, %v2316_v10   ;;  %2327 = vperm.xlu1 %6051, %v2317_v21   ;;  %v575_v40 = vld [vmem:[%s11397_s4 + $0x20] sm:$0xff]  ;;  %v5994_v45 = vld [vmem:[%s11399_s6 + $0x28] sm:$0xff]  ;;  %v577_v46 = vld [vmem:[%s11397_s4 + $0x30] sm:$0xff] }
  0x4c   : > { %v618_v1 = vld [vmem:[#allocation2 + $0x58] sm:$0xff]  ;;  %777 = vmatpush1.msra.mxu0 %v510_v49  ;;  %v477_v18 = vadd.f32 %v445_v8, %v413_v12  ;;  %v412_v19 = vadd.f32 %v380_v50, %v314_v14  ;;  %v5993_v44 = vld [vmem:[%s11399_s6 + $0x20] sm:$0xff]  ;;  %v5995_v47 = vld [vmem:[%s11399_s6 + $0x30] sm:$0xff] }
  0x4d   : > { %1055 = vmatprep.subr.mxu1 %v618_v1  ;;  %v507_v15 = vmax.f32 %v475_v16, 0.0  ;;  %v474_v20 = vadd.f32 %v442_v13, %v410_v17  ;;  %v5996_v48 = vld [vmem:[%s11399_s6 + $0x38] sm:$0xff]  ;;  %v5997_v52 = vld [vmem:[%s11399_s6 + $0x80] sm:$0xff]  ;;  %v5998_v53 = vld [vmem:[%s11399_s6 + $0x88] sm:$0xff] }
  0x4e   : > { %1056 = vmatpush1.msra.mxu1 %v516_v43  ;;  %v509_v22 = vmax.f32 %v477_v18, 0.0  ;;  %v476_v23 = vadd.f32 %v444_v61, %v412_v19  ;;  %v576_v43 = vld [vmem:[%s11397_s4 + $0x28] sm:$0xff]  ;;  %v579_v54 = vld [vmem:[%s11397_s4 + $0x40] sm:$0xff]  ;;  %v5999_v55 = vld [vmem:[%s11399_s6 + $0x90] sm:$0xff] }
  0x4f   : > { %778 = vmatprep.subr.mxu0 %v507_v15  ;;  %v506_v24 = vmax.f32 %v474_v20, 0.0  ;;  %2332 = vperm.xlu0 %6050, %v2318_v27   ;;  %v6000_v56 = vld [vmem:[%s11399_s6 + $0x98] sm:$0xff]  ;;  %v580_v57 = vld [vmem:[%s11397_s4 + $0x48] sm:$0xff]  ;;  %v6001_v58 = vld [vmem:[%s11399_s6 + $0xe0] sm:$0xff] }
  0x50   : > { %542 = vst.msk [vmem:[#allocation2 + $0x18] sm:$0xff] %vm541_vm0, %v509_v22  ;;  %v508_v26 = vmax.f32 %v476_v23, 0.0  ;;  %2337 = vperm.xlu1 %6051, %v2319_v29   ;;  %v6002_v59 = vld [vmem:[%s11399_s6 + $0xe8] sm:$0xff]  ;;  %v581_v60 = vld [vmem:[%s11397_s4 + $0x50] sm:$0xff]  ;;  %v6004_v2 = vld [vmem:[%s11399_s6 + $0xf8] sm:$0xff] }
  0x51   : > { %779 = vmatpush1.msra.mxu0 %v506_v24  ;;  %v6003_v62 = vld [vmem:[%s11399_s6 + $0xf0] sm:$0xff]  ;;  %v582_v3 = vld [vmem:[%s11397_s4 + $0x58] sm:$0xff]  ;;  %v6006_v5 = vld [vmem:[%s11399_s6 + $0x48] sm:$0xff] }
  0x52   : > { %v614_v28 = vld [vmem:[#allocation2 + $0x38] sm:$0xff]  ;;  %5913 = vmatmul.mubr.msk.f32.vlgmr.msra.gmra.mxu0 %vm639_vm1, %v571_v25  ;;  %v583_v6 = vld [vmem:[%s11397_s4 + $0x60] sm:$0xff]  ;;  %v6007_v7 = vld [vmem:[%s11399_s6 + $0x50] sm:$0xff] }
  0x53   : > { %1057 = vmatprep.subr.mxu1 %v614_v28  ;;  %818 = vmatprep.mubr.f32.mxu0 %v6264_v0  ;;  %v6008_v8 = vld [vmem:[%s11399_s6 + $0x58] sm:$0xff]  ;;  %v584_v9 = vld [vmem:[%s11397_s4 + $0x68] sm:$0xff]  ;;  %v6009_v11 = vld [vmem:[%s11399_s6 + $0xa0] sm:$0xff] }
  0x54   : > { %1058 = vmatpush1.msra.mxu1 %v512_v63  ;;  %2379 = vperm.xlu0 %6050, %v5985_v31   ;;  %v6010_v49 = vld [vmem:[%s11399_s6 + $0xa8] sm:$0xff]  ;;  %v585_v12 = vld [vmem:[%s11397_s4 + $0x70] sm:$0xff]  ;;  %v6012_v14 = vld [vmem:[%s11399_s6 + $0xb8] sm:$0xff] }
  0x55   : > { %2384 = vperm.xlu1 %6051, %v5986_v32   ;;  %v6011_v13 = vld [vmem:[%s11399_s6 + $0xb0] sm:$0xff]  ;;  %v586_v50 = vld [vmem:[%s11397_s4 + $0x78] sm:$0xff]  ;;  %v6013_v63 = vld [vmem:[%s11399_s6 + $0x100] sm:$0xff] }
  0x56   : > { %5914 = vmatmul.mubr.msk.f32.gmra.mxu0 %vm639_vm1, %v572_v30  ;;  %v6014_v16 = vld [vmem:[%s11399_s6 + $0x108] sm:$0xff]  ;;  %v587_v17 = vld [vmem:[%s11397_s4 + $0x80] sm:$0xff]  ;;  %v6015_v61 = vld [vmem:[%s11399_s6 + $0x110] sm:$0xff] }
  0x57   : > { %v610_v33 = vld [vmem:[#allocation2 + $0x18] sm:$0xff]  ;;  %824 = vmatprep.mubr.f32.mxu0 %v6264_v0  ;;  %v588_v18 = vld [vmem:[%s11397_s4 + $0x88] sm:$0xff]  ;;  %v589_v19 = vld [vmem:[%s11397_s4 + $0x90] sm:$0xff] }
  0x58   : > { %1059 = vmatprep.subr.mxu1 %v610_v33  ;;  %2389 = vperm.xlu0 %6050, %v5987_v35   ;;  %v6016_v1 = vld [vmem:[%s11399_s6 + $0x118] sm:$0xff]  ;;  %v591_v15 = vld [vmem:[%s11397_s4 + $0xa0] sm:$0xff]  ;;  %v592_v20 = vld [vmem:[%s11397_s4 + $0xa8] sm:$0xff] }
  0x59   : > { %1060 = vmatpush1.msra.mxu1 %v508_v26  ;;  %2394 = vperm.xlu1 %6051, %v5988_v36   ;;  %v590_v10 = vld [vmem:[%s11397_s4 + $0x98] sm:$0xff]  ;;  %v593_v21 = vld [vmem:[%s11397_s4 + $0xb0] sm:$0xff]  ;;  %v595_v23 = vld [vmem:[%s11397_s4 + $0xc0] sm:$0xff] }
  0x5a   : > { %5949 = vmatmul.mubr.msk.f32.vlgmr.msra.gmra.mxu1 %vm639_vm1, %v571_v25  ;;  %5915 = vmatmul.mubr.msk.f32.gmra.mxu0 %vm639_vm1, %v573_v34  ;;  %v594_v22 = vld [vmem:[%s11397_s4 + $0xb8] sm:$0xff]  ;;  %v596_v24 = vld [vmem:[%s11397_s4 + $0xc8] sm:$0xff]  ;;  %v597_v25 = vld [vmem:[%s11397_s4 + $0xd0] sm:$0xff] }
  0x5b   : > { %1099 = vmatprep.mubr.f32.mxu1 %v6264_v0  ;;  %830 = vmatprep.mubr.f32.mxu0 %v6264_v0  ;;  %v598_v26 = vld [vmem:[%s11397_s4 + $0xd8] sm:$0xff]  ;;  %v599_v27 = vld [vmem:[%s11397_s4 + $0xe0] sm:$0xff]  ;;  %v600_v28 = vld [vmem:[%s11397_s4 + $0xe8] sm:$0xff] }
  0x5c   : > { %2436 = vperm.xlu0 %6050, %v5989_v38   ;;  %v601_v29 = vld [vmem:[%s11397_s4 + $0xf0] sm:$0xff]  ;;  %v603_v31 = vld [vmem:[%s11397_s4 + $0x100] sm:$0xff]  ;;  %v604_v32 = vld [vmem:[%s11397_s4 + $0x108] sm:$0xff] }
  0x5d   : > { %2441 = vperm.xlu1 %6051, %v5990_v39   ;;  %v605_v33 = vld [vmem:[%s11397_s4 + $0x110] sm:$0xff] }
  0x5e   : > { %5950 = vmatmul.mubr.msk.f32.gmra.mxu1 %vm639_vm1, %v572_v30  ;;  %5916 = vmatmul.mubr.msk.f32.gmra.mxu0 %vm639_vm1, %v574_v37  ;;  %v602_v30 = vld [vmem:[%s11397_s4 + $0xf8] sm:$0xff] }
  0x5f   : > { %1105 = vmatprep.mubr.f32.mxu1 %v6264_v0  ;;  %836 = vmatprep.mubr.f32.mxu0 %v6264_v0 }
  0x60   : > { %2446 = vperm.xlu0 %6050, %v5991_v41  }
  0x61   : > { %2451 = vperm.xlu1 %6051, %v5992_v42  }
  0x62   : > { %5951 = vmatmul.mubr.msk.f32.gmra.mxu1 %vm639_vm1, %v573_v34  ;;  %5917 = vmatmul.mubr.msk.f32.gmra.mxu0 %vm639_vm1, %v575_v40  ;;  %v606_v34 = vld [vmem:[%s11397_s4 + $0x118] sm:$0xff] }
  0x63   : > { %1111 = vmatprep.mubr.f32.mxu1 %v6264_v0  ;;  %842 = vmatprep.mubr.f32.mxu0 %v6264_v0 }
  0x64   : > { %2591 = vperm.xlu0 %6050, %v5993_v44  }
  0x65   : > { %2596 = vperm.xlu1 %6051, %v5994_v45  }
  0x66   : > { %5952 = vmatmul.mubr.msk.f32.gmra.mxu1 %vm639_vm1, %v574_v37  ;;  %5918 = vmatmul.mubr.msk.f32.gmra.mxu0 %vm639_vm1, %v576_v43 }
  0x67   : > { %1117 = vmatprep.mubr.f32.mxu1 %v6264_v0  ;;  %848 = vmatprep.mubr.f32.mxu0 %v6264_v0 }
  0x68   : > { %2601 = vperm.xlu0 %6050, %v5995_v47  }
  0x69   : > { %2606 = vperm.xlu1 %6051, %v5996_v48  }
  0x6a   : > { %5953 = vmatmul.mubr.msk.f32.gmra.mxu1 %vm639_vm1, %v575_v40  ;;  %5919 = vmatmul.mubr.msk.f32.gmra.mxu0 %vm639_vm1, %v577_v46 }
  0x6b   : > { %1123 = vmatprep.mubr.f32.mxu1 %v6264_v0  ;;  %854 = vmatprep.mubr.f32.mxu0 %v6264_v0 }
  0x6c   : > { %2648 = vperm.xlu0 %6050, %v5997_v52  }
  0x6d   : > { %2653 = vperm.xlu1 %6051, %v5998_v53  }
  0x6e   : > { %5954 = vmatmul.mubr.msk.f32.gmra.mxu1 %vm639_vm1, %v576_v43  ;;  %5920 = vmatmul.mubr.msk.f32.gmra.mxu0 %vm639_vm1, %v578_v51 }
  0x6f   : > { %1129 = vmatprep.mubr.f32.mxu1 %v6264_v0  ;;  %860 = vmatprep.mubr.f32.mxu0 %v6264_v0 }
  0x70   : > { %2658 = vperm.xlu0 %6050, %v5999_v55  }
  0x71   : > { %2663 = vperm.xlu1 %6051, %v6000_v56  }
  0x72   : > { %5955 = vmatmul.mubr.msk.f32.gmra.mxu1 %vm639_vm1, %v577_v46  ;;  %5921 = vmatmul.mubr.msk.f32.gmra.mxu0 %vm639_vm1, %v579_v54 }
  0x73   : > { %1135 = vmatprep.mubr.f32.mxu1 %v6264_v0  ;;  %866 = vmatprep.mubr.f32.mxu0 %v6264_v0 }
  0x74   : > { %2705 = vperm.xlu0 %6050, %v6001_v58  }
  0x75   : > { %2710 = vperm.xlu1 %6051, %v6002_v59  }
  0x76   : > { %5956 = vmatmul.mubr.msk.f32.gmra.mxu1 %vm639_vm1, %v578_v51  ;;  %5922 = vmatmul.mubr.msk.f32.gmra.mxu0 %vm639_vm1, %v580_v57 }
  0x77   : > { %1141 = vmatprep.mubr.f32.mxu1 %v6264_v0  ;;  %872 = vmatprep.mubr.f32.mxu0 %v6264_v0 }
  0x78   : > { %2715 = vperm.xlu0 %6050, %v6003_v62  }
  0x79   : > { %2720 = vperm.xlu1 %6051, %v6004_v2  }
  0x7a   : > { %5957 = vmatmul.mubr.msk.f32.gmra.mxu1 %vm639_vm1, %v579_v54  ;;  %5923 = vmatmul.mubr.msk.f32.gmra.mxu0 %vm639_vm1, %v581_v60 }
  0x7b   : > { %1147 = vmatprep.mubr.f32.mxu1 %v6264_v0  ;;  %878 = vmatprep.mubr.f32.mxu0 %v6264_v0 }
  0x7c   : > { %2858 = vperm.xlu0 %6050, %v6005_v4  }
  0x7d   : > { %2863 = vperm.xlu1 %6051, %v6006_v5  }
  0x7e   : > { %5958 = vmatmul.mubr.msk.f32.gmra.mxu1 %vm639_vm1, %v580_v57  ;;  %5924 = vmatmul.mubr.msk.f32.gmra.mxu0 %vm639_vm1, %v582_v3 }
  0x7f   : > { %1153 = vmatprep.mubr.f32.mxu1 %v6264_v0  ;;  %884 = vmatprep.mubr.f32.mxu0 %v6264_v0 }
  0x80   : > { %2868 = vperm.xlu0 %6050, %v6007_v7  }
  0x81   : > { %2873 = vperm.xlu1 %6051, %v6008_v8  }
  0x82   : > { %5959 = vmatmul.mubr.msk.f32.gmra.mxu1 %vm639_vm1, %v581_v60  ;;  %5925 = vmatmul.mubr.msk.f32.gmra.mxu0 %vm639_vm1, %v583_v6 }
  0x83   : > { %1159 = vmatprep.mubr.f32.mxu1 %v6264_v0  ;;  %890 = vmatprep.mubr.f32.mxu0 %v6264_v0 }
  0x84   : > { %2899 = vperm.xlu0 %6050, %v6009_v11  }
  0x85   : > { %2904 = vperm.xlu1 %6051, %v6010_v49  }
  0x86   : > { %5960 = vmatmul.mubr.msk.f32.gmra.mxu1 %vm639_vm1, %v582_v3  ;;  %5926 = vmatmul.mubr.msk.f32.gmra.mxu0 %vm639_vm1, %v584_v9 }
  0x87   : > { %1165 = vmatprep.mubr.f32.mxu1 %v6264_v0  ;;  %896 = vmatprep.mubr.f32.mxu0 %v6264_v0 }
  0x88   : > { %2909 = vperm.xlu0 %6050, %v6011_v13  }
  0x89   : > { %2914 = vperm.xlu1 %6051, %v6012_v14  }
  0x8a   : > { %5961 = vmatmul.mubr.msk.f32.gmra.mxu1 %vm639_vm1, %v583_v6  ;;  %5927 = vmatmul.mubr.msk.f32.gmra.mxu0 %vm639_vm1, %v585_v12 }
  0x8b   : > { %1171 = vmatprep.mubr.f32.mxu1 %v6264_v0  ;;  %902 = vmatprep.mubr.f32.mxu0 %v6264_v0 }
  0x8c   : > { %2956 = vperm.xlu0 %6050, %v6013_v63  }
  0x8d   : > { %2961 = vperm.xlu1 %6051, %v6014_v16  }
  0x8e   : > { %5962 = vmatmul.mubr.msk.f32.gmra.mxu1 %vm639_vm1, %v584_v9  ;;  %5928 = vmatmul.mubr.msk.f32.gmra.mxu0 %vm639_vm1, %v586_v50 }
  0x8f   : > { %1177 = vmatprep.mubr.f32.mxu1 %v6264_v0  ;;  %908 = vmatprep.mubr.f32.mxu0 %v6264_v0 }
  0x90   : > { %2966 = vperm.xlu0 %6050, %v6015_v61  }
  0x91   : > { %2971 = vperm.xlu1 %6051, %v6016_v1  }
  0x92   : > { %5963 = vmatmul.mubr.msk.f32.gmra.mxu1 %vm639_vm1, %v585_v12  ;;  %5929 = vmatmul.mubr.msk.f32.gmra.mxu0 %vm639_vm1, %v587_v17 }
  0x93   : > { %1183 = vmatprep.mubr.f32.mxu1 %v6264_v0  ;;  %914 = vmatprep.mubr.f32.mxu0 %v6264_v0 }
  0x96   : > { %5964 = vmatmul.mubr.msk.f32.gmra.mxu1 %vm639_vm1, %v586_v50  ;;  %5930 = vmatmul.mubr.msk.f32.gmra.mxu0 %vm639_vm1, %v588_v18 }
  0x97   : > { %1189 = vmatprep.mubr.f32.mxu1 %v6264_v0  ;;  %920 = vmatprep.mubr.f32.mxu0 %v6264_v0 }
  0x9a   : > { %5965 = vmatmul.mubr.msk.f32.gmra.mxu1 %vm639_vm1, %v587_v17  ;;  %5931 = vmatmul.mubr.msk.f32.gmra.mxu0 %vm639_vm1, %v589_v19 }
  0x9b   : > { %1195 = vmatprep.mubr.f32.mxu1 %v6264_v0  ;;  %926 = vmatprep.mubr.f32.mxu0 %v6264_v0 }
  0x9e   : > { %5966 = vmatmul.mubr.msk.f32.gmra.mxu1 %vm639_vm1, %v588_v18  ;;  %5932 = vmatmul.mubr.msk.f32.gmra.mxu0 %vm639_vm1, %v590_v10 }
  0x9f   : > { %1201 = vmatprep.mubr.f32.mxu1 %v6264_v0  ;;  %932 = vmatprep.mubr.f32.mxu0 %v6264_v0 }
  0xa2   : > { %5967 = vmatmul.mubr.msk.f32.gmra.mxu1 %vm639_vm1, %v589_v19  ;;  %5933 = vmatmul.mubr.msk.f32.gmra.mxu0 %vm639_vm1, %v591_v15 }
  0xa3   : > { %1207 = vmatprep.mubr.f32.mxu1 %v6264_v0  ;;  %938 = vmatprep.mubr.f32.mxu0 %v6264_v0 }
  0xa6   : > { %5968 = vmatmul.mubr.msk.f32.gmra.mxu1 %vm639_vm1, %v590_v10  ;;  %5934 = vmatmul.mubr.msk.f32.gmra.mxu0 %vm639_vm1, %v592_v20 }
  0xa7   : > { %1213 = vmatprep.mubr.f32.mxu1 %v6264_v0  ;;  %944 = vmatprep.mubr.f32.mxu0 %v6264_v0 }
  0xaa   : > { %5969 = vmatmul.mubr.msk.f32.gmra.mxu1 %vm639_vm1, %v591_v15  ;;  %5935 = vmatmul.mubr.msk.f32.gmra.mxu0 %vm639_vm1, %v593_v21 }
  0xab   : > { %1219 = vmatprep.mubr.f32.mxu1 %v6264_v0  ;;  %950 = vmatprep.mubr.f32.mxu0 %v6264_v0 }
  0xae   : > { %5970 = vmatmul.mubr.msk.f32.gmra.mxu1 %vm639_vm1, %v592_v20  ;;  %5936 = vmatmul.mubr.msk.f32.gmra.mxu0 %vm639_vm1, %v594_v22 }
  0xaf   : > { %1225 = vmatprep.mubr.f32.mxu1 %v6264_v0  ;;  %956 = vmatprep.mubr.f32.mxu0 %v6264_v0 }
  0xb2   : > { %5971 = vmatmul.mubr.msk.f32.gmra.mxu1 %vm639_vm1, %v593_v21  ;;  %5937 = vmatmul.mubr.msk.f32.gmra.mxu0 %vm639_vm1, %v595_v23 }
  0xb3   : > { %1231 = vmatprep.mubr.f32.mxu1 %v6264_v0  ;;  %962 = vmatprep.mubr.f32.mxu0 %v6264_v0 }
  0xb6   : > { %5972 = vmatmul.mubr.msk.f32.gmra.mxu1 %vm639_vm1, %v594_v22  ;;  %5938 = vmatmul.mubr.msk.f32.gmra.mxu0 %vm639_vm1, %v596_v24 }
  0xb7   : > { %1237 = vmatprep.mubr.f32.mxu1 %v6264_v0  ;;  %968 = vmatprep.mubr.f32.mxu0 %v6264_v0 }
  0xba   : > { %5973 = vmatmul.mubr.msk.f32.gmra.mxu1 %vm639_vm1, %v595_v23  ;;  %5939 = vmatmul.mubr.msk.f32.gmra.mxu0 %vm639_vm1, %v597_v25  ;;  %v7109_v11 = vpop.permute.xlu0 %1460 }
  0xbb   : > { %1243 = vmatprep.mubr.f32.mxu1 %v6264_v0  ;;  %974 = vmatprep.mubr.f32.mxu0 %v6264_v0 }
  0xbd   : > { %v7116_v1 = vpop.permute.xlu1 %1470 }
  0xbe   : > { %5974 = vmatmul.mubr.msk.f32.gmra.mxu1 %vm639_vm1, %v596_v24  ;;  %5940 = vmatmul.mubr.msk.f32.gmra.mxu0 %vm639_vm1, %v598_v26  ;;  %v7113_v16 = vpop.permute.xlu0 %1465 }
  0xbf   : > { %1249 = vmatprep.mubr.f32.mxu1 %v6264_v0  ;;  %980 = vmatprep.mubr.f32.mxu0 %v6264_v0 }
  0xc1   : > { %v7129_v24 = vpop.permute.xlu1 %1475 }
  0xc2   : > { %5975 = vmatmul.mubr.msk.f32.gmra.mxu1 %vm639_vm1, %v597_v25  ;;  %5941 = vmatmul.mubr.msk.f32.gmra.mxu0 %vm639_vm1, %v599_v27 }
  0xc3   : > { %1255 = vmatprep.mubr.f32.mxu1 %v6264_v0  ;;  %986 = vmatprep.mubr.f32.mxu0 %v6264_v0 }
  0xc6   : > { %5976 = vmatmul.mubr.msk.f32.gmra.mxu1 %vm639_vm1, %v598_v26  ;;  %5942 = vmatmul.mubr.msk.f32.gmra.mxu0 %vm639_vm1, %v600_v28  ;;  %v7121_v10 = vpop.permute.xlu0 %2322 }
  0xc7   : > { %1261 = vmatprep.mubr.f32.mxu1 %v6264_v0  ;;  %992 = vmatprep.mubr.f32.mxu0 %v6264_v0  ;;  %11734 = vst [vmem:[#allocation9_spill] sm:$0xff] %v7121_v10 }
  0xca   : > { %5977 = vmatmul.mubr.msk.f32.gmra.mxu1 %vm639_vm1, %v599_v27  ;;  %5943 = vmatmul.mubr.msk.f32.gmra.mxu0 %vm639_vm1, %v601_v29  ;;  %v7133_v27 = vpop.permute.xlu0 %2332 }
  0xcb   : > { %1267 = vmatprep.mubr.f32.mxu1 %v6264_v0  ;;  %998 = vmatprep.mubr.f32.mxu0 %v6264_v0  ;;  %11735 = vst [vmem:[#allocation10_spill] sm:$0xff] %v7133_v27 }
  0xce   : > { %5978 = vmatmul.mubr.msk.f32.gmra.mxu1 %vm639_vm1, %v600_v28  ;;  %5944 = vmatmul.mubr.msk.f32.gmra.mxu0 %vm639_vm1, %v602_v30 }
  0xcf   : > { %1273 = vmatprep.mubr.f32.mxu1 %v6264_v0  ;;  %1004 = vmatprep.mubr.f32.mxu0 %v6264_v0 }
  0xd2   : > { %5979 = vmatmul.mubr.msk.f32.gmra.mxu1 %vm639_vm1, %v601_v29  ;;  %5945 = vmatmul.mubr.msk.f32.gmra.mxu0 %vm639_vm1, %v603_v31 }
  0xd3   : > { %1279 = vmatprep.mubr.f32.mxu1 %v6264_v0  ;;  %1010 = vmatprep.mubr.f32.mxu0 %v6264_v0 }
  0xd6   : > { %5980 = vmatmul.mubr.msk.f32.gmra.mxu1 %vm639_vm1, %v602_v30  ;;  %5946 = vmatmul.mubr.msk.f32.gmra.mxu0 %vm639_vm1, %v604_v32 }
  0xd7   : > { %1285 = vmatprep.mubr.f32.mxu1 %v6264_v0  ;;  %1016 = vmatprep.mubr.f32.mxu0 %v6264_v0 }
  0xda   : > { %5981 = vmatmul.mubr.msk.f32.gmra.mxu1 %vm639_vm1, %v603_v31  ;;  %5947 = vmatmul.mubr.msk.f32.gmra.mxu0 %vm639_vm1, %v605_v33 }
  0xdb   : > { %1291 = vmatprep.mubr.f32.mxu1 %v6264_v0  ;;  %1022 = vmatprep.mubr.f32.mxu0 %v6264_v0 }
  0xde   : > { %5982 = vmatmul.mubr.msk.f32.gmra.mxu1 %vm639_vm1, %v604_v32  ;;  %5948 = vmatmul.mubr.msk.f32.gmra.mxu0 %vm639_vm1, %v606_v34  ;;  %v7138_v32 = vpop.permute.xlu1 %2327 }
  0xdf   : > { %1297 = vmatprep.mubr.f32.mxu1 %v6264_v0  ;;  %11736 = vst [vmem:[#allocation11_spill] sm:$0xff] %v7138_v32 }
  0xe2   : > { %5983 = vmatmul.mubr.msk.f32.gmra.mxu1 %vm639_vm1, %v605_v33 }
  0xe3   : > { %1303 = vmatprep.mubr.f32.mxu1 %v6264_v0 }
  0xe6   : > { %5984 = vmatmul.mubr.msk.f32.gmra.mxu1 %vm639_vm1, %v606_v34 }
 0x112   : > { %v814_v35 = vpop.f32.mrf.mxu0 }
 0x113   : > { %1310 = vst [vmem:[#allocation3] sm:$0xff] %v814_v35 }
 0x114   : > { %v816_v36 = vpop.f32.mrf.mxu0 }
 0x115   : > { %1311 = vst [vmem:[#allocation3 + $0x8] sm:$0xff] %v816_v36  ;;  %v7141_v36 = vpop.permute.xlu0 %2379 }
 0x116   : > { %v820_v37 = vpop.f32.mrf.mxu0  ;;  %11737 = vst [vmem:[#allocation12_spill] sm:$0xff] %v7141_v36 }
 0x117   : > { %1314 = vst [vmem:[#allocation3 + $0x20] sm:$0xff] %v820_v37 }
 0x118   : > { %v822_v38 = vpop.f32.mrf.mxu0 }
 0x119   : > { %1315 = vst [vmem:[#allocation3 + $0x28] sm:$0xff] %v822_v38 }
 0x11a   : > { %v1095_v39 = vpop.f32.mrf.mxu1  ;;  %v826_v40 = vpop.f32.mrf.mxu0 }
 0x11b   : > { %1312 = vst [vmem:[#allocation3 + $0x10] sm:$0xff] %v1095_v39  ;;  %1318 = vst [vmem:[#allocation3 + $0x40] sm:$0xff] %v826_v40 }
 0x11c   : > { %v1097_v41 = vpop.f32.mrf.mxu1  ;;  %v828_v42 = vpop.f32.mrf.mxu0 }
 0x11d   : > { %1313 = vst.msk [vmem:[#allocation3 + $0x18] sm:$0xff] %vm541_vm0, %v1097_v41  ;;  %1319 = vst [vmem:[#allocation3 + $0x48] sm:$0xff] %v828_v42  ;;  %v7146_v41 = vpop.permute.xlu1 %2337 }
 0x11e   : > { %v1101_v0 = vpop.f32.mrf.mxu1  ;;  %v832_v43 = vpop.f32.mrf.mxu0  ;;  %11738 = vst [vmem:[#allocation13_spill] sm:$0xff] %v7146_v41 }
 0x11f   : > { %1316 = vst [vmem:[#allocation3 + $0x30] sm:$0xff] %v1101_v0  ;;  %1322 = vst [vmem:[#allocation3 + $0x60] sm:$0xff] %v832_v43  ;;  %v7150_v43 = vpop.permute.xlu0 %2389 }
 0x120   : > { %v1103_v44 = vpop.f32.mrf.mxu1  ;;  %v834_v45 = vpop.f32.mrf.mxu0  ;;  %11739 = vst [vmem:[#allocation14_spill] sm:$0xff] %v7150_v43 }
 0x121   : > { %1317 = vst.msk [vmem:[#allocation3 + $0x38] sm:$0xff] %vm541_vm0, %v1103_v44  ;;  %1323 = vst [vmem:[#allocation3 + $0x68] sm:$0xff] %v834_v45 }
 0x122   : > { %v1107_v46 = vpop.f32.mrf.mxu1  ;;  %v838_v47 = vpop.f32.mrf.mxu0 }
 0x123   : > { %1320 = vst [vmem:[#allocation3 + $0x50] sm:$0xff] %v1107_v46  ;;  %1326 = vst [vmem:[#allocation3 + $0x80] sm:$0xff] %v838_v47 }
 0x124   : > { %v1109_v48 = vpop.f32.mrf.mxu1  ;;  %v840_v51 = vpop.f32.mrf.mxu0 }
 0x125   : > { %1321 = vst.msk [vmem:[#allocation3 + $0x58] sm:$0xff] %vm541_vm0, %v1109_v48  ;;  %1327 = vst [vmem:[#allocation3 + $0x88] sm:$0xff] %v840_v51 }
 0x126   : > { %v1113_v52 = vpop.f32.mrf.mxu1  ;;  %v844_v53 = vpop.f32.mrf.mxu0 }
 0x127   : > { %1324 = vst [vmem:[#allocation3 + $0x70] sm:$0xff] %v1113_v52  ;;  %1330 = vst [vmem:[#allocation3 + $0xa0] sm:$0xff] %v844_v53 }
 0x128   : > { %v1115_v54 = vpop.f32.mrf.mxu1  ;;  %v846_v55 = vpop.f32.mrf.mxu0 }
 0x129   : > { %1325 = vst.msk [vmem:[#allocation3 + $0x78] sm:$0xff] %vm541_vm0, %v1115_v54  ;;  %1331 = vst [vmem:[#allocation3 + $0xa8] sm:$0xff] %v846_v55  ;;  %v7157_v54 = vpop.permute.xlu1 %2384 }
 0x12a   : > { %v1119_v56 = vpop.f32.mrf.mxu1  ;;  %v850_v57 = vpop.f32.mrf.mxu0  ;;  %11740 = vst [vmem:[#allocation15_spill] sm:$0xff] %v7157_v54 }
 0x12b   : > { %1328 = vst [vmem:[#allocation3 + $0x90] sm:$0xff] %v1119_v56  ;;  %1334 = vst [vmem:[#allocation3 + $0xc0] sm:$0xff] %v850_v57 }
 0x12c   : > { %v1121_v58 = vpop.f32.mrf.mxu1  ;;  %v852_v59 = vpop.f32.mrf.mxu0 }
 0x12d   : > { %1329 = vst.msk [vmem:[#allocation3 + $0x98] sm:$0xff] %vm541_vm0, %v1121_v58  ;;  %1335 = vst [vmem:[#allocation3 + $0xc8] sm:$0xff] %v852_v59  ;;  %v7160_v59 = vpop.permute.xlu0 %2436 }
 0x12e   : > { %v1125_v60 = vpop.f32.mrf.mxu1  ;;  %v856_v62 = vpop.f32.mrf.mxu0  ;;  %11741 = vst [vmem:[#allocation16_spill] sm:$0xff] %v7160_v59 }
 0x12f   : > { %1332 = vst [vmem:[#allocation3 + $0xb0] sm:$0xff] %v1125_v60  ;;  %1338 = vst [vmem:[#allocation3 + $0xe0] sm:$0xff] %v856_v62 }
 0x130   : > { %v1127_v2 = vpop.f32.mrf.mxu1  ;;  %v858_v3 = vpop.f32.mrf.mxu0 }
 0x131   : > { %1333 = vst.msk [vmem:[#allocation3 + $0xb8] sm:$0xff] %vm541_vm0, %v1127_v2  ;;  %1339 = vst [vmem:[#allocation3 + $0xe8] sm:$0xff] %v858_v3 }
 0x132   : > { %v1131_v4 = vpop.f32.mrf.mxu1  ;;  %v862_v5 = vpop.f32.mrf.mxu0  ;;  %v1883_v43 = vld [vmem:[#allocation3 + $0x90] sm:$0xff] }
 0x133   : > { %1336 = vst [vmem:[#allocation3 + $0xd0] sm:$0xff] %v1131_v4  ;;  %1542 = vrot.lane.b32.xlu0 %v862_v5, %s6266_s1 }
 0x134   : > { %v1133_v6 = vpop.f32.mrf.mxu1  ;;  %v864_v7 = vpop.f32.mrf.mxu0 }
 0x135   : > { %1337 = vst.msk [vmem:[#allocation3 + $0xd8] sm:$0xff] %vm541_vm0, %v1133_v6  ;;  %1544 = vrot.lane.b32.xlu1 %v864_v7, %s6266_s1 }
 0x136   : > { %v1137_v8 = vpop.f32.mrf.mxu1  ;;  %v868_v9 = vpop.f32.mrf.mxu0 }
 0x137   : > { %1340 = vst [vmem:[#allocation3 + $0xf0] sm:$0xff] %v1137_v8 }
 0x138   : > { %v1139_v49 = vpop.f32.mrf.mxu1  ;;  %v870_v12 = vpop.f32.mrf.mxu0 }
 0x139   : > { %1341 = vst.msk [vmem:[#allocation3 + $0xf8] sm:$0xff] %vm541_vm0, %v1139_v49  ;;  %v7168_v49 = vpop.permute.xlu1 %2394 }
 0x13a   : > { %v1143_v13 = vpop.f32.mrf.mxu1  ;;  %v874_v14 = vpop.f32.mrf.mxu0  ;;  %11742 = vst [vmem:[#allocation17_spill] sm:$0xff] %v7168_v49 }
 0x13b   : > { %1546 = vrot.lane.b32.xlu0 %v1143_v13, %s6266_s1 }
 0x13c   : > { %v1145_v50 = vpop.f32.mrf.mxu1  ;;  %v876_v63 = vpop.f32.mrf.mxu0 }
 0x13d   : > { %1345 = vst.msk [vmem:[#allocation3 + $0x118] sm:$0xff] %vm541_vm0, %v1145_v50 }
 0x13e   : > { %v1149_v17 = vpop.f32.mrf.mxu1  ;;  %v880_v61 = vpop.f32.mrf.mxu0 }
 0x13f   : > { %1550 = vrot.lane.b32.xlu0 %v868_v9, %s6266_s1 }
 0x140   : > { %v1151_v18 = vpop.f32.mrf.mxu1  ;;  %v7119_v19 = vpop.f32.mrf.mxu0 }
 0x141   : > { %1349 = vst.msk [vmem:[#allocation3 + $0x138] sm:$0xff] %vm541_vm0, %v1151_v18 }
 0x142   : > { %v1155_v15 = vpop.f32.mrf.mxu1  ;;  %v7124_v20 = vpop.f32.mrf.mxu0 }
 0x143   : > { %1554 = vrot.lane.b32.xlu0 %v1149_v17, %s6266_s1  ;;  %v7173_v17 = vpop.permute.xlu0 %2446 }
 0x144   : > { %v1157_v21 = vpop.f32.mrf.mxu1  ;;  %v1513_v22 = vld [vmem:[#allocation3 + $0x118] sm:$0xff]  ;;  %v7127_v23 = vpop.f32.mrf.mxu0  ;;  %11743 = vst [vmem:[#allocation18_spill] sm:$0xff] %v7173_v17 }
 0x145   : > { %1353 = vst.msk [vmem:[#allocation3 + $0x158] sm:$0xff] %vm541_vm0, %v1157_v21  ;;  %1548 = vrot.lane.b32.xlu1 %v1513_v22, %s6266_s1 }
 0x146   : > { %v1161_v25 = vpop.f32.mrf.mxu1  ;;  %v892_v26 = vpop.f32.mrf.mxu0 }
 0x147   : > { %1362 = vst [vmem:[#allocation3 + $0x1a0] sm:$0xff] %v892_v26  ;;  %1558 = vrot.lane.b32.xlu0 %v874_v14, %s6266_s1 }
 0x148   : > { %v1163_v28 = vpop.f32.mrf.mxu1  ;;  %v894_v29 = vpop.f32.mrf.mxu0  ;;  %v1517_v34 = vld [vmem:[#allocation3 + $0x138] sm:$0xff] }
 0x149   : > { %1357 = vst.msk [vmem:[#allocation3 + $0x178] sm:$0xff] %vm541_vm0, %v1163_v28  ;;  %1552 = vrot.lane.b32.xlu1 %v870_v12, %s6266_s1  ;;  %1363 = vst [vmem:[#allocation3 + $0x1a8] sm:$0xff] %v894_v29 }
 0x14a   : > { %v1167_v30 = vpop.f32.mrf.mxu1  ;;  %v898_v31 = vpop.f32.mrf.mxu0 }
 0x14b   : > { %1360 = vst [vmem:[#allocation3 + $0x190] sm:$0xff] %v1167_v30  ;;  %1366 = vst [vmem:[#allocation3 + $0x1c0] sm:$0xff] %v898_v31  ;;  %1562 = vrot.lane.b32.xlu0 %v1155_v15, %s6266_s1  ;;  %v7179_v30 = vpop.permute.xlu1 %2441 }
 0x14c   : > { %v1169_v33 = vpop.f32.mrf.mxu1  ;;  %v900_v35 = vpop.f32.mrf.mxu0  ;;  %v1521_v46 = vld [vmem:[#allocation3 + $0x158] sm:$0xff]  ;;  %11744 = vst [vmem:[#allocation19_spill] sm:$0xff] %v7179_v30 }
 0x14d   : > { %1361 = vst.msk [vmem:[#allocation3 + $0x198] sm:$0xff] %vm541_vm0, %v1169_v33  ;;  %1556 = vrot.lane.b32.xlu1 %v1517_v34, %s6266_s1  ;;  %1367 = vst [vmem:[#allocation3 + $0x1c8] sm:$0xff] %v900_v35 }
 0x14e   : > { %v1173_v37 = vpop.f32.mrf.mxu1  ;;  %v904_v38 = vpop.f32.mrf.mxu0 }
 0x14f   : > { %1364 = vst [vmem:[#allocation3 + $0x1b0] sm:$0xff] %v1173_v37  ;;  %1370 = vst [vmem:[#allocation3 + $0x1e0] sm:$0xff] %v904_v38  ;;  %1566 = vrot.lane.b32.xlu0 %v880_v61, %s6266_s1  ;;  %v7183_v38 = vpop.permute.xlu0 %2591 }
 0x150   : > { %v1175_v39 = vpop.f32.mrf.mxu1  ;;  %v906_v40 = vpop.f32.mrf.mxu0  ;;  %v1525_v8 = vld [vmem:[#allocation3 + $0x178] sm:$0xff]  ;;  %11745 = vst [vmem:[#allocation20_spill] sm:$0xff] %v7183_v38 }
 0x151   : > { %1365 = vst.msk [vmem:[#allocation3 + $0x1b8] sm:$0xff] %vm541_vm0, %v1175_v39  ;;  %1560 = vrot.lane.b32.xlu1 %v876_v63, %s6266_s1  ;;  %1371 = vst [vmem:[#allocation3 + $0x1e8] sm:$0xff] %v906_v40 }
 0x152   : > { %v1179_v42 = vpop.f32.mrf.mxu1  ;;  %v910_v0 = vpop.f32.mrf.mxu0 }
 0x153   : > { %1368 = vst [vmem:[#allocation3 + $0x1d0] sm:$0xff] %v1179_v42  ;;  %v2251_v44 = vadd.f32 %v7109_v11, %v910_v0  ;;  %1570 = vrot.lane.b32.xlu0 %v1161_v25, %s6266_s1 }
 0x154   : > { %v1181_v45 = vpop.f32.mrf.mxu1  ;;  %v912_v47 = vpop.f32.mrf.mxu0 }
 0x155   : > { %1369 = vst.msk [vmem:[#allocation3 + $0x1d8] sm:$0xff] %vm541_vm0, %v1181_v45  ;;  %1564 = vrot.lane.b32.xlu1 %v1521_v46, %s6266_s1  ;;  %v2267_v48 = vmax.f32 %v2251_v44, 0.0  ;;  %v2252_v51 = vadd.f32 %v7109_v11, %v912_v47 }
 0x156   : > { %v1185_v52 = vpop.f32.mrf.mxu1  ;;  %v916_v53 = vpop.f32.mrf.mxu0 }
 0x157   : > { %1372 = vst [vmem:[#allocation3 + $0x1f0] sm:$0xff] %v1185_v52  ;;  %2284 = vst [vmem:[#allocation4 + $0x180] sm:$0xff] %v2267_v48  ;;  %v2268_v55 = vmax.f32 %v2252_v51, 0.0  ;;  %v2255_v56 = vadd.f32 %v7113_v16, %v916_v53  ;;  %v7189_v51 = vpop.permute.xlu1 %2451 }
 0x158   : > { %v1187_v57 = vpop.f32.mrf.mxu1  ;;  %v918_v58 = vpop.f32.mrf.mxu0  ;;  %11746 = vst [vmem:[#allocation21_spill] sm:$0xff] %v7189_v51 }
 0x159   : > { %1373 = vst.msk [vmem:[#allocation3 + $0x1f8] sm:$0xff] %vm541_vm0, %v1187_v57  ;;  %2285 = vst [vmem:[#allocation4 + $0x188] sm:$0xff] %v2268_v55  ;;  %1568 = vrot.lane.b32.xlu1 %v7119_v19, %s6266_s1  ;;  %v2271_v60 = vmax.f32 %v2255_v56, 0.0  ;;  %v2256_v62 = vadd.f32 %v7113_v16, %v918_v58  ;;  %v7194_v57 = vpop.permute.xlu0 %2601 }
 0x15a   : > { %v1191_v2 = vpop.f32.mrf.mxu1  ;;  %v922_v3 = vpop.f32.mrf.mxu0  ;;  %11747 = vst [vmem:[#allocation22_spill] sm:$0xff] %v7194_v57 }
 0x15b   : > { %v2253_v4 = vadd.f32 %v7109_v11, %v1191_v2  ;;  %2288 = vst [vmem:[#allocation4 + $0x1a0] sm:$0xff] %v2271_v60  ;;  %v2272_v5 = vmax.f32 %v2256_v62, 0.0  ;;  %v2259_v6 = vadd.f32 %v7116_v1, %v922_v3 }
 0x15c   : > { %v1193_v7 = vpop.f32.mrf.mxu1  ;;  %v924_v9 = vpop.f32.mrf.mxu0 }
 0x15d   : > { %v2269_v12 = vmax.f32 %v2253_v4, 0.0  ;;  %1377 = vst.msk [vmem:[#allocation3 + $0x218] sm:$0xff] %vm541_vm0, %v1193_v7  ;;  %2289 = vst [vmem:[#allocation4 + $0x1a8] sm:$0xff] %v2272_v5  ;;  %1572 = vrot.lane.b32.xlu1 %v1525_v8, %s6266_s1  ;;  %v2275_v13 = vmax.f32 %v2259_v6, 0.0  ;;  %v2260_v14 = vadd.f32 %v7116_v1, %v924_v9  ;;  %v7200_v6 = vpop.permute.xlu1 %2596 }
 0x15e   : > { %v1197_v50 = vpop.f32.mrf.mxu1  ;;  %v928_v63 = vpop.f32.mrf.mxu0  ;;  %11748 = vst [vmem:[#allocation23_spill] sm:$0xff] %v7200_v6 }
 0x15f   : > { %2286 = vst [vmem:[#allocation4 + $0x190] sm:$0xff] %v2269_v12  ;;  %v2257_v61 = vadd.f32 %v7113_v16, %v1197_v50  ;;  %2292 = vst [vmem:[#allocation4 + $0x1c0] sm:$0xff] %v2275_v13  ;;  %v2276_v18 = vmax.f32 %v2260_v14, 0.0  ;;  %v2263_v19 = vadd.f32 %v7129_v24, %v928_v63  ;;  %v7203_v13 = vpop.permute.xlu0 %2648 }
 0x160   : > { %v1199_v15 = vpop.f32.mrf.mxu1  ;;  %v930_v21 = vpop.f32.mrf.mxu0  ;;  %11749 = vst [vmem:[#allocation24_spill] sm:$0xff] %v7203_v13 }
 0x161   : > { %v2273_v22 = vmax.f32 %v2257_v61, 0.0  ;;  %1381 = vst.msk [vmem:[#allocation3 + $0x238] sm:$0xff] %vm541_vm0, %v1199_v15  ;;  %2293 = vst [vmem:[#allocation4 + $0x1c8] sm:$0xff] %v2276_v18  ;;  %v2279_v25 = vmax.f32 %v2263_v19, 0.0  ;;  %v2264_v26 = vadd.f32 %v7129_v24, %v930_v21  ;;  %v7211_v21 = vpop.permute.xlu1 %2606 }
 0x162   : > { %v1203_v28 = vpop.f32.mrf.mxu1  ;;  %v934_v29 = vpop.f32.mrf.mxu0  ;;  %11750 = vst [vmem:[#allocation25_spill] sm:$0xff] %v7211_v21 }
 0x163   : > { %2290 = vst [vmem:[#allocation4 + $0x1b0] sm:$0xff] %v2273_v22  ;;  %v2261_v31 = vadd.f32 %v7116_v1, %v1203_v28  ;;  %2296 = vst [vmem:[#allocation4 + $0x1e0] sm:$0xff] %v2279_v25  ;;  %v2280_v33 = vmax.f32 %v2264_v26, 0.0  ;;  %2122 = vrot.lane.b32.xlu0 %v934_v29, %s6266_s1  ;;  %v7216_v26 = vpop.permute.xlu0 %2658 }
 0x164   : > { %v2238_v34 = vld [vmem:[#allocation3 + $0x218] sm:$0xff]  ;;  %v1205_v35 = vpop.f32.mrf.mxu1  ;;  %v936_v37 = vpop.f32.mrf.mxu0  ;;  %11751 = vst [vmem:[#allocation26_spill] sm:$0xff] %v7216_v26 }
 0x165   : > { %v2254_v39 = vadd.f32 %v2238_v34, %v7109_v11  ;;  %v2277_v40 = vmax.f32 %v2261_v31, 0.0  ;;  %1385 = vst.msk [vmem:[#allocation3 + $0x258] sm:$0xff] %vm541_vm0, %v1205_v35  ;;  %2297 = vst [vmem:[#allocation4 + $0x1e8] sm:$0xff] %v2280_v33  ;;  %2124 = vrot.lane.b32.xlu1 %v936_v37, %s6266_s1  ;;  %v7225_v34 = vpop.permute.xlu1 %2653 }
 0x166   : > { %v1209_v42 = vpop.f32.mrf.mxu1  ;;  %v940_v0 = vpop.f32.mrf.mxu0  ;;  %11752 = vst [vmem:[#allocation27_spill] sm:$0xff] %v7225_v34 }
 0x167   : > { %v2270_v44 = vmax.f32 %v2254_v39, 0.0  ;;  %2294 = vst [vmem:[#allocation4 + $0x1d0] sm:$0xff] %v2277_v40  ;;  %v2265_v45 = vadd.f32 %v7129_v24, %v1209_v42  ;;  %v7230_v40 = vpop.permute.xlu0 %2705 }
 0x168   : > { %v2242_v46 = vld [vmem:[#allocation3 + $0x238] sm:$0xff]  ;;  %v1211_v47 = vpop.f32.mrf.mxu1  ;;  %v942_v48 = vpop.f32.mrf.mxu0  ;;  %11753 = vst [vmem:[#allocation28_spill] sm:$0xff] %v7230_v40 }
 0x169   : > { %2287 = vst.msk [vmem:[#allocation4 + $0x198] sm:$0xff] %vm541_vm0, %v2270_v44  ;;  %v2258_v52 = vadd.f32 %v2242_v46, %v7113_v16  ;;  %v2281_v53 = vmax.f32 %v2265_v45, 0.0  ;;  %1389 = vst.msk [vmem:[#allocation3 + $0x278] sm:$0xff] %vm541_vm0, %v1211_v47  ;;  %v7239_v46 = vpop.permute.xlu1 %2663 }
 0x16a   : > { %v1215_v55 = vpop.f32.mrf.mxu1  ;;  %v946_v56 = vpop.f32.mrf.mxu0  ;;  %11754 = vst [vmem:[#allocation29_spill] sm:$0xff] %v7239_v46  ;;  %v1885_v46 = vld [vmem:[#allocation3 + $0xa0] sm:$0xff] }
 0x16b   : > { %v2274_v58 = vmax.f32 %v2258_v52, 0.0  ;;  %2298 = vst [vmem:[#allocation4 + $0x1f0] sm:$0xff] %v2281_v53  ;;  %2126 = vrot.lane.b32.xlu0 %v1215_v55, %s6266_s1  ;;  %v7245_v52 = vpop.permute.xlu0 %2715 }
 0x16c   : > { %v2246_v60 = vld [vmem:[#allocation3 + $0x258] sm:$0xff]  ;;  %v1217_v62 = vpop.f32.mrf.mxu1  ;;  %v948_v2 = vpop.f32.mrf.mxu0  ;;  %11755 = vst [vmem:[#allocation30_spill] sm:$0xff] %v7245_v52 }
 0x16d   : > { %2291 = vst.msk [vmem:[#allocation4 + $0x1b8] sm:$0xff] %vm541_vm0, %v2274_v58  ;;  %v2262_v3 = vadd.f32 %v2246_v60, %v7116_v1  ;;  %1393 = vst.msk [vmem:[#allocation3 + $0x298] sm:$0xff] %vm541_vm0, %v1217_v62  ;;  %v7256_v62 = vpop.permute.xlu1 %2710 }
 0x16e   : > { %v1221_v4 = vpop.f32.mrf.mxu1  ;;  %v952_v5 = vpop.f32.mrf.mxu0  ;;  %11756 = vst [vmem:[#allocation31_spill] sm:$0xff] %v7256_v62 }
 0x16f   : > { %v2278_v7 = vmax.f32 %v2262_v3, 0.0  ;;  %2130 = vrot.lane.b32.xlu0 %v940_v0, %s6266_s1 }
 0x170   : > { %v2250_v8 = vld [vmem:[#allocation3 + $0x278] sm:$0xff]  ;;  %v1223_v9 = vpop.f32.mrf.mxu1  ;;  %v954_v12 = vpop.f32.mrf.mxu0 }
 0x171   : > { %2295 = vst.msk [vmem:[#allocation4 + $0x1d8] sm:$0xff] %vm541_vm0, %v2278_v7  ;;  %v2266_v14 = vadd.f32 %v2250_v8, %v7129_v24  ;;  %1397 = vst.msk [vmem:[#allocation3 + $0x2b8] sm:$0xff] %vm541_vm0, %v1223_v9 }
 0x172   : > { %v1227_v50 = vpop.f32.mrf.mxu1  ;;  %v958_v63 = vpop.f32.mrf.mxu0 }
 0x173   : > { %v2282_v61 = vmax.f32 %v2266_v14, 0.0  ;;  %2134 = vrot.lane.b32.xlu0 %v1221_v4, %s6266_s1  ;;  %v7261_v4 = vpop.permute.xlu0 %2858 }
 0x174   : > { %v2093_v18 = vld [vmem:[#allocation3 + $0x298] sm:$0xff]  ;;  %v1229_v19 = vpop.f32.mrf.mxu1  ;;  %v7209_v15 = vpop.f32.mrf.mxu0  ;;  %11757 = vst [vmem:[#allocation32_spill] sm:$0xff] %v7261_v4 }
 0x175   : > { %2299 = vst.msk [vmem:[#allocation4 + $0x1f8] sm:$0xff] %vm541_vm0, %v2282_v61  ;;  %2128 = vrot.lane.b32.xlu1 %v2093_v18, %s6266_s1  ;;  %1401 = vst.msk [vmem:[#allocation3 + $0x2d8] sm:$0xff] %vm541_vm0, %v1229_v19 }
 0x176   : > { %v1233_v22 = vpop.f32.mrf.mxu1  ;;  %v964_v25 = vpop.f32.mrf.mxu0 }
 0x177   : > { %2138 = vrot.lane.b32.xlu0 %v946_v56, %s6266_s1  ;;  %v7280_v61 = vpop.permute.xlu0 %2868 }
 0x178   : > { %v1235_v28 = vpop.f32.mrf.mxu1  ;;  %v7219_v29 = vpop.f32.mrf.mxu0  ;;  %v2097_v35 = vld [vmem:[#allocation3 + $0x2b8] sm:$0xff]  ;;  %11759 = vst [vmem:[#allocation34_spill] sm:$0xff] %v7280_v61 }
 0x179   : > { %2132 = vrot.lane.b32.xlu1 %v942_v48, %s6266_s1  ;;  %1405 = vst.msk [vmem:[#allocation3 + $0x2f8] sm:$0xff] %vm541_vm0, %v1235_v28 }
 0x17a   : > { %v1239_v31 = vpop.f32.mrf.mxu1  ;;  %v7223_v33 = vpop.f32.mrf.mxu0 }
 0x17b   : > { %2142 = vrot.lane.b32.xlu0 %v1227_v50, %s6266_s1  ;;  %v7272_v50 = vpop.permute.xlu1 %2720 }
 0x17c   : > { %v1241_v37 = vpop.f32.mrf.mxu1  ;;  %v7228_v39 = vpop.f32.mrf.mxu0  ;;  %v2101_v53 = vld [vmem:[#allocation3 + $0x2d8] sm:$0xff]  ;;  %11758 = vst [vmem:[#allocation33_spill] sm:$0xff] %v7272_v50  ;;  %v2070_v50 = vld [vmem:[#allocation3 + $0x1e0] sm:$0xff] }
 0x17d   : > { %2136 = vrot.lane.b32.xlu1 %v2097_v35, %s6266_s1  ;;  %1409 = vst.msk [vmem:[#allocation3 + $0x318] sm:$0xff] %vm541_vm0, %v1241_v37 }
 0x17e   : > { %v1245_v42 = vpop.f32.mrf.mxu1  ;;  %v7234_v0 = vpop.f32.mrf.mxu0 }
 0x17f   : > { %2146 = vrot.lane.b32.xlu0 %v952_v5, %s6266_s1 }
 0x180   : > { %v1247_v44 = vpop.f32.mrf.mxu1  ;;  %v7237_v45 = vpop.f32.mrf.mxu0  ;;  %v2105_v8 = vld [vmem:[#allocation3 + $0x2f8] sm:$0xff] }
 0x181   : > { %2140 = vrot.lane.b32.xlu1 %v948_v2, %s6266_s1  ;;  %1413 = vst.msk [vmem:[#allocation3 + $0x338] sm:$0xff] %vm541_vm0, %v1247_v44 }
 0x182   : > { %v1251_v47 = vpop.f32.mrf.mxu1  ;;  %v7243_v48 = vpop.f32.mrf.mxu0 }
 0x183   : > { %2150 = vrot.lane.b32.xlu0 %v1233_v22, %s6266_s1 }
 0x184   : > { %v1253_v55 = vpop.f32.mrf.mxu1  ;;  %v7248_v56 = vpop.f32.mrf.mxu0  ;;  %v1626_v35 = vld [vmem:[#allocation3 + $0x318] sm:$0xff] }
 0x185   : > { %2144 = vrot.lane.b32.xlu1 %v2101_v53, %s6266_s1  ;;  %1417 = vst.msk [vmem:[#allocation3 + $0x358] sm:$0xff] %vm541_vm0, %v1253_v55 }
 0x186   : > { %v7252_v58 = vpop.f32.mrf.mxu1  ;;  %v7254_v60 = vpop.f32.mrf.mxu0 }
 0x187   : > { %1655 = vrot.lane.b32.xlu0 %v958_v63, %s6267_s30 }
 0x188   : > { %v1259_v2 = vpop.f32.mrf.mxu1  ;;  %v7259_v3 = vpop.f32.mrf.mxu0 }
 0x189   : > { %2148 = vrot.lane.b32.xlu1 %v954_v12, %s6266_s1  ;;  %1421 = vst.msk [vmem:[#allocation3 + $0x378] sm:$0xff] %vm541_vm0, %v1259_v2 }
 0x18a   : > { %v7265_v5 = vpop.f32.mrf.mxu1  ;;  %v7267_v7 = vpop.f32.mrf.mxu0 }
 0x18b   : > { %1659 = vrot.lane.b32.xlu0 %v1239_v31, %s6267_s30  ;;  %v7292_v31 = vpop.permute.xlu1 %2863 }
 0x18c   : > { %v1265_v9 = vpop.f32.mrf.mxu1  ;;  %v7270_v14 = vpop.f32.mrf.mxu0  ;;  %11760 = vst [vmem:[#allocation35_spill] sm:$0xff] %v7292_v31 }
 0x18d   : > { %2152 = vrot.lane.b32.xlu1 %v2105_v8, %s6266_s1  ;;  %1425 = vst.msk [vmem:[#allocation3 + $0x398] sm:$0xff] %vm541_vm0, %v1265_v9 }
 0x18e   : > { %v7276_v63 = vpop.f32.mrf.mxu1  ;;  %v7278_v12 = vpop.f32.mrf.mxu0 }
 0x18f   : > { %1663 = vrot.lane.b32.xlu0 %v964_v25, %s6267_s30  ;;  %v7297_v25 = vpop.permute.xlu0 %2899 }
 0x190   : > { %v1271_v18 = vpop.f32.mrf.mxu1  ;;  %v7283_v19 = vpop.f32.mrf.mxu0  ;;  %11761 = vst [vmem:[#allocation36_spill] sm:$0xff] %v7297_v25 }
 0x191   : > { %1657 = vrot.lane.b32.xlu1 %v7209_v15, %s6267_s30  ;;  %1429 = vst.msk [vmem:[#allocation3 + $0x3b8] sm:$0xff] %vm541_vm0, %v1271_v18 }
 0x192   : > { %v7288_v22 = vpop.f32.mrf.mxu1  ;;  %v7290_v28 = vpop.f32.mrf.mxu0 }
 0x193   : > { %1667 = vrot.lane.b32.xlu0 %v1245_v42, %s6267_s30  ;;  %v7309_v42 = vpop.permute.xlu1 %2873  ;;  %v7318_v18 = vpop.permute.xlu0 %2909 }
 0x194   : > { %v1277_v37 = vpop.f32.mrf.mxu1  ;;  %v7295_v44 = vpop.f32.mrf.mxu0  ;;  %11762 = vst [vmem:[#allocation37_spill] sm:$0xff] %v7309_v42  ;;  %11763 = vst [vmem:[#allocation38_spill] sm:$0xff] %v7318_v18  ;;  %v2060_v18 = vld [vmem:[#allocation3 + $0x190] sm:$0xff] }
 0x195   : > { %1661 = vrot.lane.b32.xlu1 %v1626_v35, %s6267_s30  ;;  %1433 = vst.msk [vmem:[#allocation3 + $0x3d8] sm:$0xff] %vm541_vm0, %v1277_v37  ;;  %v1630_v35 = vld [vmem:[#allocation3 + $0x338] sm:$0xff] }
 0x196   : > { %v7301_v15 = vpop.f32.mrf.mxu1  ;;  %v7303_v53 = vpop.f32.mrf.mxu0 }
 0x197   : > { %1671 = vrot.lane.b32.xlu0 %v7223_v33, %s6267_s30 }
 0x198   : > { %v1283_v55 = vpop.f32.mrf.mxu1  ;;  %v7307_v2 = vpop.f32.mrf.mxu0 }
 0x199   : > { %1665 = vrot.lane.b32.xlu1 %v7219_v29, %s6267_s30  ;;  %1437 = vst.msk [vmem:[#allocation3 + $0x3f8] sm:$0xff] %vm541_vm0, %v1283_v55  ;;  %v7329_v55 = vpop.permute.xlu1 %2904 }
 0x19a   : > { %v7314_v8 = vpop.f32.mrf.mxu1  ;;  %v7316_v9 = vpop.f32.mrf.mxu0  ;;  %11764 = vst [vmem:[#allocation39_spill] sm:$0xff] %v7329_v55 }
 0x19b   : > { %1675 = vrot.lane.b32.xlu0 %v1251_v47, %s6267_s30  ;;  %v7335_v47 = vpop.permute.xlu0 %2956 }
 0x19c   : > { %v1289_v33 = vpop.f32.mrf.mxu1  ;;  %v7321_v37 = vpop.f32.mrf.mxu0  ;;  %11765 = vst [vmem:[#allocation40_spill] sm:$0xff] %v7335_v47 }
 0x19d   : > { %1669 = vrot.lane.b32.xlu1 %v1630_v35, %s6267_s30  ;;  %1441 = vst.msk [vmem:[#allocation3 + $0x418] sm:$0xff] %vm541_vm0, %v1289_v33  ;;  %v1634_v33 = vld [vmem:[#allocation3 + $0x358] sm:$0xff]  ;;  %v7344_v41 = vpop.permute.xlu1 %2914 }
 0x19e   : > { %v7325_v25 = vpop.f32.mrf.mxu1  ;;  %v7327_v29 = vpop.f32.mrf.mxu0  ;;  %11766 = vst [vmem:[#allocation41_spill] sm:$0xff] %v7344_v41 }
 0x19f   : > { %1679 = vrot.lane.b32.xlu0 %v7234_v0, %s6267_s30  ;;  %v7346_v0 = vpop.permute.xlu0 %2966 }
 0x1a0   : > { %v1295_v4 = vpop.f32.mrf.mxu1  ;;  %v7333_v21 = vpop.f32.mrf.mxu0  ;;  %11767 = vst [vmem:[#allocation42_spill] sm:$0xff] %v7346_v0 }
 0x1a1   : > { %1673 = vrot.lane.b32.xlu1 %v7228_v39, %s6267_s30  ;;  %1445 = vst.msk [vmem:[#allocation3 + $0x438] sm:$0xff] %vm541_vm0, %v1295_v4  ;;  %v7359_v4 = vpop.permute.xlu1 %2961 }
 0x1a2   : > { %v7340_v35 = vpop.f32.mrf.mxu1  ;;  %11768 = vst [vmem:[#allocation43_spill] sm:$0xff] %v7359_v4 }
 0x1a3   : > { %1683 = vrot.lane.b32.xlu0 %v7252_v58, %s6267_s30 }
 0x1a4   : > { %v1301_v42 = vpop.f32.mrf.mxu1 }
 0x1a5   : > { %1677 = vrot.lane.b32.xlu1 %v1634_v33, %s6267_s30  ;;  %1449 = vst.msk [vmem:[#allocation3 + $0x458] sm:$0xff] %vm541_vm0, %v1301_v42  ;;  %v7356_v58 = vpop.permute.xlu0 %1542  ;;  %v1638_v33 = vld [vmem:[#allocation3 + $0x378] sm:$0xff]  ;;  %v7366_v61 = vpop.permute.xlu1 %2971 }
 0x1a6   : > { %v7350_v57 = vpop.f32.mrf.mxu1  ;;  %11769 = vst [vmem:[#allocation44_spill] sm:$0xff] %v7366_v61 }
 0x1a7   : > { %1945 = vrot.lane.b32.xlu0 %v7243_v48, %s6267_s30 }
 0x1a8   : > { %v1307_v39 = vpop.f32.mrf.mxu1 }
 0x1a9   : > { %1681 = vrot.lane.b32.xlu1 %v7237_v45, %s6267_s30  ;;  %1453 = vst.msk [vmem:[#allocation3 + $0x478] sm:$0xff] %vm541_vm0, %v1307_v39  ;;  %v7372_v45 = vpop.permute.xlu1 %1544 }
 0x1ab   : > { %1949 = vrot.lane.b32.xlu0 %v7265_v5, %s6267_s30  ;;  %v1916_v5 = vld [vmem:[#allocation3 + $0x398] sm:$0xff] }
 0x1ad   : > { %1685 = vrot.lane.b32.xlu1 %v1638_v33, %s6267_s30  ;;  %v7364_v42 = vpop.permute.xlu0 %1546 }
 0x1af   : > { %1953 = vrot.lane.b32.xlu0 %v7254_v60, %s6267_s30 }
 0x1b1   : > { %1947 = vrot.lane.b32.xlu1 %v7248_v56, %s6267_s30  ;;  %v7374_v48 = vpop.permute.xlu0 %1550  ;;  %v1920_v56 = vld [vmem:[#allocation3 + $0x3b8] sm:$0xff] }
 0x1b3   : > { %1957 = vrot.lane.b32.xlu0 %v7276_v63, %s6267_s30 }
 0x1b5   : > { %1951 = vrot.lane.b32.xlu1 %v1916_v5, %s6267_s30  ;;  %v7385_v60 = vpop.permute.xlu0 %1554 }
 0x1b7   : > { %v7379_v39 = vpop.permute.xlu1 %1548  ;;  %1961 = vrot.lane.b32.xlu0 %v7267_v7, %s6267_s30 }
 0x1b9   : > { %1955 = vrot.lane.b32.xlu1 %v7259_v3, %s6267_s30  ;;  %v7394_v5 = vpop.permute.xlu0 %1558  ;;  %v1924_v3 = vld [vmem:[#allocation3 + $0x3d8] sm:$0xff] }
 0x1bb   : > { %v7387_v33 = vpop.permute.xlu1 %1552  ;;  %1965 = vrot.lane.b32.xlu0 %v7288_v22, %s6267_s30 }
 0x1bd   : > { %1959 = vrot.lane.b32.xlu1 %v1920_v56, %s6267_s30  ;;  %v7404_v61 = vpop.permute.xlu0 %1562 }
 0x1bf   : > { %v7392_v63 = vpop.permute.xlu1 %1556  ;;  %1969 = vrot.lane.b32.xlu0 %v7278_v12, %s6267_s30 }
 0x1c1   : > { %1963 = vrot.lane.b32.xlu1 %v7270_v14, %s6267_s30  ;;  %v1928_v14 = vld [vmem:[#allocation3 + $0x3f8] sm:$0xff]  ;;  %v7413_v12 = vpop.permute.xlu0 %1566 }
 0x1c3   : > { %v7400_v7 = vpop.permute.xlu1 %1560  ;;  %1973 = vrot.lane.b32.xlu0 %v7301_v15, %s6267_s30 }
 0x1c5   : > { %1967 = vrot.lane.b32.xlu1 %v1924_v3, %s6267_s30  ;;  %v7422_v56 = vpop.permute.xlu0 %1570 }
 0x1c6   : > { %11772 = vst [vmem:[#allocation47_spill] sm:$0xff] %v7422_v56 }
 0x1c7   : > { %v7407_v22 = vpop.permute.xlu1 %1564  ;;  %1768 = vrot.lane.b32.xlu0 %v7290_v28, %s6268_s8  ;;  %v1739_v28 = vld [vmem:[#allocation3 + $0x418] sm:$0xff] }
 0x1c8   : > { %11770 = vst [vmem:[#allocation45_spill] sm:$0xff] %v7407_v22  ;;  %v1481_v22 = vld [vmem:[#allocation3 + $0x18] sm:$0xff] }
 0x1c9   : > { %1971 = vrot.lane.b32.xlu1 %v7283_v19, %s6267_s30 }
 0x1cb   : > { %1772 = vrot.lane.b32.xlu0 %v7314_v8, %s6268_s8  ;;  %v7417_v15 = vpop.permute.xlu1 %1568  ;;  %v2074_v8 = vadd.f32 %v7109_v11, %v7124_v20  ;;  %v1743_v20 = vld [vmem:[#allocation3 + $0x438] sm:$0xff] }
 0x1cc   : > { %11771 = vst [vmem:[#allocation46_spill] sm:$0xff] %v7417_v15  ;;  %v6071_v15 = vld [vmem:[#allocation3 + $0x10] sm:$0xff] }
 0x1cd   : > { %1975 = vrot.lane.b32.xlu1 %v1928_v14, %s6267_s30 }
 0x1cf   : > { %1776 = vrot.lane.b32.xlu0 %v7303_v53, %s6268_s8  ;;  %v7426_v19 = vpop.permute.xlu1 %1572 }
 0x1d0   : > { %11773 = vst [vmem:[#allocation48_spill] sm:$0xff] %v7426_v19  ;;  %v1899_v19 = vadd.f32 %v1883_v43, %v7109_v11 }
 0x1d1   : > { %1770 = vrot.lane.b32.xlu1 %v7295_v44, %s6268_s8  ;;  %v2075_v44 = vadd.f32 %v7109_v11, %v7127_v23  ;;  %v2076_v23 = vadd.f32 %v2060_v18, %v7109_v11 }
 0x1d3   : > { %1780 = vrot.lane.b32.xlu0 %v7325_v25, %s6268_s8 }
 0x1d5   : > { %1774 = vrot.lane.b32.xlu1 %v1739_v28, %s6268_s8  ;;  %v2123_v3 = vpop.permute.xlu0 %2122 }
 0x1d6   : > { %v2182_v53 = vsel %vm1574_vm2, 0.0, %v2123_v3 }
 0x1d7   : > { %1784 = vrot.lane.b32.xlu0 %v7316_v9, %s6268_s8  ;;  %v2186_v14 = vadd.f32 %v2182_v53, %v2074_v8  ;;  %v2125_v27 = vpop.permute.xlu1 %2124 }
 0x1d8   : > { %v2154_v6 = vsel %vm1574_vm2, %v2123_v3, %v2125_v27 }
 0x1d9   : > { %1778 = vrot.lane.b32.xlu1 %v7307_v2, %s6268_s8  ;;  %v2202_v25 = vmax.f32 %v2186_v14, 0.0  ;;  %v7441_v28 = vadd.f32 %v2154_v6, %v2075_v44  ;;  %v2062_v2 = vld [vmem:[#allocation3 + $0x1a0] sm:$0xff]  ;;  %v1747_v14 = vld [vmem:[#allocation3 + $0x458] sm:$0xff] }
 0x1da   : > { %v2078_v53 = vadd.f32 %v2062_v2, %v7113_v16 }
 0x1db   : > { %2219 = vst [vmem:[#allocation4 + $0x100] sm:$0xff] %v2202_v25  ;;  %v2203_v55 = vmax.f32 %v7441_v28, 0.0  ;;  %1788 = vrot.lane.b32.xlu0 %v7340_v35, %s6268_s8 }
 0x1dd   : > { %1782 = vrot.lane.b32.xlu1 %v1743_v20, %s6268_s8  ;;  %2220 = vst [vmem:[#allocation4 + $0x108] sm:$0xff] %v2203_v55  ;;  %v2127_v9 = vpop.permute.xlu0 %2126  ;;  %v4064_v20 = vmul.f32 %v7160_v59, %v2202_v25 }
 0x1de   : > { %v2155_v8 = vsel %vm1574_vm2, %v2125_v27, %v2127_v9  ;;  %v2061_v27 = vld [vmem:[#allocation3 + $0x198] sm:$0xff] }
 0x1df   : > { %v2188_v3 = vadd.f32 %v2155_v8, %v2076_v23  ;;  %1792 = vrot.lane.b32.xlu0 %v7327_v29, %s6268_s8  ;;  %v2077_v23 = vadd.f32 %v2061_v27, %v7109_v11 }
 0x1e1   : > { %1786 = vrot.lane.b32.xlu1 %v7321_v37, %s6268_s8  ;;  %v2204_v6 = vmax.f32 %v2188_v3, 0.0  ;;  %v2131_v35 = vpop.permute.xlu0 %2130  ;;  %v2066_v37 = vld [vmem:[#allocation3 + $0x1c0] sm:$0xff]  ;;  %v2063_v3 = vld [vmem:[#allocation3 + $0x1a8] sm:$0xff] }
 0x1e2   : > { %v2183_v44 = vsel %vm1574_vm2, 0.0, %v2131_v35  ;;  %v2079_v54 = vadd.f32 %v2063_v3, %v7113_v16 }
 0x1e3   : > { %2221 = vst [vmem:[#allocation4 + $0x110] sm:$0xff] %v2204_v6  ;;  %v2190_v18 = vadd.f32 %v2183_v44, %v2078_v53  ;;  %1796 = vrot.lane.b32.xlu0 %v7350_v57, %s6268_s8  ;;  %v2064_v53 = vld [vmem:[#allocation3 + $0x1b0] sm:$0xff]  ;;  %v4066_v25 = vmul.f32 %v7160_v59, %v2204_v6 }
 0x1e5   : > { %1790 = vrot.lane.b32.xlu1 %v1747_v14, %s6268_s8  ;;  %v2206_v28 = vmax.f32 %v2190_v18, 0.0  ;;  %v2135_v29 = vpop.permute.xlu0 %2134  ;;  %v2082_v14 = vadd.f32 %v2066_v37, %v7116_v1  ;;  %v1751_v18 = vld [vmem:[#allocation3 + $0x478] sm:$0xff] }
 0x1e6   : > { %v2065_v37 = vld [vmem:[#allocation3 + $0x1b8] sm:$0xff] }
 0x1e7   : > { %v2129_v8 = vpop.permute.xlu1 %2128  ;;  %2223 = vst [vmem:[#allocation4 + $0x120] sm:$0xff] %v2206_v28  ;;  %4096 = vrot.lane.b32.xlu0 %v4064_v20, %s6269_s9  ;;  %v4068_v3 = vmul.f32 %v7179_v30, %v2206_v28  ;;  %v2086_v28 = vadd.f32 %v2070_v50, %v7129_v24 }
 0x1e8   : > { %v2156_v2 = vsel %vm1574_vm2, %v2127_v9, %v2129_v8  ;;  %v2080_v9 = vadd.f32 %v2064_v53, %v7113_v16 }
 0x1e9   : > { %v2189_v57 = vadd.f32 %v2156_v2, %v2077_v23  ;;  %1794 = vrot.lane.b32.xlu1 %v7333_v21, %s6268_s8  ;;  %v2139_v44 = vpop.permute.xlu0 %2138 }
 0x1ea   : > { %v2184_v27 = vsel %vm1574_vm2, 0.0, %v2139_v44 }
 0x1eb   : > { %v2205_v31 = vmax.f32 %v2189_v57, 0.0  ;;  %v2133_v20 = vpop.permute.xlu1 %2132  ;;  %v2194_v8 = vadd.f32 %v2184_v27, %v2082_v14  ;;  %4100 = vrot.lane.b32.xlu0 %v4066_v25, %s6269_s9  ;;  %v2081_v25 = vadd.f32 %v2065_v37, %v7113_v16 }
 0x1ec   : > { %v2157_v23 = vsel %vm1574_vm2, %v2131_v35, %v2133_v20  ;;  %v2158_v21 = vsel %vm1574_vm2, %v2133_v20, %v2135_v29  ;;  %v4065_v35 = vmul.f32 %v7160_v59, %v2203_v55  ;;  %v2068_v20 = vld [vmem:[#allocation3 + $0x1d0] sm:$0xff] }
 0x1ed   : > { %2222 = vst.msk [vmem:[#allocation4 + $0x118] sm:$0xff] %vm541_vm0, %v2205_v31  ;;  %v2191_v6 = vadd.f32 %v2157_v23, %v2079_v54  ;;  %v2192_v2 = vadd.f32 %v2158_v21, %v2080_v9  ;;  %1798 = vrot.lane.b32.xlu1 %v1751_v18, %s6268_s8  ;;  %v2210_v57 = vmax.f32 %v2194_v8, 0.0  ;;  %v2143_v32 = vpop.permute.xlu0 %2142  ;;  %v2067_v31 = vld [vmem:[#allocation3 + $0x1c8] sm:$0xff] }
 0x1ee   : > { %v2083_v55 = vadd.f32 %v2067_v31, %v7116_v1 }
 0x1ef   : > { %v2207_v53 = vmax.f32 %v2191_v6, 0.0  ;;  %v2208_v14 = vmax.f32 %v2192_v2, 0.0  ;;  %v2137_v27 = vpop.permute.xlu1 %2136  ;;  %2227 = vst [vmem:[#allocation4 + $0x140] sm:$0xff] %v2210_v57  ;;  %4104 = vrot.lane.b32.xlu0 %v4068_v3, %s6269_s9 }
 0x1f0   : > { %v2159_v54 = vsel %vm1574_vm2, %v2135_v29, %v2137_v27  ;;  %v2084_v29 = vadd.f32 %v2068_v20, %v7116_v1  ;;  %v4072_v27 = vmul.f32 %v7173_v17, %v2210_v57 }
 0x1f1   : > { %2224 = vst [vmem:[#allocation4 + $0x128] sm:$0xff] %v2207_v53  ;;  %2225 = vst [vmem:[#allocation4 + $0x130] sm:$0xff] %v2208_v14  ;;  %v2193_v18 = vadd.f32 %v2159_v54, %v2081_v25  ;;  %4098 = vrot.lane.b32.xlu1 %v4065_v35, %s6269_s9  ;;  %v2147_v9 = vpop.permute.xlu0 %2146  ;;  %v4070_v8 = vmul.f32 %v7179_v30, %v2208_v14  ;;  %v2069_v25 = vld [vmem:[#allocation3 + $0x1d8] sm:$0xff] }
 0x1f2   : > { %v2185_v23 = vsel %vm1574_vm2, 0.0, %v2147_v9 }
 0x1f3   : > { %v2209_v21 = vmax.f32 %v2193_v18, 0.0  ;;  %v2141_v37 = vpop.permute.xlu1 %2140  ;;  %v2198_v6 = vadd.f32 %v2185_v23, %v2086_v28  ;;  %4108 = vrot.lane.b32.xlu0 %v4070_v8, %s6269_s9  ;;  %v2071_v23 = vld [vmem:[#allocation3 + $0x1e8] sm:$0xff] }
 0x1f4   : > { %v2160_v2 = vsel %vm1574_vm2, %v2139_v44, %v2141_v37  ;;  %v2161_v3 = vsel %vm1574_vm2, %v2141_v37, %v2143_v32  ;;  %v2359_v50 = vld [vmem:[#allocation4 + $0x118] sm:$0xff]  ;;  %v2085_v44 = vadd.f32 %v2069_v25, %v7116_v1  ;;  %v4069_v37 = vmul.f32 %v7179_v30, %v2207_v53 }
 0x1f5   : > { %2226 = vst.msk [vmem:[#allocation4 + $0x138] sm:$0xff] %vm541_vm0, %v2209_v21  ;;  %v2195_v14 = vadd.f32 %v2160_v2, %v2083_v55  ;;  %v2196_v35 = vadd.f32 %v2161_v3, %v2084_v29  ;;  %v4067_v54 = vmul.f32 %v7160_v59, %v2359_v50  ;;  %v7491_v31 = vmax.f32 %v2198_v6, 0.0  ;;  %v2151_v20 = vpop.permute.xlu0 %2150  ;;  %v2072_v21 = vld [vmem:[#allocation3 + $0x1f0] sm:$0xff]  ;;  %v2073_v53 = vld [vmem:[#allocation3 + $0x1f8] sm:$0xff] }
 0x1f6   : > { %v2087_v3 = vadd.f32 %v2071_v23, %v7129_v24 }
 0x1f7   : > { %11774 = vst [vmem:[#allocation49_spill] sm:$0xff] %v7491_v31  ;;  %v7493_v18 = vmax.f32 %v2195_v14, 0.0  ;;  %v7495_v28 = vmax.f32 %v2196_v35, 0.0  ;;  %v2145_v8 = vpop.permute.xlu1 %2144  ;;  %4102 = vrot.lane.b32.xlu1 %v4067_v54, %s6269_s9  ;;  %2231 = vst [vmem:[#allocation4 + $0x160] sm:$0xff] %v7491_v31  ;;  %4112 = vrot.lane.b32.xlu0 %v4072_v27, %s6269_s9 }
 0x1f8   : > { %v2162_v57 = vsel %vm1574_vm2, %v2143_v32, %v2145_v8  ;;  %v2088_v32 = vadd.f32 %v2072_v21, %v7129_v24  ;;  %v2089_v21 = vadd.f32 %v2073_v53, %v7129_v24 }
 0x1f9   : > { %11775 = vst [vmem:[#allocation50_spill] sm:$0xff] %v7493_v18  ;;  %11776 = vst [vmem:[#allocation51_spill] sm:$0xff] %v7495_v28  ;;  %v2197_v55 = vadd.f32 %v2162_v57, %v2085_v44  ;;  %v7505_v29 = vpop.permute.xlu0 %1655  ;;  %v4074_v6 = vmul.f32 %v7173_v17, %v7495_v28  ;;  %v4076_v57 = vmul.f32 %v7189_v51, %v7491_v31  ;;  %v1882_v31 = vld [vmem:[#allocation3 + $0x88] sm:$0xff] }
 0x1fa   : > { %2228 = vst [vmem:[#allocation4 + $0x148] sm:$0xff] %v7493_v18  ;;  %2229 = vst [vmem:[#allocation4 + $0x150] sm:$0xff] %v7495_v28 }
 0x1fb   : > { %v2213_v2 = vmax.f32 %v2197_v55, 0.0  ;;  %v2149_v25 = vpop.permute.xlu1 %2148  ;;  %4106 = vrot.lane.b32.xlu1 %v4069_v37, %s6269_s9  ;;  %4116 = vrot.lane.b32.xlu0 %v4074_v6, %s6269_s9 }
 0x1fc   : > { %v2163_v50 = vsel %vm1574_vm2, %v2147_v9, %v2149_v25  ;;  %v2164_v27 = vsel %vm1574_vm2, %v2149_v25, %v2151_v20  ;;  %v7515_v14 = vld [vmem:[#allocation4 + $0x138] sm:$0xff] }
 0x1fd   : > { %11777 = vst [vmem:[#allocation52_spill] sm:$0xff] %v7515_v14  ;;  %2230 = vst.msk [vmem:[#allocation4 + $0x158] sm:$0xff] %vm541_vm0, %v2213_v2  ;;  %v2199_v35 = vadd.f32 %v2163_v50, %v2087_v3  ;;  %v2200_v54 = vadd.f32 %v2164_v27, %v2088_v32  ;;  %v4071_v44 = vmul.f32 %v7179_v30, %v7515_v14  ;;  %v7520_v8 = vpop.permute.xlu0 %1659  ;;  %v2625_v14 = vld [vmem:[#allocation4 + $0x180] sm:$0xff] }
 0x1fe   : > { %v4073_v2 = vmul.f32 %v7173_v17, %v7493_v18  ;;  %v3240_v0 = vmul.f32 %v2625_v14, %v7141_v36  ;;  %v1884_v36 = vld [vmem:[#allocation3 + $0x98] sm:$0xff] }
 0x1ff   : > { %v7524_v23 = vmax.f32 %v2199_v35, 0.0  ;;  %v7526_v9 = vmax.f32 %v2200_v54, 0.0  ;;  %v2153_v55 = vpop.permute.xlu1 %2152  ;;  %4110 = vrot.lane.b32.xlu1 %v4071_v44, %s6269_s9  ;;  %4120 = vrot.lane.b32.xlu0 %v4076_v57, %s6269_s9  ;;  %v1900_v43 = vadd.f32 %v1884_v36, %v7109_v11 }
 0x200   : > { %v2165_v37 = vsel %vm1574_vm2, %v2151_v20, %v2153_v55 }
 0x201   : > { %11778 = vst [vmem:[#allocation53_spill] sm:$0xff] %v7524_v23  ;;  %11779 = vst [vmem:[#allocation54_spill] sm:$0xff] %v7526_v9  ;;  %v2201_v6 = vadd.f32 %v2165_v37, %v2089_v21  ;;  %v7536_v3 = vpop.permute.xlu0 %1663  ;;  %v4078_v25 = vmul.f32 %v7189_v51, %v7526_v9  ;;  %v4077_v54 = vmul.f32 %v7189_v51, %v7524_v23 }
 0x202   : > { %2232 = vst [vmem:[#allocation4 + $0x168] sm:$0xff] %v7524_v23  ;;  %2233 = vst [vmem:[#allocation4 + $0x170] sm:$0xff] %v7526_v9 }
 0x203   : > { %v2217_v32 = vmax.f32 %v2201_v6, 0.0  ;;  %v7540_v50 = vpop.permute.xlu1 %1657  ;;  %4114 = vrot.lane.b32.xlu1 %v4073_v2, %s6269_s9  ;;  %4124 = vrot.lane.b32.xlu0 %v4078_v25, %s6269_s9 }
 0x204   : > { %v7544_v20 = vld [vmem:[#allocation4 + $0x158] sm:$0xff] }
 0x205   : > { %11780 = vst [vmem:[#allocation55_spill] sm:$0xff] %v7544_v20  ;;  %2234 = vst.msk [vmem:[#allocation4 + $0x178] sm:$0xff] %vm541_vm0, %v2217_v32  ;;  %v4075_v27 = vmul.f32 %v7173_v17, %v7544_v20  ;;  %v7549_v53 = vpop.permute.xlu0 %1667 }
 0x207   : > { %v7551_v35 = vpop.permute.xlu1 %1661  ;;  %4118 = vrot.lane.b32.xlu1 %v4075_v27, %s6269_s9  ;;  %v1881_v27 = vld [vmem:[#allocation3 + $0x80] sm:$0xff] }
 0x209   : > { %v7556_v44 = vpop.permute.xlu0 %1671 }
 0x20b   : > { %v7558_v57 = vpop.permute.xlu1 %1665  ;;  %4122 = vrot.lane.b32.xlu1 %v4077_v54, %s6269_s9  ;;  %v1897_v54 = vadd.f32 %v1881_v27, %v7109_v11  ;;  %v2666_v27 = vmul.f32 %v7203_v13, %v2625_v14 }
 0x20c   : > { %v7561_v21 = vld [vmem:[#allocation4 + $0x178] sm:$0xff] }
 0x20d   : > { %11781 = vst [vmem:[#allocation56_spill] sm:$0xff] %v7561_v21  ;;  %v4079_v55 = vmul.f32 %v7189_v51, %v7561_v21  ;;  %v7565_v37 = vpop.permute.xlu0 %1675 }
 0x20e   : > { %11782 = vst [vmem:[#allocation57_spill] sm:$0xff] %v7565_v37 }
 0x20f   : > { %v7567_v6 = vpop.permute.xlu1 %1669  ;;  %4126 = vrot.lane.b32.xlu1 %v4079_v55, %s6269_s9 }
 0x211   : > { %v7570_v2 = vpop.permute.xlu0 %1679 }
 0x213   : > { %v7572_v25 = vpop.permute.xlu1 %1673 }
 0x214   : > { %11783 = vst [vmem:[#allocation58_spill] sm:$0xff] %v7572_v25  ;;  %v1716_v25 = vsel %vm1687_vm3, 0.0, %v7505_v29 }
 0x215   : > { %v7574_v32 = vpop.permute.xlu0 %1683 }
 0x216   : > { %11784 = vst [vmem:[#allocation59_spill] sm:$0xff] %v7574_v32 }
 0x217   : > { %v7576_v20 = vpop.permute.xlu1 %1677 }
 0x218   : > { %11785 = vst [vmem:[#allocation60_spill] sm:$0xff] %v7576_v20 }
 0x219   : > { %v1946_v9 = vpop.permute.xlu0 %1945 }
 0x21a   : > { %v2005_v21 = vsel %vm1687_vm3, 0.0, %v1946_v9 }
 0x21b   : > { %v7580_v51 = vpop.permute.xlu1 %1681  ;;  %v2009_v23 = vadd.f32 %v2005_v21, %v1897_v54 }
 0x21c   : > { %11786 = vst [vmem:[#allocation61_spill] sm:$0xff] %v7580_v51 }
 0x21d   : > { %v2025_v28 = vmax.f32 %v2009_v23, 0.0  ;;  %v1950_v55 = vpop.permute.xlu0 %1949  ;;  %v1901_v23 = vadd.f32 %v1885_v46, %v7113_v16 }
 0x21f   : > { %v7582_v41 = vpop.permute.xlu1 %1685  ;;  %2042 = vst [vmem:[#allocation4 + $0x80] sm:$0xff] %v2025_v28  ;;  %v2723_v49 = vmul.f32 %v7230_v40, %v2025_v28  ;;  %v2609_v18 = vmul.f32 %v7183_v38, %v2025_v28  ;;  %v3224_v26 = vmul.f32 %v7121_v10, %v2025_v28  ;;  %v3272_v10 = vmul.f32 %v7160_v59, %v2025_v28 }
 0x220   : > { %11787 = vst [vmem:[#allocation62_spill] sm:$0xff] %v7582_v41  ;;  %v1898_v41 = vadd.f32 %v1882_v31, %v7109_v11 }
 0x221   : > { %v1954_v21 = vpop.permute.xlu0 %1953  ;;  %2755 = vrot.lane.b32.xlu0 %v2723_v49, %s6269_s9  ;;  %v7592_v17 = vadd.f32 %v2666_v27, %v2609_v18  ;;  %v7594_v52 = vadd.f32 %v3240_v0, %v3224_v26  ;;  %v1889_v26 = vld [vmem:[#allocation3 + $0xc0] sm:$0xff] }
 0x222   : > { %v2006_v54 = vsel %vm1687_vm3, 0.0, %v1954_v21 }
 0x223   : > { %11788 = vst [vmem:[#allocation63_spill] sm:$0xff] %v7592_v17  ;;  %11789 = vst [vmem:[#allocation64_spill] sm:$0xff] %v7594_v52  ;;  %v1948_v38 = vpop.permute.xlu1 %1947  ;;  %v2013_v32 = vadd.f32 %v2006_v54, %v1901_v23  ;;  %v1892_v17 = vld [vmem:[#allocation3 + $0xd8] sm:$0xff] }
 0x224   : > { %v1977_v14 = vsel %vm1687_vm3, %v1946_v9, %v1948_v38  ;;  %v1978_v46 = vsel %vm1687_vm3, %v1948_v38, %v1950_v55  ;;  %v1886_v9 = vld [vmem:[#allocation3 + $0xa8] sm:$0xff]  ;;  %v3688_v38 = vmul.f32 %v7335_v47, %v2025_v28 }
 0x225   : > { %v2010_v49 = vadd.f32 %v1977_v14, %v1898_v41  ;;  %v2011_v51 = vadd.f32 %v1978_v46, %v1899_v19  ;;  %v7601_v56 = vmax.f32 %v2013_v32, 0.0  ;;  %v1958_v18 = vpop.permute.xlu0 %1957  ;;  %3304 = vrot.lane.b32.xlu0 %v3272_v10, %s6269_s9  ;;  %v1887_v19 = vld [vmem:[#allocation3 + $0xb0] sm:$0xff]  ;;  %v1905_v32 = vadd.f32 %v1889_v26, %v7116_v1 }
 0x226   : > { %v1902_v23 = vadd.f32 %v1886_v9, %v7113_v16  ;;  %v1903_v46 = vadd.f32 %v1887_v19, %v7113_v16  ;;  %v1893_v19 = vld [vmem:[#allocation3 + $0xe0] sm:$0xff] }
 0x227   : > { %v7604_v0 = vmax.f32 %v2010_v49, 0.0  ;;  %v7606_v31 = vmax.f32 %v2011_v51, 0.0  ;;  %v1952_v27 = vpop.permute.xlu1 %1951  ;;  %2046 = vst [vmem:[#allocation4 + $0xa0] sm:$0xff] %v7601_v56 }
 0x228   : > { %v1979_v41 = vsel %vm1687_vm3, %v1950_v55, %v1952_v27 }
 0x229   : > { %2043 = vst [vmem:[#allocation4 + $0x88] sm:$0xff] %v7604_v0  ;;  %2044 = vst [vmem:[#allocation4 + $0x90] sm:$0xff] %v7606_v31  ;;  %v2012_v10 = vadd.f32 %v1979_v41, %v1900_v43  ;;  %v1962_v51 = vpop.permute.xlu0 %1961  ;;  %v2724_v36 = vmul.f32 %v7230_v40, %v7604_v0  ;;  %3720 = vrot.lane.b32.xlu0 %v3688_v38, %s6269_s9  ;;  %v4192_v43 = vmul.f32 %v7203_v13, %v2025_v28  ;;  %v1888_v41 = vld [vmem:[#allocation3 + $0xb8] sm:$0xff] }
 0x22a   : > { %v2007_v54 = vsel %vm1687_vm3, 0.0, %v1962_v51  ;;  %v1904_v28 = vadd.f32 %v1888_v41, %v7113_v16  ;;  %v1909_v41 = vadd.f32 %v1893_v19, %v7129_v24 }
 0x22b   : > { %v2028_v14 = vmax.f32 %v2012_v10, 0.0  ;;  %v1956_v55 = vpop.permute.xlu1 %1955  ;;  %v2017_v49 = vadd.f32 %v2007_v54, %v1905_v32  ;;  %2757 = vrot.lane.b32.xlu1 %v2724_v36, %s6269_s9  ;;  %v1890_v54 = vld [vmem:[#allocation3 + $0xc8] sm:$0xff] }
 0x22c   : > { %v1980_v26 = vsel %vm1687_vm3, %v1954_v21, %v1956_v55  ;;  %v1981_v27 = vsel %vm1687_vm3, %v1956_v55, %v1958_v18 }
 0x22d   : > { %2045 = vst.msk [vmem:[#allocation4 + $0x98] sm:$0xff] %vm541_vm0, %v2028_v14  ;;  %v2014_v38 = vadd.f32 %v1980_v26, %v1902_v23  ;;  %v2015_v9 = vadd.f32 %v1981_v27, %v1903_v46  ;;  %v7626_v52 = vmax.f32 %v2017_v49, 0.0  ;;  %v7628_v10 = vpop.permute.xlu0 %1965  ;;  %4224 = vrot.lane.b32.xlu0 %v4192_v43, %s6269_s9  ;;  %v1891_v14 = vld [vmem:[#allocation3 + $0xd0] sm:$0xff]  ;;  %v2725_v23 = vmul.f32 %v7230_v40, %v7606_v31  ;;  %v6068_v46 = vld [vmem:[#allocation3] sm:$0xff]  ;;  %v6069_v43 = vld [vmem:[#allocation3 + $0x8] sm:$0xff] }
 0x22e   : > { %v1494_v49 = vadd.f32 %v6068_v46, %v7109_v11  ;;  %v7642_v26 = vadd.f32 %v6069_v43, %v7109_v11  ;;  %v1907_v46 = vadd.f32 %v1891_v14, %v7116_v1 }
 0x22f   : > { %11790 = vst [vmem:[#allocation65_spill] sm:$0xff] %v7626_v52  ;;  %v7631_v32 = vmax.f32 %v2014_v38, 0.0  ;;  %v7633_v36 = vmax.f32 %v2015_v9, 0.0  ;;  %v1960_v21 = vpop.permute.xlu1 %1959  ;;  %2050 = vst [vmem:[#allocation4 + $0xc0] sm:$0xff] %v7626_v52  ;;  %v6070_v9 = vld [vmem:[#allocation3 + $0x20] sm:$0xff] }
 0x230   : > { %v1982_v55 = vsel %vm1687_vm3, %v1958_v18, %v1960_v21  ;;  %v7651_v18 = vadd.f32 %v6070_v9, %v7113_v16  ;;  %v1906_v21 = vadd.f32 %v1890_v54, %v7116_v1  ;;  %v7662_v9 = vadd.f32 %v6071_v15, %v7109_v11  ;;  %v6072_v54 = vld [vmem:[#allocation3 + $0x28] sm:$0xff] }
 0x231   : > { %11791 = vst [vmem:[#allocation66_spill] sm:$0xff] %v7631_v32  ;;  %11792 = vst [vmem:[#allocation67_spill] sm:$0xff] %v7633_v36  ;;  %v2016_v27 = vadd.f32 %v1982_v55, %v1904_v28  ;;  %v7647_v38 = vpop.permute.xlu0 %1969  ;;  %2759 = vrot.lane.b32.xlu0 %v2725_v23, %s6269_s9  ;;  %v1603_v28 = vsel %vm1574_vm2, 0.0, %v7356_v58  ;;  %v3274_v23 = vmul.f32 %v7160_v59, %v7606_v31 }
 0x232   : > { %2047 = vst [vmem:[#allocation4 + $0xa8] sm:$0xff] %v7631_v32  ;;  %2048 = vst [vmem:[#allocation4 + $0xb0] sm:$0xff] %v7633_v36  ;;  %v2008_v43 = vsel %vm1687_vm3, 0.0, %v7647_v38  ;;  %v7665_v14 = vadd.f32 %v6072_v54, %v7113_v16  ;;  %v6073_v54 = vld [vmem:[#allocation3 + $0x40] sm:$0xff] }
 0x233   : > { %v2032_v55 = vmax.f32 %v2016_v27, 0.0  ;;  %v1964_v19 = vpop.permute.xlu1 %1963  ;;  %v2021_v52 = vadd.f32 %v2008_v43, %v1909_v41 }
 0x234   : > { %v1983_v20 = vsel %vm1687_vm3, %v1962_v51, %v1964_v19  ;;  %v1984_v32 = vsel %vm1687_vm3, %v1964_v19, %v7628_v10  ;;  %v7670_v27 = vld [vmem:[#allocation4 + $0x98] sm:$0xff]  ;;  %v1607_v51 = vadd.f32 %v1603_v28, %v1494_v49  ;;  %v7681_v19 = vadd.f32 %v6073_v54, %v7116_v1  ;;  %v1895_v49 = vld [vmem:[#allocation3 + $0xf0] sm:$0xff] }
 0x235   : > { %2049 = vst.msk [vmem:[#allocation4 + $0xb8] sm:$0xff] %vm541_vm0, %v2032_v55  ;;  %v2018_v41 = vadd.f32 %v1983_v20, %v1906_v21  ;;  %v2019_v43 = vadd.f32 %v1984_v32, %v1907_v46  ;;  %v2726_v15 = vmul.f32 %v7230_v40, %v7670_v27  ;;  %v7675_v37 = vmax.f32 %v2021_v52, 0.0  ;;  %v7677_v36 = vpop.permute.xlu0 %1973  ;;  %3308 = vrot.lane.b32.xlu0 %v3274_v23, %s6269_s9  ;;  %v1894_v46 = vld [vmem:[#allocation3 + $0xe8] sm:$0xff]  ;;  %v1896_v28 = vld [vmem:[#allocation3 + $0xf8] sm:$0xff]  ;;  %v6074_v54 = vld [vmem:[#allocation3 + $0x30] sm:$0xff] }
 0x236   : > { %v1908_v20 = vadd.f32 %v1892_v17, %v7116_v1  ;;  %v3690_v55 = vmul.f32 %v7335_v47, %v7606_v31  ;;  %v1497_v23 = vadd.f32 %v1481_v22, %v7109_v11  ;;  %v7696_v17 = vadd.f32 %v6074_v54, %v7113_v16 }
 0x237   : > { %11793 = vst [vmem:[#allocation68_spill] sm:$0xff] %v7675_v37  ;;  %v7686_v32 = vmax.f32 %v2018_v41, 0.0  ;;  %v7688_v21 = vmax.f32 %v2019_v43, 0.0  ;;  %v1968_v52 = vpop.permute.xlu1 %1967  ;;  %2761 = vrot.lane.b32.xlu1 %v2726_v15, %s6269_s9  ;;  %2054 = vst [vmem:[#allocation4 + $0xe0] sm:$0xff] %v7675_v37  ;;  %v6075_v41 = vld [vmem:[#allocation3 + $0x48] sm:$0xff]  ;;  %v1604_v40 = vsel %vm1574_vm2, 0.0, %v7374_v48  ;;  %v1720_v37 = vadd.f32 %v1716_v25, %v1607_v51 }
 0x238   : > { %v7699_v43 = vadd.f32 %v6075_v41, %v7116_v1  ;;  %v1985_v15 = vsel %vm1687_vm3, %v7628_v10, %v1968_v52  ;;  %v3273_v22 = vmul.f32 %v7160_v59, %v7604_v0  ;;  %v1910_v41 = vadd.f32 %v1894_v46, %v7129_v24 }
 0x239   : > { %11794 = vst [vmem:[#allocation69_spill] sm:$0xff] %v7686_v32  ;;  %2051 = vst [vmem:[#allocation4 + $0xc8] sm:$0xff] %v7686_v32  ;;  %v2020_v11 = vadd.f32 %v1985_v15, %v1908_v20  ;;  %v1769_v54 = vpop.permute.xlu0 %1768  ;;  %3724 = vrot.lane.b32.xlu0 %v3690_v55, %s6269_s9  ;;  %v1912_v10 = vadd.f32 %v1896_v28, %v7129_v24  ;;  %v1575_v25 = vsel %vm1574_vm2, %v7356_v58, %v7372_v45 }
 0x23a   : > { %11795 = vst [vmem:[#allocation70_spill] sm:$0xff] %v7699_v43  ;;  %2052 = vst [vmem:[#allocation4 + $0xd0] sm:$0xff] %v7688_v21  ;;  %v1911_v43 = vadd.f32 %v1895_v49, %v7129_v24  ;;  %v1829_v52 = vsel %vm1800_vm4, 0.0, %v1769_v54  ;;  %v4194_v55 = vmul.f32 %v7203_v13, %v7606_v31  ;;  %v1576_v46 = vsel %vm1574_vm2, %v7372_v45, %v7364_v42 }
 0x23b   : > { %v2036_v51 = vmax.f32 %v2020_v11, 0.0  ;;  %v1972_v20 = vpop.permute.xlu1 %1971  ;;  %3306 = vrot.lane.b32.xlu1 %v3273_v22, %s6269_s9  ;;  %v1833_v15 = vadd.f32 %v1829_v52, %v1720_v37  ;;  %v1611_v49 = vadd.f32 %v1604_v40, %v7651_v18  ;;  %v1485_v11 = vld [vmem:[#allocation3 + $0x38] sm:$0xff]  ;;  %v3275_v31 = vmul.f32 %v7670_v27, %v7160_v59 }
 0x23c   : > { %v1986_v28 = vsel %vm1687_vm3, %v7647_v38, %v1972_v20  ;;  %v1987_v58 = vsel %vm1687_vm3, %v1972_v20, %v7677_v36  ;;  %v1577_v40 = vsel %vm1574_vm2, %v7364_v42, %v7379_v39  ;;  %v1605_v45 = vsel %vm1574_vm2, 0.0, %v7394_v5 }
 0x23d   : > { %2053 = vst.msk [vmem:[#allocation4 + $0xd8] sm:$0xff] %vm541_vm0, %v2036_v51  ;;  %v2022_v22 = vadd.f32 %v1986_v28, %v1910_v41  ;;  %v2023_v37 = vadd.f32 %v1987_v58, %v1911_v43  ;;  %v7731_v52 = vmax.f32 %v1833_v15, 0.0  ;;  %v1773_v32 = vpop.permute.xlu0 %1772  ;;  %4228 = vrot.lane.b32.xlu0 %v4194_v55, %s6269_s9  ;;  %v1688_v38 = vsel %vm1687_vm3, %v7505_v29, %v7540_v50 }
 0x23e   : > { %v1717_v18 = vsel %vm1687_vm3, 0.0, %v7536_v3  ;;  %v1689_v43 = vsel %vm1687_vm3, %v7540_v50, %v7520_v8  ;;  %v2727_v42 = vmul.f32 %v7256_v62, %v7601_v56  ;;  %v1608_v39 = vadd.f32 %v1575_v25, %v7642_v26 }
 0x23f   : > { %v7747_v41 = vmax.f32 %v2022_v22, 0.0  ;;  %v7749_v51 = vmax.f32 %v2023_v37, 0.0  ;;  %v1976_v20 = vpop.permute.xlu1 %1975  ;;  %3310 = vrot.lane.b32.xlu1 %v3275_v31, %s6269_s9  ;;  %1865 = vst [vmem:[#allocation4] sm:$0xff] %v7731_v52  ;;  %v1609_v29 = vadd.f32 %v1576_v46, %v7662_v9  ;;  %v1501_v15 = vadd.f32 %v1485_v11, %v7113_v16 }
 0x240   : > { %v1988_v50 = vsel %vm1687_vm3, %v7677_v36, %v1976_v20  ;;  %v1610_v55 = vadd.f32 %v1577_v40, %v1497_v23  ;;  %v1724_v28 = vadd.f32 %v1717_v18, %v1611_v49  ;;  %v3689_v22 = vmul.f32 %v7335_v47, %v7604_v0 }
 0x241   : > { %2055 = vst [vmem:[#allocation4 + $0xe8] sm:$0xff] %v7747_v41  ;;  %2056 = vst [vmem:[#allocation4 + $0xf0] sm:$0xff] %v7749_v51  ;;  %v2024_v58 = vadd.f32 %v1988_v50, %v1912_v10  ;;  %v1777_v37 = vpop.permute.xlu0 %1776  ;;  %2763 = vrot.lane.b32.xlu0 %v2727_v42, %s6269_s9  ;;  %v1615_v26 = vadd.f32 %v1605_v45, %v7681_v19  ;;  %v1721_v9 = vadd.f32 %v1688_v38, %v1608_v39 }
 0x242   : > { %v1722_v16 = vadd.f32 %v1689_v43, %v1609_v29  ;;  %v1830_v25 = vsel %vm1800_vm4, 0.0, %v1777_v37  ;;  %v1690_v36 = vsel %vm1687_vm3, %v7520_v8, %v7551_v35  ;;  %v3276_v49 = vmul.f32 %v7179_v30, %v7601_v56  ;;  %v1490_v35 = vld [vmem:[#allocation3 + $0x60] sm:$0xff] }
 0x243   : > { %v2040_v23 = vmax.f32 %v2024_v58, 0.0  ;;  %v1771_v46 = vpop.permute.xlu1 %1770  ;;  %3722 = vrot.lane.b32.xlu1 %v3689_v22, %s6269_s9  ;;  %v1837_v10 = vadd.f32 %v1830_v25, %v1724_v28  ;;  %v1578_v19 = vsel %vm1574_vm2, %v7374_v48, %v7387_v33  ;;  %v1579_v11 = vsel %vm1574_vm2, %v7387_v33, %v7385_v60 }
 0x244   : > { %v1801_v31 = vsel %vm1800_vm4, %v1769_v54, %v1771_v46  ;;  %v1802_v8 = vsel %vm1800_vm4, %v1771_v46, %v1773_v32  ;;  %v3691_v38 = vmul.f32 %v7335_v47, %v7670_v27  ;;  %v1580_v48 = vsel %vm1574_vm2, %v7385_v60, %v7392_v63 }
 0x245   : > { %2057 = vst.msk [vmem:[#allocation4 + $0xf8] sm:$0xff] %vm541_vm0, %v2040_v23  ;;  %v1834_v40 = vadd.f32 %v1801_v31, %v1721_v9  ;;  %v1835_v45 = vadd.f32 %v1802_v8, %v1722_v16  ;;  %v7784_v18 = vmax.f32 %v1837_v10, 0.0  ;;  %v7786_v43 = vpop.permute.xlu0 %1780  ;;  %3312 = vrot.lane.b32.xlu0 %v3276_v49, %s6269_s9  ;;  %v1723_v33 = vadd.f32 %v1690_v36, %v1610_v55 }
 0x246   : > { %v1691_v54 = vsel %vm1687_vm3, %v7536_v3, %v7558_v57  ;;  %v1718_v20 = vsel %vm1687_vm3, 0.0, %v7556_v44  ;;  %v1692_v42 = vsel %vm1687_vm3, %v7558_v57, %v7549_v53  ;;  %v3692_v60 = vmul.f32 %v7359_v4, %v7601_v56 }
 0x247   : > { %v7800_v39 = vmax.f32 %v1834_v40, 0.0  ;;  %v7802_v29 = vmax.f32 %v1835_v45, 0.0  ;;  %v1775_v50 = vpop.permute.xlu1 %1774  ;;  %3726 = vrot.lane.b32.xlu1 %v3691_v38, %s6269_s9  ;;  %1869 = vst [vmem:[#allocation4 + $0x20] sm:$0xff] %v7784_v18  ;;  %v1612_v63 = vadd.f32 %v1578_v19, %v7665_v14  ;;  %v1613_v3 = vadd.f32 %v1579_v11, %v7696_v17  ;;  %v1489_v40 = vld [vmem:[#allocation3 + $0x58] sm:$0xff]  ;;  %v11796_v45 = vld [vmem:[#allocation58_spill] sm:$0xff] }
 0x248   : > { %v1506_v55 = vadd.f32 %v1490_v35, %v7129_v24  ;;  %v1803_v57 = vsel %vm1800_vm4, %v1773_v32, %v1775_v50  ;;  %v1614_v28 = vadd.f32 %v1580_v48, %v1501_v15  ;;  %v1728_v58 = vadd.f32 %v1718_v20, %v1615_v26  ;;  %v1488_v15 = vld [vmem:[#allocation3 + $0x50] sm:$0xff] }
 0x249   : > { %1866 = vst [vmem:[#allocation4 + $0x8] sm:$0xff] %v7800_v39  ;;  %1867 = vst [vmem:[#allocation4 + $0x10] sm:$0xff] %v7802_v29  ;;  %v1836_v22 = vadd.f32 %v1803_v57, %v1723_v33  ;;  %v4193_v9 = vmul.f32 %v7203_v13, %v7604_v0  ;;  %v7816_v16 = vpop.permute.xlu0 %1784  ;;  %3728 = vrot.lane.b32.xlu0 %v3692_v60, %s6269_s9  ;;  %v1606_v14 = vsel %vm1574_vm2, 0.0, %v7413_v12  ;;  %v1719_v35 = vsel %vm1687_vm3, 0.0, %v7570_v2 }
 0x24a   : > { %v1725_v17 = vadd.f32 %v1691_v54, %v1612_v63  ;;  %v1726_v25 = vadd.f32 %v1692_v42, %v1613_v3  ;;  %v1831_v32 = vsel %vm1800_vm4, 0.0, %v7816_v16  ;;  %v1693_v26 = vsel %vm1687_vm3, %v7549_v53, %v7567_v6  ;;  %v11797_v54 = vld [vmem:[#allocation67_spill] sm:$0xff]  ;;  %v11798_v42 = vld [vmem:[#allocation70_spill] sm:$0xff]  ;;  %v11799_v63 = vld [vmem:[#allocation57_spill] sm:$0xff] }
 0x24b   : > { %v1852_v36 = vmax.f32 %v1836_v22, 0.0  ;;  %v1779_v23 = vpop.permute.xlu1 %1778  ;;  %4226 = vrot.lane.b32.xlu1 %v4193_v9, %s6269_s9  ;;  %v1841_v0 = vadd.f32 %v1831_v32, %v1728_v58  ;;  %v4196_v46 = vmul.f32 %v7225_v34, %v7601_v56  ;;  %v1581_v10 = vsel %vm1574_vm2, %v7394_v5, %v7400_v7  ;;  %v11801_v22 = vld [vmem:[#allocation66_spill] sm:$0xff] }
 0x24c   : > { %v1582_v49 = vsel %vm1574_vm2, %v7400_v7, %v7404_v61  ;;  %v1804_v19 = vsel %vm1800_vm4, %v1777_v37, %v1779_v23  ;;  %v1805_v53 = vsel %vm1800_vm4, %v1779_v23, %v7786_v43  ;;  %v4195_v56 = vmul.f32 %v7203_v13, %v7670_v27 }
 0x24d   : > { %1868 = vst.msk [vmem:[#allocation4 + $0x18] sm:$0xff] %vm541_vm0, %v1852_v36  ;;  %v1838_v6 = vadd.f32 %v1804_v19, %v1725_v17  ;;  %v1839_v11 = vadd.f32 %v1805_v53, %v1726_v25  ;;  %v7841_v31 = vmax.f32 %v1841_v0, 0.0  ;;  %v7843_v8 = vpop.permute.xlu0 %1788  ;;  %4232 = vrot.lane.b32.xlu0 %v4196_v46, %s6269_s9  ;;  %v1504_v5 = vadd.f32 %v1488_v15, %v7116_v1  ;;  %v1492_v15 = vld [vmem:[#allocation3 + $0x70] sm:$0xff] }
 0x24e   : > { %v1619_v7 = vadd.f32 %v1606_v14, %v1506_v55  ;;  %v1727_v37 = vadd.f32 %v1693_v26, %v1614_v28  ;;  %v1694_v38 = vsel %vm1687_vm3, %v7556_v44, %v11796_v45  ;;  %v2729_v20 = vmul.f32 %v7256_v62, %v11797_v54  ;;  %v11800_v55 = vld [vmem:[#allocation45_spill] sm:$0xff] }
 0x24f   : > { %v7852_v48 = vmax.f32 %v1838_v6, 0.0  ;;  %v7854_v27 = vmax.f32 %v1839_v11, 0.0  ;;  %v1783_v33 = vpop.permute.xlu1 %1782  ;;  %4230 = vrot.lane.b32.xlu1 %v4195_v56, %s6269_s9  ;;  %1873 = vst [vmem:[#allocation4 + $0x40] sm:$0xff] %v7841_v31  ;;  %v1616_v50 = vadd.f32 %v1581_v10, %v11798_v42  ;;  %v1617_v60 = vadd.f32 %v1582_v49, %v1504_v5  ;;  %v11802_v49 = vld [vmem:[#allocation60_spill] sm:$0xff] }
 0x250   : > { %v1695_v3 = vsel %vm1687_vm3, %v11796_v45, %v11799_v63  ;;  %v1806_v44 = vsel %vm1800_vm4, %v7786_v43, %v1783_v33  ;;  %v1583_v57 = vsel %vm1574_vm2, %v7404_v61, %v11800_v55  ;;  %v1732_v28 = vadd.f32 %v1719_v35, %v1619_v7  ;;  %v7875_v43 = vld [vmem:[#allocation4 + $0xb8] sm:$0xff]  ;;  %v1491_v61 = vld [vmem:[#allocation3 + $0x68] sm:$0xff] }
 0x251   : > { %1870 = vst [vmem:[#allocation4 + $0x28] sm:$0xff] %v7852_v48  ;;  %1871 = vst [vmem:[#allocation4 + $0x30] sm:$0xff] %v7854_v27  ;;  %v1840_v58 = vadd.f32 %v1806_v44, %v1727_v37  ;;  %v2728_v9 = vmul.f32 %v7256_v62, %v11801_v22  ;;  %v1793_v14 = vpop.permute.xlu0 %1792  ;;  %2767 = vrot.lane.b32.xlu0 %v2729_v20, %s6269_s9  ;;  %v1505_v17 = vadd.f32 %v1489_v40, %v7116_v1  ;;  %v11803_v37 = vld [vmem:[#allocation46_spill] sm:$0xff]  ;;  %v11804_v40 = vld [vmem:[#allocation47_spill] sm:$0xff] }
 0x252   : > { %v1729_v25 = vadd.f32 %v1694_v38, %v1616_v50  ;;  %v1832_v32 = vsel %vm1800_vm4, 0.0, %v1793_v14  ;;  %v1730_v26 = vadd.f32 %v1695_v3, %v1617_v60  ;;  %v3278_v46 = vmul.f32 %v7179_v30, %v11797_v54  ;;  %v1493_v38 = vld [vmem:[#allocation3 + $0x78] sm:$0xff]  ;;  %v11807_v3 = vld [vmem:[#allocation59_spill] sm:$0xff] }
 0x253   : > { %v1856_v36 = vmax.f32 %v1840_v58, 0.0  ;;  %v1787_v23 = vpop.permute.xlu1 %1786  ;;  %2765 = vrot.lane.b32.xlu1 %v2728_v9, %s6269_s9  ;;  %v1845_v0 = vadd.f32 %v1832_v32, %v1732_v28  ;;  %v1618_v10 = vadd.f32 %v1583_v57, %v1505_v17  ;;  %v1696_v1 = vsel %vm1687_vm3, %v11799_v63, %v11802_v49  ;;  %v11808_v17 = vld [vmem:[#allocation48_spill] sm:$0xff] }
 0x254   : > { %v1807_v19 = vsel %vm1800_vm4, %v7816_v16, %v1787_v23  ;;  %v1808_v53 = vsel %vm1800_vm4, %v1787_v23, %v7843_v8  ;;  %v2730_v56 = vmul.f32 %v7256_v62, %v7875_v43  ;;  %v1507_v7 = vadd.f32 %v1491_v61, %v7129_v24  ;;  %v11809_v23 = vld [vmem:[#allocation62_spill] sm:$0xff] }
 0x255   : > { %1872 = vst.msk [vmem:[#allocation4 + $0x38] sm:$0xff] %vm541_vm0, %v1856_v36  ;;  %v1842_v6 = vadd.f32 %v1807_v19, %v1729_v25  ;;  %v1843_v11 = vadd.f32 %v1808_v53, %v1730_v26  ;;  %v1861_v5 = vmax.f32 %v1845_v0, 0.0  ;;  %3316 = vrot.lane.b32.xlu0 %v3278_v46, %s6269_s9  ;;  %v1584_v35 = vsel %vm1574_vm2, %v7413_v12, %v11803_v37  ;;  %v11806_v12 = vld [vmem:[#allocation61_spill] sm:$0xff]  ;;  %v1797_v26 = vpop.permute.xlu0 %1796 }
 0x256   : > { %v1508_v16 = vadd.f32 %v1492_v15, %v7129_v24  ;;  %v1585_v45 = vsel %vm1574_vm2, %v11803_v37, %v11804_v40  ;;  %v1731_v33 = vadd.f32 %v1696_v1, %v1618_v10  ;;  %v3694_v60 = vmul.f32 %v7359_v4, %v11797_v54 }
 0x257   : > { %v7900_v20 = vmax.f32 %v1842_v6, 0.0  ;;  %v7902_v42 = vmax.f32 %v1843_v11, 0.0  ;;  %v1791_v50 = vpop.permute.xlu1 %1790  ;;  %2769 = vrot.lane.b32.xlu1 %v2730_v56, %s6269_s9  ;;  %1877 = vst [vmem:[#allocation4 + $0x60] sm:$0xff] %v1861_v5  ;;  %v1697_v63 = vsel %vm1687_vm3, %v7570_v2, %v11806_v12  ;;  %v1698_v44 = vsel %vm1687_vm3, %v11806_v12, %v11807_v3  ;;  %v11810_v56 = vld [vmem:[#allocation65_spill] sm:$0xff] }
 0x258   : > { %v1809_v55 = vsel %vm1800_vm4, %v7843_v8, %v1791_v50  ;;  %v1620_v57 = vadd.f32 %v1584_v35, %v1507_v7  ;;  %v1621_v28 = vadd.f32 %v1585_v45, %v1508_v16  ;;  %v3277_v9 = vmul.f32 %v7179_v30, %v11801_v22  ;;  %v11814_v50 = vld [vmem:[#allocation42_spill] sm:$0xff] }
 0x259   : > { %11805 = vst [vmem:[#allocation58_spill] sm:$0xff] %v7900_v20  ;;  %1874 = vst [vmem:[#allocation4 + $0x48] sm:$0xff] %v7900_v20  ;;  %v1844_v58 = vadd.f32 %v1809_v55, %v1731_v33  ;;  %3732 = vrot.lane.b32.xlu0 %v3694_v60, %s6269_s9  ;;  %v1509_v2 = vadd.f32 %v1493_v38, %v7129_v24  ;;  %v1586_v25 = vsel %vm1574_vm2, %v11804_v40, %v11808_v17  ;;  %v11812_v40 = vld [vmem:[#allocation18_spill] sm:$0xff]  ;;  %v7947_v38 = vpop.permute.xlu0 %4096 }
 0x25a   : > { %1875 = vst [vmem:[#allocation4 + $0x50] sm:$0xff] %v7902_v42  ;;  %v1733_v32 = vadd.f32 %v1697_v63, %v1620_v57  ;;  %v1734_v8 = vadd.f32 %v1698_v44, %v1621_v28  ;;  %v4198_v36 = vmul.f32 %v7225_v34, %v11797_v54  ;;  %v1699_v0 = vsel %vm1687_vm3, %v11807_v3, %v11809_v23  ;;  %v11816_v3 = vld [vmem:[#allocation26_spill] sm:$0xff]  ;;  %v11818_v28 = vld [vmem:[#allocation69_spill] sm:$0xff] }
 0x25b   : > { %v1860_v61 = vmax.f32 %v1844_v58, 0.0  ;;  %3314 = vrot.lane.b32.xlu1 %v3277_v9, %s6269_s9  ;;  %v1795_v15 = vpop.permute.xlu1 %1794  ;;  %v1622_v10 = vadd.f32 %v1586_v25, %v1509_v2  ;;  %v3279_v19 = vmul.f32 %v7875_v43, %v7179_v30  ;;  %v3693_v35 = vmul.f32 %v7359_v4, %v11801_v22  ;;  %11813 = vst [vmem:[#allocation67_spill] sm:$0xff] %v7947_v38  ;;  %v7974_v9 = vld [vmem:[#allocation4 + $0xd8] sm:$0xff]  ;;  %v11824_v23 = vld [vmem:[#allocation49_spill] sm:$0xff] }
 0x25c   : > { %v1810_v24 = vsel %vm1800_vm4, %v1793_v14, %v1795_v15  ;;  %v1811_v46 = vsel %vm1800_vm4, %v1795_v15, %v1797_v26  ;;  %v11811_v14 = vld [vmem:[#allocation30_spill] sm:$0xff]  ;;  %v3280_v45 = vmul.f32 %v11812_v40, %v11810_v56  ;;  %v3695_v33 = vmul.f32 %v7359_v4, %v7875_v43  ;;  %11819 = vst [vmem:[#allocation45_spill] sm:$0xff] %v7974_v9 }
 0x25d   : > { %1876 = vst.msk [vmem:[#allocation4 + $0x58] sm:$0xff] %vm541_vm0, %v1860_v61  ;;  %v1846_v49 = vadd.f32 %v1810_v24, %v1733_v32  ;;  %v1847_v1 = vadd.f32 %v1811_v46, %v1734_v8  ;;  %4236 = vrot.lane.b32.xlu0 %v4198_v36, %s6269_s9  ;;  %v1735_v53 = vadd.f32 %v1699_v0, %v1622_v10  ;;  %v7958_v63 = vpop.permute.xlu0 %4100  ;;  %v7987_v32 = vld [vmem:[#allocation4 + $0x38] sm:$0xff]  ;;  %v11822_v15 = vld [vmem:[#allocation50_spill] sm:$0xff]  ;;  %v11825_v0 = vld [vmem:[#allocation17_spill] sm:$0xff] }
 0x25e   : > { %v2731_v5 = vmul.f32 %v11811_v14, %v11810_v56  ;;  %v3696_v60 = vmul.f32 %v11814_v50, %v11810_v56  ;;  %v4197_v12 = vmul.f32 %v7225_v34, %v11801_v22  ;;  %11815 = vst [vmem:[#allocation70_spill] sm:$0xff] %v7958_v63  ;;  %v4200_v44 = vmul.f32 %v11816_v3, %v11810_v56  ;;  %v11826_v46 = vld [vmem:[#allocation41_spill] sm:$0xff]  ;;  %v11832_v56 = vld [vmem:[#allocation15_spill] sm:$0xff] }
 0x25f   : > { %v1862_v54 = vmax.f32 %v1846_v49, 0.0  ;;  %v1863_v6 = vmax.f32 %v1847_v1, 0.0  ;;  %3318 = vrot.lane.b32.xlu1 %v3279_v19, %s6269_s9  ;;  %v1799_v11 = vpop.permute.xlu1 %1798  ;;  %v4199_v55 = vmul.f32 %v7225_v34, %v7875_v43  ;;  %v2733_v57 = vmul.f32 %v11811_v14, %v7688_v21  ;;  %v11828_v1 = vld [vmem:[#allocation68_spill] sm:$0xff]  ;;  %v11829_v19 = vld [vmem:[#allocation33_spill] sm:$0xff]  ;;  %v11846_v63 = vld [vmem:[#allocation55_spill] sm:$0xff] }
 0x260   : > { %v1812_v7 = vsel %vm1800_vm4, %v1797_v26, %v1799_v11  ;;  %v2732_v58 = vmul.f32 %v11811_v14, %v11818_v28  ;;  %v3282_v43 = vmul.f32 %v11812_v40, %v7688_v21  ;;  %v2734_v2 = vmul.f32 %v11811_v14, %v7974_v9  ;;  %v11823_v26 = vld [vmem:[#allocation14_spill] sm:$0xff]  ;;  %v11831_v11 = vld [vmem:[#allocation52_spill] sm:$0xff] }
 0x261   : > { %1878 = vst [vmem:[#allocation4 + $0x68] sm:$0xff] %v1862_v54  ;;  %1879 = vst [vmem:[#allocation4 + $0x70] sm:$0xff] %v1863_v6  ;;  %v1848_v37 = vadd.f32 %v1812_v7, %v1735_v53  ;;  %2771 = vrot.lane.b32.xlu0 %v2731_v5, %s6269_s9  ;;  %v7969_v22 = vpop.permute.xlu0 %4104  ;;  %v3698_v25 = vmul.f32 %v11814_v50, %v7688_v21  ;;  %v3281_v61 = vmul.f32 %v11812_v40, %v11818_v28  ;;  %v11827_v21 = vld [vmem:[#allocation29_spill] sm:$0xff]  ;;  %v11830_v54 = vld [vmem:[#allocation11_spill] sm:$0xff] }
 0x262   : > { %11817 = vst [vmem:[#allocation57_spill] sm:$0xff] %v7969_v22  ;;  %v2406_v36 = vmul.f32 %v11823_v26, %v11822_v15  ;;  %v7998_v24 = vmul.f32 %v11825_v0, %v11824_v23  ;;  %v8002_v10 = vmul.f32 %v11826_v46, %v11824_v23  ;;  %v8006_v49 = vmul.f32 %v11827_v21, %v11824_v23  ;;  %v11833_v7 = vld [vmem:[#allocation51_spill] sm:$0xff] }
 0x263   : > { %v1864_v16 = vmax.f32 %v1848_v37, 0.0  ;;  %3730 = vrot.lane.b32.xlu1 %v3693_v35, %s6269_s9  ;;  %v7989_v8 = vpop.permute.xlu1 %4098  ;;  %v2735_v53 = vmul.f32 %v11829_v19, %v11828_v1  ;;  %v2347_v6 = vmul.f32 %v11830_v54, %v7987_v32  ;;  %v2404_v5 = vmul.f32 %v11832_v56, %v11831_v11  ;;  %v11834_v35 = vld [vmem:[#allocation35_spill] sm:$0xff]  ;;  %v11848_v54 = vld [vmem:[#allocation34_spill] sm:$0xff] }
 0x264   : > { %11821 = vst [vmem:[#allocation60_spill] sm:$0xff] %v7989_v8  ;;  %v2407_v37 = vmul.f32 %v11823_v26, %v11833_v7  ;;  %v3411_v8 = vmul.f32 %v11816_v3, %v11846_v63  ;;  %v4201_v14 = vmul.f32 %v11816_v3, %v11818_v28 }
 0x265   : > { %1880 = vst.msk [vmem:[#allocation4 + $0x78] sm:$0xff] %vm541_vm0, %v1864_v16  ;;  %3320 = vrot.lane.b32.xlu0 %v3280_v45, %s6269_s9  ;;  %v7982_v17 = vpop.permute.xlu0 %4108  ;;  %v2883_v16 = vmul.f32 %v11834_v35, %v7987_v32  ;;  %v11835_v45 = vld [vmem:[#allocation39_spill] sm:$0xff] }
 0x266   : > { %11820 = vst [vmem:[#allocation66_spill] sm:$0xff] %v7982_v17  ;;  %v11842_v17 = vld [vmem:[#allocation53_spill] sm:$0xff] }
 0x267   : > { %3734 = vrot.lane.b32.xlu1 %v3695_v33, %s6269_s9  ;;  %v2924_v33 = vmul.f32 %v11835_v45, %v11831_v11  ;;  %v8046_v22 = vmul.f32 %v11825_v0, %v11842_v17 }
 0x269   : > { %3736 = vrot.lane.b32.xlu0 %v3696_v60, %s6269_s9  ;;  %v11836_v60 = vld [vmem:[#allocation38_spill] sm:$0xff]  ;;  %v8040_v23 = vadd.f32 %v2924_v33, %v2883_v16  ;;  %v11845_v33 = vld [vmem:[#allocation23_spill] sm:$0xff] }
 0x26a   : > { %v2928_v38 = vmul.f32 %v11836_v60, %v11846_v63 }
 0x26b   : > { %4234 = vrot.lane.b32.xlu1 %v4197_v12, %s6269_s9  ;;  %v2926_v12 = vmul.f32 %v11836_v60, %v11822_v15  ;;  %11841 = vst [vmem:[#allocation48_spill] sm:$0xff] %v8040_v23  ;;  %v3697_v23 = vmul.f32 %v11814_v50, %v11818_v28 }
 0x26c   : > { %v8116_v28 = vld [vmem:[#allocation4 + $0x78] sm:$0xff] }
 0x26d   : > { %4240 = vrot.lane.b32.xlu0 %v4200_v44, %s6269_s9  ;;  %v2927_v44 = vmul.f32 %v11836_v60, %v11833_v7  ;;  %v11850_v60 = vld [vmem:[#allocation56_spill] sm:$0xff] }
 0x26f   : > { %4238 = vrot.lane.b32.xlu1 %v4199_v55, %s6269_s9  ;;  %v8025_v55 = vpop.permute.xlu1 %4102 }
 0x270   : > { %11837 = vst [vmem:[#allocation46_spill] sm:$0xff] %v8025_v55  ;;  %v3391_v55 = vmul.f32 %v11845_v33, %v7987_v32 }
 0x271   : > { %2775 = vrot.lane.b32.xlu0 %v2733_v57, %s6269_s9  ;;  %v8027_v57 = vpop.permute.xlu0 %4112 }
 0x272   : > { %11838 = vst [vmem:[#allocation47_spill] sm:$0xff] %v8027_v57  ;;  %v3407_v57 = vmul.f32 %v7225_v34, %v11831_v11  ;;  %v2412_v34 = vmul.f32 %v11825_v0, %v11850_v60 }
 0x273   : > { %2773 = vrot.lane.b32.xlu1 %v2732_v58, %s6269_s9  ;;  %v3283_v58 = vmul.f32 %v7974_v9, %v11812_v40  ;;  %v8092_v13 = vpop.permute.xlu1 %4106 }
 0x274   : > { %v8084_v35 = vadd.f32 %v3407_v57, %v3391_v55  ;;  %11851 = vst [vmem:[#allocation65_spill] sm:$0xff] %v8092_v13  ;;  %v11853_v55 = vld [vmem:[#allocation44_spill] sm:$0xff] }
 0x275   : > { %3324 = vrot.lane.b32.xlu0 %v3282_v43, %s6269_s9  ;;  %v8032_v43 = vadd.f32 %v2404_v5, %v2347_v6  ;;  %v3700_v57 = vmul.f32 %v11853_v55, %v11828_v1 }
 0x276   : > { %11849 = vst [vmem:[#allocation62_spill] sm:$0xff] %v8084_v35  ;;  %v2737_v35 = vmul.f32 %v11829_v19, %v7749_v51 }
 0x277   : > { %2777 = vrot.lane.b32.xlu1 %v2734_v2, %s6269_s9  ;;  %11839 = vst [vmem:[#allocation61_spill] sm:$0xff] %v8032_v43  ;;  %v3409_v2 = vmul.f32 %v11816_v3, %v11822_v15  ;;  %v11844_v15 = vld [vmem:[#allocation21_spill] sm:$0xff] }
 0x278   : > { %v3284_v5 = vmul.f32 %v11844_v15, %v11828_v1  ;;  %v2885_v1 = vmul.f32 %v11848_v54, %v7900_v20 }
 0x279   : > { %3740 = vrot.lane.b32.xlu0 %v3698_v25, %s6269_s9  ;;  %v3410_v25 = vmul.f32 %v11816_v3, %v11833_v7  ;;  %v8057_v7 = vmul.f32 %v11826_v46, %v11842_v17 }
 0x27b   : > { %3322 = vrot.lane.b32.xlu1 %v3281_v61, %s6269_s9  ;;  %v8038_v61 = vld [vmem:[#allocation4 + $0x58] sm:$0xff] }
 0x27c   : > { %11840 = vst [vmem:[#allocation59_spill] sm:$0xff] %v8038_v61  ;;  %v2887_v33 = vmul.f32 %v11848_v54, %v8038_v61 }
 0x27d   : > { %2779 = vrot.lane.b32.xlu0 %v2735_v53, %s6269_s9  ;;  %v11843_v53 = vld [vmem:[#allocation54_spill] sm:$0xff] }
 0x27e   : > { %v8050_v6 = vmul.f32 %v11825_v0, %v11843_v53  ;;  %v8061_v11 = vmul.f32 %v11826_v46, %v11843_v53  ;;  %v8065_v16 = vmul.f32 %v11827_v21, %v11843_v53  ;;  %v11847_v53 = vld [vmem:[#allocation10_spill] sm:$0xff]  ;;  %v8103_v0 = vld [vmem:[#allocation4 + $0x60] sm:$0xff]  ;;  %v8109_v13 = vadd.f32 %v2928_v38, %v2887_v33  ;;  %v8130_v33 = vld [vmem:[#allocation4 + $0x70] sm:$0xff] }
 0x27f   : > { %3326 = vrot.lane.b32.xlu1 %v3283_v58, %s6269_s9  ;;  %v2408_v58 = vmul.f32 %v11823_v26, %v11846_v63  ;;  %v2351_v43 = vmul.f32 %v11847_v53, %v8038_v61  ;;  %v2349_v45 = vmul.f32 %v11847_v53, %v7900_v20  ;;  %v2932_v63 = vmul.f32 %v11826_v46, %v11850_v60  ;;  %v8094_v26 = vpop.permute.xlu0 %4116 }
 0x280   : > { %11852 = vst [vmem:[#allocation69_spill] sm:$0xff] %v8094_v26  ;;  %11855 = vst [vmem:[#allocation49_spill] sm:$0xff] %v8109_v13 }
 0x281   : > { %3328 = vrot.lane.b32.xlu0 %v3284_v5, %s6269_s9  ;;  %v3415_v5 = vmul.f32 %v11827_v21, %v11850_v60  ;;  %v8105_v46 = vadd.f32 %v2408_v58, %v2351_v43  ;;  %v3699_v60 = vmul.f32 %v11814_v50, %v7974_v9  ;;  %v8113_v26 = vadd.f32 %v2406_v36, %v2349_v45  ;;  %v11857_v58 = vld [vmem:[#allocation22_spill] sm:$0xff] }
 0x282   : > { %v2886_v43 = vmul.f32 %v11848_v54, %v7902_v42  ;;  %v3393_v38 = vmul.f32 %v11857_v58, %v7900_v20  ;;  %v3286_v36 = vmul.f32 %v11844_v15, %v7749_v51  ;;  %v8128_v45 = vld [vmem:[#allocation4 + $0x68] sm:$0xff]  ;;  %v3394_v13 = vmul.f32 %v11857_v58, %v7902_v42 }
 0x283   : > { %3738 = vrot.lane.b32.xlu1 %v3697_v23, %s6269_s9  ;;  %11854 = vst [vmem:[#allocation50_spill] sm:$0xff] %v8105_v46  ;;  %v2350_v23 = vmul.f32 %v11847_v53, %v7902_v42  ;;  %11856 = vst [vmem:[#allocation68_spill] sm:$0xff] %v8113_v26  ;;  %v3395_v46 = vmul.f32 %v11857_v58, %v8038_v61  ;;  %v11859_v26 = vld [vmem:[#allocation13_spill] sm:$0xff]  ;;  %v8139_v54 = vadd.f32 %v2926_v12, %v2885_v1  ;;  %v8158_v12 = vpop.permute.xlu0 %4120 }
 0x284   : > { %v2352_v53 = vmul.f32 %v11859_v26, %v8103_v0  ;;  %v8141_v9 = vadd.f32 %v2927_v44, %v2886_v43  ;;  %v8145_v61 = vadd.f32 %v3409_v2, %v3393_v38  ;;  %v8147_v20 = vadd.f32 %v3410_v25, %v3394_v13  ;;  %11868 = vst [vmem:[#allocation73_spill] sm:$0xff] %v8158_v12 }
 0x285   : > { %3744 = vrot.lane.b32.xlu0 %v3700_v57, %s6269_s9  ;;  %v8132_v57 = vadd.f32 %v2407_v37, %v2350_v23  ;;  %11860 = vst [vmem:[#allocation51_spill] sm:$0xff] %v8139_v54  ;;  %v8143_v3 = vadd.f32 %v3411_v8, %v3395_v46  ;;  %v2355_v23 = vmul.f32 %v11859_v26, %v8116_v28  ;;  %v11869_v46 = vld [vmem:[#allocation25_spill] sm:$0xff] }
 0x286   : > { %11861 = vst [vmem:[#allocation53_spill] sm:$0xff] %v8141_v9  ;;  %11863 = vst [vmem:[#allocation55_spill] sm:$0xff] %v8145_v61  ;;  %v8150_v37 = vadd.f32 %v7998_v24, %v2352_v53  ;;  %v2353_v13 = vmul.f32 %v11859_v26, %v8128_v45  ;;  %v2354_v24 = vmul.f32 %v11859_v26, %v8130_v33  ;;  %v8577_v9 = vld [vmem:[#allocation4 + $0x100] sm:$0xff] }
 0x287   : > { %11858 = vst [vmem:[#allocation52_spill] sm:$0xff] %v8132_v57  ;;  %3742 = vrot.lane.b32.xlu1 %v3699_v60, %s6269_s9  ;;  %11862 = vst [vmem:[#allocation54_spill] sm:$0xff] %v8143_v3  ;;  %v11866_v57 = vld [vmem:[#allocation37_spill] sm:$0xff]  ;;  %v8156_v60 = vpop.permute.xlu1 %4110  ;;  %v3396_v44 = vmul.f32 %v11869_v46, %v8103_v0  ;;  %v8169_v2 = vadd.f32 %v2412_v34, %v2355_v23 }
 0x288   : > { %11864 = vst [vmem:[#allocation56_spill] sm:$0xff] %v8147_v20  ;;  %11865 = vst [vmem:[#allocation71_spill] sm:$0xff] %v8150_v37  ;;  %v2888_v58 = vmul.f32 %v11866_v57, %v8103_v0  ;;  %v2891_v8 = vmul.f32 %v11866_v57, %v8116_v28  ;;  %v2889_v53 = vmul.f32 %v11866_v57, %v8128_v45  ;;  %v11941_v20 = vld [vmem:[#allocation9_spill] sm:$0xff] }
 0x289   : > { %11867 = vst [vmem:[#allocation72_spill] sm:$0xff] %v8156_v60  ;;  %2783 = vrot.lane.b32.xlu0 %v2737_v35, %s6269_s9  ;;  %11870 = vst [vmem:[#allocation74_spill] sm:$0xff] %v8169_v2  ;;  %v2890_v35 = vmul.f32 %v11866_v57, %v8130_v33  ;;  %v8182_v43 = vadd.f32 %v8046_v22, %v2353_v13  ;;  %v8185_v38 = vadd.f32 %v8050_v6, %v2354_v24  ;;  %v8216_v13 = vpop.permute.xlu0 %4124  ;;  %v8625_v57 = vld [vmem:[#allocation4 + $0xf0] sm:$0xff] }
 0x28a   : > { %v8172_v25 = vadd.f32 %v8002_v10, %v2888_v58  ;;  %v8179_v1 = vadd.f32 %v2932_v63, %v2891_v8  ;;  %v8188_v34 = vadd.f32 %v8006_v49, %v3396_v44  ;;  %v8194_v58 = vadd.f32 %v8057_v7, %v2889_v53  ;;  %11882 = vst [vmem:[#allocation86_spill] sm:$0xff] %v8216_v13 }
 0x28b   : > { %4242 = vrot.lane.b32.xlu1 %v4201_v14, %s6269_s9  ;;  %11873 = vst [vmem:[#allocation77_spill] sm:$0xff] %v8182_v43  ;;  %11874 = vst [vmem:[#allocation78_spill] sm:$0xff] %v8185_v38  ;;  %v8191_v10 = vadd.f32 %v8061_v11, %v2890_v35  ;;  %v3399_v14 = vmul.f32 %v11869_v46, %v8116_v28  ;;  %v3398_v63 = vmul.f32 %v11869_v46, %v8130_v33  ;;  %v8207_v11 = vld [vmem:[#allocation4 + $0xf8] sm:$0xff]  ;;  %v8214_v8 = vpop.permute.xlu1 %4114  ;;  %v8545_v38 = vld [vmem:[#allocation4 + $0x190] sm:$0xff] }
 0x28c   : > { %11871 = vst [vmem:[#allocation75_spill] sm:$0xff] %v8172_v25  ;;  %11872 = vst [vmem:[#allocation76_spill] sm:$0xff] %v8179_v1  ;;  %v2736_v22 = vmul.f32 %v11829_v19, %v7747_v41  ;;  %v3413_v49 = vmul.f32 %v11827_v21, %v11842_v17  ;;  %v3397_v6 = vmul.f32 %v11869_v46, %v8128_v45  ;;  %v11937_v43 = vld [vmem:[#allocation26_spill] sm:$0xff] }
 0x28d   : > { %11875 = vst [vmem:[#allocation79_spill] sm:$0xff] %v8188_v34  ;;  %11876 = vst [vmem:[#allocation80_spill] sm:$0xff] %v8191_v10  ;;  %3332 = vrot.lane.b32.xlu0 %v3286_v36, %s6269_s9  ;;  %v8209_v7 = vadd.f32 %v3415_v5, %v3399_v14  ;;  %v8212_v23 = vadd.f32 %v8065_v16, %v3398_v63  ;;  %v3702_v36 = vmul.f32 %v11853_v55, %v7749_v51 }
 0x28e   : > { %11877 = vst [vmem:[#allocation81_spill] sm:$0xff] %v8194_v58  ;;  %11878 = vst [vmem:[#allocation82_spill] sm:$0xff] %v8207_v11  ;;  %v8221_v17 = vadd.f32 %v3413_v49, %v3397_v6  ;;  %v2738_v24 = vmul.f32 %v11829_v19, %v8207_v11  ;;  %v2454_v5 = vmul.f32 %v7160_v59, %v7731_v52  ;;  %v11887_v49 = vld [vmem:[#allocation28_spill] sm:$0xff] }
 0x28f   : > { %11879 = vst [vmem:[#allocation83_spill] sm:$0xff] %v8209_v7  ;;  %11880 = vst [vmem:[#allocation84_spill] sm:$0xff] %v8212_v23  ;;  %2781 = vrot.lane.b32.xlu1 %v2736_v22, %s6269_s9  ;;  %v8231_v44 = vpop.permute.xlu1 %4118  ;;  %v3285_v35 = vmul.f32 %v11844_v15, %v7747_v41  ;;  %v2974_v53 = vmul.f32 %v7335_v47, %v7731_v52  ;;  %v3287_v14 = vmul.f32 %v8207_v11, %v11844_v15 }
 0x290   : > { %11881 = vst [vmem:[#allocation85_spill] sm:$0xff] %v8214_v8  ;;  %11883 = vst [vmem:[#allocation87_spill] sm:$0xff] %v8221_v17  ;;  %v3432_v6 = vmul.f32 %v11887_v49, %v7731_v52  ;;  %v3959_v23 = vmul.f32 %v11832_v56, %v7987_v32  ;;  %v2987_v25 = vmul.f32 %v11853_v55, %v8128_v45 }
 0x291   : > { %3748 = vrot.lane.b32.xlu0 %v3702_v36, %s6269_s9  ;;  %11884 = vst [vmem:[#allocation88_spill] sm:$0xff] %v8231_v44  ;;  %v3701_v36 = vmul.f32 %v11853_v55, %v7747_v41  ;;  %v2456_v41 = vmul.f32 %v7160_v59, %v7802_v29  ;;  %v3433_v44 = vmul.f32 %v11887_v49, %v7800_v39  ;;  %11942 = vst [vmem:[#allocation133_spill] sm:$0xff] %v8577_v9 }
 0x292   : > { %11947 = vst [vmem:[#allocation138_spill] sm:$0xff] %v8625_v57 }
 0x293   : > { %2785 = vrot.lane.b32.xlu1 %v2738_v24, %s6269_s9  ;;  %v8227_v16 = vpop.permute.xlu0 %2755  ;;  %v8244_v63 = vpop.permute.xlu1 %4122 }
 0x294   : > { %11886 = vst [vmem:[#allocation90_spill] sm:$0xff] %v8244_v63 }
 0x295   : > { %2486 = vrot.lane.b32.xlu0 %v2454_v5, %s6269_s9  ;;  %v11889_v5 = vld [vmem:[#allocation12_spill] sm:$0xff] }
 0x297   : > { %3330 = vrot.lane.b32.xlu1 %v3285_v35, %s6269_s9  ;;  %v8237_v51 = vpop.permute.xlu0 %3304  ;;  %v3952_v35 = vmul.f32 %v11889_v5, %v7731_v52  ;;  %v8274_v52 = vld [vmem:[#allocation4 + $0x18] sm:$0xff] }
 0x298   : > { %11885 = vst [vmem:[#allocation89_spill] sm:$0xff] %v8237_v51  ;;  %11891 = vst [vmem:[#allocation93_spill] sm:$0xff] %v8274_v52  ;;  %v2457_v12 = vmul.f32 %v7160_v59, %v8274_v52  ;;  %v3435_v8 = vmul.f32 %v11887_v49, %v8274_v52 }
 0x299   : > { %3006 = vrot.lane.b32.xlu0 %v2974_v53, %s6269_s9  ;;  %v8259_v53 = vpop.permute.xlu1 %4126 }
 0x29a   : > { %11890 = vst [vmem:[#allocation92_spill] sm:$0xff] %v8259_v53 }
 0x29b   : > { %3334 = vrot.lane.b32.xlu1 %v3287_v14, %s6269_s9  ;;  %v8247_v22 = vpop.permute.xlu0 %3720  ;;  %v3703_v14 = vmul.f32 %v11853_v55, %v8207_v11 }
 0x29d   : > { %3464 = vrot.lane.b32.xlu0 %v3432_v6, %s6269_s9  ;;  %v8269_v6 = vpop.permute.xlu1 %2757 }
 0x29f   : > { %3746 = vrot.lane.b32.xlu1 %v3701_v36, %s6269_s9  ;;  %v8255_v24 = vpop.permute.xlu0 %4224  ;;  %v2455_v36 = vmul.f32 %v7160_v59, %v7800_v39  ;;  %v2977_v59 = vmul.f32 %v7335_v47, %v8274_v52 }
 0x2a0   : > { %11888 = vst [vmem:[#allocation91_spill] sm:$0xff] %v8255_v24 }
 0x2a1   : > { %3984 = vrot.lane.b32.xlu0 %v3952_v35, %s6269_s9  ;;  %v2976_v35 = vmul.f32 %v7335_v47, %v7802_v29 }
 0x2a3   : > { %3750 = vrot.lane.b32.xlu1 %v3703_v14, %s6269_s9  ;;  %v8265_v13 = vpop.permute.xlu0 %2759 }
 0x2a5   : > { %2490 = vrot.lane.b32.xlu0 %v2456_v41, %s6269_s9  ;;  %v3434_v41 = vmul.f32 %v11887_v49, %v7802_v29 }
 0x2a7   : > { %2488 = vrot.lane.b32.xlu1 %v2455_v36, %s6269_s9  ;;  %v8277_v53 = vpop.permute.xlu0 %3308 }
 0x2a8   : > { %11892 = vst [vmem:[#allocation94_spill] sm:$0xff] %v8277_v53  ;;  %v2975_v53 = vmul.f32 %v7335_v47, %v7800_v39  ;;  %v3955_v47 = vmul.f32 %v11889_v5, %v8274_v52 }
 0x2a9   : > { %v8281_v14 = vpop.permute.xlu1 %2761  ;;  %3010 = vrot.lane.b32.xlu0 %v2976_v35, %s6269_s9  ;;  %v3954_v35 = vmul.f32 %v11889_v5, %v7802_v29 }
 0x2ab   : > { %2492 = vrot.lane.b32.xlu1 %v2457_v12, %s6269_s9  ;;  %v8287_v63 = vpop.permute.xlu0 %3724 }
 0x2ad   : > { %v8291_v36 = vpop.permute.xlu1 %3306  ;;  %3468 = vrot.lane.b32.xlu0 %v3434_v41, %s6269_s9  ;;  %v2458_v41 = vmul.f32 %v7179_v30, %v7784_v18 }
 0x2ae   : > { %11893 = vst [vmem:[#allocation95_spill] sm:$0xff] %v8291_v36 }
 0x2af   : > { %3008 = vrot.lane.b32.xlu1 %v2975_v53, %s6269_s9  ;;  %v8297_v51 = vpop.permute.xlu0 %4228 }
 0x2b0   : > { %11894 = vst [vmem:[#allocation96_spill] sm:$0xff] %v8297_v51 }
 0x2b1   : > { %v8301_v12 = vpop.permute.xlu1 %3310  ;;  %3988 = vrot.lane.b32.xlu0 %v3954_v35, %s6269_s9  ;;  %v2978_v35 = vmul.f32 %v7359_v4, %v7784_v18 }
 0x2b2   : > { %11895 = vst [vmem:[#allocation97_spill] sm:$0xff] %v8301_v12 }
 0x2b3   : > { %3012 = vrot.lane.b32.xlu1 %v2977_v59, %s6269_s9  ;;  %v8307_v36 = vpop.permute.xlu0 %2763 }
 0x2b5   : > { %v8311_v53 = vpop.permute.xlu1 %3722  ;;  %2494 = vrot.lane.b32.xlu0 %v2458_v41, %s6269_s9  ;;  %v3436_v41 = vmul.f32 %v7256_v62, %v7784_v18 }
 0x2b7   : > { %3466 = vrot.lane.b32.xlu1 %v3433_v44, %s6269_s9  ;;  %v8317_v12 = vpop.permute.xlu0 %3312 }
 0x2b8   : > { %11896 = vst [vmem:[#allocation98_spill] sm:$0xff] %v8317_v12  ;;  %v3953_v12 = vmul.f32 %v11889_v5, %v7800_v39 }
 0x2b9   : > { %v8321_v59 = vpop.permute.xlu1 %3726  ;;  %3014 = vrot.lane.b32.xlu0 %v2978_v35, %s6269_s9  ;;  %v3956_v35 = vmul.f32 %v11832_v56, %v7784_v18 }
 0x2bb   : > { %3470 = vrot.lane.b32.xlu1 %v3435_v8, %s6269_s9  ;;  %v8327_v60 = vpop.permute.xlu0 %3728 }
 0x2bd   : > { %v8331_v44 = vpop.permute.xlu1 %4226  ;;  %3472 = vrot.lane.b32.xlu0 %v3436_v41, %s6269_s9  ;;  %v2460_v41 = vmul.f32 %v7179_v30, %v7854_v27 }
 0x2be   : > { %11897 = vst [vmem:[#allocation99_spill] sm:$0xff] %v8331_v44 }
 0x2bf   : > { %3986 = vrot.lane.b32.xlu1 %v3953_v12, %s6269_s9  ;;  %v8337_v26 = vpop.permute.xlu0 %4232 }
 0x2c0   : > { %11898 = vst [vmem:[#allocation100_spill] sm:$0xff] %v8337_v26  ;;  %v2459_v26 = vmul.f32 %v7179_v30, %v7852_v48 }
 0x2c1   : > { %v8341_v8 = vpop.permute.xlu1 %4230  ;;  %3992 = vrot.lane.b32.xlu0 %v3956_v35, %s6269_s9  ;;  %v2980_v35 = vmul.f32 %v7359_v4, %v7854_v27 }
 0x2c2   : > { %11899 = vst [vmem:[#allocation101_spill] sm:$0xff] %v8341_v8  ;;  %v2461_v8 = vmul.f32 %v7179_v30, %v7987_v32  ;;  %v2981_v30 = vmul.f32 %v7359_v4, %v7987_v32 }
 0x2c3   : > { %3990 = vrot.lane.b32.xlu1 %v3955_v47, %s6269_s9  ;;  %v8347_v51 = vpop.permute.xlu0 %2767 }
 0x2c5   : > { %v8351_v12 = vpop.permute.xlu1 %2765  ;;  %2498 = vrot.lane.b32.xlu0 %v2460_v41, %s6269_s9  ;;  %v3438_v41 = vmul.f32 %v7256_v62, %v7854_v27 }
 0x2c7   : > { %2496 = vrot.lane.b32.xlu1 %v2459_v26, %s6269_s9  ;;  %v8357_v18 = vpop.permute.xlu0 %3316 }
 0x2c8   : > { %11900 = vst [vmem:[#allocation102_spill] sm:$0xff] %v8357_v18  ;;  %v2979_v18 = vmul.f32 %v7359_v4, %v7852_v48 }
 0x2c9   : > { %v8361_v47 = vpop.permute.xlu1 %2769  ;;  %3018 = vrot.lane.b32.xlu0 %v2980_v35, %s6269_s9  ;;  %v3958_v35 = vmul.f32 %v11832_v56, %v7854_v27 }
 0x2cb   : > { %2500 = vrot.lane.b32.xlu1 %v2461_v8, %s6269_s9  ;;  %v8367_v24 = vpop.permute.xlu0 %3732 }
 0x2cd   : > { %v8371_v26 = vpop.permute.xlu1 %3314  ;;  %3476 = vrot.lane.b32.xlu0 %v3438_v41, %s6269_s9  ;;  %v2462_v41 = vmul.f32 %v11812_v40, %v7841_v31 }
 0x2ce   : > { %11901 = vst [vmem:[#allocation103_spill] sm:$0xff] %v8371_v26 }
 0x2cf   : > { %3016 = vrot.lane.b32.xlu1 %v2979_v18, %s6269_s9  ;;  %v8377_v44 = vpop.permute.xlu0 %4236 }
 0x2d0   : > { %11902 = vst [vmem:[#allocation104_spill] sm:$0xff] %v8377_v44  ;;  %v3437_v44 = vmul.f32 %v7256_v62, %v7852_v48 }
 0x2d1   : > { %v8381_v8 = vpop.permute.xlu1 %3318  ;;  %3996 = vrot.lane.b32.xlu0 %v3958_v35, %s6269_s9  ;;  %v2982_v35 = vmul.f32 %v11814_v50, %v7841_v31 }
 0x2d2   : > { %11903 = vst [vmem:[#allocation105_spill] sm:$0xff] %v8381_v8  ;;  %v3439_v8 = vmul.f32 %v7256_v62, %v7987_v32  ;;  %v2984_v32 = vmul.f32 %v11814_v50, %v7902_v42 }
 0x2d3   : > { %3020 = vrot.lane.b32.xlu1 %v2981_v30, %s6269_s9  ;;  %v8387_v26 = vpop.permute.xlu0 %2771 }
 0x2d4   : > { %11904 = vst [vmem:[#allocation106_spill] sm:$0xff] %v8387_v26  ;;  %v8584_v26 = vld [vmem:[#allocation4 + $0x90] sm:$0xff] }
 0x2d5   : > { %v8391_v18 = vpop.permute.xlu1 %3730  ;;  %2502 = vrot.lane.b32.xlu0 %v2462_v41, %s6269_s9  ;;  %v11906_v41 = vld [vmem:[#allocation30_spill] sm:$0xff] }
 0x2d6   : > { %v3440_v7 = vmul.f32 %v11906_v41, %v7841_v31 }
 0x2d7   : > { %3474 = vrot.lane.b32.xlu1 %v3437_v44, %s6269_s9  ;;  %v8397_v27 = vpop.permute.xlu0 %3320 }
 0x2d8   : > { %11905 = vst [vmem:[#allocation107_spill] sm:$0xff] %v8397_v27  ;;  %v3957_v27 = vmul.f32 %v11832_v56, %v7852_v48  ;;  %v2464_v48 = vmul.f32 %v11812_v40, %v7902_v42 }
 0x2d9   : > { %v8401_v30 = vpop.permute.xlu1 %3734  ;;  %3022 = vrot.lane.b32.xlu0 %v2982_v35, %s6269_s9  ;;  %v11909_v35 = vld [vmem:[#allocation14_spill] sm:$0xff] }
 0x2da   : > { %v3960_v1 = vmul.f32 %v11909_v35, %v7841_v31 }
 0x2db   : > { %3478 = vrot.lane.b32.xlu1 %v3439_v8, %s6269_s9  ;;  %v8407_v4 = vpop.permute.xlu0 %3736 }
 0x2dd   : > { %v8411_v44 = vpop.permute.xlu1 %4234  ;;  %3480 = vrot.lane.b32.xlu0 %v3440_v7, %s6269_s9 }
 0x2de   : > { %11907 = vst [vmem:[#allocation108_spill] sm:$0xff] %v8411_v44 }
 0x2df   : > { %3994 = vrot.lane.b32.xlu1 %v3957_v27, %s6269_s9  ;;  %v8417_v17 = vpop.permute.xlu0 %4240  ;;  %v11913_v27 = vld [vmem:[#allocation58_spill] sm:$0xff] }
 0x2e0   : > { %11908 = vst [vmem:[#allocation109_spill] sm:$0xff] %v8417_v17  ;;  %v2463_v17 = vmul.f32 %v11812_v40, %v11913_v27  ;;  %v3441_v3 = vmul.f32 %v11906_v41, %v11913_v27 }
 0x2e1   : > { %v8421_v8 = vpop.permute.xlu1 %4238  ;;  %4000 = vrot.lane.b32.xlu0 %v3960_v1, %s6269_s9 }
 0x2e2   : > { %11910 = vst [vmem:[#allocation110_spill] sm:$0xff] %v8421_v8 }
 0x2e3   : > { %3998 = vrot.lane.b32.xlu1 %v3959_v23, %s6269_s9  ;;  %v8427_v44 = vpop.permute.xlu0 %2775  ;;  %v11916_v23 = vld [vmem:[#allocation59_spill] sm:$0xff] }
 0x2e4   : > { %11911 = vst [vmem:[#allocation111_spill] sm:$0xff] %v8427_v44  ;;  %v2465_v8 = vmul.f32 %v11812_v40, %v11916_v23  ;;  %v2985_v40 = vmul.f32 %v11814_v50, %v11916_v23  ;;  %v3963_v61 = vmul.f32 %v11909_v35, %v11916_v23  ;;  %v2341_v44 = vmul.f32 %v11941_v20, %v7800_v39  ;;  %v8597_v39 = vld [vmem:[#allocation4 + $0x118] sm:$0xff] }
 0x2e5   : > { %v8431_v7 = vpop.permute.xlu1 %2773  ;;  %2506 = vrot.lane.b32.xlu0 %v2464_v48, %s6269_s9  ;;  %v3442_v48 = vmul.f32 %v11906_v41, %v7902_v42  ;;  %11945 = vst [vmem:[#allocation136_spill] sm:$0xff] %v8597_v39 }
 0x2e6   : > { %11912 = vst [vmem:[#allocation112_spill] sm:$0xff] %v8431_v7 }
 0x2e7   : > { %2504 = vrot.lane.b32.xlu1 %v2463_v17, %s6269_s9  ;;  %v8437_v31 = vpop.permute.xlu0 %3324 }
 0x2e8   : > { %11914 = vst [vmem:[#allocation58_spill] sm:$0xff] %v8437_v31  ;;  %v2983_v31 = vmul.f32 %v11814_v50, %v11913_v27  ;;  %v3961_v50 = vmul.f32 %v11909_v35, %v11913_v27  ;;  %v2468_v27 = vmul.f32 %v11844_v15, %v8130_v33 }
 0x2e9   : > { %v8441_v1 = vpop.permute.xlu1 %2777  ;;  %3026 = vrot.lane.b32.xlu0 %v2984_v32, %s6269_s9  ;;  %v3962_v32 = vmul.f32 %v11909_v35, %v7902_v42  ;;  %v8588_v35 = vld [vmem:[#allocation4 + $0x108] sm:$0xff] }
 0x2ea   : > { %11915 = vst [vmem:[#allocation113_spill] sm:$0xff] %v8441_v1  ;;  %v2397_v1 = vmul.f32 %v8577_v9, %v11889_v5  ;;  %11943 = vst [vmem:[#allocation134_spill] sm:$0xff] %v8588_v35  ;;  %v2400_v9 = vmul.f32 %v8597_v39, %v11889_v5 }
 0x2eb   : > { %2508 = vrot.lane.b32.xlu1 %v2465_v8, %s6269_s9  ;;  %v8447_v58 = vpop.permute.xlu0 %3740 }
 0x2ec   : > { %11917 = vst [vmem:[#allocation59_spill] sm:$0xff] %v8447_v58 }
 0x2ed   : > { %v8451_v17 = vpop.permute.xlu1 %3322  ;;  %3484 = vrot.lane.b32.xlu0 %v3442_v48, %s6269_s9  ;;  %v2466_v48 = vmul.f32 %v11844_v15, %v8103_v0 }
 0x2ee   : > { %11918 = vst [vmem:[#allocation114_spill] sm:$0xff] %v8451_v17 }
 0x2ef   : > { %3024 = vrot.lane.b32.xlu1 %v2983_v31, %s6269_s9  ;;  %v8457_v34 = vpop.permute.xlu0 %2779 }
 0x2f0   : > { %11919 = vst [vmem:[#allocation115_spill] sm:$0xff] %v8457_v34 }
 0x2f1   : > { %v8461_v8 = vpop.permute.xlu1 %3326  ;;  %4004 = vrot.lane.b32.xlu0 %v3962_v32, %s6269_s9  ;;  %v2986_v32 = vmul.f32 %v11853_v55, %v8103_v0 }
 0x2f2   : > { %11920 = vst [vmem:[#allocation116_spill] sm:$0xff] %v8461_v8 }
 0x2f3   : > { %3028 = vrot.lane.b32.xlu1 %v2985_v40, %s6269_s9  ;;  %v8467_v17 = vpop.permute.xlu0 %3328 }
 0x2f4   : > { %11921 = vst [vmem:[#allocation117_spill] sm:$0xff] %v8467_v17  ;;  %v3443_v17 = vmul.f32 %v11906_v41, %v11916_v23  ;;  %v2469_v23 = vmul.f32 %v11844_v15, %v8116_v28 }
 0x2f5   : > { %v8471_v31 = vpop.permute.xlu1 %3738  ;;  %2510 = vrot.lane.b32.xlu0 %v2466_v48, %s6269_s9  ;;  %v3444_v48 = vmul.f32 %v11829_v19, %v8103_v0 }
 0x2f7   : > { %3482 = vrot.lane.b32.xlu1 %v3441_v3, %s6269_s9  ;;  %v8477_v42 = vpop.permute.xlu0 %3744 }
 0x2f8   : > { %11922 = vst [vmem:[#allocation118_spill] sm:$0xff] %v8477_v42  ;;  %v2343_v42 = vmul.f32 %v11941_v20, %v8274_v52 }
 0x2f9   : > { %v8481_v40 = vpop.permute.xlu1 %3742  ;;  %3030 = vrot.lane.b32.xlu0 %v2986_v32, %s6269_s9  ;;  %v11926_v32 = vld [vmem:[#allocation17_spill] sm:$0xff] }
 0x2fa   : > { %v3964_v41 = vmul.f32 %v11926_v32, %v8103_v0 }
 0x2fb   : > { %3486 = vrot.lane.b32.xlu1 %v3443_v17, %s6269_s9  ;;  %v8487_v8 = vpop.permute.xlu0 %2783 }
 0x2fc   : > { %11923 = vst [vmem:[#allocation119_spill] sm:$0xff] %v8487_v8  ;;  %v11938_v8 = vld [vmem:[#allocation24_spill] sm:$0xff] }
 0x2fd   : > { %v8491_v3 = vpop.permute.xlu1 %4242  ;;  %3488 = vrot.lane.b32.xlu0 %v3444_v48, %s6269_s9  ;;  %v2467_v48 = vmul.f32 %v11844_v15, %v8128_v45  ;;  %v8543_v15 = vld [vmem:[#allocation4 + $0x188] sm:$0xff] }
 0x2fe   : > { %11924 = vst [vmem:[#allocation120_spill] sm:$0xff] %v8491_v3 }
 0x2ff   : > { %4002 = vrot.lane.b32.xlu1 %v3961_v50, %s6269_s9  ;;  %v8497_v10 = vpop.permute.xlu0 %3332 }
 0x300   : > { %11925 = vst [vmem:[#allocation121_spill] sm:$0xff] %v8497_v10 }
 0x301   : > { %v8501_v17 = vpop.permute.xlu1 %2781  ;;  %4008 = vrot.lane.b32.xlu0 %v3964_v41, %s6269_s9  ;;  %v2988_v41 = vmul.f32 %v11853_v55, %v8130_v33 }
 0x302   : > { %11927 = vst [vmem:[#allocation122_spill] sm:$0xff] %v8501_v17 }
 0x303   : > { %4006 = vrot.lane.b32.xlu1 %v3963_v61, %s6269_s9  ;;  %v8507_v3 = vpop.permute.xlu0 %3748 }
 0x304   : > { %11928 = vst [vmem:[#allocation123_spill] sm:$0xff] %v8507_v3  ;;  %v8601_v3 = vld [vmem:[#allocation4 + $0xe0] sm:$0xff] }
 0x305   : > { %v8511_v50 = vpop.permute.xlu1 %2785  ;;  %2514 = vrot.lane.b32.xlu0 %v2468_v27, %s6269_s9  ;;  %v3446_v27 = vmul.f32 %v11829_v19, %v8130_v33  ;;  %11946 = vst [vmem:[#allocation137_spill] sm:$0xff] %v8601_v3 }
 0x306   : > { %11929 = vst [vmem:[#allocation124_spill] sm:$0xff] %v8511_v50  ;;  %v8559_v50 = vld [vmem:[#allocation4 + $0xd0] sm:$0xff] }
 0x307   : > { %2512 = vrot.lane.b32.xlu1 %v2467_v48, %s6269_s9  ;;  %v8517_v0 = vpop.permute.xlu0 %2486  ;;  %v4202_v37 = vmul.f32 %v8559_v50, %v11937_v43 }
 0x309   : > { %v8521_v61 = vpop.permute.xlu1 %3330  ;;  %3034 = vrot.lane.b32.xlu0 %v2988_v41, %s6269_s9  ;;  %v3966_v41 = vmul.f32 %v11926_v32, %v8130_v33 }
 0x30a   : > { %11930 = vst [vmem:[#allocation125_spill] sm:$0xff] %v8521_v61 }
 0x30b   : > { %2516 = vrot.lane.b32.xlu1 %v2469_v23, %s6269_s9  ;;  %v8527_v10 = vpop.permute.xlu0 %3006  ;;  %v8541_v23 = vld [vmem:[#allocation4 + $0x198] sm:$0xff] }
 0x30c   : > { %11931 = vst [vmem:[#allocation126_spill] sm:$0xff] %v8527_v10  ;;  %v2669_v34 = vmul.f32 %v11938_v8, %v8541_v23 }
 0x30d   : > { %v8531_v48 = vpop.permute.xlu1 %3334  ;;  %3492 = vrot.lane.b32.xlu0 %v3446_v27, %s6269_s9  ;;  %v8552_v27 = vld [vmem:[#allocation4 + $0x88] sm:$0xff] }
 0x30e   : > { %11932 = vst [vmem:[#allocation127_spill] sm:$0xff] %v8531_v48  ;;  %v2989_v48 = vmul.f32 %v11853_v55, %v8116_v28  ;;  %v2668_v55 = vmul.f32 %v11938_v8, %v8545_v38 }
 0x30f   : > { %3032 = vrot.lane.b32.xlu1 %v2987_v25, %s6269_s9  ;;  %v8537_v61 = vpop.permute.xlu0 %3464  ;;  %v11935_v25 = vld [vmem:[#allocation20_spill] sm:$0xff] }
 0x310   : > { %11933 = vst [vmem:[#allocation128_spill] sm:$0xff] %v8537_v61  ;;  %v2610_v54 = vmul.f32 %v8552_v27, %v11935_v25  ;;  %v2611_v7 = vmul.f32 %v8584_v26, %v11935_v25  ;;  %v2398_v61 = vmul.f32 %v8588_v35, %v11889_v5  ;;  %v4204_v35 = vmul.f32 %v8601_v3, %v11827_v21 }
 0x311   : > { %v8547_v2 = vpop.permute.xlu1 %3746  ;;  %4012 = vrot.lane.b32.xlu0 %v3966_v41, %s6269_s9  ;;  %v2667_v41 = vmul.f32 %v11938_v8, %v8543_v15  ;;  %v8592_v8 = vld [vmem:[#allocation4 + $0x110] sm:$0xff] }
 0x312   : > { %11934 = vst [vmem:[#allocation129_spill] sm:$0xff] %v8547_v2  ;;  %11944 = vst [vmem:[#allocation135_spill] sm:$0xff] %v8592_v8  ;;  %v2399_v10 = vmul.f32 %v8592_v8, %v11889_v5  ;;  %v8608_v8 = vld [vmem:[#allocation4 + $0x98] sm:$0xff]  ;;  %v2414_v2 = vadd.f32 %v2398_v61, %v2341_v44  ;;  %v2684_v3 = vadd.f32 %v2668_v55, %v2611_v7 }
 0x313   : > { %3036 = vrot.lane.b32.xlu1 %v2989_v48, %s6269_s9  ;;  %v8557_v33 = vpop.permute.xlu0 %3984  ;;  %v3445_v48 = vmul.f32 %v11829_v19, %v8128_v45  ;;  %v2789_v7 = vsel %vm2518_vm5, %v8265_v13, %v8281_v14  ;;  %v2416_v61 = vadd.f32 %v2400_v9, %v2343_v42 }
 0x314   : > { %11936 = vst [vmem:[#allocation130_spill] sm:$0xff] %v8557_v33  ;;  %v8573_v33 = vld [vmem:[#allocation4] sm:$0xff] }
 0x315   : > { %v8569_v17 = vpop.permute.xlu1 %3750  ;;  %11940 = vst [vmem:[#allocation132_spill] sm:$0xff] %v8573_v33  ;;  %v2340_v46 = vmul.f32 %v8573_v33, %v11941_v20  ;;  %4244 = vrot.lane.b32.xlu0 %v4202_v37, %s6269_s9  ;;  %v2683_v37 = vadd.f32 %v2667_v41, %v2610_v54  ;;  %v2612_v54 = vmul.f32 %v8608_v8, %v11935_v25 }
 0x316   : > { %11939 = vst [vmem:[#allocation131_spill] sm:$0xff] %v8569_v17  ;;  %v2787_v17 = vsel %vm2518_vm5, %v8227_v16, %v8269_v6  ;;  %v2788_v41 = vsel %vm2518_vm5, %v8269_v6, %v8265_v13  ;;  %v2342_v16 = vmul.f32 %v11941_v20, %v7802_v29 }
 0x317   : > { %3490 = vrot.lane.b32.xlu1 %v3445_v48, %s6269_s9  ;;  %v2491_v33 = vpop.permute.xlu0 %2490  ;;  %v3447_v48 = vmul.f32 %v11829_v19, %v8116_v28  ;;  %v2413_v5 = vadd.f32 %v2397_v1, %v2340_v46  ;;  %v4206_v46 = vmul.f32 %v8625_v57, %v11827_v21  ;;  %v11948_v1 = vld [vmem:[#allocation63_spill] sm:$0xff]  ;;  %v2820_v52 = vadd.f32 %v2788_v41, %v2683_v37  ;;  %v8668_v41 = vld [vmem:[#allocation4 + $0x1a0] sm:$0xff] }
 0x318   : > { %v2819_v19 = vadd.f32 %v2787_v17, %v11948_v1  ;;  %v2685_v55 = vadd.f32 %v2669_v34, %v2612_v54  ;;  %v2415_v37 = vadd.f32 %v2399_v10, %v2342_v16  ;;  %v4306_v54 = vmul.f32 %v11887_v49, %v8545_v38  ;;  %11958 = vst [vmem:[#allocation147_spill] sm:$0xff] %v8668_v41  ;;  %v11959_v16 = vld [vmem:[#allocation32_spill] sm:$0xff] }
 0x319   : > { %v2489_v39 = vpop.permute.xlu1 %2488  ;;  %4248 = vrot.lane.b32.xlu0 %v4204_v35, %s6269_s9  ;;  %v2815_v35 = vsel %vm2547_vm6, %v8281_v14, 0.0 }
 0x31a   : > { %v2519_v25 = vsel %vm2518_vm5, %v8517_v0, %v2489_v39  ;;  %v2520_v6 = vsel %vm2518_vm5, %v2489_v39, %v2491_v33  ;;  %v3965_v0 = vmul.f32 %v11926_v32, %v8128_v45  ;;  %v8647_v39 = vld [vmem:[#allocation4 + $0x180] sm:$0xff]  ;;  %v2822_v14 = vadd.f32 %v2815_v35, %v2685_v55 }
 0x31b   : > { %v2552_v58 = vadd.f32 %v2519_v25, %v2413_v5  ;;  %3494 = vrot.lane.b32.xlu1 %v3447_v48, %s6269_s9  ;;  %v2553_v29 = vadd.f32 %v2520_v6, %v2414_v2  ;;  %v8631_v44 = vpop.permute.xlu0 %3010  ;;  %11952 = vst [vmem:[#allocation141_spill] sm:$0xff] %v8647_v39  ;;  %v4304_v13 = vmul.f32 %v8647_v39, %v11887_v49  ;;  %v6088_v48 = vld [vmem:[#allocation4 + $0x80] sm:$0xff] }
 0x31c   : > { %11949 = vst [vmem:[#allocation63_spill] sm:$0xff] %v8631_v44  ;;  %v2821_v45 = vadd.f32 %v2789_v7, %v2684_v3  ;;  %v3640_v6 = vmul.f32 %v6088_v48, %v11959_v16  ;;  %v4308_v7 = vmul.f32 %v7256_v62, %v8668_v41  ;;  %v11983_v44 = vld [vmem:[#allocation34_spill] sm:$0xff] }
 0x31d   : > { %v2493_v17 = vpop.permute.xlu1 %2492  ;;  %4252 = vrot.lane.b32.xlu0 %v4206_v46, %s6269_s9  ;;  %v8641_v5 = vadd.f32 %v2819_v19, %v2552_v58  ;;  %v8643_v2 = vadd.f32 %v2820_v52, %v2553_v29  ;;  %v3967_v58 = vmul.f32 %v11926_v32, %v8116_v28  ;;  %v11961_v28 = vld [vmem:[#allocation45_spill] sm:$0xff]  ;;  %v11962_v29 = vld [vmem:[#allocation36_spill] sm:$0xff]  ;;  %v11974_v32 = vld [vmem:[#allocation38_spill] sm:$0xff] }
 0x31e   : > { %v2548_v34 = vsel %vm2547_vm6, %v2493_v17, 0.0  ;;  %v2521_v25 = vsel %vm2518_vm5, %v2491_v33, %v2493_v17  ;;  %v4203_v1 = vmul.f32 %v11937_v43, %v11961_v28  ;;  %v3656_v55 = vmul.f32 %v8647_v39, %v11962_v29  ;;  %v11969_v28 = vld [vmem:[#allocation35_spill] sm:$0xff]  ;;  %v11977_v39 = vld [vmem:[#allocation41_spill] sm:$0xff] }
 0x31f   : > { %11950 = vst [vmem:[#allocation139_spill] sm:$0xff] %v8641_v5  ;;  %11951 = vst [vmem:[#allocation140_spill] sm:$0xff] %v8643_v2  ;;  %v2555_v9 = vadd.f32 %v2548_v34, %v2416_v61  ;;  %4010 = vrot.lane.b32.xlu1 %v3965_v0, %s6269_s9  ;;  %v2554_v10 = vadd.f32 %v2521_v25, %v2415_v37  ;;  %v8652_v42 = vpop.permute.xlu0 %3468  ;;  %v3752_v0 = vsel %vm2518_vm5, %v8247_v22, %v8311_v53  ;;  %v8690_v34 = vld [vmem:[#allocation4 + $0xe8] sm:$0xff] }
 0x320   : > { %11953 = vst [vmem:[#allocation142_spill] sm:$0xff] %v8652_v42  ;;  %v3672_v61 = vadd.f32 %v3656_v55, %v3640_v6  ;;  %v3642_v17 = vmul.f32 %v8584_v26, %v11959_v16  ;;  %11964 = vst [vmem:[#allocation149_spill] sm:$0xff] %v8690_v34  ;;  %v4205_v25 = vmul.f32 %v8690_v34, %v11827_v21  ;;  %v6090_v6 = vld [vmem:[#allocation4 + $0xa0] sm:$0xff]  ;;  %v8714_v55 = vld [vmem:[#allocation4 + $0x1d0] sm:$0xff] }
 0x321   : > { %v8654_v19 = vpop.permute.xlu1 %3008  ;;  %4336 = vrot.lane.b32.xlu0 %v4304_v13, %s6269_s9  ;;  %v8659_v52 = vadd.f32 %v2821_v45, %v2554_v10  ;;  %v8661_v33 = vadd.f32 %v2822_v14, %v2555_v9  ;;  %v3658_v14 = vmul.f32 %v11962_v29, %v8545_v38  ;;  %v8697_v45 = vld [vmem:[#allocation4 + $0x1a8] sm:$0xff]  ;;  %v3657_v26 = vmul.f32 %v11962_v29, %v8543_v15  ;;  %v8707_v10 = vld [vmem:[#allocation4 + $0x1b0] sm:$0xff]  ;;  %v8786_v34 = vld [vmem:[#allocation4 + $0xc0] sm:$0xff] }
 0x322   : > { %11954 = vst [vmem:[#allocation143_spill] sm:$0xff] %v8654_v19  ;;  %v3784_v13 = vadd.f32 %v3752_v0, %v3672_v61  ;;  %v3754_v9 = vsel %vm2518_vm5, %v8287_v63, %v8321_v59  ;;  %11966 = vst [vmem:[#allocation151_spill] sm:$0xff] %v8707_v10  ;;  %v11968_v38 = vld [vmem:[#allocation27_spill] sm:$0xff]  ;;  %v4207_v61 = vmul.f32 %v11827_v21, %v8207_v11  ;;  %v8768_v11 = vld [vmem:[#allocation4 + $0xb8] sm:$0xff] }
 0x323   : > { %11955 = vst [vmem:[#allocation144_spill] sm:$0xff] %v8659_v52  ;;  %11956 = vst [vmem:[#allocation145_spill] sm:$0xff] %v8661_v33  ;;  %4014 = vrot.lane.b32.xlu1 %v3967_v58, %s6269_s9  ;;  %v8664_v3 = vpop.permute.xlu0 %3988  ;;  %v8709_v58 = vld [vmem:[#allocation4 + $0x1c0] sm:$0xff]  ;;  %v2670_v48 = vmul.f32 %v11968_v38, %v8668_v41  ;;  %v4305_v52 = vmul.f32 %v11887_v49, %v8543_v15  ;;  %v8731_v33 = vmul.f32 %v7256_v62, %v8697_v45  ;;  %v6091_v21 = vld [vmem:[#allocation4 + $0xb0] sm:$0xff] }
 0x324   : > { %11957 = vst [vmem:[#allocation146_spill] sm:$0xff] %v8664_v3  ;;  %11967 = vst [vmem:[#allocation152_spill] sm:$0xff] %v8709_v58  ;;  %v2672_v5 = vmul.f32 %v11968_v38, %v8707_v10  ;;  %v3664_v3 = vmul.f32 %v11974_v32, %v8709_v58  ;;  %v3659_v15 = vmul.f32 %v11962_v29, %v8541_v23 }
 0x325   : > { %v8671_v46 = vpop.permute.xlu1 %3012  ;;  %4340 = vrot.lane.b32.xlu0 %v4306_v54, %s6269_s9  ;;  %v3674_v54 = vadd.f32 %v3658_v14, %v3642_v17  ;;  %11970 = vst [vmem:[#allocation153_spill] sm:$0xff] %v8714_v55  ;;  %v2671_v17 = vmul.f32 %v11968_v38, %v8697_v45  ;;  %v3643_v42 = vmul.f32 %v8608_v8, %v11959_v16  ;;  %11982 = vst [vmem:[#allocation161_spill] sm:$0xff] %v8786_v34 }
 0x326   : > { %11960 = vst [vmem:[#allocation148_spill] sm:$0xff] %v8671_v46  ;;  %v8800_v46 = vld [vmem:[#allocation4 + $0x20] sm:$0xff] }
 0x327   : > { %4246 = vrot.lane.b32.xlu1 %v4203_v1, %s6269_s9  ;;  %v8679_v35 = vpop.permute.xlu0 %2494  ;;  %v3644_v1 = vmul.f32 %v6090_v6, %v11969_v28  ;;  %v3786_v2 = vadd.f32 %v3754_v9, %v3674_v54  ;;  %v3755_v9 = vsel %vm2518_vm5, %v8327_v60, %v8391_v18  ;;  %v8751_v54 = vmul.f32 %v11974_v32, %v8714_v55  ;;  %v11986_v55 = vld [vmem:[#allocation11_spill] sm:$0xff] }
 0x328   : > { %v4307_v60 = vmul.f32 %v11887_v49, %v8541_v23  ;;  %v2344_v43 = vmul.f32 %v8800_v46, %v11986_v55  ;;  %v3675_v58 = vadd.f32 %v3659_v15, %v3643_v42  ;;  %v3758_v42 = vsel %vm2518_vm5, %v8407_v4, %v8471_v31 }
 0x329   : > { %v8688_v37 = vpop.permute.xlu1 %3466  ;;  %4344 = vrot.lane.b32.xlu0 %v4308_v7, %s6269_s9  ;;  %v8716_v7 = vld [vmem:[#allocation4 + $0x1e0] sm:$0xff] }
 0x32a   : > { %11963 = vst [vmem:[#allocation45_spill] sm:$0xff] %v8688_v37  ;;  %11971 = vst [vmem:[#allocation154_spill] sm:$0xff] %v8716_v7  ;;  %v8755_v62 = vmul.f32 %v11977_v39, %v8716_v7  ;;  %v3757_v37 = vsel %vm2518_vm5, %v8367_v24, %v8401_v30 }
 0x32b   : > { %4250 = vrot.lane.b32.xlu1 %v4205_v25, %s6269_s9  ;;  %v8700_v22 = vpop.permute.xlu0 %3014  ;;  %v11973_v25 = vld [vmem:[#allocation39_spill] sm:$0xff] }
 0x32c   : > { %11965 = vst [vmem:[#allocation150_spill] sm:$0xff] %v8700_v22  ;;  %v3660_v14 = vmul.f32 %v11973_v25, %v8668_v41  ;;  %v8744_v41 = vld [vmem:[#allocation4 + $0x1b8] sm:$0xff] }
 0x32d   : > { %v8718_v0 = vpop.permute.xlu1 %3470  ;;  %3816 = vrot.lane.b32.xlu0 %v3784_v13, %s6270_s10  ;;  %v3662_v13 = vmul.f32 %v11973_v25, %v8707_v10  ;;  %11976 = vst [vmem:[#allocation157_spill] sm:$0xff] %v8744_v41 }
 0x32e   : > { %11972 = vst [vmem:[#allocation155_spill] sm:$0xff] %v8718_v0  ;;  %v3676_v10 = vadd.f32 %v3660_v14, %v3644_v1  ;;  %v11979_v0 = vld [vmem:[#allocation23_spill] sm:$0xff]  ;;  %v6093_v1 = vld [vmem:[#allocation4 + $0xa8] sm:$0xff] }
 0x32f   : > { %4254 = vrot.lane.b32.xlu1 %v4207_v61, %s6269_s9  ;;  %v8740_v20 = vpop.permute.xlu0 %3472  ;;  %v3641_v61 = vmul.f32 %v8552_v27, %v11959_v16  ;;  %v2613_v7 = vmul.f32 %v6090_v6, %v11979_v0  ;;  %v2616_v27 = vmul.f32 %v8768_v11, %v11979_v0  ;;  %v2614_v14 = vmul.f32 %v6093_v1, %v11979_v0 }
 0x330   : > { %11975 = vst [vmem:[#allocation156_spill] sm:$0xff] %v8740_v20  ;;  %v3646_v20 = vmul.f32 %v6091_v21, %v11969_v28  ;;  %v2615_v23 = vmul.f32 %v6091_v21, %v11979_v0  ;;  %v3788_v49 = vadd.f32 %v3755_v9, %v3676_v10  ;;  %v8790_v21 = vld [vmem:[#allocation4 + $0x128] sm:$0xff]  ;;  %v8794_v10 = vld [vmem:[#allocation4 + $0x130] sm:$0xff] }
 0x331   : > { %v8760_v22 = vpop.permute.xlu1 %3986  ;;  %3820 = vrot.lane.b32.xlu0 %v3786_v2, %s6270_s10  ;;  %v8777_v2 = vld [vmem:[#allocation4 + $0x120] sm:$0xff]  ;;  %11984 = vst [vmem:[#allocation162_spill] sm:$0xff] %v8790_v21  ;;  %v2403_v9 = vmul.f32 %v8794_v10, %v11832_v56  ;;  %v2686_v32 = vadd.f32 %v2670_v48, %v2613_v7 }
 0x332   : > { %11978 = vst [vmem:[#allocation158_spill] sm:$0xff] %v8760_v22  ;;  %v2673_v22 = vmul.f32 %v11968_v38, %v8744_v41  ;;  %11980 = vst [vmem:[#allocation159_spill] sm:$0xff] %v8777_v2  ;;  %v2401_v8 = vmul.f32 %v8777_v2, %v11832_v56  ;;  %v3648_v38 = vmul.f32 %v8786_v34, %v11983_v44  ;;  %v8805_v34 = vld [vmem:[#allocation4 + $0x28] sm:$0xff] }
 0x333   : > { %4338 = vrot.lane.b32.xlu1 %v4305_v52, %s6269_s9  ;;  %v8781_v6 = vpop.permute.xlu0 %3992  ;;  %v2402_v52 = vmul.f32 %v8790_v21, %v11832_v56  ;;  %v3678_v0 = vadd.f32 %v3662_v13, %v3646_v20  ;;  %11987 = vst [vmem:[#allocation164_spill] sm:$0xff] %v8805_v34  ;;  %v2345_v21 = vmul.f32 %v8805_v34, %v11986_v55 }
 0x334   : > { %11981 = vst [vmem:[#allocation160_spill] sm:$0xff] %v8781_v6  ;;  %v3673_v6 = vadd.f32 %v3657_v26, %v3641_v61  ;;  %v2689_v19 = vadd.f32 %v2673_v22, %v2616_v27  ;;  %v2687_v56 = vadd.f32 %v2671_v17, %v2614_v14  ;;  %v2790_v20 = vsel %vm2518_vm5, %v8307_v36, %v8351_v12  ;;  %v11989_v27 = vld [vmem:[#allocation37_spill] sm:$0xff] }
 0x335   : > { %v8798_v2 = vpop.permute.xlu1 %3990  ;;  %3824 = vrot.lane.b32.xlu0 %v3788_v49, %s6270_s10  ;;  %v2688_v26 = vadd.f32 %v2672_v5, %v2615_v23  ;;  %v2791_v13 = vsel %vm2518_vm5, %v8351_v12, %v8347_v51  ;;  %v3790_v61 = vadd.f32 %v3757_v37, %v3678_v0  ;;  %v3680_v34 = vadd.f32 %v3664_v3, %v3648_v38  ;;  %v8825_v37 = vld [vmem:[#allocation4 + $0x30] sm:$0xff] }
 0x336   : > { %11985 = vst [vmem:[#allocation163_spill] sm:$0xff] %v8798_v2  ;;  %v3645_v2 = vmul.f32 %v6093_v1, %v11969_v28  ;;  %v3650_v22 = vmul.f32 %v8559_v50, %v11983_v44  ;;  %v3753_v36 = vsel %vm2518_vm5, %v8311_v53, %v8287_v63  ;;  %v2417_v5 = vadd.f32 %v2401_v8, %v2344_v43  ;;  %v11990_v1 = vld [vmem:[#allocation137_spill] sm:$0xff] }
 0x337   : > { %4342 = vrot.lane.b32.xlu1 %v4307_v60, %s6269_s9  ;;  %v2499_v49 = vpop.permute.xlu0 %2498  ;;  %v2346_v48 = vmul.f32 %v8825_v37, %v11986_v55  ;;  %v2418_v7 = vadd.f32 %v2402_v52, %v2345_v21  ;;  %v2823_v3 = vadd.f32 %v2790_v20, %v2686_v32  ;;  %v2824_v38 = vadd.f32 %v2791_v13, %v2687_v56  ;;  %v12022_v55 = vld [vmem:[#allocation24_spill] sm:$0xff] }
 0x338   : > { %v2816_v63 = vsel %vm2547_vm6, %v8361_v47, 0.0  ;;  %v3792_v43 = vadd.f32 %v3758_v42, %v3680_v34  ;;  %v2792_v56 = vsel %vm2518_vm5, %v8347_v51, %v8361_v47  ;;  %v3682_v32 = vadd.f32 %v8751_v54, %v3650_v22 }
 0x339   : > { %v2497_v12 = vpop.permute.xlu1 %2496  ;;  %3828 = vrot.lane.b32.xlu0 %v3790_v61, %s6270_s10  ;;  %v3652_v34 = vmul.f32 %v11990_v1, %v11989_v27  ;;  %v3785_v14 = vadd.f32 %v3753_v36, %v3673_v6  ;;  %v2419_v8 = vadd.f32 %v2403_v9, %v2346_v48  ;;  %v3780_v51 = vsel %vm2547_vm6, %v8321_v59, 0.0  ;;  %v11993_v61 = vld [vmem:[#allocation61_spill] sm:$0xff]  ;;  %v8863_v36 = vld [vmem:[#allocation4 + $0x1f0] sm:$0xff] }
 0x33a   : > { %v2522_v4 = vsel %vm2518_vm5, %v8679_v35, %v2497_v12  ;;  %v2523_v0 = vsel %vm2518_vm5, %v2497_v12, %v2499_v49  ;;  %v11988_v35 = vld [vmem:[#allocation59_spill] sm:$0xff]  ;;  %v2826_v47 = vadd.f32 %v2816_v63, %v2689_v19  ;;  %v2825_v20 = vadd.f32 %v2792_v56, %v2688_v26  ;;  %11994 = vst [vmem:[#allocation61_spill] sm:$0xff] %v8863_v36  ;;  %v11995_v19 = vld [vmem:[#allocation129_spill] sm:$0xff] }
 0x33b   : > { %v2556_v53 = vadd.f32 %v2522_v4, %v2417_v5  ;;  %4346 = vrot.lane.b32.xlu1 %v8731_v33, %s6269_s9  ;;  %v2557_v17 = vadd.f32 %v2523_v0, %v2418_v7  ;;  %v8837_v15 = vpop.permute.xlu0 %3018  ;;  %v3760_v60 = vsel %vm2518_vm5, %v11988_v35, %v8481_v40  ;;  %v3661_v22 = vmul.f32 %v11973_v25, %v8697_v45  ;;  %v11996_v5 = vld [vmem:[#allocation118_spill] sm:$0xff]  ;;  %v12000_v63 = vld [vmem:[#allocation131_spill] sm:$0xff] }
 0x33c   : > { %v3794_v13 = vadd.f32 %v3760_v60, %v3682_v32  ;;  %v3684_v59 = vadd.f32 %v8755_v62, %v3652_v34  ;;  %v3787_v26 = vadd.f32 %v3780_v51, %v3675_v58  ;;  %v3654_v12 = vmul.f32 %v8625_v57, %v11989_v27  ;;  %v8900_v60 = vld [vmem:[#allocation4 + $0x1c8] sm:$0xff] }
 0x33d   : > { %v2501_v23 = vpop.permute.xlu1 %2500  ;;  %3832 = vrot.lane.b32.xlu0 %v3792_v43, %s6270_s10  ;;  %v8849_v33 = vadd.f32 %v2823_v3, %v2556_v53  ;;  %v8851_v21 = vadd.f32 %v2824_v38, %v2557_v17  ;;  %v3756_v62 = vsel %vm2518_vm5, %v8391_v18, %v8367_v24  ;;  %v3647_v45 = vmul.f32 %v8768_v11, %v11969_v28  ;;  %v12001_v43 = vld [vmem:[#allocation123_spill] sm:$0xff]  ;;  %v12002_v11 = vld [vmem:[#allocation132_spill] sm:$0xff] }
 0x33e   : > { %v2549_v54 = vsel %vm2547_vm6, %v2501_v23, 0.0  ;;  %v2524_v52 = vsel %vm2518_vm5, %v2499_v49, %v2501_v23  ;;  %v3761_v49 = vsel %vm2518_vm5, %v11996_v5, %v11995_v19  ;;  %v3677_v38 = vadd.f32 %v3661_v22, %v3645_v2  ;;  %12003 = vst [vmem:[#allocation131_spill] sm:$0xff] %v8900_v60  ;;  %v8920_v5 = vld [vmem:[#allocation4 + $0x10] sm:$0xff] }
 0x33f   : > { %11991 = vst [vmem:[#allocation59_spill] sm:$0xff] %v8849_v33  ;;  %11992 = vst [vmem:[#allocation165_spill] sm:$0xff] %v8851_v21  ;;  %v2559_v6 = vadd.f32 %v2549_v54, %v11993_v61  ;;  %3818 = vrot.lane.b32.xlu1 %v3785_v14, %s6270_s10  ;;  %v2558_v9 = vadd.f32 %v2524_v52, %v2419_v8  ;;  %v8859_v42 = vpop.permute.xlu0 %3476  ;;  %v3796_v58 = vadd.f32 %v3761_v49, %v3684_v59  ;;  %v8902_v14 = vld [vmem:[#allocation4 + $0xc8] sm:$0xff] }
 0x340   : > { %v3670_v4 = vmul.f32 %v11977_v39, %v8863_v36  ;;  %v3763_v53 = vsel %vm2518_vm5, %v12001_v43, %v12000_v63  ;;  %v3663_v17 = vmul.f32 %v11973_v25, %v8744_v41  ;;  %v3789_v24 = vadd.f32 %v3756_v62, %v3677_v38  ;;  %12004 = vst [vmem:[#allocation123_spill] sm:$0xff] %v8902_v14  ;;  %v8906_v8 = vld [vmem:[#allocation4 + $0x1e8] sm:$0xff]  ;;  %v12025_v41 = vld [vmem:[#allocation159_spill] sm:$0xff] }
 0x341   : > { %v8871_v48 = vpop.permute.xlu1 %3016  ;;  %3836 = vrot.lane.b32.xlu0 %v3794_v13, %s6270_s10  ;;  %v8874_v7 = vadd.f32 %v2825_v20, %v2558_v9  ;;  %v8876_v3 = vadd.f32 %v2826_v47, %v2559_v6  ;;  %v2876_v2 = vmul.f32 %v12002_v11, %v11959_v16  ;;  %v3781_v32 = vsel %vm2547_vm6, %v8401_v30, 0.0  ;;  %12005 = vst [vmem:[#allocation132_spill] sm:$0xff] %v8906_v8  ;;  %v12006_v47 = vld [vmem:[#allocation133_spill] sm:$0xff]  ;;  %v12007_v20 = vld [vmem:[#allocation143_spill] sm:$0xff]  ;;  %v12008_v30 = vld [vmem:[#allocation126_spill] sm:$0xff] }
 0x342   : > { %v3686_v18 = vadd.f32 %v3670_v4, %v3654_v12  ;;  %v3679_v34 = vadd.f32 %v3663_v17, %v3647_v45  ;;  %v3649_v23 = vmul.f32 %v8902_v14, %v11983_v44  ;;  %v2917_v54 = vmul.f32 %v12006_v47, %v11962_v29  ;;  %v8916_v6 = vld [vmem:[#allocation4 + $0x1d8] sm:$0xff]  ;;  %v12010_v9 = vld [vmem:[#allocation38_spill] sm:$0xff]  ;;  %12011 = vst [vmem:[#allocation143_spill] sm:$0xff] %v8920_v5 }
 0x343   : > { %11997 = vst [vmem:[#allocation129_spill] sm:$0xff] %v8874_v7  ;;  %11998 = vst [vmem:[#allocation118_spill] sm:$0xff] %v8876_v3  ;;  %3822 = vrot.lane.b32.xlu1 %v3787_v26, %s6270_s10  ;;  %v8886_v0 = vpop.permute.xlu0 %3996  ;;  %v3038_v13 = vsel %vm2518_vm5, %v12008_v30, %v12007_v20  ;;  %v3665_v22 = vmul.f32 %v12010_v9, %v8900_v60  ;;  %v2878_v49 = vmul.f32 %v8920_v5, %v11959_v16  ;;  %v12012_v12 = vld [vmem:[#allocation152_spill] sm:$0xff]  ;;  %v12013_v62 = vld [vmem:[#allocation26_spill] sm:$0xff] }
 0x344   : > { %11999 = vst [vmem:[#allocation166_spill] sm:$0xff] %v8886_v0  ;;  %v3798_v51 = vadd.f32 %v3763_v53, %v3686_v18  ;;  %v3791_v61 = vadd.f32 %v3781_v32, %v3679_v34  ;;  %12009 = vst [vmem:[#allocation133_spill] sm:$0xff] %v8916_v6  ;;  %v2933_v59 = vadd.f32 %v2917_v54, %v2876_v2  ;;  %v8936_v4 = vld [vmem:[#allocation4 + $0x1f8] sm:$0xff]  ;;  %v12016_v32 = vld [vmem:[#allocation135_spill] sm:$0xff]  ;;  %v3782_v33 = vsel %vm2547_vm6, %v8481_v40, 0.0 }
 0x345   : > { %v8895_v56 = vpop.permute.xlu1 %3020  ;;  %3840 = vrot.lane.b32.xlu0 %v3796_v58, %s6270_s10  ;;  %v2674_v45 = vmul.f32 %v12013_v62, %v12012_v12  ;;  %v8931_v38 = vmul.f32 %v12013_v62, %v8900_v60  ;;  %v3759_v58 = vsel %vm2518_vm5, %v8471_v31, %v11988_v35  ;;  %12014 = vst [vmem:[#allocation126_spill] sm:$0xff] %v8936_v4  ;;  %v8940_v17 = vld [vmem:[#allocation4 + $0xd8] sm:$0xff]  ;;  %v12018_v35 = vld [vmem:[#allocation153_spill] sm:$0xff]  ;;  %v12020_v3 = vld [vmem:[#allocation63_spill] sm:$0xff] }
 0x346   : > { %v3669_v53 = vmul.f32 %v11977_v39, %v8906_v8  ;;  %12015 = vst [vmem:[#allocation167_spill] sm:$0xff] %v8940_v17  ;;  %v3681_v18 = vadd.f32 %v3665_v22, %v3649_v23  ;;  %v3070_v2 = vadd.f32 %v3038_v13, %v2933_v59  ;;  %v2919_v34 = vmul.f32 %v12016_v32, %v11962_v29  ;;  %v12019_v0 = vld [vmem:[#allocation148_spill] sm:$0xff]  ;;  %v12023_v60 = vld [vmem:[#allocation134_spill] sm:$0xff] }
 0x347   : > { %3826 = vrot.lane.b32.xlu1 %v3789_v24, %s6270_s10  ;;  %v8911_v52 = vpop.permute.xlu0 %2502  ;;  %v3651_v24 = vmul.f32 %v8940_v17, %v11983_v44  ;;  %v2677_v31 = vmul.f32 %v12013_v62, %v8916_v6  ;;  %v2676_v54 = vmul.f32 %v12013_v62, %v12018_v35  ;;  %v3667_v30 = vmul.f32 %v12010_v9, %v8916_v6  ;;  %v12027_v35 = vld [vmem:[#allocation45_spill] sm:$0xff]  ;;  %v9020_v62 = vld [vmem:[#allocation4 + $0x8] sm:$0xff] }
 0x348   : > { %v3040_v23 = vsel %vm2518_vm5, %v12020_v3, %v12019_v0  ;;  %v3793_v13 = vadd.f32 %v3759_v58, %v3681_v18  ;;  %v3671_v22 = vmul.f32 %v11977_v39, %v8936_v4  ;;  %v2935_v7 = vadd.f32 %v2919_v34, %v2878_v49  ;;  %v12029_v4 = vld [vmem:[#allocation27_spill] sm:$0xff] }
 0x349   : > { %v8924_v26 = vpop.permute.xlu1 %3474  ;;  %3844 = vrot.lane.b32.xlu0 %v3798_v51, %s6270_s10  ;;  %v3400_v6 = vmul.f32 %v12006_v47, %v12022_v55  ;;  %v2918_v58 = vmul.f32 %v12023_v60, %v11962_v29  ;;  %v3402_v18 = vmul.f32 %v12016_v32, %v12022_v55  ;;  %v3683_v39 = vadd.f32 %v3667_v30, %v3651_v24  ;;  %v12028_v47 = vld [vmem:[#allocation128_spill] sm:$0xff]  ;;  %v12031_v32 = vld [vmem:[#allocation14_spill] sm:$0xff] }
 0x34a   : > { %v3072_v34 = vadd.f32 %v3040_v23, %v2935_v7  ;;  %v3496_v12 = vsel %vm2518_vm5, %v12028_v47, %v12027_v35  ;;  %v8985_v57 = vmul.f32 %v12025_v41, %v12029_v4  ;;  %v8989_v24 = vmul.f32 %v8794_v10, %v11973_v25  ;;  %v8991_v7 = vld [vmem:[#allocation4 + $0x140] sm:$0xff]  ;;  %v12032_v23 = vld [vmem:[#allocation22_spill] sm:$0xff] }
 0x34b   : > { %3830 = vrot.lane.b32.xlu1 %v3791_v61, %s6270_s10  ;;  %v8947_v51 = vpop.permute.xlu0 %3022  ;;  %v12021_v61 = vld [vmem:[#allocation20_spill] sm:$0xff]  ;;  %12030 = vst [vmem:[#allocation63_spill] sm:$0xff] %v8991_v7  ;;  %v2405_v30 = vmul.f32 %v8991_v7, %v12031_v32  ;;  %v3795_v8 = vadd.f32 %v3782_v33, %v3683_v39  ;;  %v3762_v32 = vsel %vm2518_vm5, %v11995_v19, %v12001_v43  ;;  %v12039_v43 = vld [vmem:[#allocation155_spill] sm:$0xff] }
 0x34c   : > { %12017 = vst [vmem:[#allocation135_spill] sm:$0xff] %v8947_v51  ;;  %v3384_v59 = vmul.f32 %v12002_v11, %v12021_v61  ;;  %v12024_v11 = vld [vmem:[#allocation149_spill] sm:$0xff]  ;;  %v3386_v47 = vmul.f32 %v8920_v5, %v12021_v61  ;;  %v12035_v39 = vld [vmem:[#allocation136_spill] sm:$0xff]  ;;  %v2877_v19 = vmul.f32 %v9020_v62, %v11959_v16 }
 0x34d   : > { %v8962_v21 = vpop.permute.xlu1 %3478  ;;  %3102 = vrot.lane.b32.xlu0 %v3070_v2, %s6270_s10  ;;  %v3653_v49 = vmul.f32 %v12024_v11, %v11989_v27  ;;  %v2921_v2 = vmul.f32 %v12025_v41, %v11973_v25  ;;  %v2620_v41 = vmul.f32 %v8940_v17, %v12032_v23  ;;  %v2920_v33 = vmul.f32 %v12035_v39, %v11962_v29  ;;  %v12040_v29 = vld [vmem:[#allocation142_spill] sm:$0xff] }
 0x34e   : > { %v3416_v11 = vadd.f32 %v3400_v6, %v3384_v59  ;;  %v2619_v6 = vmul.f32 %v8559_v50, %v12032_v23  ;;  %v3498_v50 = vsel %vm2518_vm5, %v12040_v29, %v12039_v43 }
 0x34f   : > { %3834 = vrot.lane.b32.xlu1 %v3793_v13, %s6270_s10  ;;  %v8978_v40 = vpop.permute.xlu0 %3480  ;;  %v12033_v13 = vld [vmem:[#allocation161_spill] sm:$0xff]  ;;  %v3685_v59 = vadd.f32 %v3669_v53, %v3653_v49  ;;  %v2880_v53 = vmul.f32 %v8800_v46, %v11969_v28  ;;  %v2693_v25 = vadd.f32 %v2677_v31, %v2620_v41  ;;  %v12046_v41 = vld [vmem:[#allocation150_spill] sm:$0xff] }
 0x350   : > { %12026 = vst [vmem:[#allocation148_spill] sm:$0xff] %v8978_v40  ;;  %v2617_v36 = vmul.f32 %v12033_v13, %v12032_v23  ;;  %v2618_v40 = vmul.f32 %v8902_v14, %v12032_v23  ;;  %v12036_v13 = vld [vmem:[#allocation82_spill] sm:$0xff]  ;;  %v3528_v5 = vadd.f32 %v3496_v12, %v3416_v11  ;;  %v12038_v14 = vld [vmem:[#allocation93_spill] sm:$0xff] }
 0x351   : > { %v8999_v1 = vpop.permute.xlu1 %3994  ;;  %3106 = vrot.lane.b32.xlu0 %v3072_v34, %s6270_s10  ;;  %v3655_v34 = vmul.f32 %v11989_v27, %v12036_v13  ;;  %v3797_v11 = vadd.f32 %v3762_v32, %v3685_v59  ;;  %v9031_v13 = vld [vmem:[#allocation4 + $0x40] sm:$0xff]  ;;  %v2937_v7 = vadd.f32 %v2921_v2, %v2880_v53 }
 0x352   : > { %12034 = vst [vmem:[#allocation134_spill] sm:$0xff] %v8999_v1  ;;  %v2879_v1 = vmul.f32 %v11959_v16, %v12038_v14  ;;  %v2690_v12 = vadd.f32 %v2674_v45, %v2617_v36  ;;  %v12042_v14 = vld [vmem:[#allocation10_spill] sm:$0xff]  ;;  %v12043_v16 = vld [vmem:[#allocation112_spill] sm:$0xff]  ;;  %v2691_v51 = vadd.f32 %v8931_v38, %v2618_v40  ;;  %v3783_v36 = vsel %vm2547_vm6, %v12000_v63, 0.0  ;;  %v12047_v2 = vld [vmem:[#allocation113_spill] sm:$0xff] }
 0x353   : > { %3838 = vrot.lane.b32.xlu1 %v3795_v8, %s6270_s10  ;;  %v9016_v17 = vpop.permute.xlu0 %4000  ;;  %v3418_v8 = vadd.f32 %v3402_v18, %v3386_v47  ;;  %v2348_v27 = vmul.f32 %v9031_v13, %v12042_v14  ;;  %v2692_v45 = vadd.f32 %v2676_v54, %v2619_v6  ;;  %v12045_v18 = vld [vmem:[#allocation111_spill] sm:$0xff]  ;;  %v3687_v47 = vadd.f32 %v3671_v22, %v3655_v34 }
 0x354   : > { %12037 = vst [vmem:[#allocation45_spill] sm:$0xff] %v9016_v17  ;;  %v12044_v17 = vld [vmem:[#allocation106_spill] sm:$0xff]  ;;  %v2794_v32 = vsel %vm2518_vm5, %v12043_v16, %v12045_v18  ;;  %v2934_v14 = vadd.f32 %v2918_v58, %v2877_v19  ;;  %v3041_v38 = vsel %vm2518_vm5, %v12046_v41, %v8871_v48  ;;  %v2882_v63 = vmul.f32 %v8825_v37, %v11969_v28 }
 0x355   : > { %v9029_v49 = vpop.permute.xlu1 %3998  ;;  %3560 = vrot.lane.b32.xlu0 %v3528_v5, %s6270_s10  ;;  %v2793_v23 = vsel %vm2518_vm5, %v12044_v17, %v12043_v16  ;;  %v3530_v59 = vadd.f32 %v3498_v50, %v3418_v8  ;;  %v3799_v31 = vadd.f32 %v3783_v36, %v3687_v47  ;;  %v2421_v54 = vadd.f32 %v2405_v30, %v2348_v27  ;;  %v12048_v27 = vld [vmem:[#allocation68_spill] sm:$0xff] }
 0x356   : > { %12041 = vst [vmem:[#allocation128_spill] sm:$0xff] %v9029_v49  ;;  %v2936_v49 = vadd.f32 %v2920_v33, %v2879_v1  ;;  %v2827_v17 = vadd.f32 %v2793_v23, %v2690_v12  ;;  %v2828_v16 = vadd.f32 %v2794_v32, %v2691_v51  ;;  %v3039_v1 = vsel %vm2518_vm5, %v12007_v20, %v12020_v3  ;;  %v12049_v20 = vld [vmem:[#allocation23_spill] sm:$0xff] }
 0x357   : > { %3842 = vrot.lane.b32.xlu1 %v3797_v11, %s6270_s10  ;;  %v2507_v5 = vpop.permute.xlu0 %2506  ;;  %v2817_v23 = vsel %vm2547_vm6, %v12047_v2, 0.0  ;;  %v3074_v33 = vadd.f32 %v3041_v38, %v2937_v7  ;;  %v2795_v3 = vsel %vm2518_vm5, %v12045_v18, %v12047_v2  ;;  %v3388_v51 = vmul.f32 %v8800_v46, %v12049_v20 }
 0x358   : > { %v3043_v7 = vsel %vm2518_vm5, %v8837_v15, %v8895_v56  ;;  %v3071_v19 = vadd.f32 %v3039_v1, %v2934_v14  ;;  %v2939_v50 = vadd.f32 %v8989_v24, %v2882_v63  ;;  %v2830_v8 = vadd.f32 %v2817_v23, %v2693_v25  ;;  %v12052_v14 = vld [vmem:[#allocation50_spill] sm:$0xff]  ;;  %v12053_v24 = vld [vmem:[#allocation52_spill] sm:$0xff] }
 0x359   : > { %v2505_v40 = vpop.permute.xlu1 %2504  ;;  %3564 = vrot.lane.b32.xlu0 %v3530_v59, %s6270_s10  ;;  %v3066_v36 = vsel %vm2547_vm6, %v12019_v0, 0.0  ;;  %v2829_v47 = vadd.f32 %v2795_v3, %v2692_v45  ;;  %v3401_v25 = vmul.f32 %v12023_v60, %v12022_v55  ;;  %v12054_v0 = vld [vmem:[#allocation156_spill] sm:$0xff]  ;;  %v3390_v45 = vmul.f32 %v8825_v37, %v12049_v20 }
 0x35a   : > { %v2525_v22 = vsel %vm2518_vm5, %v8911_v52, %v2505_v40  ;;  %v2526_v58 = vsel %vm2518_vm5, %v2505_v40, %v2507_v5  ;;  %v3385_v52 = vmul.f32 %v9020_v62, %v12021_v61  ;;  %v3076_v59 = vadd.f32 %v3043_v7, %v2939_v50  ;;  %v9107_v1 = vld [vmem:[#allocation4 + $0x18] sm:$0xff] }
 0x35b   : > { %v2560_v6 = vadd.f32 %v2525_v22, %v2421_v54  ;;  %3846 = vrot.lane.b32.xlu1 %v3799_v31, %s6270_s10  ;;  %v2561_v30 = vadd.f32 %v2526_v58, %v12048_v27  ;;  %v9062_v34 = vpop.permute.xlu0 %3026  ;;  %v3420_v31 = vadd.f32 %v8985_v57, %v3388_v51  ;;  %v3499_v63 = vsel %vm2518_vm5, %v12054_v0, %v8924_v26  ;;  %v12063_v0 = vld [vmem:[#allocation22_spill] sm:$0xff] }
 0x35c   : > { %v3497_v57 = vsel %vm2518_vm5, %v12027_v35, %v12040_v29  ;;  %v3417_v22 = vadd.f32 %v3401_v25, %v3385_v52  ;;  %v3406_v2 = vmul.f32 %v8794_v10, %v12029_v4  ;;  %v3403_v29 = vmul.f32 %v12035_v39, %v12022_v55  ;;  %v12058_v52 = vld [vmem:[#allocation164_spill] sm:$0xff]  ;;  %v12127_v55 = vld [vmem:[#allocation146_spill] sm:$0xff] }
 0x35d   : > { %v2509_v53 = vpop.permute.xlu1 %2508  ;;  %3110 = vrot.lane.b32.xlu0 %v3074_v33, %s6270_s10  ;;  %v9076_v12 = vadd.f32 %v2827_v17, %v2560_v6  ;;  %v9078_v11 = vadd.f32 %v2828_v16, %v2561_v30  ;;  %v3532_v58 = vadd.f32 %v3499_v63, %v3420_v31  ;;  %v3501_v33 = vsel %vm2518_vm5, %v8859_v42, %v8962_v21 }
 0x35e   : > { %v2550_v18 = vsel %vm2547_vm6, %v2509_v53, 0.0  ;;  %v2527_v32 = vsel %vm2518_vm5, %v2507_v5, %v2509_v53  ;;  %v3073_v5 = vadd.f32 %v3066_v36, %v2936_v49  ;;  %v3387_v49 = vmul.f32 %v9107_v1, %v12021_v61  ;;  %v12060_v53 = vld [vmem:[#allocation135_spill] sm:$0xff] }
 0x35f   : > { %12050 = vst [vmem:[#allocation161_spill] sm:$0xff] %v9076_v12  ;;  %12051 = vst [vmem:[#allocation136_spill] sm:$0xff] %v9078_v11  ;;  %v2563_v41 = vadd.f32 %v2550_v18, %v12052_v14  ;;  %3104 = vrot.lane.b32.xlu1 %v3071_v19, %s6270_s10  ;;  %v2562_v38 = vadd.f32 %v2527_v32, %v12053_v24  ;;  %v9087_v17 = vpop.permute.xlu0 %3484  ;;  %v3529_v35 = vadd.f32 %v3497_v57, %v3417_v22  ;;  %v12059_v19 = vld [vmem:[#allocation63_spill] sm:$0xff]  ;;  %v12062_v32 = vld [vmem:[#allocation162_spill] sm:$0xff] }
 0x360   : > { %v3422_v6 = vadd.f32 %v3406_v2, %v3390_v45  ;;  %v2884_v27 = vmul.f32 %v9031_v13, %v11983_v44  ;;  %v3524_v10 = vsel %vm2547_vm6, %v12039_v43, 0.0  ;;  %v3419_v3 = vadd.f32 %v3403_v29, %v3387_v49  ;;  %v12061_v18 = vld [vmem:[#allocation39_spill] sm:$0xff]  ;;  %v12064_v45 = vld [vmem:[#allocation26_spill] sm:$0xff]  ;;  %v12065_v49 = vld [vmem:[#allocation53_spill] sm:$0xff] }
 0x361   : > { %v9097_v54 = vpop.permute.xlu1 %3024  ;;  %3114 = vrot.lane.b32.xlu0 %v3076_v59, %s6270_s10  ;;  %v9100_v40 = vadd.f32 %v2829_v47, %v2562_v38  ;;  %v9102_v16 = vadd.f32 %v2830_v8, %v2563_v41  ;;  %v2881_v51 = vmul.f32 %v12058_v52, %v11969_v28  ;;  %v2925_v39 = vmul.f32 %v12059_v19, %v12010_v9  ;;  %v12066_v2 = vld [vmem:[#allocation148_spill] sm:$0xff]  ;;  %v12142_v12 = vld [vmem:[#allocation101_spill] sm:$0xff] }
 0x362   : > { %v3534_v7 = vadd.f32 %v3501_v33, %v3422_v6  ;;  %v3044_v8 = vsel %vm2518_vm5, %v12060_v53, %v9097_v54  ;;  %v3531_v36 = vadd.f32 %v3524_v10, %v3419_v3  ;;  %v2922_v47 = vmul.f32 %v12062_v32, %v12061_v18  ;;  %v12067_v29 = vld [vmem:[#allocation48_spill] sm:$0xff]  ;;  %v12070_v53 = vld [vmem:[#allocation25_spill] sm:$0xff] }
 0x363   : > { %12055 = vst [vmem:[#allocation82_spill] sm:$0xff] %v9100_v40  ;;  %12056 = vst [vmem:[#allocation93_spill] sm:$0xff] %v9102_v16  ;;  %3108 = vrot.lane.b32.xlu1 %v3073_v5, %s6270_s10  ;;  %v9114_v23 = vpop.permute.xlu0 %4004  ;;  %v2941_v43 = vadd.f32 %v2925_v39, %v2884_v27  ;;  %v3042_v14 = vsel %vm2518_vm5, %v8871_v48, %v8837_v15  ;;  %v3392_v63 = vmul.f32 %v9031_v13, %v12063_v0 }
 0x364   : > { %12057 = vst [vmem:[#allocation155_spill] sm:$0xff] %v9114_v23  ;;  %v2938_v41 = vadd.f32 %v2922_v47, %v2881_v51  ;;  %v3067_v15 = vsel %vm2547_vm6, %v8895_v56, 0.0  ;;  %v3389_v48 = vmul.f32 %v12058_v52, %v12049_v20  ;;  %v3408_v57 = vmul.f32 %v12059_v19, %v12064_v45 }
 0x365   : > { %v9123_v30 = vpop.permute.xlu1 %3028  ;;  %3568 = vrot.lane.b32.xlu0 %v3532_v58, %s6270_s10  ;;  %v3078_v24 = vadd.f32 %v3044_v8, %v2941_v43  ;;  %v3405_v56 = vmul.f32 %v12062_v32, %v12029_v4  ;;  %v3500_v10 = vsel %vm2518_vm5, %v8924_v26, %v8859_v42  ;;  %v12071_v8 = vld [vmem:[#allocation137_spill] sm:$0xff]  ;;  %v3525_v42 = vsel %vm2547_vm6, %v8962_v21, 0.0  ;;  %v12074_v26 = vld [vmem:[#allocation154_spill] sm:$0xff]  ;;  %v12087_v4 = vld [vmem:[#allocation124_spill] sm:$0xff] }
 0x366   : > { %v3046_v25 = vsel %vm2518_vm5, %v9062_v34, %v9123_v30  ;;  %v3075_v31 = vadd.f32 %v3042_v14, %v2938_v41  ;;  %v3424_v6 = vadd.f32 %v3408_v57, %v3392_v63  ;;  %v12072_v32 = vld [vmem:[#allocation149_spill] sm:$0xff]  ;;  %v12077_v63 = vld [vmem:[#allocation56_spill] sm:$0xff]  ;;  %v12078_v57 = vld [vmem:[#allocation122_spill] sm:$0xff] }
 0x367   : > { %3562 = vrot.lane.b32.xlu1 %v3529_v35, %s6270_s10  ;;  %v2511_v50 = vpop.permute.xlu0 %2510  ;;  %v3080_v22 = vadd.f32 %v3046_v25, %v12065_v49  ;;  %v3077_v35 = vadd.f32 %v3067_v15, %v12067_v29  ;;  %v3421_v3 = vadd.f32 %v3405_v56, %v3389_v48  ;;  %v2622_v47 = vmul.f32 %v12072_v32, %v12070_v53  ;;  %v12075_v41 = vld [vmem:[#allocation29_spill] sm:$0xff]  ;;  %v12076_v25 = vld [vmem:[#allocation132_spill] sm:$0xff]  ;;  %v12079_v49 = vld [vmem:[#allocation115_spill] sm:$0xff] }
 0x369   : > { %v9138_v59 = vpop.permute.xlu1 %3482  ;;  %3572 = vrot.lane.b32.xlu0 %v3534_v7, %s6270_s10  ;;  %v3533_v43 = vadd.f32 %v3500_v10, %v3421_v3  ;;  %v12082_v10 = vld [vmem:[#allocation138_spill] sm:$0xff] }
 0x36a   : > { %v3502_v33 = vsel %vm2518_vm5, %v12066_v2, %v9138_v59  ;;  %v9201_v2 = vld [vmem:[#allocation4 + $0xf8] sm:$0xff]  ;;  %v2623_v3 = vmul.f32 %v12082_v10, %v12070_v53  ;;  %v12085_v10 = vld [vmem:[#allocation71_spill] sm:$0xff] }
 0x36b   : > { %3566 = vrot.lane.b32.xlu1 %v3531_v36, %s6270_s10  ;;  %v9145_v38 = vpop.permute.xlu0 %3030  ;;  %v3536_v51 = vadd.f32 %v3502_v33, %v3424_v6  ;;  %v2621_v36 = vmul.f32 %v12071_v8, %v12070_v53  ;;  %v2624_v21 = vmul.f32 %v9201_v2, %v12070_v53  ;;  %v12080_v33 = vld [vmem:[#allocation61_spill] sm:$0xff] }
 0x36c   : > { %v2680_v29 = vmul.f32 %v12075_v41, %v12080_v33 }
 0x36d   : > { %v9152_v5 = vpop.permute.xlu1 %3486  ;;  %3118 = vrot.lane.b32.xlu0 %v3078_v24, %s6270_s10  ;;  %v2678_v24 = vmul.f32 %v12075_v41, %v12074_v26 }
 0x36e   : > { %v3504_v39 = vsel %vm2518_vm5, %v9087_v17, %v9152_v5 }
 0x36f   : > { %3112 = vrot.lane.b32.xlu1 %v3075_v31, %s6270_s10  ;;  %v9163_v58 = vpop.permute.xlu0 %3488  ;;  %v2679_v31 = vmul.f32 %v12075_v41, %v12076_v25  ;;  %v3538_v15 = vadd.f32 %v3504_v39, %v12077_v63  ;;  %v2694_v6 = vadd.f32 %v2678_v24, %v2621_v36  ;;  %v12083_v39 = vld [vmem:[#allocation62_spill] sm:$0xff] }
 0x370   : > { %v3535_v8 = vadd.f32 %v3525_v42, %v12083_v39  ;;  %v12086_v42 = vld [vmem:[#allocation77_spill] sm:$0xff] }
 0x371   : > { %v9171_v27 = vpop.permute.xlu1 %4002  ;;  %3122 = vrot.lane.b32.xlu0 %v3080_v22, %s6270_s10  ;;  %v2796_v22 = vsel %vm2518_vm5, %v12079_v49, %v12078_v57  ;;  %v3045_v49 = vsel %vm2518_vm5, %v9097_v54, %v9062_v34  ;;  %v2696_v54 = vadd.f32 %v2680_v29, %v2623_v3  ;;  %v12093_v3 = vld [vmem:[#allocation49_spill] sm:$0xff] }
 0x372   : > { %12068 = vst [vmem:[#allocation142_spill] sm:$0xff] %v9171_v27  ;;  %v2831_v24 = vadd.f32 %v2796_v22, %v2694_v6  ;;  %v3068_v6 = vsel %vm2547_vm6, %v9123_v30, 0.0  ;;  %v3503_v30 = vsel %vm2518_vm5, %v9138_v59, %v9087_v17  ;;  %v12099_v17 = vld [vmem:[#allocation80_spill] sm:$0xff]  ;;  %v4284_v27 = vsel %vm2547_vm6, %v12142_v12, 0.0 }
 0x373   : > { %3116 = vrot.lane.b32.xlu1 %v3077_v35, %s6270_s10  ;;  %v9178_v7 = vpop.permute.xlu0 %4008  ;;  %v12081_v35 = vld [vmem:[#allocation119_spill] sm:$0xff] }
 0x374   : > { %12069 = vst [vmem:[#allocation112_spill] sm:$0xff] %v9178_v7  ;;  %v2797_v56 = vsel %vm2518_vm5, %v12078_v57, %v12081_v35  ;;  %v2798_v34 = vsel %vm2518_vm5, %v12081_v35, %v12087_v4  ;;  %v12136_v7 = vld [vmem:[#allocation159_spill] sm:$0xff] }
 0x375   : > { %v9187_v14 = vpop.permute.xlu1 %4006  ;;  %3576 = vrot.lane.b32.xlu0 %v3536_v51, %s6270_s10  ;;  %v2695_v51 = vadd.f32 %v2679_v31, %v2622_v47 }
 0x376   : > { %12073 = vst [vmem:[#allocation106_spill] sm:$0xff] %v9187_v14  ;;  %v6115_v14 = vld [vmem:[#allocation4] sm:$0xff] }
 0x377   : > { %3570 = vrot.lane.b32.xlu1 %v3533_v43, %s6270_s10  ;;  %v2515_v48 = vpop.permute.xlu0 %2514  ;;  %v12084_v43 = vld [vmem:[#allocation126_spill] sm:$0xff]  ;;  %v2832_v57 = vadd.f32 %v2797_v56, %v2695_v51 }
 0x378   : > { %v2681_v63 = vmul.f32 %v12075_v41, %v12084_v43  ;;  %v2818_v41 = vsel %vm2547_vm6, %v12087_v4, 0.0  ;;  %v12092_v4 = vld [vmem:[#allocation78_spill] sm:$0xff] }
 0x379   : > { %v2513_v32 = vpop.permute.xlu1 %2512  ;;  %3580 = vrot.lane.b32.xlu0 %v3538_v15, %s6270_s10 }
 0x37a   : > { %v2528_v45 = vsel %vm2518_vm5, %v2511_v50, %v2513_v32  ;;  %v2529_v36 = vsel %vm2518_vm5, %v2513_v32, %v2515_v48  ;;  %v2697_v39 = vadd.f32 %v2681_v63, %v2624_v21  ;;  %v12088_v50 = vld [vmem:[#allocation51_spill] sm:$0xff]  ;;  %v2833_v63 = vadd.f32 %v2798_v34, %v2696_v54 }
 0x37b   : > { %v2564_v47 = vadd.f32 %v2528_v45, %v12085_v10  ;;  %3574 = vrot.lane.b32.xlu1 %v3535_v8, %s6270_s10  ;;  %v2565_v31 = vadd.f32 %v2529_v36, %v12086_v42  ;;  %v3035_v15 = vpop.permute.xlu0 %3034  ;;  %v3079_v32 = vadd.f32 %v3045_v49, %v12088_v50  ;;  %v12091_v36 = vld [vmem:[#allocation74_spill] sm:$0xff]  ;;  %v3081_v49 = vadd.f32 %v3068_v6, %v12093_v3 }
 0x37c   : > { %v2834_v8 = vadd.f32 %v2818_v41, %v2697_v39  ;;  %v12098_v39 = vld [vmem:[#allocation55_spill] sm:$0xff]  ;;  %v3526_v50 = vsel %vm2547_vm6, %v9152_v5, 0.0 }
 0x37d   : > { %v2517_v22 = vpop.permute.xlu1 %2516  ;;  %v9230_v56 = vadd.f32 %v2831_v24, %v2564_v47  ;;  %v9232_v45 = vadd.f32 %v2832_v57, %v2565_v31  ;;  %v3537_v34 = vadd.f32 %v3503_v30, %v12098_v39  ;;  %v12105_v30 = vld [vmem:[#allocation84_spill] sm:$0xff]  ;;  %v12109_v39 = vld [vmem:[#allocation151_spill] sm:$0xff] }
 0x37e   : > { %v2551_v21 = vsel %vm2547_vm6, %v2517_v22, 0.0  ;;  %v2530_v51 = vsel %vm2518_vm5, %v2515_v48, %v2517_v22  ;;  %v12096_v48 = vld [vmem:[#allocation75_spill] sm:$0xff]  ;;  %v12101_v22 = vld [vmem:[#allocation54_spill] sm:$0xff] }
 0x37f   : > { %12089 = vst [vmem:[#allocation111_spill] sm:$0xff] %v9230_v56  ;;  %12090 = vst [vmem:[#allocation150_spill] sm:$0xff] %v9232_v45  ;;  %v2567_v10 = vadd.f32 %v2551_v21, %v12091_v36  ;;  %3120 = vrot.lane.b32.xlu1 %v3079_v32, %s6270_s10  ;;  %v2566_v29 = vadd.f32 %v2530_v51, %v12092_v4  ;;  %v3493_v35 = vpop.permute.xlu0 %3492  ;;  %v3539_v6 = vadd.f32 %v3526_v50, %v12101_v22  ;;  %v12132_v56 = vld [vmem:[#allocation91_spill] sm:$0xff] }
 0x381   : > { %v3033_v24 = vpop.permute.xlu1 %3032  ;;  %v9242_v57 = vadd.f32 %v2833_v63, %v2566_v29  ;;  %v9244_v47 = vadd.f32 %v2834_v8, %v2567_v10  ;;  %v12102_v63 = vld [vmem:[#allocation79_spill] sm:$0xff]  ;;  %v12104_v10 = vld [vmem:[#allocation81_spill] sm:$0xff] }
 0x382   : > { %v3047_v41 = vsel %vm2518_vm5, %v9145_v38, %v3033_v24  ;;  %v3048_v8 = vsel %vm2518_vm5, %v3033_v24, %v3035_v15 }
 0x383   : > { %12094 = vst [vmem:[#allocation113_spill] sm:$0xff] %v9242_v57  ;;  %12095 = vst [vmem:[#allocation68_spill] sm:$0xff] %v9244_v47  ;;  %v3082_v42 = vadd.f32 %v3047_v41, %v12096_v48  ;;  %3124 = vrot.lane.b32.xlu1 %v3081_v49, %s6270_s10  ;;  %v9253_v31 = vpop.permute.xlu0 %4012  ;;  %v3083_v4 = vadd.f32 %v3048_v8, %v12104_v10  ;;  %v12115_v8 = vld [vmem:[#allocation83_spill] sm:$0xff]  ;;  %v12117_v10 = vld [vmem:[#allocation153_spill] sm:$0xff] }
 0x384   : > { %12097 = vst [vmem:[#allocation50_spill] sm:$0xff] %v9253_v31  ;;  %v12130_v47 = vld [vmem:[#allocation133_spill] sm:$0xff]  ;;  %v12135_v31 = vld [vmem:[#allocation11_spill] sm:$0xff] }
 0x385   : > { %v3037_v54 = vpop.permute.xlu1 %3036  ;;  %3126 = vrot.lane.b32.xlu0 %v3082_v42, %s6270_s10 }
 0x386   : > { %v3049_v32 = vsel %vm2518_vm5, %v3035_v15, %v3037_v54  ;;  %v3069_v3 = vsel %vm2547_vm6, %v3037_v54, 0.0  ;;  %v12107_v15 = vld [vmem:[#allocation76_spill] sm:$0xff] }
 0x387   : > { %3578 = vrot.lane.b32.xlu1 %v3537_v34, %s6270_s10  ;;  %v3084_v59 = vadd.f32 %v3049_v32, %v12099_v17  ;;  %v9262_v38 = vpop.permute.xlu0 %4244  ;;  %v3085_v24 = vadd.f32 %v3069_v3, %v12107_v15  ;;  %v12110_v34 = vld [vmem:[#allocation31_spill] sm:$0xff] }
 0x388   : > { %12100 = vst [vmem:[#allocation52_spill] sm:$0xff] %v9262_v38  ;;  %v4310_v54 = vmul.f32 %v12110_v34, %v12109_v39  ;;  %v12111_v32 = vld [vmem:[#allocation87_spill] sm:$0xff] }
 0x389   : > { %v3491_v21 = vpop.permute.xlu1 %3490  ;;  %3130 = vrot.lane.b32.xlu0 %v3084_v59, %s6270_s10  ;;  %v9321_v39 = vld [vmem:[#allocation4 + $0x190] sm:$0xff] }
 0x38a   : > { %v3505_v51 = vsel %vm2518_vm5, %v9163_v58, %v3491_v21  ;;  %v3506_v42 = vsel %vm2518_vm5, %v3491_v21, %v3493_v35  ;;  %v12134_v38 = vld [vmem:[#allocation163_spill] sm:$0xff] }
 0x38b   : > { %v3540_v5 = vadd.f32 %v3505_v51, %v12102_v63  ;;  %3582 = vrot.lane.b32.xlu1 %v3539_v6, %s6270_s10  ;;  %v9271_v36 = vpop.permute.xlu0 %4248  ;;  %v3541_v17 = vadd.f32 %v3506_v42, %v12111_v32  ;;  %v12113_v6 = vld [vmem:[#allocation152_spill] sm:$0xff]  ;;  %v12114_v51 = vld [vmem:[#allocation30_spill] sm:$0xff]  ;;  %v12121_v32 = vld [vmem:[#allocation147_spill] sm:$0xff]  ;;  %v4044_v40 = vsel %vm2547_vm6, %v12134_v38, 0.0 }
 0x38c   : > { %12103 = vst [vmem:[#allocation156_spill] sm:$0xff] %v9271_v36  ;;  %v12133_v36 = vld [vmem:[#allocation96_spill] sm:$0xff] }
 0x38d   : > { %v3495_v29 = vpop.permute.xlu1 %3494  ;;  %3584 = vrot.lane.b32.xlu0 %v3540_v5, %s6270_s10 }
 0x38e   : > { %v3507_v49 = vsel %vm2518_vm5, %v3493_v35, %v3495_v29  ;;  %v3527_v22 = vsel %vm2547_vm6, %v3495_v29, 0.0  ;;  %v4312_v35 = vmul.f32 %v12114_v51, %v12113_v6  ;;  %v12123_v6 = vld [vmem:[#allocation130_spill] sm:$0xff] }
 0x38f   : > { %v3542_v41 = vadd.f32 %v3507_v49, %v12105_v30  ;;  %3128 = vrot.lane.b32.xlu1 %v3083_v4, %s6270_s10  ;;  %v9279_v58 = vpop.permute.xlu0 %4252  ;;  %v3543_v63 = vadd.f32 %v3527_v22, %v12115_v8  ;;  %v4314_v4 = vmul.f32 %v12114_v51, %v12117_v10  ;;  %v12119_v49 = vld [vmem:[#allocation157_spill] sm:$0xff]  ;;  %v12122_v22 = vld [vmem:[#allocation158_spill] sm:$0xff] }
 0x390   : > { %12106 = vst [vmem:[#allocation164_spill] sm:$0xff] %v9279_v58  ;;  %v4311_v30 = vmul.f32 %v12110_v34, %v12119_v49  ;;  %v12124_v8 = vld [vmem:[#allocation33_spill] sm:$0xff] }
 0x391   : > { %v9282_v48 = vpop.permute.xlu1 %4010  ;;  %3588 = vrot.lane.b32.xlu0 %v3542_v41, %s6270_s10  ;;  %v12120_v41 = vld [vmem:[#allocation141_spill] sm:$0xff]  ;;  %v4317_v57 = vmul.f32 %v12124_v8, %v12076_v25  ;;  %v4318_v45 = vmul.f32 %v12124_v8, %v12080_v33 }
 0x392   : > { %12108 = vst [vmem:[#allocation63_spill] sm:$0xff] %v9282_v48  ;;  %v4176_v15 = vmul.f32 %v12120_v41, %v12021_v61  ;;  %v9341_v41 = vld [vmem:[#allocation4 + $0x100] sm:$0xff]  ;;  %v3940_v48 = vmul.f32 %v12136_v7, %v12135_v31 }
 0x393   : > { %3132 = vrot.lane.b32.xlu1 %v3085_v24, %s6270_s10  ;;  %v9289_v50 = vpop.permute.xlu0 %4336  ;;  %v9317_v24 = vld [vmem:[#allocation4 + $0x188] sm:$0xff] }
 0x394   : > { %v4177_v42 = vmul.f32 %v9317_v24, %v12021_v61 }
 0x395   : > { %v9292_v59 = vpop.permute.xlu1 %4014  ;;  %4348 = vrot.lane.b32.xlu0 %v4310_v54, %s6269_s9  ;;  %v4178_v54 = vmul.f32 %v9321_v39, %v12021_v61 }
 0x396   : > { %12112 = vst [vmem:[#allocation135_spill] sm:$0xff] %v9292_v59 }
 0x397   : > { %3586 = vrot.lane.b32.xlu1 %v3541_v17, %s6270_s10  ;;  %v9299_v21 = vpop.permute.xlu0 %4340  ;;  %v9327_v17 = vmul.f32 %v12121_v32, %v12049_v20  ;;  %v12126_v32 = vld [vmem:[#allocation9_spill] sm:$0xff] }
 0x398   : > { %v3936_v34 = vmul.f32 %v9341_v41, %v12126_v32 }
 0x399   : > { %v9302_v5 = vpop.permute.xlu1 %4246  ;;  %4352 = vrot.lane.b32.xlu0 %v4312_v35, %s6269_s9  ;;  %v4016_v35 = vsel %vm2518_vm5, %v12123_v6, %v12122_v22  ;;  %v4017_v6 = vsel %vm2518_vm5, %v12122_v22, %v12127_v55  ;;  %v12131_v22 = vld [vmem:[#allocation99_spill] sm:$0xff] }
 0x39a   : > { %12116 = vst [vmem:[#allocation162_spill] sm:$0xff] %v9302_v5  ;;  %v4256_v58 = vsel %vm2518_vm5, %v12132_v56, %v12131_v22  ;;  %v9371_v5 = vld [vmem:[#allocation4 + $0x118] sm:$0xff]  ;;  %v4018_v56 = vsel %vm2518_vm5, %v12127_v55, %v12134_v38 }
 0x39b   : > { %3590 = vrot.lane.b32.xlu1 %v3543_v63, %s6270_s10  ;;  %v9308_v3 = vpop.permute.xlu0 %4344  ;;  %v4316_v63 = vmul.f32 %v12124_v8, %v12074_v26  ;;  %v3937_v26 = vmul.f32 %v12023_v60, %v12126_v32  ;;  %v4257_v60 = vsel %vm2518_vm5, %v12131_v22, %v12133_v36  ;;  %v3939_v59 = vmul.f32 %v9371_v5, %v12126_v32  ;;  %v12139_v22 = vld [vmem:[#allocation67_spill] sm:$0xff]  ;;  %v12141_v55 = vld [vmem:[#allocation36_spill] sm:$0xff] }
 0x39c   : > { %v4448_v23 = vmul.f32 %v6115_v14, %v12141_v55  ;;  %v4288_v11 = vadd.f32 %v4256_v58, %v4176_v15  ;;  %v4289_v7 = vadd.f32 %v4257_v60, %v4177_v42 }
 0x39d   : > { %v9310_v29 = vpop.permute.xlu1 %4250  ;;  %4356 = vrot.lane.b32.xlu0 %v4314_v4, %s6269_s9  ;;  %v9337_v4 = vld [vmem:[#allocation4 + $0x198] sm:$0xff]  ;;  %v4051_v15 = vadd.f32 %v4044_v40, %v3939_v59 }
 0x39e   : > { %12118 = vst [vmem:[#allocation53_spill] sm:$0xff] %v9310_v29  ;;  %v4179_v49 = vmul.f32 %v9337_v4, %v12021_v61  ;;  %v4315_v61 = vmul.f32 %v12114_v51, %v12130_v47  ;;  %v9367_v29 = vld [vmem:[#allocation4 + $0x110] sm:$0xff] }
 0x39f   : > { %4350 = vrot.lane.b32.xlu1 %v4311_v30, %s6269_s9  ;;  %v9335_v10 = vpop.permute.xlu0 %3816  ;;  %v12128_v30 = vld [vmem:[#allocation131_spill] sm:$0xff] }
 0x3a0   : > { %12125 = vst [vmem:[#allocation148_spill] sm:$0xff] %v9335_v10  ;;  %v4313_v44 = vmul.f32 %v12114_v51, %v12128_v30  ;;  %v4049_v51 = vadd.f32 %v4017_v6, %v3937_v26  ;;  %v12140_v26 = vld [vmem:[#allocation70_spill] sm:$0xff]  ;;  %v4291_v59 = vadd.f32 %v4284_v27, %v4179_v49 }
 0x3a1   : > { %v9352_v28 = vpop.permute.xlu1 %4254  ;;  %4360 = vrot.lane.b32.xlu0 %v4316_v63, %s6269_s9  ;;  %v3938_v63 = vmul.f32 %v9367_v29, %v12126_v32 }
 0x3a2   : > { %12129 = vst [vmem:[#allocation48_spill] sm:$0xff] %v9352_v28  ;;  %v4048_v28 = vadd.f32 %v4016_v35, %v3936_v34  ;;  %v12138_v35 = vld [vmem:[#allocation60_spill] sm:$0xff] }
 0x3a3   : > { %4354 = vrot.lane.b32.xlu1 %v4313_v44, %s6269_s9  ;;  %v9381_v34 = vpop.permute.xlu0 %3820  ;;  %v4128_v6 = vsel %vm2518_vm5, %v12139_v22, %v12138_v35  ;;  %v4129_v16 = vsel %vm2518_vm5, %v12138_v35, %v12140_v26  ;;  %v4258_v44 = vsel %vm2518_vm5, %v12133_v36, %v12142_v12  ;;  %v4050_v35 = vadd.f32 %v4018_v56, %v3938_v63  ;;  %v12144_v12 = vld [vmem:[#allocation46_spill] sm:$0xff] }
 0x3a4   : > { %12137 = vst [vmem:[#allocation137_spill] sm:$0xff] %v9381_v34  ;;  %v4160_v34 = vadd.f32 %v4128_v6, %v4048_v28  ;;  %v4161_v58 = vadd.f32 %v4129_v16, %v4049_v51  ;;  %v4156_v28 = vsel %vm2547_vm6, %v12144_v12, 0.0  ;;  %v12145_v63 = vld [vmem:[#allocation134_spill] sm:$0xff]  ;;  %v12147_v16 = vld [vmem:[#allocation143_spill] sm:$0xff] }
 0x3a5   : > { %v4339_v22 = vpop.permute.xlu1 %4338  ;;  %4364 = vrot.lane.b32.xlu0 %v4318_v45, %s6269_s9  ;;  %v4130_v45 = vsel %vm2518_vm5, %v12140_v26, %v12144_v12  ;;  %v4450_v40 = vmul.f32 %v12147_v16, %v12141_v55  ;;  %v12150_v26 = vld [vmem:[#allocation108_spill] sm:$0xff]  ;;  %v4449_v16 = vmul.f32 %v9020_v62, %v12141_v55  ;;  %v4456_v62 = vmul.f32 %v9031_v13, %v12010_v9 }
 0x3a6   : > { %v4368_v38 = vsel %vm2518_vm5, %v9289_v50, %v4339_v22  ;;  %v4369_v14 = vsel %vm2518_vm5, %v4339_v22, %v9299_v21  ;;  %v12146_v50 = vld [vmem:[#allocation160_spill] sm:$0xff] }
 0x3a7   : > { %v4400_v42 = vadd.f32 %v4368_v38, %v4288_v11  ;;  %v4401_v60 = vadd.f32 %v4369_v14, %v4289_v7  ;;  %4358 = vrot.lane.b32.xlu1 %v4315_v61, %s6269_s9  ;;  %v9403_v36 = vpop.permute.xlu0 %3824  ;;  %v4019_v56 = vsel %vm2518_vm5, %v12146_v50, %v12145_v63  ;;  %v4290_v11 = vadd.f32 %v4258_v44, %v4178_v54  ;;  %v12151_v7 = vld [vmem:[#allocation100_spill] sm:$0xff]  ;;  %v6153_v63 = vld [vmem:[#allocation4 + $0xe8] sm:$0xff] }
 0x3a8   : > { %12143 = vst [vmem:[#allocation149_spill] sm:$0xff] %v9403_v36  ;;  %v4259_v22 = vsel %vm2518_vm5, %v12151_v7, %v12150_v26  ;;  %v4162_v38 = vadd.f32 %v4130_v45, %v4050_v35  ;;  %v4163_v50 = vadd.f32 %v4156_v28, %v4051_v15  ;;  %v4052_v54 = vadd.f32 %v4019_v56, %v3940_v48  ;;  %v12156_v48 = vld [vmem:[#allocation65_spill] sm:$0xff] }
 0x3a9   : > { %v4343_v51 = vpop.permute.xlu1 %4342  ;;  %4480 = vrot.lane.b32.xlu0 %v4448_v23, %s6269_s9  ;;  %v9416_v61 = vadd.f32 %v4400_v42, %v4160_v34  ;;  %v9418_v6 = vadd.f32 %v4401_v60, %v4161_v58  ;;  %v4292_v34 = vadd.f32 %v4259_v22, %v9327_v17  ;;  %v4319_v35 = vmul.f32 %v12124_v8, %v12084_v43  ;;  %v12157_v15 = vld [vmem:[#allocation57_spill] sm:$0xff]  ;;  %v6116_v22 = vld [vmem:[#allocation4 + $0x50] sm:$0xff] }
 0x3aa   : > { %v4370_v14 = vsel %vm2518_vm5, %v9299_v21, %v4343_v51  ;;  %v4396_v12 = vsel %vm2547_vm6, %v4343_v51, 0.0  ;;  %v4131_v42 = vsel %vm2518_vm5, %v12157_v15, %v12156_v48  ;;  %v4452_v45 = vmul.f32 %v8800_v46, %v12061_v18  ;;  %v12169_v15 = vld [vmem:[#allocation15_spill] sm:$0xff] }
 0x3ab   : > { %12148 = vst [vmem:[#allocation154_spill] sm:$0xff] %v9416_v61  ;;  %12149 = vst [vmem:[#allocation132_spill] sm:$0xff] %v9418_v6  ;;  %v4402_v27 = vadd.f32 %v4370_v14, %v4290_v11  ;;  %v4403_v49 = vadd.f32 %v4396_v12, %v4291_v59  ;;  %4362 = vrot.lane.b32.xlu1 %v4317_v57, %s6269_s9  ;;  %v9427_v23 = vpop.permute.xlu0 %3828  ;;  %v4164_v17 = vadd.f32 %v4131_v42, %v4052_v54  ;;  %v6117_v12 = vld [vmem:[#allocation4 + $0x38] sm:$0xff] }
 0x3ac   : > { %12152 = vst [vmem:[#allocation56_spill] sm:$0xff] %v9427_v23  ;;  %v4451_v46 = vmul.f32 %v9107_v1, %v12141_v55  ;;  %v4458_v1 = vmul.f32 %v6116_v22, %v12010_v9  ;;  %v4455_v13 = vmul.f32 %v6117_v12, %v12061_v18  ;;  %v6123_v22 = vld [vmem:[#allocation4 + $0x1b0] sm:$0xff]  ;;  %v9564_v61 = vmul.f32 %v12080_v33, %v12070_v53 }
 0x3ad   : > { %v9430_v44 = vpop.permute.xlu1 %4346  ;;  %4484 = vrot.lane.b32.xlu0 %v4450_v40, %s6269_s9  ;;  %v9435_v21 = vadd.f32 %v4402_v27, %v4162_v38  ;;  %v9437_v58 = vadd.f32 %v4403_v49, %v4163_v50  ;;  %v6118_v50 = vld [vmem:[#allocation4 + $0x60] sm:$0xff]  ;;  %v12168_v49 = vld [vmem:[#allocation12_spill] sm:$0xff] }
 0x3ae   : > { %12153 = vst [vmem:[#allocation122_spill] sm:$0xff] %v9430_v44  ;;  %v4371_v57 = vsel %vm2518_vm5, %v9308_v3, %v9430_v44  ;;  %v4454_v3 = vmul.f32 %v8825_v37, %v12061_v18  ;;  %v4453_v37 = vmul.f32 %v12058_v52, %v12061_v18  ;;  %v12167_v52 = vld [vmem:[#allocation41_spill] sm:$0xff]  ;;  %12177 = vst [vmem:[#allocation54_spill] sm:$0xff] %v9564_v61 }
 0x3af   : > { %12154 = vst [vmem:[#allocation115_spill] sm:$0xff] %v9435_v21  ;;  %12155 = vst [vmem:[#allocation61_spill] sm:$0xff] %v9437_v58  ;;  %v4404_v60 = vadd.f32 %v4371_v57, %v4292_v34  ;;  %4366 = vrot.lane.b32.xlu1 %v4319_v35, %s6269_s9  ;;  %v9448_v28 = vpop.permute.xlu0 %3832  ;;  %v4460_v54 = vmul.f32 %v6118_v50, %v12167_v52  ;;  %v9491_v34 = vmul.f32 %v9317_v24, %v12168_v49  ;;  %v6119_v35 = vld [vmem:[#allocation4 + $0x1a0] sm:$0xff]  ;;  %v6120_v57 = vld [vmem:[#allocation4 + $0x1a8] sm:$0xff] }
 0x3b0   : > { %12158 = vst [vmem:[#allocation119_spill] sm:$0xff] %v9448_v28  ;;  %v9494_v42 = vmul.f32 %v6119_v35, %v12169_v15  ;;  %v6124_v50 = vld [vmem:[#allocation4 + $0x1e0] sm:$0xff] }
 0x3b1   : > { %v9450_v56 = vpop.permute.xlu1 %3818  ;;  %4488 = vrot.lane.b32.xlu0 %v4452_v45, %s6269_s9  ;;  %v9455_v40 = vadd.f32 %v4404_v60, %v4164_v17  ;;  %v9497_v17 = vmul.f32 %v6120_v57, %v12169_v15  ;;  %v9501_v60 = vmul.f32 %v9321_v39, %v12168_v49  ;;  %v9504_v45 = vmul.f32 %v6120_v57, %v12049_v20  ;;  %v12172_v35 = vld [vmem:[#allocation17_spill] sm:$0xff] }
 0x3b2   : > { %12159 = vst [vmem:[#allocation138_spill] sm:$0xff] %v9450_v56  ;;  %v9517_v39 = vmul.f32 %v6123_v22, %v12049_v20  ;;  %v9527_v57 = vmul.f32 %v6124_v50, %v12172_v35 }
 0x3b3   : > { %12160 = vst [vmem:[#allocation62_spill] sm:$0xff] %v9455_v40  ;;  %4482 = vrot.lane.b32.xlu1 %v4449_v16, %s6269_s9  ;;  %v9460_v11 = vpop.permute.xlu0 %3836  ;;  %v6121_v16 = vld [vmem:[#allocation4 + $0x1c0] sm:$0xff]  ;;  %v9548_v40 = vmul.f32 %v6124_v50, %v12070_v53  ;;  %v6127_v50 = vld [vmem:[#allocation4 + $0x58] sm:$0xff] }
 0x3b4   : > { %12161 = vst [vmem:[#allocation126_spill] sm:$0xff] %v9460_v11  ;;  %v4459_v18 = vmul.f32 %v6127_v50, %v12010_v9  ;;  %v9586_v50 = vmul.f32 %v12084_v43, %v12172_v35 }
 0x3b5   : > { %v9462_v59 = vpop.permute.xlu1 %3822  ;;  %4492 = vrot.lane.b32.xlu0 %v4454_v3, %s6269_s9  ;;  %v12170_v3 = vld [vmem:[#allocation14_spill] sm:$0xff]  ;;  %12175 = vst [vmem:[#allocation55_spill] sm:$0xff] %v9548_v40 }
 0x3b6   : > { %12162 = vst [vmem:[#allocation71_spill] sm:$0xff] %v9462_v59  ;;  %v9521_v12 = vmul.f32 %v12128_v30, %v12170_v3 }
 0x3b7   : > { %4486 = vrot.lane.b32.xlu1 %v4451_v46, %s6269_s9  ;;  %v9470_v51 = vpop.permute.xlu0 %3840  ;;  %v9507_v46 = vmul.f32 %v6121_v16, %v12170_v3 }
 0x3b8   : > { %12163 = vst [vmem:[#allocation77_spill] sm:$0xff] %v9470_v51  ;;  %v6134_v51 = vld [vmem:[#allocation4 + $0x160] sm:$0xff] }
 0x3b9   : > { %v9472_v7 = vpop.permute.xlu1 %3826  ;;  %4496 = vrot.lane.b32.xlu0 %v4456_v62, %s6269_s9  ;;  %v6122_v62 = vld [vmem:[#allocation4 + $0x48] sm:$0xff] }
 0x3ba   : > { %12164 = vst [vmem:[#allocation124_spill] sm:$0xff] %v9472_v7  ;;  %v6150_v7 = vld [vmem:[#allocation4 + $0xc0] sm:$0xff] }
 0x3bb   : > { %4490 = vrot.lane.b32.xlu1 %v4453_v37, %s6269_s9  ;;  %v9479_v38 = vpop.permute.xlu0 %3844  ;;  %v4457_v37 = vmul.f32 %v6122_v62, %v12010_v9  ;;  %v9535_v62 = vmul.f32 %v12128_v30, %v12063_v0  ;;  %v9552_v30 = vmul.f32 %v12076_v25, %v12070_v53  ;;  %v9595_v9 = vld [vmem:[#allocation4 + $0x108] sm:$0xff] }
 0x3bc   : > { %12165 = vst [vmem:[#allocation51_spill] sm:$0xff] %v9479_v38  ;;  %12182 = vst [vmem:[#allocation76_spill] sm:$0xff] %v9595_v9  ;;  %v9627_v38 = vld [vmem:[#allocation4 + $0x148] sm:$0xff] }
 0x3bd   : > { %v9481_v14 = vpop.permute.xlu1 %3830  ;;  %4500 = vrot.lane.b32.xlu0 %v4458_v1, %s6269_s9  ;;  %v9514_v1 = vmul.f32 %v6123_v22, %v12169_v15  ;;  %12173 = vst [vmem:[#allocation49_spill] sm:$0xff] %v9535_v62  ;;  %v6125_v22 = vld [vmem:[#allocation4 + $0x70] sm:$0xff]  ;;  %12176 = vst [vmem:[#allocation80_spill] sm:$0xff] %v9552_v30 }
 0x3be   : > { %12166 = vst [vmem:[#allocation74_spill] sm:$0xff] %v9481_v14  ;;  %v4462_v8 = vmul.f32 %v6125_v22, %v12167_v52  ;;  %v9560_v22 = vmul.f32 %v12080_v33, %v12172_v35  ;;  %v9582_v33 = vmul.f32 %v12130_v47, %v12063_v0  ;;  %12191 = vst [vmem:[#allocation141_spill] sm:$0xff] %v9627_v38  ;;  %v9646_v62 = vld [vmem:[#allocation4 + $0x150] sm:$0xff] }
 0x3bf   : > { %4494 = vrot.lane.b32.xlu1 %v4455_v13, %s6269_s9  ;;  %v9487_v27 = vpop.permute.xlu0 %3102  ;;  %v9524_v13 = vmul.f32 %v6121_v16, %v12063_v0  ;;  %v6126_v16 = vld [vmem:[#allocation4 + $0x1d0] sm:$0xff]  ;;  %12198 = vst [vmem:[#allocation133_spill] sm:$0xff] %v9646_v62 }
 0x3c0   : > { %v9542_v58 = vmul.f32 %v6126_v16, %v12170_v3  ;;  %v9545_v6 = vmul.f32 %v6126_v16, %v12063_v0  ;;  %12179 = vst [vmem:[#allocation81_spill] sm:$0xff] %v9582_v33  ;;  %v9603_v0 = vld [vmem:[#allocation4 + $0x128] sm:$0xff] }
 0x3c1   : > { %v9509_v24 = vpop.permute.xlu1 %3834  ;;  %4504 = vrot.lane.b32.xlu0 %v4460_v54, %s6269_s9  ;;  %v9531_v54 = vmul.f32 %v12076_v25, %v12172_v35  ;;  %v6128_v25 = vld [vmem:[#allocation4 + $0x1b8] sm:$0xff]  ;;  %12183 = vst [vmem:[#allocation151_spill] sm:$0xff] %v9603_v0  ;;  %v9607_v35 = vmul.f32 %v9603_v0, %v12135_v31 }
 0x3c2   : > { %12171 = vst [vmem:[#allocation78_spill] sm:$0xff] %v9509_v24  ;;  %12174 = vst [vmem:[#allocation75_spill] sm:$0xff] %v9545_v6  ;;  %v9571_v55 = vmul.f32 %v6128_v25, %v12169_v15  ;;  %v12188_v15 = vld [vmem:[#allocation43_spill] sm:$0xff]  ;;  %v9640_v6 = vld [vmem:[#allocation4 + $0x138] sm:$0xff] }
 0x3c3   : > { %4498 = vrot.lane.b32.xlu1 %v4457_v37, %s6269_s9  ;;  %v9539_v21 = vpop.permute.xlu0 %3106  ;;  %v9556_v37 = vmul.f32 %v9337_v4, %v12168_v49  ;;  %v9574_v4 = vmul.f32 %v6128_v25, %v12049_v20  ;;  %v9578_v49 = vmul.f32 %v12130_v47, %v12170_v3  ;;  %v12181_v25 = vld [vmem:[#allocation40_spill] sm:$0xff]  ;;  %12184 = vst [vmem:[#allocation87_spill] sm:$0xff] %v9607_v35  ;;  %12196 = vst [vmem:[#allocation146_spill] sm:$0xff] %v9640_v6 }
 0x3c4   : > { %v4560_v20 = vmul.f32 %v9341_v41, %v12181_v25  ;;  %v9599_v3 = vmul.f32 %v9595_v9, %v12181_v25  ;;  %v4562_v41 = vmul.f32 %v9367_v29, %v12181_v25  ;;  %v12193_v29 = vld [vmem:[#allocation13_spill] sm:$0xff]  ;;  %v9669_v24 = vmul.f32 %v9640_v6, %v12188_v15  ;;  %v6147_v35 = vld [vmem:[#allocation4 + $0xb8] sm:$0xff] }
 0x3c5   : > { %v9566_v16 = vpop.permute.xlu1 %3838  ;;  %4508 = vrot.lane.b32.xlu0 %v4462_v8, %s6269_s9  ;;  %v9590_v8 = vmul.f32 %v12084_v43, %v12070_v53  ;;  %v12185_v43 = vld [vmem:[#allocation10_spill] sm:$0xff]  ;;  %v9615_v53 = vld [vmem:[#allocation4 + $0x120] sm:$0xff]  ;;  %v9634_v30 = vmul.f32 %v6134_v51, %v12193_v29  ;;  %v3231_v23 = vmul.f32 %v6147_v35, %v12135_v31  ;;  %v6151_v35 = vld [vmem:[#allocation4 + $0xd0] sm:$0xff]  ;;  %v3239_v56 = vmul.f32 %v9201_v2, %v12193_v29 }
 0x3c6   : > { %12178 = vst [vmem:[#allocation79_spill] sm:$0xff] %v9566_v16  ;;  %12187 = vst [vmem:[#allocation83_spill] sm:$0xff] %v9615_v53  ;;  %v9619_v9 = vmul.f32 %v9615_v53, %v12188_v15  ;;  %v9631_v44 = vmul.f32 %v9627_v38, %v12185_v43  ;;  %v6135_v53 = vld [vmem:[#allocation4 + $0x68] sm:$0xff]  ;;  %v9644_v16 = vmul.f32 %v9640_v6, %v12135_v31  ;;  %v6140_v6 = vld [vmem:[#allocation4 + $0x170] sm:$0xff] }
 0x3c7   : > { %12180 = vst [vmem:[#allocation84_spill] sm:$0xff] %v9590_v8  ;;  %4502 = vrot.lane.b32.xlu1 %v4459_v18, %s6269_s9  ;;  %v9601_v47 = vpop.permute.xlu0 %3560  ;;  %v9611_v18 = vmul.f32 %v12059_v19, %v12185_v43  ;;  %v9621_v8 = vld [vmem:[#allocation4 + $0x130] sm:$0xff]  ;;  %12194 = vst [vmem:[#allocation158_spill] sm:$0xff] %v9634_v30  ;;  %v4461_v33 = vmul.f32 %v6135_v53, %v12167_v52  ;;  %v9650_v11 = vmul.f32 %v9646_v62, %v12185_v43  ;;  %v12200_v30 = vld [vmem:[#allocation42_spill] sm:$0xff] }
 0x3c8   : > { %12189 = vst [vmem:[#allocation153_spill] sm:$0xff] %v9621_v8  ;;  %v9625_v61 = vmul.f32 %v9621_v8, %v12135_v31  ;;  %12192 = vst [vmem:[#allocation147_spill] sm:$0xff] %v9631_v44  ;;  %v9658_v53 = vmul.f32 %v9603_v0, %v12188_v15  ;;  %v9665_v28 = vmul.f32 %v9621_v8, %v12188_v15  ;;  %v9679_v0 = vld [vmem:[#allocation4 + $0x158] sm:$0xff]  ;;  %v9685_v8 = vld [vmem:[#allocation4 + $0x168] sm:$0xff] }
 0x3c9   : > { %12186 = vst [vmem:[#allocation152_spill] sm:$0xff] %v9611_v18  ;;  %v9636_v40 = vpop.permute.xlu1 %3842  ;;  %4592 = vrot.lane.b32.xlu0 %v4560_v20, %s6269_s9  ;;  %12197 = vst [vmem:[#allocation131_spill] sm:$0xff] %v9644_v16  ;;  %v9689_v15 = vmul.f32 %v9685_v8, %v12193_v29  ;;  %v6141_v44 = vld [vmem:[#allocation4 + $0x78] sm:$0xff]  ;;  %v3232_v59 = vmul.f32 %v6150_v7, %v12185_v43  ;;  %v3234_v10 = vmul.f32 %v6151_v35, %v12185_v43 }
 0x3ca   : > { %12190 = vst [vmem:[#allocation157_spill] sm:$0xff] %v9625_v61  ;;  %12195 = vst [vmem:[#allocation130_spill] sm:$0xff] %v9636_v40  ;;  %v9654_v40 = vmul.f32 %v9371_v5, %v12181_v25  ;;  %v9673_v5 = vmul.f32 %v12059_v19, %v12200_v30  ;;  %v9677_v25 = vmul.f32 %v9627_v38, %v12200_v30 }
 0x3cb   : > { %12199 = vst [vmem:[#allocation99_spill] sm:$0xff] %v9650_v11  ;;  %4506 = vrot.lane.b32.xlu1 %v4461_v33, %s6269_s9  ;;  %v9661_v20 = vpop.permute.xlu0 %3564  ;;  %12201 = vst [vmem:[#allocation91_spill] sm:$0xff] %v9679_v0  ;;  %v9683_v33 = vmul.f32 %v9679_v0, %v12185_v43  ;;  %v9692_v19 = vmul.f32 %v6140_v6, %v12193_v29  ;;  %v9696_v38 = vmul.f32 %v9646_v62, %v12200_v30  ;;  %v6142_v62 = vld [vmem:[#allocation4 + $0x88] sm:$0xff] }
 0x3cc   : > { %12203 = vst [vmem:[#allocation163_spill] sm:$0xff] %v9685_v8  ;;  %12204 = vst [vmem:[#allocation159_spill] sm:$0xff] %v9689_v15  ;;  %v4463_v18 = vmul.f32 %v6141_v44, %v12167_v52  ;;  %v12208_v15 = vld [vmem:[#allocation44_spill] sm:$0xff]  ;;  %v3225_v61 = vmul.f32 %v6142_v62, %v12126_v32  ;;  %v6148_v62 = vld [vmem:[#allocation4 + $0xa8] sm:$0xff] }
 0x3cd   : > { %12202 = vst [vmem:[#allocation96_spill] sm:$0xff] %v9683_v33  ;;  %12205 = vst [vmem:[#allocation60_spill] sm:$0xff] %v9692_v19  ;;  %v9698_v11 = vpop.permute.xlu1 %3846  ;;  %4596 = vrot.lane.b32.xlu0 %v4562_v41, %s6269_s9  ;;  %v9704_v33 = vmul.f32 %v9679_v0, %v12200_v30  ;;  %v9707_v16 = vmul.f32 %v6134_v51, %v12208_v15  ;;  %v9711_v19 = vmul.f32 %v9685_v8, %v12208_v15  ;;  %v6144_v44 = vld [vmem:[#allocation4 + $0x178] sm:$0xff]  ;;  %v6146_v0 = vld [vmem:[#allocation4 + $0xa0] sm:$0xff] }
 0x3ce   : > { %12206 = vst [vmem:[#allocation67_spill] sm:$0xff] %v9698_v11  ;;  %v6143_v11 = vld [vmem:[#allocation4 + $0x90] sm:$0xff]  ;;  %v9716_v41 = vmul.f32 %v6144_v44, %v12193_v29  ;;  %v9719_v30 = vmul.f32 %v6140_v6, %v12208_v15  ;;  %v6145_v52 = vld [vmem:[#allocation4 + $0x98] sm:$0xff]  ;;  %v3228_v8 = vmul.f32 %v6146_v0, %v12135_v31  ;;  %v3229_v36 = vmul.f32 %v6148_v62, %v12135_v31  ;;  %v6152_v62 = vld [vmem:[#allocation4 + $0xe0] sm:$0xff] }
 0x3cf   : > { %12207 = vst [vmem:[#allocation70_spill] sm:$0xff] %v9704_v33  ;;  %12209 = vst [vmem:[#allocation101_spill] sm:$0xff] %v9711_v19  ;;  %v3226_v14 = vmul.f32 %v6143_v11, %v12126_v32  ;;  %v3227_v51 = vmul.f32 %v6145_v52, %v12126_v32  ;;  %4510 = vrot.lane.b32.xlu1 %v4463_v18, %s6269_s9  ;;  %v9726_v11 = vpop.permute.xlu0 %3110  ;;  %v12211_v52 = vld [vmem:[#allocation167_spill] sm:$0xff]  ;;  %v3236_v18 = vmul.f32 %v6152_v62, %v12193_v29 }
 0x3d0   : > { %12210 = vst [vmem:[#allocation46_spill] sm:$0xff] %v9716_v41  ;;  %v6149_v41 = vld [vmem:[#allocation4 + $0xb0] sm:$0xff]  ;;  %v3235_v32 = vmul.f32 %v12211_v52, %v12185_v43  ;;  %v3257_v7 = vadd.f32 %v9491_v34, %v3225_v61  ;;  %v9747_v62 = vmul.f32 %v6144_v44, %v12208_v15  ;;  %v3261_v33 = vadd.f32 %v9497_v17, %v3229_v36  ;;  %v12215_v17 = vld [vmem:[#allocation85_spill] sm:$0xff]  ;;  %v12234_v15 = vld [vmem:[#allocation102_spill] sm:$0xff] }
 0x3d1   : > { %v3230_v6 = vmul.f32 %v6149_v41, %v12135_v31  ;;  %v12212_v0 = vld [vmem:[#allocation123_spill] sm:$0xff]  ;;  %v3237_v41 = vmul.f32 %v6153_v63, %v12193_v29  ;;  %v9739_v31 = vpop.permute.xlu1 %3104  ;;  %4600 = vrot.lane.b32.xlu0 %v9619_v9, %s6269_s9  ;;  %v3258_v52 = vadd.f32 %v9501_v60, %v3226_v14  ;;  %v3259_v2 = vadd.f32 %v9556_v37, %v3227_v51  ;;  %v12222_v44 = vld [vmem:[#allocation73_spill] sm:$0xff] }
 0x3d2   : > { %v3233_v19 = vmul.f32 %v12212_v0, %v12185_v43  ;;  %v6154_v0 = vld [vmem:[#allocation4 + $0xf0] sm:$0xff]  ;;  %v3260_v43 = vadd.f32 %v9494_v42, %v3228_v8  ;;  %v3263_v63 = vadd.f32 %v9571_v55, %v3231_v23  ;;  %v3264_v14 = vadd.f32 %v9507_v46, %v3232_v59  ;;  %v12217_v46 = vld [vmem:[#allocation69_spill] sm:$0xff] }
 0x3d3   : > { %v3238_v35 = vmul.f32 %v6154_v0, %v12193_v29  ;;  %4594 = vrot.lane.b32.xlu1 %v9599_v3, %s6269_s9  ;;  %v9755_v9 = vpop.permute.xlu0 %3114  ;;  %v3262_v61 = vadd.f32 %v9514_v1, %v3230_v6  ;;  %v3267_v34 = vadd.f32 %v9578_v49, %v3235_v32  ;;  %v9762_v37 = vadd.f32 %v9542_v58, %v3234_v10  ;;  %v12213_v32 = vld [vmem:[#allocation66_spill] sm:$0xff]  ;;  %v12214_v10 = vld [vmem:[#allocation72_spill] sm:$0xff]  ;;  %v12216_v3 = vld [vmem:[#allocation47_spill] sm:$0xff] }
 0x3d4   : > { %v3265_v60 = vadd.f32 %v9521_v12, %v3233_v19  ;;  %v9765_v55 = vadd.f32 %v9527_v57, %v3236_v18  ;;  %v9768_v36 = vadd.f32 %v9586_v50, %v3239_v56  ;;  %v9771_v23 = vadd.f32 %v9531_v54, %v3237_v41  ;;  %v12218_v1 = vld [vmem:[#allocation88_spill] sm:$0xff]  ;;  %v12219_v57 = vld [vmem:[#allocation95_spill] sm:$0xff]  ;;  %v12220_v54 = vld [vmem:[#allocation89_spill] sm:$0xff] }
 0x3d5   : > { %v9773_v42 = vpop.permute.xlu1 %3108  ;;  %4604 = vrot.lane.b32.xlu0 %v9665_v28, %s6269_s9  ;;  %v9780_v59 = vsel %vm2518_vm5, %v12156_v48, %v12213_v32  ;;  %v9785_v58 = vsel %vm2518_vm5, %v12213_v32, %v12214_v10  ;;  %v9789_v56 = vsel %vm2547_vm6, %v12214_v10, 0.0  ;;  %v9792_v49 = vadd.f32 %v9560_v22, %v3238_v35  ;;  %v12221_v19 = vld [vmem:[#allocation90_spill] sm:$0xff]  ;;  %v12226_v0 = vld [vmem:[#allocation92_spill] sm:$0xff]  ;;  %v12229_v10 = vld [vmem:[#allocation97_spill] sm:$0xff] }
 0x3d6   : > { %v9797_v28 = vsel %vm2518_vm5, %v12216_v3, %v12215_v17  ;;  %v9802_v48 = vsel %vm2518_vm5, %v12215_v17, %v12217_v46  ;;  %v9807_v12 = vsel %vm2518_vm5, %v12217_v46, %v12218_v1  ;;  %v3336_v22 = vsel %vm2518_vm5, %v12220_v54, %v12219_v57  ;;  %v12223_v6 = vld [vmem:[#allocation86_spill] sm:$0xff]  ;;  %v12231_v54 = vld [vmem:[#allocation103_spill] sm:$0xff] }
 0x3d7   : > { %4598 = vrot.lane.b32.xlu1 %v9654_v40, %s6269_s9  ;;  %v9814_v50 = vpop.permute.xlu0 %3568  ;;  %v9818_v8 = vsel %vm2547_vm6, %v12218_v1, 0.0  ;;  %v9823_v51 = vsel %vm2518_vm5, %v12222_v44, %v12221_v19  ;;  %v9828_v18 = vsel %vm2518_vm5, %v12221_v19, %v12223_v6  ;;  %v12225_v41 = vld [vmem:[#allocation94_spill] sm:$0xff]  ;;  %v9836_v35 = vsel %vm2518_vm5, %v12223_v6, %v12226_v0  ;;  %v12230_v1 = vld [vmem:[#allocation64_spill] sm:$0xff]  ;;  %v12233_v6 = vld [vmem:[#allocation105_spill] sm:$0xff] }
 0x3d8   : > { %12224 = vst [vmem:[#allocation160_spill] sm:$0xff] %v9828_v18  ;;  %v3337_v40 = vsel %vm2518_vm5, %v12219_v57, %v12225_v41  ;;  %12227 = vst [vmem:[#allocation143_spill] sm:$0xff] %v9836_v35  ;;  %v9840_v32 = vsel %vm2547_vm6, %v12226_v0, 0.0  ;;  %v3364_v17 = vsel %vm2547_vm6, %v12229_v10, 0.0  ;;  %v3338_v3 = vsel %vm2518_vm5, %v12225_v41, %v12229_v10  ;;  %v12232_v19 = vld [vmem:[#allocation98_spill] sm:$0xff]  ;;  %v12235_v10 = vld [vmem:[#allocation104_spill] sm:$0xff] }
 0x3d9   : > { %12228 = vst [vmem:[#allocation108_spill] sm:$0xff] %v9840_v32  ;;  %v9847_v46 = vpop.permute.xlu1 %3562  ;;  %4608 = vrot.lane.b32.xlu0 %v9673_v5, %s6269_s9  ;;  %v9852_v57 = vadd.f32 %v3336_v22, %v12230_v1  ;;  %v3339_v44 = vsel %vm2518_vm5, %v12232_v19, %v12231_v54  ;;  %v3365_v0 = vsel %vm2547_vm6, %v12233_v6, 0.0  ;;  %v3340_v29 = vsel %vm2518_vm5, %v12231_v54, %v12234_v15  ;;  %v12236_v1 = vld [vmem:[#allocation110_spill] sm:$0xff] }
 0x3da   : > { %v9862_v41 = vadd.f32 %v3337_v40, %v3257_v7  ;;  %v3341_v5 = vsel %vm2518_vm5, %v12234_v15, %v12233_v6  ;;  %v4260_v22 = vsel %vm2518_vm5, %v12150_v26, %v12235_v10  ;;  %v4261_v19 = vsel %vm2518_vm5, %v12235_v10, %v12236_v1  ;;  %v12237_v40 = vld [vmem:[#allocation114_spill] sm:$0xff]  ;;  %v12238_v6 = vld [vmem:[#allocation107_spill] sm:$0xff] }
 0x3db   : > { %4602 = vrot.lane.b32.xlu1 %v9658_v53, %s6269_s9  ;;  %v9875_v32 = vpop.permute.xlu0 %3572  ;;  %v9877_v54 = vadd.f32 %v3364_v17, %v3259_v2  ;;  %v9879_v7 = vadd.f32 %v3338_v3, %v3258_v52  ;;  %v4285_v15 = vsel %vm2547_vm6, %v12236_v1, 0.0  ;;  %v3342_v26 = vsel %vm2518_vm5, %v12238_v6, %v12237_v40  ;;  %v12239_v53 = vld [vmem:[#allocation58_spill] sm:$0xff]  ;;  %v12244_v1 = vld [vmem:[#allocation117_spill] sm:$0xff] }
 0x3dc   : > { %v9886_v35 = vadd.f32 %v3339_v44, %v3260_v43  ;;  %v9888_v18 = vadd.f32 %v3365_v0, %v3263_v63  ;;  %v9890_v10 = vadd.f32 %v3340_v29, %v3261_v33  ;;  %v3343_v2 = vsel %vm2518_vm5, %v12237_v40, %v12239_v53  ;;  %v12240_v63 = vld [vmem:[#allocation116_spill] sm:$0xff]  ;;  %v12242_v0 = vld [vmem:[#allocation109_spill] sm:$0xff] }
 0x3dd   : > { %v3567_v17 = vpop.permute.xlu1 %3566  ;;  %4612 = vrot.lane.b32.xlu0 %v9696_v38, %s6269_s9  ;;  %v9897_v52 = vadd.f32 %v3341_v5, %v3262_v61  ;;  %v9900_v3 = vadd.f32 %v4260_v22, %v9504_v45  ;;  %v9903_v43 = vadd.f32 %v4261_v19, %v9517_v39  ;;  %v3366_v29 = vsel %vm2547_vm6, %v12240_v63, 0.0  ;;  %v12243_v22 = vld [vmem:[#allocation125_spill] sm:$0xff] }
 0x3de   : > { %v9908_v33 = vadd.f32 %v4285_v15, %v9574_v4  ;;  %v9910_v44 = vadd.f32 %v3342_v26, %v3264_v14  ;;  %v3344_v38 = vsel %vm2518_vm5, %v12239_v53, %v12240_v63  ;;  %v9917_v45 = vadd.f32 %v3343_v2, %v3265_v60  ;;  %v12241_v14 = vld [vmem:[#allocation120_spill] sm:$0xff]  ;;  %v12246_v26 = vld [vmem:[#allocation139_spill] sm:$0xff] }
 0x3df   : > { %4606 = vrot.lane.b32.xlu1 %v9669_v24, %s6269_s9  ;;  %v3135_v39 = vsel %vm3134_vm7, %v9487_v27, %v9739_v31  ;;  %v3136_v4 = vsel %vm3134_vm7, %v9739_v31, %v9539_v21  ;;  %v9925_v61 = vadd.f32 %v3366_v29, %v3267_v34  ;;  %v4262_v5 = vsel %vm2518_vm5, %v12242_v0, %v12241_v14  ;;  %v9937_v27 = vpop.permute.xlu0 %3118  ;;  %v12245_v34 = vld [vmem:[#allocation121_spill] sm:$0xff]  ;;  %v12247_v2 = vld [vmem:[#allocation140_spill] sm:$0xff] }
 0x3e0   : > { %v3345_v24 = vsel %vm2518_vm5, %v12244_v1, %v12243_v22  ;;  %v3164_v60 = vsel %vm3163_vm8, %v9773_v42, 0.0  ;;  %v9940_v31 = vadd.f32 %v3344_v38, %v9762_v37  ;;  %v3346_v15 = vsel %vm2518_vm5, %v12243_v22, %v12245_v34  ;;  %v12249_v0 = vld [vmem:[#allocation165_spill] sm:$0xff] }
 0x3e1   : > { %v3113_v19 = vpop.permute.xlu1 %3112  ;;  %4616 = vrot.lane.b32.xlu0 %v9707_v16, %s6269_s9  ;;  %v3168_v53 = vadd.f32 %v3135_v39, %v12246_v26  ;;  %v3169_v63 = vadd.f32 %v3136_v4, %v12247_v2  ;;  %v12248_v16 = vld [vmem:[#allocation59_spill] sm:$0xff]  ;;  %v9956_v37 = vadd.f32 %v4262_v5, %v9524_v13  ;;  %v9959_v38 = vadd.f32 %v3345_v24, %v9765_v55  ;;  %v12251_v39 = vld [vmem:[#allocation145_spill] sm:$0xff]  ;;  %v12253_v24 = vld [vmem:[#allocation144_spill] sm:$0xff] }
 0x3e2   : > { %v3138_v40 = vsel %vm3134_vm7, %v9726_v11, %v3113_v19  ;;  %v3139_v6 = vsel %vm3134_vm7, %v3113_v19, %v9755_v9  ;;  %v3137_v11 = vsel %vm3134_vm7, %v9539_v21, %v9773_v42  ;;  %v3171_v22 = vadd.f32 %v3164_v60, %v12251_v39  ;;  %v12252_v55 = vld [vmem:[#allocation127_spill] sm:$0xff] }
 0x3e3   : > { %v3172_v29 = vadd.f32 %v3138_v40, %v12248_v16  ;;  %v3173_v1 = vadd.f32 %v3139_v6, %v12249_v0  ;;  %4610 = vrot.lane.b32.xlu1 %v9677_v25, %s6269_s9  ;;  %12250 = vst [vmem:[#allocation100_spill] sm:$0xff] %v9956_v37  ;;  %v9966_v4 = vadd.f32 %v3346_v15, %v9771_v23  ;;  %v9979_v21 = vsel %vm2547_vm6, %v12252_v55, 0.0  ;;  %v12254_v40 = vld [vmem:[#allocation129_spill] sm:$0xff]  ;;  %v9993_v2 = vpop.permute.xlu0 %3122 }
 0x3e4   : > { %v3592_v19 = vsel %vm3134_vm7, %v9601_v47, %v9847_v46  ;;  %v3593_v23 = vsel %vm3134_vm7, %v9847_v46, %v9661_v20  ;;  %v3170_v60 = vadd.f32 %v3137_v11, %v12253_v24  ;;  %v3620_v15 = vsel %vm3163_vm8, %v3567_v17, 0.0  ;;  %v12262_v24 = vld [vmem:[#allocation101_spill] sm:$0xff] }
 0x3e5   : > { %v9971_v25 = vadd.f32 %v3172_v29, %v3168_v53  ;;  %v9973_v13 = vadd.f32 %v3173_v1, %v3169_v63  ;;  %v3117_v5 = vpop.permute.xlu1 %3116  ;;  %4620 = vrot.lane.b32.xlu0 %v9719_v30, %s6269_s9  ;;  %v12255_v30 = vld [vmem:[#allocation118_spill] sm:$0xff]  ;;  %v9998_v46 = vsel %vm2518_vm5, %v12245_v34, %v12252_v55  ;;  %v3211_v29 = vsel %vm541_vm0, %v3171_v22, 0.0 }
 0x3e6   : > { %v3140_v42 = vsel %vm3134_vm7, %v9755_v9, %v3117_v5  ;;  %v3165_v47 = vsel %vm3163_vm8, %v3117_v5, 0.0  ;;  %v12256_v53 = vld [vmem:[#allocation70_spill] sm:$0xff]  ;;  %v3624_v0 = vadd.f32 %v3592_v19, %v9852_v57  ;;  %v3625_v1 = vadd.f32 %v3593_v23, %v9862_v41  ;;  %v12260_v41 = vld [vmem:[#allocation148_spill] sm:$0xff] }
 0x3e7   : > { %v3174_v6 = vadd.f32 %v3140_v42, %v12254_v40  ;;  %v3175_v26 = vadd.f32 %v3165_v47, %v12255_v30  ;;  %4614 = vrot.lane.b32.xlu1 %v12256_v53, %s6269_s9  ;;  %v12257_v9 = vld [vmem:[#allocation166_spill] sm:$0xff]  ;;  %v3594_v11 = vsel %vm3134_vm7, %v9661_v20, %v3567_v17  ;;  %v3627_v34 = vadd.f32 %v3620_v15, %v9877_v54  ;;  %v12261_v20 = vld [vmem:[#allocation137_spill] sm:$0xff]  ;;  %v12264_v15 = vld [vmem:[#allocation124_spill] sm:$0xff] }
 0x3e8   : > { %v12258_v63 = vld [vmem:[#allocation134_spill] sm:$0xff]  ;;  %v12265_v40 = vld [vmem:[#allocation149_spill] sm:$0xff]  ;;  %v12266_v30 = vld [vmem:[#allocation56_spill] sm:$0xff] }
 0x3e9   : > { %v4020_v16 = vsel %vm2518_vm5, %v12258_v63, %v12257_v9  ;;  %v10008_v39 = vadd.f32 %v3174_v6, %v3170_v60  ;;  %v3212_v5 = vsel %vm541_vm0, %v3175_v26, 0.0  ;;  %v3571_v42 = vpop.permute.xlu1 %3570  ;;  %v12259_v22 = vld [vmem:[#allocation138_spill] sm:$0xff]  ;;  %v12263_v60 = vld [vmem:[#allocation71_spill] sm:$0xff]  ;;  %v3851_v6 = vsel %vm3134_vm7, %v12265_v40, %v12264_v15 }
 0x3ea   : > { %v10012_v55 = vadd.f32 %v3212_v5, %v3211_v29  ;;  %v3595_v47 = vsel %vm3134_vm7, %v9814_v50, %v3571_v42  ;;  %v3596_v57 = vsel %vm3134_vm7, %v3571_v42, %v9875_v32  ;;  %v3848_v19 = vsel %vm3134_vm7, %v12260_v41, %v12259_v22  ;;  %v3577_v42 = vpop.permute.xlu0 %3576 }
 0x3eb   : > { %v3849_v17 = vsel %vm3134_vm7, %v12259_v22, %v12261_v20  ;;  %v3628_v23 = vadd.f32 %v3595_v47, %v9886_v35  ;;  %v3629_v54 = vadd.f32 %v3596_v57, %v9890_v10  ;;  %4618 = vrot.lane.b32.xlu1 %v12262_v24, %s6269_s9  ;;  %v3876_v50 = vsel %vm3163_vm8, %v12263_v60, 0.0  ;;  %v12267_v47 = vld [vmem:[#allocation87_spill] sm:$0xff] }
 0x3ec   : > { %v3852_v26 = vsel %vm3134_vm7, %v12264_v15, %v12266_v30  ;;  %v3880_v53 = vadd.f32 %v3848_v19, %v3624_v0  ;;  %v3881_v63 = vadd.f32 %v3849_v17, %v3625_v1  ;;  %v3626_v35 = vadd.f32 %v3594_v11, %v9879_v7  ;;  %v12268_v1 = vld [vmem:[#allocation128_spill] sm:$0xff]  ;;  %v12269_v11 = vld [vmem:[#allocation74_spill] sm:$0xff] }
 0x3ed   : > { %v3884_v29 = vadd.f32 %v3851_v6, %v3628_v23  ;;  %v3885_v10 = vadd.f32 %v3852_v26, %v3629_v54  ;;  %v3575_v5 = vpop.permute.xlu1 %3574  ;;  %v4053_v57 = vadd.f32 %v4020_v16, %v12267_v47  ;;  %v3883_v22 = vadd.f32 %v3876_v50, %v3627_v34  ;;  %v12270_v54 = vld [vmem:[#allocation142_spill] sm:$0xff]  ;;  %v12272_v26 = vld [vmem:[#allocation161_spill] sm:$0xff] }
 0x3ee   : > { %v3597_v41 = vsel %vm3134_vm7, %v9875_v32, %v3575_v5  ;;  %v3621_v24 = vsel %vm3163_vm8, %v3575_v5, 0.0  ;;  %v4021_v16 = vsel %vm2518_vm5, %v12257_v9, %v12268_v1  ;;  %v3850_v32 = vsel %vm3134_vm7, %v12261_v20, %v12263_v60  ;;  %v12271_v9 = vld [vmem:[#allocation45_spill] sm:$0xff] }
 0x3ef   : > { %v10041_v40 = vadd.f32 %v3884_v29, %v3880_v53  ;;  %v10043_v37 = vadd.f32 %v3885_v10, %v3881_v63  ;;  %v3630_v0 = vadd.f32 %v3597_v41, %v9897_v52  ;;  %v3631_v7 = vadd.f32 %v3621_v24, %v9888_v18  ;;  %4622 = vrot.lane.b32.xlu1 %v9747_v62, %s6269_s9  ;;  %v12273_v63 = vld [vmem:[#allocation136_spill] sm:$0xff]  ;;  %v3581_v29 = vpop.permute.xlu0 %3580  ;;  %v12274_v5 = vld [vmem:[#allocation157_spill] sm:$0xff]  ;;  %v12276_v24 = vld [vmem:[#allocation155_spill] sm:$0xff] }
 0x3f0   : > { %v3853_v34 = vsel %vm3134_vm7, %v12266_v30, %v12269_v11  ;;  %v3877_v52 = vsel %vm3163_vm8, %v12269_v11, 0.0  ;;  %v4045_v18 = vsel %vm2547_vm6, %v12268_v1, 0.0  ;;  %v3882_v19 = vadd.f32 %v3850_v32, %v3626_v35 }
 0x3f1   : > { %v3886_v62 = vadd.f32 %v3853_v34, %v3630_v0  ;;  %v3887_v17 = vadd.f32 %v3877_v52, %v3631_v7  ;;  %v3121_v23 = vpop.permute.xlu1 %3120  ;;  %v4022_v50 = vsel %vm2518_vm5, %v12271_v9, %v12270_v54  ;;  %v3923_v20 = vsel %vm541_vm0, %v3883_v22, 0.0  ;;  %v12275_v22 = vld [vmem:[#allocation131_spill] sm:$0xff]  ;;  %v12277_v7 = vld [vmem:[#allocation106_spill] sm:$0xff] }
 0x3f2   : > { %v3141_v60 = vsel %vm3134_vm7, %v9937_v27, %v3121_v23  ;;  %v3142_v15 = vsel %vm3134_vm7, %v3121_v23, %v9993_v2  ;;  %v10077_v10 = vadd.f32 %v9979_v21, %v9768_v36  ;;  %v4054_v47 = vadd.f32 %v4021_v16, %v12274_v5  ;;  %v12278_v16 = vld [vmem:[#allocation152_spill] sm:$0xff] }
 0x3f3   : > { %v10070_v6 = vadd.f32 %v3886_v62, %v3882_v19  ;;  %v3924_v30 = vsel %vm541_vm0, %v3887_v17, 0.0  ;;  %v3176_v53 = vadd.f32 %v3141_v60, %v12272_v26  ;;  %v3177_v35 = vadd.f32 %v3142_v15, %v12273_v63  ;;  %v12280_v17 = vld [vmem:[#allocation93_spill] sm:$0xff]  ;;  %v12282_v60 = vld [vmem:[#allocation99_spill] sm:$0xff] }
 0x3f4   : > { %v4055_v27 = vadd.f32 %v4045_v18, %v12275_v22  ;;  %v10081_v41 = vadd.f32 %v3924_v30, %v3923_v20  ;;  %v4023_v0 = vsel %vm2518_vm5, %v12270_v54, %v12276_v24  ;;  %v4024_v1 = vsel %vm2518_vm5, %v12276_v24, %v12277_v7  ;;  %v12284_v30 = vld [vmem:[#allocation63_spill] sm:$0xff] }
 0x3f5   : > { %v10090_v32 = vadd.f32 %v9971_v25, %v3176_v53  ;;  %v10093_v36 = vadd.f32 %v9973_v13, %v3177_v35  ;;  %v3125_v21 = vpop.permute.xlu1 %3124  ;;  %v4056_v11 = vadd.f32 %v4022_v50, %v12278_v16  ;;  %v4046_v34 = vsel %vm2547_vm6, %v12277_v7, 0.0  ;;  %v12279_v13 = vld [vmem:[#allocation82_spill] sm:$0xff] }
 0x3f6   : > { %v3143_v52 = vsel %vm3134_vm7, %v9993_v2, %v3125_v21  ;;  %v3166_v18 = vsel %vm3163_vm8, %v3125_v21, 0.0  ;;  %v10103_v19 = vadd.f32 %v9998_v46, %v9792_v49  ;;  %v10106_v25 = vadd.f32 %v9780_v59, %v4053_v57  ;;  %v12281_v2 = vld [vmem:[#allocation147_spill] sm:$0xff]  ;;  %v12283_v49 = vld [vmem:[#allocation96_spill] sm:$0xff]  ;;  %v12288_v7 = vld [vmem:[#allocation158_spill] sm:$0xff] }
 0x3f7   : > { %v3178_v62 = vadd.f32 %v3143_v52, %v12279_v13  ;;  %v3179_v23 = vadd.f32 %v3166_v18, %v12280_v17  ;;  %v3127_v54 = vpop.permute.xlu0 %3126  ;;  %v10111_v9 = vadd.f32 %v9785_v58, %v4054_v47  ;;  %v10114_v50 = vadd.f32 %v9789_v56, %v4055_v27  ;;  %v12285_v59 = vld [vmem:[#allocation112_spill] sm:$0xff]  ;;  %v12286_v47 = vld [vmem:[#allocation50_spill] sm:$0xff]  ;;  %v12290_v21 = vld [vmem:[#allocation119_spill] sm:$0xff] }
 0x3f8   : > { %v4057_v20 = vadd.f32 %v4023_v0, %v12281_v2  ;;  %v4058_v15 = vadd.f32 %v4024_v1, %v12282_v60  ;;  %v4059_v46 = vadd.f32 %v4046_v34, %v12283_v49  ;;  %v4025_v57 = vsel %vm2518_vm5, %v12285_v59, %v12284_v30  ;;  %v12287_v27 = vld [vmem:[#allocation52_spill] sm:$0xff]  ;;  %v12289_v1 = vld [vmem:[#allocation78_spill] sm:$0xff]  ;;  %v12292_v18 = vld [vmem:[#allocation159_spill] sm:$0xff] }
 0x3f9   : > { %v10123_v26 = vadd.f32 %v10008_v39, %v3178_v62  ;;  %v3214_v53 = vsel %vm541_vm0, %v3179_v23, 0.0  ;;  %v3579_v58 = vpop.permute.xlu1 %3578  ;;  %v10127_v63 = vadd.f32 %v9797_v28, %v4056_v11  ;;  %v4026_v22 = vsel %vm2518_vm5, %v12284_v30, %v12286_v47  ;;  %v12291_v11 = vld [vmem:[#allocation126_spill] sm:$0xff]  ;;  %v12293_v62 = vld [vmem:[#allocation49_spill] sm:$0xff]  ;;  %v12295_v30 = vld [vmem:[#allocation79_spill] sm:$0xff] }
 0x3fa   : > { %v10130_v56 = vadd.f32 %v3214_v53, %v10012_v55  ;;  %v3598_v35 = vsel %vm3134_vm7, %v3577_v42, %v3579_v58  ;;  %v3599_v5 = vsel %vm3134_vm7, %v3579_v58, %v3581_v29  ;;  %v4263_v39 = vsel %vm2518_vm5, %v12241_v14, %v12287_v27  ;;  %v12296_v59 = vld [vmem:[#allocation162_spill] sm:$0xff]  ;;  %v12297_v58 = vld [vmem:[#allocation53_spill] sm:$0xff] }
 0x3fb   : > { %v3632_v24 = vadd.f32 %v3598_v35, %v9910_v44  ;;  %v3633_v28 = vadd.f32 %v3599_v5, %v9917_v45  ;;  %v3131_v0 = vpop.permute.xlu0 %3130  ;;  %v10143_v55 = vadd.f32 %v9802_v48, %v4057_v20  ;;  %v4060_v42 = vadd.f32 %v4025_v57, %v12288_v7  ;;  %v12298_v35 = vld [vmem:[#allocation156_spill] sm:$0xff]  ;;  %v12300_v7 = vld [vmem:[#allocation111_spill] sm:$0xff] }
 0x3fc   : > { %v3854_v16 = vsel %vm3134_vm7, %v12290_v21, %v12289_v1  ;;  %v3855_v34 = vsel %vm3134_vm7, %v12289_v1, %v12291_v11  ;;  %v10153_v14 = vadd.f32 %v9807_v12, %v4058_v15  ;;  %v10156_v44 = vadd.f32 %v9818_v8, %v4059_v46  ;;  %v12294_v46 = vld [vmem:[#allocation135_spill] sm:$0xff]  ;;  %v12301_v1 = vld [vmem:[#allocation150_spill] sm:$0xff] }
 0x3fd   : > { %v3888_v45 = vadd.f32 %v3854_v16, %v3632_v24  ;;  %v3889_v52 = vadd.f32 %v3855_v34, %v3633_v28  ;;  %v3583_v48 = vpop.permute.xlu1 %3582  ;;  %v4061_v13 = vadd.f32 %v4026_v22, %v12292_v18  ;;  %v10160_v17 = vadd.f32 %v4263_v39, %v12293_v62  ;;  %v12305_v62 = vld [vmem:[#allocation81_spill] sm:$0xff] }
 0x3fe   : > { %v3600_v23 = vsel %vm3134_vm7, %v3581_v29, %v3583_v48  ;;  %v3622_v2 = vsel %vm3163_vm8, %v3583_v48, 0.0  ;;  %v10173_v49 = vadd.f32 %v9823_v51, %v4060_v42  ;;  %v4027_v29 = vsel %vm2518_vm5, %v12286_v47, %v12294_v46  ;;  %v12299_v47 = vld [vmem:[#allocation164_spill] sm:$0xff]  ;;  %v12304_v48 = vld [vmem:[#allocation75_spill] sm:$0xff] }
 0x3ff   : > { %v10165_v20 = vadd.f32 %v10041_v40, %v3888_v45  ;;  %v10168_v12 = vadd.f32 %v10043_v37, %v3889_v52  ;;  %v3634_v8 = vadd.f32 %v3600_v23, %v9940_v31  ;;  %v3635_v60 = vadd.f32 %v3622_v2, %v9925_v61  ;;  %v3585_v15 = vpop.permute.xlu0 %3584 }
 0x400   : > { %v3856_v40 = vsel %vm3134_vm7, %v12291_v11, %v12295_v30  ;;  %v3878_v37 = vsel %vm3163_vm8, %v12295_v30, 0.0  ;;  %v4264_v31 = vsel %vm2518_vm5, %v12287_v27, %v12296_v59  ;;  %v4286_v61 = vsel %vm2547_vm6, %v12296_v59, 0.0  ;;  %v12302_v11 = vld [vmem:[#allocation160_spill] sm:$0xff] }
 0x401   : > { %v3890_v51 = vadd.f32 %v3856_v40, %v3634_v8  ;;  %v3891_v57 = vadd.f32 %v3878_v37, %v3635_v60  ;;  %v3129_v53 = vpop.permute.xlu1 %3128  ;;  %v4265_v5 = vsel %vm2518_vm5, %v12298_v35, %v12297_v58  ;;  %v4266_v22 = vsel %vm2518_vm5, %v12297_v58, %v12299_v47  ;;  %v12306_v60 = vld [vmem:[#allocation55_spill] sm:$0xff]  ;;  %v12307_v30 = vld [vmem:[#allocation80_spill] sm:$0xff]  ;;  %v12311_v35 = vld [vmem:[#allocation130_spill] sm:$0xff] }
 0x402   : > { %v3144_v39 = vsel %vm3134_vm7, %v3127_v54, %v3129_v53  ;;  %v3145_v24 = vsel %vm3134_vm7, %v3129_v53, %v3131_v0  ;;  %v10203_v34 = vadd.f32 %v12302_v11, %v4061_v13  ;;  %v10207_v45 = vsel %vm2547_vm6, %v12294_v46, 0.0  ;;  %v12303_v54 = vld [vmem:[#allocation60_spill] sm:$0xff] }
 0x403   : > { %v10197_v27 = vadd.f32 %v10070_v6, %v3890_v51  ;;  %v3926_v28 = vsel %vm541_vm0, %v3891_v57, 0.0  ;;  %v3180_v42 = vadd.f32 %v3144_v39, %v12300_v7  ;;  %v3181_v21 = vadd.f32 %v3145_v24, %v12301_v1  ;;  %v3589_v16 = vpop.permute.xlu0 %3588  ;;  %v12309_v51 = vld [vmem:[#allocation68_spill] sm:$0xff] }
 0x404   : > { %v10210_v52 = vadd.f32 %v4027_v29, %v12303_v54  ;;  %v10213_v6 = vadd.f32 %v3926_v28, %v10081_v41  ;;  %v10216_v18 = vadd.f32 %v4264_v31, %v12304_v48  ;;  %v10219_v23 = vadd.f32 %v4286_v61, %v12305_v62  ;;  %v12308_v31 = vld [vmem:[#allocation113_spill] sm:$0xff]  ;;  %v12310_v53 = vld [vmem:[#allocation48_spill] sm:$0xff] }
 0x405   : > { %v3186_v2 = vadd.f32 %v10090_v32, %v3180_v42  ;;  %v3195_v13 = vadd.f32 %v10093_v36, %v3181_v21  ;;  %v3133_v8 = vpop.permute.xlu1 %3132  ;;  %v10224_v46 = vadd.f32 %v4265_v5, %v12306_v60  ;;  %v10227_v29 = vadd.f32 %v4266_v22, %v12307_v30  ;;  %v12313_v22 = vld [vmem:[#allocation122_spill] sm:$0xff] }
 0x406   : > { %v3146_v41 = vsel %vm3134_vm7, %v3131_v0, %v3133_v8  ;;  %v3167_v40 = vsel %vm3163_vm8, %v3133_v8, 0.0  ;;  %v10236_v36 = vsel %vm2518_vm5, %v12299_v47, %v12310_v53  ;;  %v10240_v58 = vsel %vm2547_vm6, %v12310_v53, 0.0  ;;  %v12312_v0 = vld [vmem:[#allocation77_spill] sm:$0xff] }
 0x407   : > { %v3187_v37 = vrot.slane %v3186_v2, 4  ;;  %v3196_v59 = vrot.slane %v3195_v13, 4  ;;  %v3182_v61 = vadd.f32 %v3146_v41, %v12308_v31  ;;  %v3183_v57 = vadd.f32 %v3167_v40, %v12309_v51  ;;  %v4349_v32 = vpop.permute.xlu0 %4348 }
 0x408   : > { %v3857_v5 = vsel %vm3134_vm7, %v12312_v0, %v12311_v35  ;;  %v4372_v39 = vsel %vm2518_vm5, %v12313_v22, %v4349_v32 }
 0x409   : > { %v3188_v24 = vadd.f32 %v3187_v37, %v3186_v2  ;;  %v3197_v28 = vadd.f32 %v3196_v59, %v3195_v13  ;;  %v3204_v7 = vadd.f32 %v10123_v26, %v3182_v61  ;;  %v3216_v42 = vsel %vm541_vm0, %v3183_v57, 0.0  ;;  %v3587_v1 = vpop.permute.xlu1 %3586  ;;  %v12314_v13 = vld [vmem:[#allocation51_spill] sm:$0xff] }
 0x40a   : > { %v3217_v47 = vadd.f32 %v3216_v42, %v10130_v56  ;;  %v3601_v21 = vsel %vm3134_vm7, %v3585_v15, %v3587_v1  ;;  %v3602_v11 = vsel %vm3134_vm7, %v3587_v1, %v3589_v16  ;;  %v4405_v54 = vadd.f32 %v4372_v39, %v9900_v3 }
 0x40b   : > { %v3189_v48 = vrot.slane %v3188_v24, 2  ;;  %v3198_v62 = vrot.slane %v3197_v28, 2  ;;  %v3205_v8 = vrot.slane %v3204_v7, 4  ;;  %v3636_v60 = vadd.f32 %v3601_v21, %v9959_v38  ;;  %v4353_v2 = vpop.permute.xlu0 %4352 }
 0x40c   : > { %v3858_v26 = vsel %vm3134_vm7, %v12311_v35, %v12314_v13  ;;  %v3218_v30 = vrot.slane %v3217_v47, 4  ;;  %v3637_v41 = vadd.f32 %v3602_v11, %v9966_v4  ;;  %v10259_v56 = vadd.f32 %v4405_v54, %v10106_v25 }
 0x40d   : > { %v3190_v15 = vadd.f32 %v3189_v48, %v3188_v24  ;;  %v3199_v40 = vadd.f32 %v3198_v62, %v3197_v28  ;;  %v3206_v37 = vadd.f32 %v3205_v8, %v3204_v7  ;;  %v3892_v3 = vadd.f32 %v3857_v5, %v3636_v60  ;;  %v3591_v59 = vpop.permute.xlu1 %3590  ;;  %v12315_v24 = vld [vmem:[#allocation67_spill] sm:$0xff] }
 0x40e   : > { %v3219_v31 = vadd.f32 %v3218_v30, %v3217_v47  ;;  %v3893_v61 = vadd.f32 %v3858_v26, %v3637_v41  ;;  %v3603_v38 = vsel %vm3134_vm7, %v3589_v16, %v3591_v59  ;;  %v3623_v51 = vsel %vm3163_vm8, %v3591_v59, 0.0 }
 0x40f   : > { %v3191_v57 = vrot.slane %v3190_v15, 1  ;;  %v3200_v53 = vrot.slane %v3199_v40, 1  ;;  %v3207_v35 = vrot.slane %v3206_v37, 2  ;;  %v3898_v0 = vadd.f32 %v10165_v20, %v3892_v3  ;;  %v4357_v4 = vpop.permute.xlu0 %4356 }
 0x410   : > { %v3220_v22 = vrot.slane %v3219_v31, 2  ;;  %v3907_v25 = vadd.f32 %v10168_v12, %v3893_v61  ;;  %v3638_v39 = vadd.f32 %v3603_v38, %v10103_v19  ;;  %v3639_v5 = vadd.f32 %v3623_v51, %v10077_v10 }
 0x411   : > { %v3859_v28 = vsel %vm3134_vm7, %v12314_v13, %v12315_v24  ;;  %v3879_v16 = vsel %vm3163_vm8, %v12315_v24, 0.0  ;;  %v10272_v7 = vadd.f32 %v3207_v35, %v3206_v37  ;;  %v3899_v42 = vrot.slane %v3898_v0, 4  ;;  %v4351_v1 = vpop.permute.xlu1 %4350  ;;  %v12316_v35 = vld [vmem:[#allocation100_spill] sm:$0xff] }
 0x412   : > { %v10274_v20 = vadd.f32 %v3220_v22, %v3219_v31  ;;  %v3908_v47 = vrot.slane %v3907_v25, 4  ;;  %v3894_v12 = vadd.f32 %v3859_v28, %v3638_v39  ;;  %v3895_v21 = vadd.f32 %v3879_v16, %v3639_v5 }
 0x413   : > { %v3192_v19 = vadd.f32 %v3191_v57, %v3190_v15  ;;  %v3900_v11 = vadd.f32 %v3899_v42, %v3898_v0  ;;  %v4373_v10 = vsel %vm2518_vm5, %v4349_v32, %v4351_v1  ;;  %v4397_v54 = vsel %vm2547_vm6, %v4351_v1, 0.0  ;;  %v4361_v48 = vpop.permute.xlu0 %4360 }
 0x414   : > { %v3201_v62 = vadd.f32 %v3200_v53, %v3199_v40  ;;  %v3909_v8 = vadd.f32 %v3908_v47, %v3907_v25  ;;  %v3916_v60 = vadd.f32 %v10197_v27, %v3894_v12  ;;  %v3928_v13 = vsel %vm541_vm0, %v3895_v21, 0.0 }
 0x415   : > { %v3209_v26 = vrot.slane %v10272_v7, 1  ;;  %v3901_v30 = vrot.slane %v3900_v11, 2  ;;  %v3929_v41 = vadd.f32 %v3928_v13, %v10213_v6  ;;  %v4406_v37 = vadd.f32 %v4373_v10, %v9903_v43  ;;  %v4355_v15 = vpop.permute.xlu1 %4354 }
 0x416   : > { %v3222_v3 = vrot.slane %v10274_v20, 1  ;;  %v3910_v32 = vrot.slane %v3909_v8, 2  ;;  %v3917_v59 = vrot.slane %v3916_v60, 4  ;;  %v4407_v31 = vadd.f32 %v4397_v54, %v9908_v33 }
 0x417   : > { %v3902_v40 = vadd.f32 %v3901_v30, %v3900_v11  ;;  %v3930_v61 = vrot.slane %v3929_v41, 4  ;;  %v4374_v27 = vsel %vm2518_vm5, %v4353_v2, %v4355_v15  ;;  %v4375_v38 = vsel %vm2518_vm5, %v4355_v15, %v4357_v4  ;;  %v4365_v51 = vpop.permute.xlu0 %4364  ;;  %v12319_v15 = vld [vmem:[#allocation84_spill] sm:$0xff] }
 0x418   : > { %v3911_v57 = vadd.f32 %v3910_v32, %v3909_v8  ;;  %v3918_v53 = vadd.f32 %v3917_v59, %v3916_v60  ;;  %v4408_v6 = vadd.f32 %v4374_v27, %v12316_v35  ;;  %v4409_v43 = vadd.f32 %v4375_v38, %v10160_v17  ;;  %v12317_v60 = vld [vmem:[#allocation46_spill] sm:$0xff] }
 0x419   : > { %v3903_v0 = vrot.slane %v3902_v40, 1  ;;  %v3931_v22 = vadd.f32 %v3930_v61, %v3929_v41  ;;  %v4359_v25 = vpop.permute.xlu1 %4358  ;;  %v10290_v39 = vadd.f32 %v4406_v37, %v10111_v9  ;;  %v10293_v33 = vadd.f32 %v4407_v31, %v10114_v50  ;;  %v12318_v37 = vld [vmem:[#allocation54_spill] sm:$0xff] }
 0x41a   : > { %v3912_v5 = vrot.slane %v3911_v57, 1  ;;  %v3919_v2 = vrot.slane %v3918_v53, 2  ;;  %v4376_v24 = vsel %vm2518_vm5, %v4357_v4, %v4359_v25  ;;  %v4398_v28 = vsel %vm2547_vm6, %v4359_v25, 0.0 }
 0x41b   : > { %v3904_v16 = vadd.f32 %v3903_v0, %v3902_v40  ;;  %v3932_v42 = vrot.slane %v3931_v22, 2  ;;  %v4410_v1 = vadd.f32 %v4376_v24, %v10216_v18  ;;  %v4411_v17 = vadd.f32 %v4398_v28, %v10219_v23  ;;  %v4481_v47 = vpop.permute.xlu0 %4480 }
 0x41c   : > { %v3913_v12 = vadd.f32 %v3912_v5, %v3911_v57  ;;  %v3920_v21 = vadd.f32 %v3919_v2, %v3918_v53  ;;  %v10300_v9 = vadd.f32 %v4408_v6, %v10127_v63  ;;  %v10303_v50 = vadd.f32 %v4409_v43, %v10143_v55 }
 0x41d   : > { %v10306_v11 = vsel %vm5760_vm9, %v3192_v19, %v3904_v16  ;;  %v3933_v4 = vadd.f32 %v3932_v42, %v3931_v22  ;;  %v4363_v10 = vpop.permute.xlu1 %4362  ;;  %v10309_v54 = vadd.f32 %v4410_v1, %v10153_v14  ;;  %v10312_v18 = vadd.f32 %v4411_v17, %v10156_v44 }
 0x41e   : > { %v10315_v23 = vsel %vm5760_vm9, %v3201_v62, %v3913_v12  ;;  %v3921_v8 = vrot.slane %v3920_v21, 1  ;;  %v4377_v63 = vsel %vm2518_vm5, %v4361_v48, %v4363_v10  ;;  %v4378_v55 = vsel %vm2518_vm5, %v4363_v10, %v4365_v51  ;;  %v10366_v12 = vld [vmem:[#allocation4 + $0x100] sm:$0xff]  ;;  %v12323_v10 = vld [vmem:[#allocation76_spill] sm:$0xff] }
 0x41f   : > { %v4063_v19 = vadd.f32 %v10207_v45, %v12317_v60  ;;  %v3934_v13 = vrot.slane %v3933_v4, 1  ;;  %v4412_v30 = vadd.f32 %v4377_v63, %v10224_v46  ;;  %v4413_v14 = vadd.f32 %v4378_v55, %v10227_v29  ;;  %v4485_v41 = vpop.permute.xlu0 %4484  ;;  %v12320_v29 = vld [vmem:[#allocation143_spill] sm:$0xff] }
 0x420   : > { %v4302_v44 = vadd.f32 %v10236_v36, %v12318_v37  ;;  %v4303_v62 = vadd.f32 %v10240_v58, %v12319_v15  ;;  %v3210_v32 = vadd.f32 %v3209_v26, %v10272_v7  ;;  %v3922_v48 = vadd.f32 %v3921_v8, %v3920_v21  ;;  %v12321_v26 = vld [vmem:[#allocation108_spill] sm:$0xff]  ;;  %v10376_v37 = vld [vmem:[#allocation4 + $0x110] sm:$0xff] }
 0x421   : > { %v3223_v59 = vadd.f32 %v3222_v3, %v10274_v20  ;;  %v3935_v31 = vadd.f32 %v3934_v13, %v3933_v4  ;;  %v4367_v40 = vpop.permute.xlu1 %4366  ;;  %v10330_v45 = vadd.f32 %v4412_v30, %v10173_v49  ;;  %v10333_v46 = vadd.f32 %v4413_v14, %v10203_v34  ;;  %v12322_v21 = vld [vmem:[#allocation32_spill] sm:$0xff] }
 0x422   : > { %v4174_v61 = vadd.f32 %v12320_v29, %v10210_v52  ;;  %v10338_v36 = vsel %vm5760_vm9, %v3210_v32, %v3922_v48  ;;  %v4379_v58 = vsel %vm2518_vm5, %v4365_v51, %v4367_v40  ;;  %v4399_v7 = vsel %vm2547_vm6, %v4367_v40, 0.0  ;;  %v10380_v15 = vld [vmem:[#allocation4 + $0x118] sm:$0xff] }
 0x423   : > { %v4175_v20 = vadd.f32 %v12321_v26, %v4063_v19  ;;  %v10344_v3 = vsel %vm5760_vm9, %v3223_v59, %v3935_v31  ;;  %v4414_v49 = vadd.f32 %v4379_v58, %v4302_v44  ;;  %v4415_v27 = vadd.f32 %v4399_v7, %v4303_v62  ;;  %v4489_v38 = vpop.permute.xlu0 %4488  ;;  %12324 = vst [vmem:[#allocation65_spill] sm:$0xff] %v10380_v15  ;;  %v12325_v26 = vld [vmem:[#allocation35_spill] sm:$0xff] }
 0x424   : > { %v4432_v4 = vmul.f32 %v10366_v12, %v12322_v21  ;;  %v4433_v8 = vmul.f32 %v12323_v10, %v12322_v21  ;;  %v4434_v44 = vmul.f32 %v10376_v37, %v12322_v21  ;;  %v4435_v62 = vmul.f32 %v10380_v15, %v12322_v21 }
 0x425   : > { %v4483_v34 = vpop.permute.xlu1 %4482  ;;  %v10346_v57 = vadd.f32 %v4414_v49, %v4174_v61  ;;  %v10348_v53 = vadd.f32 %v4415_v27, %v4175_v20  ;;  %v12326_v20 = vld [vmem:[#allocation83_spill] sm:$0xff] }
 0x426   : > { %v4512_v1 = vsel %vm2518_vm5, %v4481_v47, %v4483_v34  ;;  %v4513_v17 = vsel %vm2518_vm5, %v4483_v34, %v4485_v41  ;;  %v4436_v49 = vmul.f32 %v12326_v20, %v12325_v26  ;;  %v12327_v27 = vld [vmem:[#allocation151_spill] sm:$0xff] }
 0x427   : > { %v4493_v52 = vpop.permute.xlu0 %4492  ;;  %v4544_v55 = vadd.f32 %v4512_v1, %v4432_v4  ;;  %v4545_v60 = vadd.f32 %v4513_v17, %v4433_v8  ;;  %v4437_v34 = vmul.f32 %v12327_v27, %v12325_v26 }
 0x429   : > { %v4487_v35 = vpop.permute.xlu1 %4486 }
 0x42a   : > { %v4514_v13 = vsel %vm2518_vm5, %v4485_v41, %v4487_v35  ;;  %v4540_v30 = vsel %vm2547_vm6, %v4487_v35, 0.0 }
 0x42b   : > { %v10350_v6 = vpop.permute.xlu0 %4496  ;;  %v4546_v41 = vadd.f32 %v4514_v13, %v4434_v44  ;;  %v4547_v31 = vadd.f32 %v4540_v30, %v4435_v62 }
 0x42d   : > { %v4491_v51 = vpop.permute.xlu1 %4490 }
 0x42e   : > { %v4515_v29 = vsel %vm2518_vm5, %v4489_v38, %v4491_v51  ;;  %v4516_v61 = vsel %vm2518_vm5, %v4491_v51, %v4493_v52 }
 0x42f   : > { %v10352_v43 = vpop.permute.xlu0 %4500  ;;  %v4548_v17 = vadd.f32 %v4515_v29, %v4436_v49  ;;  %v4549_v4 = vadd.f32 %v4516_v61, %v4437_v34  ;;  %v12331_v29 = vld [vmem:[#allocation141_spill] sm:$0xff] }
 0x431   : > { %v4495_v0 = vpop.permute.xlu1 %4494 }
 0x432   : > { %v4517_v51 = vsel %vm2518_vm5, %v4493_v52, %v4495_v0 }
 0x433   : > { %v10354_v22 = vpop.permute.xlu0 %4504 }
 0x435   : > { %v4499_v25 = vpop.permute.xlu1 %4498 }
 0x437   : > { %v10356_v5 = vpop.permute.xlu0 %4508 }
 0x439   : > { %v10358_v2 = vpop.permute.xlu1 %4502 }
 0x43b   : > { %v4593_v24 = vpop.permute.xlu0 %4592 }
 0x43d   : > { %v10360_v28 = vpop.permute.xlu1 %4506 }
 0x43f   : > { %v4597_v16 = vpop.permute.xlu0 %4596 }
 0x441   : > { %v10362_v42 = vpop.permute.xlu1 %4510 }
 0x443   : > { %v4601_v63 = vpop.permute.xlu0 %4600 }
 0x445   : > { %v4595_v19 = vpop.permute.xlu1 %4594 }
 0x446   : > { %v4624_v47 = vsel %vm2518_vm5, %v4593_v24, %v4595_v19  ;;  %v4625_v14 = vsel %vm2518_vm5, %v4595_v19, %v4597_v16  ;;  %v12329_v19 = vld [vmem:[#allocation146_spill] sm:$0xff] }
 0x447   : > { %v4656_v32 = vadd.f32 %v4624_v47, %v4544_v55  ;;  %v4657_v48 = vadd.f32 %v4625_v14, %v4545_v60  ;;  %v4605_v59 = vpop.permute.xlu0 %4604  ;;  %v12328_v55 = vld [vmem:[#allocation153_spill] sm:$0xff]  ;;  %v4439_v13 = vmul.f32 %v12329_v19, %v12325_v26 }
 0x448   : > { %v4438_v60 = vmul.f32 %v12328_v55, %v12325_v26  ;;  %v10441_v19 = vld [vmem:[#allocation4 + $0x160] sm:$0xff]  ;;  %v6196_v26 = vld [vmem:[#allocation4 + $0x10] sm:$0xff] }
 0x449   : > { %4688 = vrot.lane.b32.xlu0 %v4656_v32, %s6270_s10  ;;  %v4599_v40 = vpop.permute.xlu1 %4598  ;;  %4690 = vrot.lane.b32.xlu1 %v4657_v48, %s6270_s10  ;;  %12334 = vst [vmem:[#allocation57_spill] sm:$0xff] %v10441_v19 }
 0x44a   : > { %v4626_v58 = vsel %vm2518_vm5, %v4597_v16, %v4599_v40  ;;  %v4652_v7 = vsel %vm2547_vm6, %v4599_v40, 0.0  ;;  %v4541_v16 = vsel %vm2547_vm6, %v4495_v0, 0.0  ;;  %v4550_v14 = vadd.f32 %v4517_v51, %v4438_v60 }
 0x44b   : > { %v4658_v35 = vadd.f32 %v4626_v58, %v4546_v41  ;;  %v4659_v24 = vadd.f32 %v4652_v7, %v4547_v31  ;;  %v4609_v1 = vpop.permute.xlu0 %4608  ;;  %v4551_v44 = vadd.f32 %v4541_v16, %v4439_v13  ;;  %v4518_v0 = vsel %vm2518_vm5, %v10350_v6, %v4499_v25  ;;  %v10412_v41 = vld [vmem:[#allocation4 + $0x140] sm:$0xff]  ;;  %v12330_v31 = vld [vmem:[#allocation34_spill] sm:$0xff] }
 0x44c   : > { %v4440_v40 = vmul.f32 %v10412_v41, %v12330_v31  ;;  %v4441_v61 = vmul.f32 %v12331_v29, %v12330_v31  ;;  %v12335_v13 = vld [vmem:[#allocation37_spill] sm:$0xff]  ;;  %v10456_v29 = vld [vmem:[#allocation4 + $0x170] sm:$0xff] }
 0x44d   : > { %4692 = vrot.lane.b32.xlu0 %v4658_v35, %s6270_s10  ;;  %v4603_v38 = vpop.permute.xlu1 %4602  ;;  %4694 = vrot.lane.b32.xlu1 %v4659_v24, %s6270_s10  ;;  %v12332_v35 = vld [vmem:[#allocation133_spill] sm:$0xff]  ;;  %12337 = vst [vmem:[#allocation167_spill] sm:$0xff] %v10456_v29 }
 0x44e   : > { %v4627_v10 = vsel %vm2518_vm5, %v4601_v63, %v4603_v38  ;;  %v4628_v8 = vsel %vm2518_vm5, %v4603_v38, %v4605_v59  ;;  %v4519_v63 = vsel %vm2518_vm5, %v4499_v25, %v10352_v43  ;;  %v4552_v20 = vadd.f32 %v4518_v0, %v4440_v40 }
 0x44f   : > { %v4660_v30 = vadd.f32 %v4627_v10, %v4548_v17  ;;  %v4661_v47 = vadd.f32 %v4628_v8, %v4549_v4  ;;  %v4613_v52 = vpop.permute.xlu0 %4612  ;;  %v4553_v49 = vadd.f32 %v4519_v63, %v4441_v61  ;;  %v4520_v25 = vsel %vm2518_vm5, %v10352_v43, %v10358_v2  ;;  %v12333_v17 = vld [vmem:[#allocation91_spill] sm:$0xff] }
 0x450   : > { %v4442_v24 = vmul.f32 %v12332_v35, %v12330_v31  ;;  %v4443_v4 = vmul.f32 %v12333_v17, %v12330_v31  ;;  %v4446_v61 = vmul.f32 %v10456_v29, %v12335_v13  ;;  %v10470_v35 = vld [vmem:[#allocation4 + $0x80] sm:$0xff] }
 0x451   : > { %4696 = vrot.lane.b32.xlu0 %v4660_v30, %s6270_s10  ;;  %v4607_v62 = vpop.permute.xlu1 %4606  ;;  %4698 = vrot.lane.b32.xlu1 %v4661_v47, %s6270_s10  ;;  %v4444_v30 = vmul.f32 %v10441_v19, %v12335_v13  ;;  %v12336_v47 = vld [vmem:[#allocation163_spill] sm:$0xff] }
 0x452   : > { %v4629_v32 = vsel %vm2518_vm5, %v4605_v59, %v4607_v62  ;;  %v4653_v48 = vsel %vm2547_vm6, %v4607_v62, 0.0  ;;  %v4542_v59 = vsel %vm2547_vm6, %v10358_v2, 0.0  ;;  %v4554_v10 = vadd.f32 %v4520_v25, %v4442_v24  ;;  %v12338_v24 = vld [vmem:[#allocation12_spill] sm:$0xff] }
 0x453   : > { %v4662_v58 = vadd.f32 %v4629_v32, %v4550_v14  ;;  %v4663_v7 = vadd.f32 %v4653_v48, %v4551_v44  ;;  %v4617_v16 = vpop.permute.xlu0 %4616  ;;  %v4555_v8 = vadd.f32 %v4542_v59, %v4443_v4  ;;  %v4521_v2 = vsel %vm2518_vm5, %v10354_v22, %v10360_v28  ;;  %v10474_v4 = vld [vmem:[#allocation4 + $0x88] sm:$0xff] }
 0x454   : > { %v4445_v14 = vmul.f32 %v12336_v47, %v12335_v13  ;;  %v4556_v0 = vadd.f32 %v4521_v2, %v4444_v30  ;;  %v4543_v32 = vsel %vm2547_vm6, %v10362_v42, 0.0  ;;  %v4824_v17 = vmul.f32 %v10470_v35, %v12338_v24  ;;  %v12339_v2 = vld [vmem:[#allocation15_spill] sm:$0xff] }
 0x455   : > { %4700 = vrot.lane.b32.xlu0 %v4662_v58, %s6270_s10  ;;  %v4611_v6 = vpop.permute.xlu1 %4610  ;;  %4702 = vrot.lane.b32.xlu1 %v4663_v7, %s6270_s10  ;;  %v10460_v58 = vld [vmem:[#allocation4 + $0x178] sm:$0xff]  ;;  %v10500_v30 = vld [vmem:[#allocation4 + $0xb0] sm:$0xff] }
 0x456   : > { %v4630_v27 = vsel %vm2518_vm5, %v4609_v1, %v4611_v6  ;;  %v4631_v34 = vsel %vm2518_vm5, %v4611_v6, %v4613_v52  ;;  %v4522_v1 = vsel %vm2518_vm5, %v10360_v28, %v10356_v5  ;;  %v4447_v7 = vmul.f32 %v10460_v58, %v12335_v13  ;;  %v12358_v13 = vld [vmem:[#allocation24_spill] sm:$0xff] }
 0x457   : > { %v4664_v38 = vadd.f32 %v4630_v27, %v4552_v20  ;;  %v4665_v51 = vadd.f32 %v4631_v34, %v4553_v49  ;;  %v4557_v22 = vadd.f32 %v4522_v1, %v4445_v14  ;;  %v4621_v28 = vpop.permute.xlu0 %4620  ;;  %v4830_v47 = vmul.f32 %v10500_v30, %v12339_v2  ;;  %v10504_v14 = vld [vmem:[#allocation4 + $0xb8] sm:$0xff] }
 0x458   : > { %v4559_v6 = vadd.f32 %v4543_v32, %v4447_v7  ;;  %v12342_v7 = vld [vmem:[#allocation17_spill] sm:$0xff]  ;;  %v5066_v21 = vmul.f32 %v6196_v26, %v12358_v13 }
 0x459   : > { %4704 = vrot.lane.b32.xlu0 %v4664_v38, %s6270_s10  ;;  %v4615_v43 = vpop.permute.xlu1 %4614  ;;  %4706 = vrot.lane.b32.xlu1 %v4665_v51, %s6270_s10  ;;  %v4825_v38 = vmul.f32 %v10474_v4, %v12338_v24  ;;  %v10480_v51 = vld [vmem:[#allocation4 + $0x90] sm:$0xff] }
 0x45a   : > { %v4632_v55 = vsel %vm2518_vm5, %v4613_v52, %v4615_v43  ;;  %v4654_v60 = vsel %vm2547_vm6, %v4615_v43, 0.0  ;;  %v4523_v52 = vsel %vm2518_vm5, %v10356_v5, %v10362_v42  ;;  %v10490_v43 = vld [vmem:[#allocation4 + $0xa0] sm:$0xff] }
 0x45b   : > { %v4666_v44 = vadd.f32 %v4632_v55, %v4554_v10  ;;  %v4667_v62 = vadd.f32 %v4654_v60, %v4555_v8  ;;  %v4558_v5 = vadd.f32 %v4523_v52, %v4446_v61  ;;  %v10484_v10 = vld [vmem:[#allocation4 + $0x98] sm:$0xff]  ;;  %v4828_v1 = vmul.f32 %v10490_v43, %v12339_v2  ;;  %v10494_v55 = vld [vmem:[#allocation4 + $0xa8] sm:$0xff]  ;;  %v10520_v52 = vld [vmem:[#allocation4 + $0xd0] sm:$0xff] }
 0x45c   : > { %v4827_v8 = vmul.f32 %v10484_v10, %v12338_v24  ;;  %v4829_v60 = vmul.f32 %v10494_v55, %v12339_v2  ;;  %v10530_v61 = vld [vmem:[#allocation4 + $0xe0] sm:$0xff] }
 0x45d   : > { %4708 = vrot.lane.b32.xlu0 %v4666_v44, %s6270_s10  ;;  %v4619_v63 = vpop.permute.xlu1 %4618  ;;  %4710 = vrot.lane.b32.xlu1 %v4667_v62, %s6270_s10  ;;  %v4831_v44 = vmul.f32 %v10504_v14, %v12339_v2  ;;  %v10510_v62 = vld [vmem:[#allocation4 + $0xc0] sm:$0xff]  ;;  %12341 = vst [vmem:[#allocation123_spill] sm:$0xff] %v10530_v61  ;;  %v10564_v2 = vld [vmem:[#allocation4 + $0x198] sm:$0xff] }
 0x45e   : > { %v4633_v48 = vsel %vm2518_vm5, %v4617_v16, %v4619_v63  ;;  %v4634_v40 = vsel %vm2518_vm5, %v4619_v63, %v4621_v28  ;;  %v4826_v16 = vmul.f32 %v10480_v51, %v12338_v24  ;;  %v10514_v63 = vld [vmem:[#allocation4 + $0xc8] sm:$0xff] }
 0x45f   : > { %v4668_v20 = vadd.f32 %v4633_v48, %v4556_v0  ;;  %v4669_v49 = vadd.f32 %v4634_v40, %v4557_v22  ;;  %v12340_v0 = vld [vmem:[#allocation14_spill] sm:$0xff]  ;;  %v10524_v48 = vld [vmem:[#allocation4 + $0xd8] sm:$0xff] }
 0x460   : > { %v4832_v22 = vmul.f32 %v10510_v62, %v12340_v0  ;;  %v4834_v32 = vmul.f32 %v10520_v52, %v12340_v0  ;;  %v4835_v40 = vmul.f32 %v10524_v48, %v12340_v0 }
 0x461   : > { %4712 = vrot.lane.b32.xlu0 %v4668_v20, %s6270_s10  ;;  %v4623_v42 = vpop.permute.xlu1 %4622  ;;  %4714 = vrot.lane.b32.xlu1 %v4669_v49, %s6270_s10  ;;  %v4836_v20 = vmul.f32 %v10530_v61, %v12342_v7  ;;  %v10534_v49 = vld [vmem:[#allocation4 + $0xe8] sm:$0xff] }
 0x462   : > { %v4635_v25 = vsel %vm2518_vm5, %v4621_v28, %v4623_v42  ;;  %v4655_v59 = vsel %vm2547_vm6, %v4623_v42, 0.0  ;;  %v4833_v28 = vmul.f32 %v10514_v63, %v12340_v0  ;;  %12343 = vst [vmem:[#allocation66_spill] sm:$0xff] %v10534_v49  ;;  %v10574_v0 = vld [vmem:[#allocation4 + $0x1a8] sm:$0xff] }
 0x463   : > { %v4670_v27 = vadd.f32 %v4635_v25, %v4558_v5  ;;  %v4671_v34 = vadd.f32 %v4655_v59, %v4559_v6  ;;  %v4837_v5 = vmul.f32 %v10534_v49, %v12342_v7  ;;  %v10540_v6 = vld [vmem:[#allocation4 + $0xf0] sm:$0xff]  ;;  %v10544_v25 = vld [vmem:[#allocation4 + $0xf8] sm:$0xff]  ;;  %v12366_v49 = vld [vmem:[#allocation154_spill] sm:$0xff] }
 0x464   : > { %12344 = vst [vmem:[#allocation72_spill] sm:$0xff] %v10540_v6  ;;  %v4838_v42 = vmul.f32 %v10540_v6, %v12342_v7  ;;  %12345 = vst [vmem:[#allocation85_spill] sm:$0xff] %v10544_v25  ;;  %v4839_v59 = vmul.f32 %v10544_v25, %v12342_v7  ;;  %v10679_v25 = vld [vmem:[#allocation4 + $0x108] sm:$0xff] }
 0x465   : > { %4716 = vrot.lane.b32.xlu0 %v4670_v27, %s6270_s10  ;;  %4718 = vrot.lane.b32.xlu1 %v4671_v34, %s6270_s10  ;;  %v10550_v27 = vld [vmem:[#allocation4 + $0x180] sm:$0xff]  ;;  %v12346_v34 = vld [vmem:[#allocation16_spill] sm:$0xff] }
 0x466   : > { %v4936_v24 = vmul.f32 %v10550_v27, %v12346_v34 }
 0x469   : > { %4856 = vrot.lane.b32.xlu0 %v4824_v17, %s6269_s9  ;;  %4858 = vrot.lane.b32.xlu1 %v4825_v38, %s6269_s9  ;;  %v10554_v17 = vld [vmem:[#allocation4 + $0x188] sm:$0xff] }
 0x46a   : > { %v4937_v38 = vmul.f32 %v10554_v17, %v12346_v34 }
 0x46d   : > { %4860 = vrot.lane.b32.xlu0 %v4826_v16, %s6269_s9  ;;  %4862 = vrot.lane.b32.xlu1 %v4827_v8, %s6269_s9  ;;  %v10560_v16 = vld [vmem:[#allocation4 + $0x190] sm:$0xff] }
 0x46e   : > { %v4938_v8 = vmul.f32 %v10560_v16, %v12346_v34 }
 0x471   : > { %4864 = vrot.lane.b32.xlu0 %v4828_v1, %s6269_s9  ;;  %4866 = vrot.lane.b32.xlu1 %v4829_v60, %s6269_s9  ;;  %v4939_v1 = vmul.f32 %v10564_v2, %v12346_v34  ;;  %v10570_v60 = vld [vmem:[#allocation4 + $0x1a0] sm:$0xff] }
 0x475   : > { %4868 = vrot.lane.b32.xlu0 %v4830_v47, %s6269_s9  ;;  %4870 = vrot.lane.b32.xlu1 %v4831_v44, %s6269_s9  ;;  %v12347_v47 = vld [vmem:[#allocation19_spill] sm:$0xff] }
 0x476   : > { %v4940_v44 = vmul.f32 %v10570_v60, %v12347_v47 }
 0x479   : > { %4872 = vrot.lane.b32.xlu0 %v4832_v22, %s6269_s9  ;;  %4874 = vrot.lane.b32.xlu1 %v4833_v28, %s6269_s9  ;;  %v4941_v22 = vmul.f32 %v10574_v0, %v12347_v47  ;;  %v10580_v28 = vld [vmem:[#allocation4 + $0x1b0] sm:$0xff] }
 0x47d   : > { %4876 = vrot.lane.b32.xlu0 %v4834_v32, %s6269_s9  ;;  %4878 = vrot.lane.b32.xlu1 %v4835_v40, %s6269_s9  ;;  %v4942_v32 = vmul.f32 %v10580_v28, %v12347_v47  ;;  %v10584_v40 = vld [vmem:[#allocation4 + $0x1b8] sm:$0xff] }
 0x47e   : > { %v4943_v7 = vmul.f32 %v10584_v40, %v12347_v47  ;;  %v10610_v47 = vld [vmem:[#allocation4 + $0x1e0] sm:$0xff] }
 0x47f   : > { %12353 = vst [vmem:[#allocation89_spill] sm:$0xff] %v10610_v47 }
 0x481   : > { %4880 = vrot.lane.b32.xlu0 %v4836_v20, %s6269_s9  ;;  %4882 = vrot.lane.b32.xlu1 %v4837_v5, %s6269_s9  ;;  %v10590_v20 = vld [vmem:[#allocation4 + $0x1c0] sm:$0xff]  ;;  %v12349_v5 = vld [vmem:[#allocation18_spill] sm:$0xff] }
 0x482   : > { %12348 = vst [vmem:[#allocation47_spill] sm:$0xff] %v10590_v20 }
 0x485   : > { %4884 = vrot.lane.b32.xlu0 %v4838_v42, %s6269_s9  ;;  %4886 = vrot.lane.b32.xlu1 %v4839_v59, %s6269_s9  ;;  %v4944_v42 = vmul.f32 %v10590_v20, %v12349_v5  ;;  %v10594_v59 = vld [vmem:[#allocation4 + $0x1c8] sm:$0xff] }
 0x486   : > { %12350 = vst [vmem:[#allocation69_spill] sm:$0xff] %v10594_v59  ;;  %v4945_v34 = vmul.f32 %v10594_v59, %v12349_v5 }
 0x489   : > { %4968 = vrot.lane.b32.xlu0 %v4936_v24, %s6269_s9  ;;  %4970 = vrot.lane.b32.xlu1 %v4937_v38, %s6269_s9  ;;  %v10600_v24 = vld [vmem:[#allocation4 + $0x1d0] sm:$0xff] }
 0x48a   : > { %12351 = vst [vmem:[#allocation88_spill] sm:$0xff] %v10600_v24  ;;  %v4946_v38 = vmul.f32 %v10600_v24, %v12349_v5  ;;  %v6199_v24 = vld [vmem:[#allocation4 + $0x38] sm:$0xff] }
 0x48d   : > { %4972 = vrot.lane.b32.xlu0 %v4938_v8, %s6269_s9  ;;  %4974 = vrot.lane.b32.xlu1 %v4939_v1, %s6269_s9  ;;  %v10604_v8 = vld [vmem:[#allocation4 + $0x1d8] sm:$0xff] }
 0x48e   : > { %12352 = vst [vmem:[#allocation95_spill] sm:$0xff] %v10604_v8  ;;  %v4947_v1 = vmul.f32 %v10604_v8, %v12349_v5 }
 0x491   : > { %4976 = vrot.lane.b32.xlu0 %v4940_v44, %s6269_s9  ;;  %4978 = vrot.lane.b32.xlu1 %v4941_v22, %s6269_s9  ;;  %v12354_v44 = vld [vmem:[#allocation21_spill] sm:$0xff] }
 0x492   : > { %v4948_v22 = vmul.f32 %v10610_v47, %v12354_v44  ;;  %v6197_v47 = vld [vmem:[#allocation4 + $0x18] sm:$0xff] }
 0x495   : > { %4980 = vrot.lane.b32.xlu0 %v4942_v32, %s6269_s9  ;;  %4982 = vrot.lane.b32.xlu1 %v4943_v7, %s6269_s9  ;;  %v10614_v32 = vld [vmem:[#allocation4 + $0x1e8] sm:$0xff] }
 0x496   : > { %12355 = vst [vmem:[#allocation90_spill] sm:$0xff] %v10614_v32  ;;  %v4949_v7 = vmul.f32 %v10614_v32, %v12354_v44 }
 0x499   : > { %4984 = vrot.lane.b32.xlu0 %v4944_v42, %s6269_s9  ;;  %4986 = vrot.lane.b32.xlu1 %v4945_v34, %s6269_s9  ;;  %v10620_v42 = vld [vmem:[#allocation4 + $0x1f0] sm:$0xff]  ;;  %v10624_v34 = vld [vmem:[#allocation4 + $0x1f8] sm:$0xff] }
 0x49a   : > { %12356 = vst [vmem:[#allocation73_spill] sm:$0xff] %v10620_v42  ;;  %v4950_v5 = vmul.f32 %v10620_v42, %v12354_v44  ;;  %12357 = vst [vmem:[#allocation86_spill] sm:$0xff] %v10624_v34 }
 0x49d   : > { %4988 = vrot.lane.b32.xlu0 %v4946_v38, %s6269_s9  ;;  %4990 = vrot.lane.b32.xlu1 %v4947_v1, %s6269_s9  ;;  %v4951_v38 = vmul.f32 %v10624_v34, %v12354_v44  ;;  %v6194_v1 = vld [vmem:[#allocation4] sm:$0xff]  ;;  %v5067_v44 = vmul.f32 %v6197_v47, %v12358_v13  ;;  %v12360_v47 = vld [vmem:[#allocation26_spill] sm:$0xff] }
 0x49e   : > { %v5064_v31 = vmul.f32 %v6194_v1, %v12358_v13 }
 0x4a1   : > { %4992 = vrot.lane.b32.xlu0 %v4948_v22, %s6269_s9  ;;  %4994 = vrot.lane.b32.xlu1 %v4949_v7, %s6269_s9  ;;  %v6195_v22 = vld [vmem:[#allocation4 + $0x8] sm:$0xff] }
 0x4a2   : > { %v5065_v7 = vmul.f32 %v6195_v22, %v12358_v13 }
 0x4a5   : > { %4996 = vrot.lane.b32.xlu0 %v4950_v5, %s6269_s9  ;;  %4998 = vrot.lane.b32.xlu1 %v4951_v38, %s6269_s9  ;;  %v6198_v5 = vld [vmem:[#allocation4 + $0x20] sm:$0xff]  ;;  %v12359_v38 = vld [vmem:[#allocation27_spill] sm:$0xff] }
 0x4a6   : > { %v5068_v1 = vmul.f32 %v6198_v5, %v12359_v38  ;;  %v5071_v22 = vmul.f32 %v6199_v24, %v12359_v38  ;;  %v12361_v5 = vld [vmem:[#allocation28_spill] sm:$0xff] }
 0x4a7   : > { %v5179_v24 = vmul.f32 %v10380_v15, %v12361_v5  ;;  %v12365_v15 = vld [vmem:[#allocation39_spill] sm:$0xff] }
 0x4a9   : > { %5096 = vrot.lane.b32.xlu0 %v5064_v31, %s6269_s9  ;;  %5098 = vrot.lane.b32.xlu1 %v5065_v7, %s6269_s9  ;;  %v6200_v31 = vld [vmem:[#allocation4 + $0x28] sm:$0xff]  ;;  %v6201_v7 = vld [vmem:[#allocation4 + $0x30] sm:$0xff] }
 0x4aa   : > { %v5069_v26 = vmul.f32 %v6200_v31, %v12359_v38  ;;  %v5070_v13 = vmul.f32 %v6201_v7, %v12359_v38  ;;  %v12363_v31 = vld [vmem:[#allocation31_spill] sm:$0xff] }
 0x4ad   : > { %5100 = vrot.lane.b32.xlu0 %v5066_v21, %s6269_s9  ;;  %5102 = vrot.lane.b32.xlu1 %v5067_v44, %s6269_s9  ;;  %v6202_v21 = vld [vmem:[#allocation4 + $0x58] sm:$0xff] }
 0x4ae   : > { %v5075_v44 = vmul.f32 %v6202_v21, %v12360_v47 }
 0x4b1   : > { %5104 = vrot.lane.b32.xlu0 %v5068_v1, %s6269_s9  ;;  %5110 = vrot.lane.b32.xlu1 %v5071_v22, %s6269_s9  ;;  %v10651_v22 = vld [vmem:[#allocation4 + $0x138] sm:$0xff] }
 0x4b2   : > { %12362 = vst [vmem:[#allocation94_spill] sm:$0xff] %v10651_v22  ;;  %v5183_v38 = vmul.f32 %v10651_v22, %v12363_v31 }
 0x4b5   : > { %5106 = vrot.lane.b32.xlu0 %v5069_v26, %s6269_s9  ;;  %5108 = vrot.lane.b32.xlu1 %v5070_v13, %s6269_s9  ;;  %v12364_v26 = vld [vmem:[#allocation36_spill] sm:$0xff] }
 0x4b6   : > { %v5403_v13 = vmul.f32 %v10484_v10, %v12364_v26  ;;  %v6205_v10 = vld [vmem:[#allocation4 + $0x48] sm:$0xff] }
 0x4b9   : > { %5118 = vrot.lane.b32.xlu0 %v5075_v44, %s6269_s9  ;;  %5214 = vrot.lane.b32.xlu1 %v5179_v24, %s6269_s9  ;;  %v5407_v44 = vmul.f32 %v10504_v14, %v12365_v15  ;;  %v6204_v24 = vld [vmem:[#allocation4 + $0x40] sm:$0xff] }
 0x4ba   : > { %v5072_v20 = vmul.f32 %v6204_v24, %v12360_v47 }
 0x4bb   : > { %v4689_v1 = vpop.permute.xlu0 %4688  ;;  %v4691_v7 = vpop.permute.xlu1 %4690 }
 0x4bc   : > { %v4720_v22 = vsel %vm3134_vm7, %v4689_v1, %v4691_v7  ;;  %v12367_v1 = vld [vmem:[#allocation62_spill] sm:$0xff] }
 0x4bd   : > { %5222 = vrot.lane.b32.xlu0 %v5183_v38, %s6269_s9  ;;  %5438 = vrot.lane.b32.xlu1 %v5403_v13, %s6269_s9  ;;  %v5073_v38 = vmul.f32 %v6205_v10, %v12360_v47  ;;  %v6206_v13 = vld [vmem:[#allocation4 + $0x50] sm:$0xff]  ;;  %v5176_v10 = vmul.f32 %v10366_v12, %v12361_v5 }
 0x4be   : > { %v5074_v42 = vmul.f32 %v6206_v13, %v12360_v47  ;;  %v12368_v47 = vld [vmem:[#allocation132_spill] sm:$0xff] }
 0x4bf   : > { %v4693_v21 = vpop.permute.xlu0 %4692  ;;  %v4695_v59 = vpop.permute.xlu1 %4694 }
 0x4c0   : > { %v4721_v14 = vsel %vm3134_vm7, %v4691_v7, %v4693_v21  ;;  %v4748_v32 = vsel %vm3163_vm8, %v4695_v59, 0.0  ;;  %v12369_v7 = vld [vmem:[#allocation61_spill] sm:$0xff] }
 0x4c1   : > { %5446 = vrot.lane.b32.xlu0 %v5407_v44, %s6269_s9  ;;  %5112 = vrot.lane.b32.xlu1 %v5072_v20, %s6269_s9  ;;  %v4752_v44 = vadd.f32 %v4720_v22, %v12366_v49  ;;  %v4722_v20 = vsel %vm3134_vm7, %v4693_v21, %v4695_v59  ;;  %v4753_v13 = vadd.f32 %v4721_v14, %v12368_v47  ;;  %v12370_v59 = vld [vmem:[#allocation115_spill] sm:$0xff] }
 0x4c2   : > { %v4755_v29 = vadd.f32 %v4748_v32, %v12369_v7  ;;  %v5177_v49 = vmul.f32 %v10679_v25, %v12361_v5  ;;  %v4754_v22 = vadd.f32 %v4722_v20, %v12370_v59  ;;  %v10708_v59 = vld [vmem:[#allocation4 + $0x130] sm:$0xff] }
 0x4c3   : > { %v4697_v6 = vpop.permute.xlu0 %4696  ;;  %v4699_v34 = vpop.permute.xlu1 %4698 }
 0x4c4   : > { %v4723_v24 = vsel %vm3134_vm7, %v4697_v6, %v4699_v34 }
 0x4c5   : > { %5114 = vrot.lane.b32.xlu0 %v5073_v38, %s6269_s9  ;;  %v4756_v61 = vadd.f32 %v4723_v24, %v12367_v1  ;;  %5116 = vrot.lane.b32.xlu1 %v5074_v42, %s6269_s9  ;;  %v5178_v24 = vmul.f32 %v10376_v37, %v12361_v5 }
 0x4c7   : > { %v4768_v19 = vadd.f32 %v4756_v61, %v4752_v44  ;;  %v4701_v8 = vpop.permute.xlu0 %4700  ;;  %v4703_v6 = vpop.permute.xlu1 %4702  ;;  %v10694_v44 = vld [vmem:[#allocation4 + $0x120] sm:$0xff] }
 0x4c8   : > { %v4724_v21 = vsel %vm3134_vm7, %v4699_v34, %v4701_v8  ;;  %v4725_v42 = vsel %vm3134_vm7, %v4701_v8, %v4703_v6  ;;  %v4749_v38 = vsel %vm3163_vm8, %v4703_v6, 0.0  ;;  %v5180_v8 = vmul.f32 %v10694_v44, %v12363_v31 }
 0x4c9   : > { %v4757_v14 = vadd.f32 %v4724_v21, %v10259_v56  ;;  %5208 = vrot.lane.b32.xlu0 %v5176_v10, %s6269_s9  ;;  %v4758_v61 = vadd.f32 %v4725_v42, %v10290_v39  ;;  %v4759_v32 = vadd.f32 %v4749_v38, %v10293_v33  ;;  %5210 = vrot.lane.b32.xlu1 %v5177_v49, %s6269_s9  ;;  %v4795_v34 = vsel %vm541_vm0, %v4755_v29, 0.0  ;;  %v10704_v49 = vld [vmem:[#allocation4 + $0x128] sm:$0xff] }
 0x4ca   : > { %v5181_v29 = vmul.f32 %v10704_v49, %v12363_v31 }
 0x4cb   : > { %v4777_v20 = vadd.f32 %v4757_v14, %v4753_v13  ;;  %v4786_v56 = vadd.f32 %v4758_v61, %v4754_v22  ;;  %v4796_v1 = vsel %vm541_vm0, %v4759_v32, 0.0  ;;  %v4705_v10 = vpop.permute.xlu0 %4704  ;;  %v4707_v39 = vpop.permute.xlu1 %4706  ;;  %v5182_v22 = vmul.f32 %v10708_v59, %v12363_v31 }
 0x4cc   : > { %v4797_v47 = vadd.f32 %v4796_v1, %v4795_v34  ;;  %v4726_v33 = vsel %vm3134_vm7, %v4705_v10, %v4707_v39  ;;  %v5400_v61 = vmul.f32 %v10470_v35, %v12364_v26 }
 0x4cd   : > { %5212 = vrot.lane.b32.xlu0 %v5178_v24, %s6269_s9  ;;  %v4760_v5 = vadd.f32 %v4726_v33, %v10300_v9  ;;  %5216 = vrot.lane.b32.xlu1 %v5180_v8, %s6269_s9 }
 0x4cf   : > { %v4769_v7 = vadd.f32 %v4768_v19, %v4760_v5  ;;  %v4709_v6 = vpop.permute.xlu0 %4708  ;;  %v4711_v13 = vpop.permute.xlu1 %4710 }
 0x4d0   : > { %v4727_v21 = vsel %vm3134_vm7, %v4707_v39, %v4709_v6  ;;  %v4728_v42 = vsel %vm3134_vm7, %v4709_v6, %v4711_v13  ;;  %v4750_v9 = vsel %vm3163_vm8, %v4711_v13, 0.0  ;;  %v5404_v39 = vmul.f32 %v10490_v43, %v12365_v15 }
 0x4d1   : > { %v4761_v19 = vadd.f32 %v4727_v21, %v10303_v50  ;;  %5218 = vrot.lane.b32.xlu0 %v5181_v29, %s6269_s9  ;;  %v4762_v38 = vadd.f32 %v4728_v42, %v10309_v54  ;;  %v4763_v14 = vadd.f32 %v4750_v9, %v10312_v18  ;;  %5220 = vrot.lane.b32.xlu1 %v5182_v22, %s6269_s9 }
 0x4d2   : > { %v5401_v50 = vmul.f32 %v10474_v4, %v12364_v26  ;;  %v5406_v43 = vmul.f32 %v10500_v30, %v12365_v15 }
 0x4d3   : > { %v4778_v31 = vadd.f32 %v4777_v20, %v4761_v19  ;;  %v4787_v32 = vadd.f32 %v4786_v56, %v4762_v38  ;;  %v4798_v24 = vsel %vm541_vm0, %v4763_v14, 0.0  ;;  %v4713_v8 = vpop.permute.xlu0 %4712  ;;  %v4715_v34 = vpop.permute.xlu1 %4714  ;;  %v5402_v20 = vmul.f32 %v10480_v51, %v12364_v26  ;;  %v10752_v19 = vld [vmem:[#allocation4 + $0x158] sm:$0xff] }
 0x4d4   : > { %v4799_v1 = vadd.f32 %v4798_v24, %v4797_v47  ;;  %v4729_v10 = vsel %vm3134_vm7, %v4713_v8, %v4715_v34  ;;  %v5405_v51 = vmul.f32 %v10494_v55, %v12365_v15  ;;  %v12371_v15 = vld [vmem:[#allocation30_spill] sm:$0xff]  ;;  %v12372_v24 = vld [vmem:[#allocation29_spill] sm:$0xff] }
 0x4d5   : > { %5432 = vrot.lane.b32.xlu0 %v5400_v61, %s6269_s9  ;;  %v4764_v54 = vadd.f32 %v4729_v10, %v10330_v45  ;;  %5434 = vrot.lane.b32.xlu1 %v5401_v50, %s6269_s9  ;;  %v5187_v30 = vmul.f32 %v10752_v19, %v12371_v15 }
 0x4d7   : > { %v4770_v18 = vadd.f32 %v4769_v7, %v4764_v54  ;;  %v4717_v35 = vpop.permute.xlu0 %4716  ;;  %v4719_v56 = vpop.permute.xlu1 %4718 }
 0x4d8   : > { %v4730_v4 = vsel %vm3134_vm7, %v4715_v34, %v4717_v35  ;;  %v4731_v47 = vsel %vm3134_vm7, %v4717_v35, %v4719_v56  ;;  %v4751_v33 = vsel %vm3163_vm8, %v4719_v56, 0.0  ;;  %v12373_v35 = vld [vmem:[#allocation40_spill] sm:$0xff] }
 0x4d9   : > { %v4771_v5 = vrot.slane %v4770_v18, 4  ;;  %v4765_v45 = vadd.f32 %v4730_v4, %v10333_v46  ;;  %5436 = vrot.lane.b32.xlu0 %v5402_v20, %s6269_s9  ;;  %v4766_v7 = vadd.f32 %v4731_v47, %v10346_v57  ;;  %v4767_v6 = vadd.f32 %v4751_v33, %v10348_v53  ;;  %5440 = vrot.lane.b32.xlu1 %v5404_v39, %s6269_s9  ;;  %v12375_v33 = vld [vmem:[#allocation38_spill] sm:$0xff] }
 0x4da   : > { %v5515_v20 = vmul.f32 %v10564_v2, %v12373_v35 }
 0x4db   : > { %v4772_v26 = vadd.f32 %v4771_v5, %v4770_v18  ;;  %v4779_v29 = vadd.f32 %v4778_v31, %v4765_v45  ;;  %v4788_v13 = vadd.f32 %v4787_v32, %v4766_v7  ;;  %v4800_v22 = vsel %vm541_vm0, %v4767_v6, 0.0  ;;  %v10746_v46 = vpop.permute.xlu0 %4856  ;;  %v10748_v21 = vpop.permute.xlu1 %4858  ;;  %v6212_v32 = vld [vmem:[#allocation4 + $0x78] sm:$0xff] }
 0x4dc   : > { %v4801_v57 = vadd.f32 %v4800_v22, %v4799_v1  ;;  %v5079_v8 = vmul.f32 %v6212_v32, %v12372_v24  ;;  %v5411_v5 = vmul.f32 %v10524_v48, %v12375_v33 }
 0x4dd   : > { %v4773_v42 = vrot.slane %v4772_v26, 2  ;;  %v4780_v53 = vrot.slane %v4779_v29, 4  ;;  %v4789_v9 = vrot.slane %v4788_v13, 4  ;;  %5442 = vrot.lane.b32.xlu0 %v5405_v51, %s6269_s9  ;;  %5444 = vrot.lane.b32.xlu1 %v5406_v43, %s6269_s9 }
 0x4de   : > { %v4802_v55 = vrot.slane %v4801_v57, 4 }
 0x4df   : > { %v4774_v38 = vadd.f32 %v4773_v42, %v4772_v26  ;;  %v4781_v14 = vadd.f32 %v4780_v53, %v4779_v29  ;;  %v4790_v61 = vadd.f32 %v4789_v9, %v4788_v13  ;;  %v10756_v31 = vpop.permute.xlu0 %4860  ;;  %v10759_v34 = vpop.permute.xlu1 %4862  ;;  %v6213_v9 = vld [vmem:[#allocation4 + $0x60] sm:$0xff] }
 0x4e0   : > { %v4803_v50 = vadd.f32 %v4802_v55, %v4801_v57  ;;  %v12379_v57 = vld [vmem:[#allocation43_spill] sm:$0xff] }
 0x4e1   : > { %v4775_v1 = vrot.slane %v4774_v38, 1  ;;  %v4782_v10 = vrot.slane %v4781_v14, 2  ;;  %v4791_v54 = vrot.slane %v4790_v61, 2  ;;  %5126 = vrot.lane.b32.xlu0 %v5079_v8, %s6269_s9  ;;  %5230 = vrot.lane.b32.xlu1 %v5187_v30, %s6269_s9  ;;  %v5519_v48 = vmul.f32 %v10584_v40, %v12379_v57 }
 0x4e2   : > { %v4804_v18 = vrot.slane %v4803_v50, 2 }
 0x4e3   : > { %v4776_v56 = vadd.f32 %v4775_v1, %v4774_v38  ;;  %v4783_v39 = vadd.f32 %v4782_v10, %v4781_v14  ;;  %v4792_v4 = vadd.f32 %v4791_v54, %v4790_v61  ;;  %v10765_v47 = vpop.permute.xlu0 %4864  ;;  %v10769_v45 = vpop.permute.xlu1 %4866  ;;  %v6214_v61 = vld [vmem:[#allocation4 + $0x68] sm:$0xff] }
 0x4e4   : > { %12374 = vst [vmem:[#allocation92_spill] sm:$0xff] %v10765_v47  ;;  %12376 = vst [vmem:[#allocation97_spill] sm:$0xff] %v10769_v45  ;;  %v4805_v7 = vadd.f32 %v4804_v18, %v4803_v50  ;;  %v5077_v32 = vmul.f32 %v6214_v61, %v12372_v24  ;;  %v10812_v10 = vld [vmem:[#allocation4 + $0x148] sm:$0xff]  ;;  %v10820_v18 = vld [vmem:[#allocation4 + $0x150] sm:$0xff] }
 0x4e5   : > { %v10773_v6 = vsel %vm5765_vm10, %v10306_v11, %v4776_v56  ;;  %v4784_v51 = vrot.slane %v4783_v39, 1  ;;  %v4793_v43 = vrot.slane %v4792_v4, 1  ;;  %5454 = vrot.lane.b32.xlu0 %v5411_v5, %s6269_s9  ;;  %5550 = vrot.lane.b32.xlu1 %v5515_v20, %s6269_s9  ;;  %v5076_v11 = vmul.f32 %v6213_v9, %v12372_v24 }
 0x4e6   : > { %12377 = vst [vmem:[#allocation64_spill] sm:$0xff] %v10773_v6  ;;  %v4806_v26 = vrot.slane %v4805_v7, 1  ;;  %v5185_v54 = vmul.f32 %v10812_v10, %v12371_v15  ;;  %v5186_v20 = vmul.f32 %v10820_v18, %v12371_v15  ;;  %v5409_v5 = vmul.f32 %v10514_v63, %v12375_v33  ;;  %v12411_v6 = vld [vmem:[#allocation90_spill] sm:$0xff] }
 0x4e7   : > { %v4785_v29 = vadd.f32 %v4784_v51, %v4783_v39  ;;  %v4794_v13 = vadd.f32 %v4793_v43, %v4792_v4  ;;  %v10777_v22 = vpop.permute.xlu0 %4868  ;;  %v10781_v42 = vpop.permute.xlu1 %4870  ;;  %v5408_v39 = vmul.f32 %v10510_v62, %v12375_v33  ;;  %v5410_v51 = vmul.f32 %v10520_v52, %v12375_v33 }
 0x4e8   : > { %12378 = vst [vmem:[#allocation103_spill] sm:$0xff] %v10777_v22  ;;  %v4807_v53 = vadd.f32 %v4806_v26, %v4805_v7  ;;  %v5512_v62 = vmul.f32 %v10550_v27, %v12373_v35  ;;  %v5513_v26 = vmul.f32 %v10554_v17, %v12373_v35  ;;  %v5514_v52 = vmul.f32 %v10560_v16, %v12373_v35 }
 0x4e9   : > { %v10786_v55 = vsel %vm5765_vm10, %v10315_v23, %v4785_v29  ;;  %v10790_v30 = vsel %vm5765_vm10, %v10338_v36, %v4794_v13  ;;  %5558 = vrot.lane.b32.xlu0 %v5519_v48, %s6269_s9  ;;  %5120 = vrot.lane.b32.xlu1 %v5076_v11, %s6269_s9  ;;  %v6215_v23 = vld [vmem:[#allocation4 + $0x70] sm:$0xff]  ;;  %v5516_v29 = vmul.f32 %v10570_v60, %v12379_v57  ;;  %v12395_v11 = vld [vmem:[#allocation33_spill] sm:$0xff] }
 0x4ea   : > { %12380 = vst [vmem:[#allocation98_spill] sm:$0xff] %v10786_v55  ;;  %12381 = vst [vmem:[#allocation105_spill] sm:$0xff] %v10790_v30  ;;  %v10795_v38 = vsel %vm5765_vm10, %v10344_v3, %v4807_v53  ;;  %v5078_v50 = vmul.f32 %v6215_v23, %v12372_v24  ;;  %v5184_v3 = vmul.f32 %v10412_v41, %v12371_v15  ;;  %v12396_v23 = vld [vmem:[#allocation41_spill] sm:$0xff] }
 0x4eb   : > { %12382 = vst [vmem:[#allocation102_spill] sm:$0xff] %v10795_v38  ;;  %v10798_v14 = vpop.permute.xlu0 %4872  ;;  %v10801_v8 = vpop.permute.xlu1 %4874  ;;  %v5517_v48 = vmul.f32 %v10574_v0, %v12379_v57  ;;  %v5518_v9 = vmul.f32 %v10580_v28, %v12379_v57  ;;  %v5191_v61 = vmul.f32 %v10460_v58, %v12395_v11  ;;  %v12399_v57 = vld [vmem:[#allocation42_spill] sm:$0xff]  ;;  %v12412_v38 = vld [vmem:[#allocation73_spill] sm:$0xff] }
 0x4ec   : > { %12383 = vst [vmem:[#allocation104_spill] sm:$0xff] %v10798_v14  ;;  %12384 = vst [vmem:[#allocation110_spill] sm:$0xff] %v10801_v8 }
 0x4ed   : > { %5122 = vrot.lane.b32.xlu0 %v5077_v32, %s6269_s9  ;;  %5124 = vrot.lane.b32.xlu1 %v5078_v50, %s6269_s9  ;;  %v12397_v50 = vld [vmem:[#allocation85_spill] sm:$0xff] }
 0x4ef   : > { %v10806_v36 = vpop.permute.xlu0 %4876  ;;  %v10810_v1 = vpop.permute.xlu1 %4878 }
 0x4f0   : > { %12385 = vst [vmem:[#allocation114_spill] sm:$0xff] %v10806_v36  ;;  %12386 = vst [vmem:[#allocation107_spill] sm:$0xff] %v10810_v1  ;;  %v12414_v36 = vld [vmem:[#allocation72_spill] sm:$0xff] }
 0x4f1   : > { %5224 = vrot.lane.b32.xlu0 %v5184_v3, %s6269_s9  ;;  %5226 = vrot.lane.b32.xlu1 %v5185_v54, %s6269_s9  ;;  %v5415_v3 = vmul.f32 %v12397_v50, %v12396_v23 }
 0x4f3   : > { %v10818_v24 = vpop.permute.xlu0 %4880  ;;  %v10824_v56 = vpop.permute.xlu1 %4882 }
 0x4f4   : > { %12387 = vst [vmem:[#allocation58_spill] sm:$0xff] %v10818_v24  ;;  %12388 = vst [vmem:[#allocation116_spill] sm:$0xff] %v10824_v56 }
 0x4f5   : > { %5228 = vrot.lane.b32.xlu0 %v5186_v20, %s6269_s9  ;;  %5448 = vrot.lane.b32.xlu1 %v5408_v39, %s6269_s9  ;;  %v12400_v20 = vld [vmem:[#allocation95_spill] sm:$0xff] }
 0x4f6   : > { %v5523_v39 = vmul.f32 %v12400_v20, %v12399_v57 }
 0x4f7   : > { %v4885_v4 = vpop.permute.xlu0 %4884  ;;  %v4887_v7 = vpop.permute.xlu1 %4886 }
 0x4f8   : > { %v4899_v30 = vsel %vm2518_vm5, %v4885_v4, %v4887_v7  ;;  %v4919_v55 = vsel %vm2547_vm6, %v4887_v7, 0.0 }
 0x4f9   : > { %5450 = vrot.lane.b32.xlu0 %v5409_v5, %s6269_s9  ;;  %5452 = vrot.lane.b32.xlu1 %v5410_v51, %s6269_s9  ;;  %v12402_v51 = vld [vmem:[#allocation57_spill] sm:$0xff] }
 0x4fb   : > { %v10836_v15 = vpop.permute.xlu0 %4968  ;;  %v10840_v43 = vpop.permute.xlu1 %4970 }
 0x4fc   : > { %12389 = vst [vmem:[#allocation120_spill] sm:$0xff] %v10836_v15  ;;  %12390 = vst [vmem:[#allocation109_spill] sm:$0xff] %v10840_v43 }
 0x4fd   : > { %5544 = vrot.lane.b32.xlu0 %v5512_v62, %s6269_s9  ;;  %5546 = vrot.lane.b32.xlu1 %v5513_v26, %s6269_s9  ;;  %v5188_v62 = vmul.f32 %v12402_v51, %v12395_v11 }
 0x4ff   : > { %v10846_v63 = vpop.permute.xlu0 %4972  ;;  %v10850_v33 = vpop.permute.xlu1 %4974 }
 0x500   : > { %12391 = vst [vmem:[#allocation125_spill] sm:$0xff] %v10846_v63 }
 0x501   : > { %5548 = vrot.lane.b32.xlu0 %v5514_v52, %s6269_s9  ;;  %5552 = vrot.lane.b32.xlu1 %v5516_v29, %s6269_s9  ;;  %v10888_v52 = vld [vmem:[#allocation4 + $0x168] sm:$0xff] }
 0x502   : > { %v5189_v29 = vmul.f32 %v10888_v52, %v12395_v11 }
 0x503   : > { %v10856_v13 = vpop.permute.xlu0 %4976  ;;  %v10860_v53 = vpop.permute.xlu1 %4978 }
 0x504   : > { %12392 = vst [vmem:[#allocation117_spill] sm:$0xff] %v10856_v13  ;;  %12393 = vst [vmem:[#allocation121_spill] sm:$0xff] %v10860_v53 }
 0x505   : > { %5554 = vrot.lane.b32.xlu0 %v5517_v48, %s6269_s9  ;;  %5556 = vrot.lane.b32.xlu1 %v5518_v9, %s6269_s9  ;;  %v12405_v9 = vld [vmem:[#allocation167_spill] sm:$0xff] }
 0x507   : > { %v10866_v35 = vpop.permute.xlu0 %4980  ;;  %v10870_v32 = vpop.permute.xlu1 %4982 }
 0x508   : > { %12394 = vst [vmem:[#allocation139_spill] sm:$0xff] %v10866_v35 }
 0x509   : > { %5238 = vrot.lane.b32.xlu0 %v5191_v61, %s6269_s9  ;;  %5462 = vrot.lane.b32.xlu1 %v5415_v3, %s6269_s9  ;;  %v5190_v61 = vmul.f32 %v12405_v9, %v12395_v11  ;;  %v12407_v3 = vld [vmem:[#allocation123_spill] sm:$0xff]  ;;  %v12409_v11 = vld [vmem:[#allocation66_spill] sm:$0xff] }
 0x50a   : > { %v5413_v9 = vmul.f32 %v12409_v11, %v12396_v23  ;;  %v5414_v11 = vmul.f32 %v12414_v36, %v12396_v23 }
 0x50b   : > { %v10876_v54 = vpop.permute.xlu0 %4984  ;;  %v10880_v5 = vpop.permute.xlu1 %4986 }
 0x50c   : > { %12398 = vst [vmem:[#allocation140_spill] sm:$0xff] %v10876_v54  ;;  %12401 = vst [vmem:[#allocation59_spill] sm:$0xff] %v10880_v5 }
 0x50d   : > { %5566 = vrot.lane.b32.xlu0 %v5523_v39, %s6269_s9  ;;  %5232 = vrot.lane.b32.xlu1 %v5188_v62, %s6269_s9  ;;  %v5412_v39 = vmul.f32 %v12407_v3, %v12396_v23  ;;  %v4898_v62 = vsel %vm2518_vm5, %v10824_v56, %v4885_v4  ;;  %v12413_v3 = vld [vmem:[#allocation86_spill] sm:$0xff] }
 0x50f   : > { %v10886_v26 = vpop.permute.xlu0 %4988  ;;  %v10892_v48 = vpop.permute.xlu1 %4990 }
 0x510   : > { %12403 = vst [vmem:[#allocation165_spill] sm:$0xff] %v10886_v26  ;;  %12404 = vst [vmem:[#allocation145_spill] sm:$0xff] %v10892_v48 }
 0x511   : > { %5234 = vrot.lane.b32.xlu0 %v5189_v29, %s6269_s9  ;;  %5236 = vrot.lane.b32.xlu1 %v5190_v61, %s6269_s9  ;;  %v12410_v29 = vld [vmem:[#allocation13_spill] sm:$0xff] }
 0x512   : > { %v4821_v61 = vmul.f32 %v12411_v6, %v12410_v29  ;;  %v4823_v24 = vmul.f32 %v12413_v3, %v12410_v29 }
 0x513   : > { %v10898_v50 = vpop.permute.xlu0 %4992  ;;  %v10902_v51 = vpop.permute.xlu1 %4994 }
 0x514   : > { %12406 = vst [vmem:[#allocation127_spill] sm:$0xff] %v10898_v50  ;;  %12408 = vst [vmem:[#allocation144_spill] sm:$0xff] %v10902_v51  ;;  %v4822_v50 = vmul.f32 %v12412_v38, %v12410_v29  ;;  %v4933_v56 = vadd.f32 %v4898_v62, %v4821_v61  ;;  %v4935_v26 = vadd.f32 %v4919_v55, %v4823_v24  ;;  %v12415_v29 = vld [vmem:[#allocation47_spill] sm:$0xff]  ;;  %v12419_v24 = vld [vmem:[#allocation69_spill] sm:$0xff] }
 0x515   : > { %5456 = vrot.lane.b32.xlu0 %v5412_v39, %s6269_s9  ;;  %5458 = vrot.lane.b32.xlu1 %v5413_v9, %s6269_s9  ;;  %v5520_v39 = vmul.f32 %v12415_v29, %v12399_v57  ;;  %v5521_v23 = vmul.f32 %v12419_v24, %v12399_v57 }
 0x516   : > { %v4934_v4 = vadd.f32 %v4899_v30, %v4822_v50 }
 0x517   : > { %v4997_v7 = vpop.permute.xlu0 %4996  ;;  %v4999_v54 = vpop.permute.xlu1 %4998 }
 0x518   : > { %v5010_v5 = vsel %vm2518_vm5, %v10902_v51, %v4997_v7  ;;  %v5011_v14 = vsel %vm2518_vm5, %v4997_v7, %v4999_v54  ;;  %v5031_v8 = vsel %vm2547_vm6, %v4999_v54, 0.0  ;;  %v12420_v54 = vld [vmem:[#allocation88_spill] sm:$0xff] }
 0x519   : > { %v10926_v48 = vadd.f32 %v5010_v5, %v4933_v56  ;;  %5460 = vrot.lane.b32.xlu0 %v5414_v11, %s6269_s9  ;;  %v10929_v55 = vadd.f32 %v5011_v14, %v4934_v4  ;;  %v10931_v30 = vadd.f32 %v5031_v8, %v4935_v26  ;;  %5560 = vrot.lane.b32.xlu1 %v5520_v39, %s6269_s9  ;;  %v12421_v5 = vld [vmem:[#allocation44_spill] sm:$0xff]  ;;  %v12422_v26 = vld [vmem:[#allocation89_spill] sm:$0xff] }
 0x51a   : > { %v5522_v62 = vmul.f32 %v12420_v54, %v12399_v57  ;;  %v5527_v14 = vmul.f32 %v12413_v3, %v12421_v5  ;;  %v5524_v9 = vmul.f32 %v12422_v26, %v12421_v5  ;;  %v5525_v57 = vmul.f32 %v12411_v6, %v12421_v5 }
 0x51b   : > { %12416 = vst [vmem:[#allocation129_spill] sm:$0xff] %v10926_v48  ;;  %12417 = vst [vmem:[#allocation118_spill] sm:$0xff] %v10929_v55  ;;  %v5097_v36 = vpop.permute.xlu0 %5096  ;;  %v5099_v50 = vpop.permute.xlu1 %5098  ;;  %v5526_v7 = vmul.f32 %v12412_v38, %v12421_v5  ;;  %v12425_v38 = vld [vmem:[#allocation23_spill] sm:$0xff]  ;;  %v12426_v5 = vld [vmem:[#allocation94_spill] sm:$0xff] }
 0x51c   : > { %12418 = vst [vmem:[#allocation70_spill] sm:$0xff] %v10931_v30 }
 0x51d   : > { %5562 = vrot.lane.b32.xlu0 %v5521_v23, %s6269_s9  ;;  %5564 = vrot.lane.b32.xlu1 %v5522_v62, %s6269_s9  ;;  %v12423_v62 = vld [vmem:[#allocation20_spill] sm:$0xff] }
 0x51e   : > { %v5050_v1 = vmul.f32 %v10376_v37, %v12423_v62  ;;  %v5053_v37 = vmul.f32 %v10704_v49, %v12425_v38 }
 0x51f   : > { %v5101_v56 = vpop.permute.xlu0 %5100  ;;  %v5103_v8 = vpop.permute.xlu1 %5102 }
 0x520   : > { %v5156_v23 = vsel %vm2547_vm6, %v5103_v8, 0.0 }
 0x521   : > { %5574 = vrot.lane.b32.xlu0 %v5527_v14, %s6269_s9  ;;  %5568 = vrot.lane.b32.xlu1 %v5524_v9, %s6269_s9  ;;  %v12424_v14 = vld [vmem:[#allocation65_spill] sm:$0xff] }
 0x522   : > { %v5051_v55 = vmul.f32 %v12424_v14, %v12423_v62 }
 0x523   : > { %v5105_v61 = vpop.permute.xlu0 %5104  ;;  %v5111_v4 = vpop.permute.xlu1 %5110 }
 0x524   : > { %v5163_v9 = vadd.f32 %v5156_v23, %v5051_v55  ;;  %v5157_v6 = vsel %vm2547_vm6, %v5111_v4, 0.0 }
 0x525   : > { %5570 = vrot.lane.b32.xlu0 %v5525_v57, %s6269_s9  ;;  %5572 = vrot.lane.b32.xlu1 %v5526_v7, %s6269_s9  ;;  %v5055_v57 = vmul.f32 %v12426_v5, %v12425_v38 }
 0x527   : > { %v5107_v11 = vpop.permute.xlu0 %5106  ;;  %v5109_v39 = vpop.permute.xlu1 %5108  ;;  %v5167_v7 = vadd.f32 %v5157_v6, %v5055_v57  ;;  %v5129_v57 = vsel %vm2518_vm5, %v5099_v50, %v5101_v56 }
 0x52b   : > { %v10955_v48 = vpop.permute.xlu0 %5118  ;;  %v5215_v30 = vpop.permute.xlu1 %5214 }
 0x52c   : > { %v5268_v51 = vsel %vm2547_vm6, %v5215_v30, 0.0 }
 0x52d   : > { %v5275_v35 = vadd.f32 %v5268_v51, %v5163_v9  ;;  %v5128_v51 = vsel %vm2518_vm5, %v5097_v36, %v5099_v50  ;;  %v5132_v50 = vsel %vm2518_vm5, %v5107_v11, %v5109_v39 }
 0x52f   : > { %v5223_v13 = vpop.permute.xlu0 %5222  ;;  %5310 = vrot.lane.b32.xlu0 %v5275_v35, %s6270_s10  ;;  %v10962_v53 = vpop.permute.xlu1 %5438  ;;  %v5048_v35 = vmul.f32 %v10366_v12, %v12423_v62 }
 0x530   : > { %v5269_v14 = vsel %vm2547_vm6, %v5223_v13, 0.0 }
 0x531   : > { %v5279_v55 = vadd.f32 %v5269_v14, %v5167_v7  ;;  %v5160_v9 = vadd.f32 %v5128_v51, %v5048_v35  ;;  %v5130_v7 = vsel %vm2518_vm5, %v5101_v56, %v5103_v8  ;;  %v5131_v51 = vsel %vm2518_vm5, %v5105_v61, %v5107_v11 }
 0x532   : > { %v5162_v47 = vadd.f32 %v5130_v7, %v5050_v1  ;;  %v5133_v11 = vsel %vm2518_vm5, %v5109_v39, %v5111_v4  ;;  %v12427_v39 = vld [vmem:[#allocation32_spill] sm:$0xff] }
 0x533   : > { %v10965_v23 = vpop.permute.xlu0 %5446  ;;  %5318 = vrot.lane.b32.xlu1 %v5279_v55, %s6270_s10  ;;  %v10968_v63 = vpop.permute.xlu1 %5112  ;;  %v5049_v55 = vmul.f32 %v10679_v25, %v12423_v62  ;;  %v5052_v25 = vmul.f32 %v10694_v44, %v12425_v38  ;;  %v5054_v44 = vmul.f32 %v10708_v59, %v12425_v38 }
 0x535   : > { %v5161_v36 = vadd.f32 %v5129_v57, %v5049_v55  ;;  %v5164_v35 = vadd.f32 %v5131_v51, %v5052_v25 }
 0x537   : > { %v10970_v15 = vpop.permute.xlu0 %5114  ;;  %v10972_v43 = vpop.permute.xlu1 %5116 }
 0x53b   : > { %v5209_v6 = vpop.permute.xlu0 %5208  ;;  %v5211_v5 = vpop.permute.xlu1 %5210 }
 0x53c   : > { %v5240_v14 = vsel %vm2518_vm5, %v5209_v6, %v5211_v5 }
 0x53d   : > { %v5272_v22 = vadd.f32 %v5240_v14, %v5160_v9  ;;  %v5165_v9 = vadd.f32 %v5132_v50, %v5053_v37  ;;  %v5386_v14 = vmul.f32 %v10560_v16, %v12427_v39  ;;  %v5158_v16 = vsel %vm2547_vm6, %v10955_v48, 0.0 }
 0x53f   : > { %v5213_v45 = vpop.permute.xlu0 %5212  ;;  %5304 = vrot.lane.b32.xlu0 %v5272_v22, %s6270_s10  ;;  %v5217_v12 = vpop.permute.xlu1 %5216 }
 0x540   : > { %v5241_v56 = vsel %vm2518_vm5, %v5211_v5, %v5213_v45  ;;  %v5242_v8 = vsel %vm2518_vm5, %v5213_v45, %v5215_v30  ;;  %v5166_v5 = vadd.f32 %v5133_v11, %v5054_v44 }
 0x541   : > { %v5273_v62 = vadd.f32 %v5241_v56, %v5161_v36  ;;  %v5274_v1 = vadd.f32 %v5242_v8, %v5162_v47  ;;  %v12429_v8 = vld [vmem:[#allocation22_spill] sm:$0xff] }
 0x542   : > { %v5059_v25 = vmul.f32 %v10752_v19, %v12429_v8 }
 0x543   : > { %v5219_v22 = vpop.permute.xlu0 %5218  ;;  %5306 = vrot.lane.b32.xlu1 %v5273_v62, %s6270_s10  ;;  %5308 = vrot.lane.b32.xlu0 %v5274_v1, %s6270_s10  ;;  %v5221_v61 = vpop.permute.xlu1 %5220 }
 0x544   : > { %v5243_v45 = vsel %vm2518_vm5, %v5217_v12, %v5219_v22  ;;  %v5244_v30 = vsel %vm2518_vm5, %v5219_v22, %v5221_v61  ;;  %v5245_v47 = vsel %vm2518_vm5, %v5221_v61, %v5223_v13  ;;  %v12428_v12 = vld [vmem:[#allocation35_spill] sm:$0xff]  ;;  %v5171_v62 = vadd.f32 %v5158_v16, %v5059_v25 }
 0x545   : > { %v5276_v49 = vadd.f32 %v5243_v45, %v5164_v35  ;;  %v5277_v6 = vadd.f32 %v5244_v30, %v5165_v9  ;;  %v5278_v4 = vadd.f32 %v5245_v47, %v5166_v5  ;;  %v5390_v51 = vmul.f32 %v10580_v28, %v12428_v12 }
 0x546   : > { %v5492_v28 = vsel %vm2547_vm6, %v10962_v53, 0.0  ;;  %v5387_v22 = vmul.f32 %v10564_v2, %v12427_v39  ;;  %v5493_v30 = vsel %vm2547_vm6, %v10965_v23, 0.0  ;;  %v5136_v25 = vsel %vm2518_vm5, %v10972_v43, %v10955_v48 }
 0x547   : > { %v11001_v57 = vpop.permute.xlu0 %5432  ;;  %5312 = vrot.lane.b32.xlu1 %v5276_v49, %s6270_s10  ;;  %5314 = vrot.lane.b32.xlu0 %v5277_v6, %s6270_s10  ;;  %v11005_v7 = vpop.permute.xlu1 %5434 }
 0x548   : > { %v5499_v11 = vadd.f32 %v5492_v28, %v5387_v22  ;;  %v5057_v28 = vmul.f32 %v10812_v10, %v12429_v8 }
 0x54b   : > { %v11009_v55 = vpop.permute.xlu0 %5436  ;;  %5316 = vrot.lane.b32.xlu1 %v5278_v4, %s6270_s10  ;;  %v11012_v59 = vpop.permute.xlu1 %5440 }
 0x54c   : > { %v5466_v13 = vsel %vm2518_vm5, %v11009_v55, %v10962_v53  ;;  %v5391_v53 = vmul.f32 %v10584_v40, %v12428_v12  ;;  %v5134_v40 = vsel %vm2518_vm5, %v10968_v63, %v10970_v15  ;;  %v5058_v63 = vmul.f32 %v10820_v18, %v12429_v8 }
 0x54d   : > { %v11017_v38 = vadd.f32 %v5466_v13, %v5386_v14  ;;  %v5056_v13 = vmul.f32 %v10412_v41, %v12429_v8  ;;  %v5464_v8 = vsel %vm2518_vm5, %v11001_v57, %v11005_v7 }
 0x54e   : > { %v5503_v6 = vadd.f32 %v5493_v30, %v5391_v53 }
 0x54f   : > { %v11019_v36 = vpop.permute.xlu0 %5442  ;;  %v11023_v50 = vpop.permute.xlu1 %5444  ;;  %v5168_v16 = vadd.f32 %v5134_v40, %v5056_v13 }
 0x550   : > { %v5469_v56 = vsel %vm2518_vm5, %v11023_v50, %v10965_v23  ;;  %v5467_v57 = vsel %vm2518_vm5, %v11012_v59, %v11019_v36  ;;  %v5389_v59 = vmul.f32 %v10574_v0, %v12428_v12 }
 0x551   : > { %v11032_v37 = vadd.f32 %v5469_v56, %v5390_v51  ;;  %v5135_v56 = vsel %vm2518_vm5, %v10970_v15, %v10972_v43 }
 0x552   : > { %v5169_v22 = vadd.f32 %v5135_v56, %v5057_v28 }
 0x553   : > { %v11034_v1 = vpop.permute.xlu0 %5126  ;;  %v5231_v35 = vpop.permute.xlu1 %5230 }
 0x554   : > { %v5270_v9 = vsel %vm2547_vm6, %v5231_v35, 0.0 }
 0x555   : > { %v5283_v61 = vadd.f32 %v5270_v9, %v5171_v62 }
 0x557   : > { %v11041_v45 = vpop.permute.xlu0 %5454  ;;  %5326 = vrot.lane.b32.xlu0 %v5283_v61, %s6270_s10  ;;  %v5551_v19 = vpop.permute.xlu1 %5550  ;;  %v5170_v61 = vadd.f32 %v5136_v25, %v5058_v63  ;;  %v5159_v63 = vsel %vm2547_vm6, %v11034_v1, 0.0 }
 0x558   : > { %v5604_v44 = vsel %vm2547_vm6, %v5551_v19, 0.0 }
 0x559   : > { %v5611_v49 = vadd.f32 %v5604_v44, %v5499_v11 }
 0x55b   : > { %v11049_v47 = vpop.permute.xlu0 %5558  ;;  %5646 = vrot.lane.b32.xlu1 %v5611_v49, %s6270_s10  ;;  %v11054_v5 = vpop.permute.xlu1 %5120 }
 0x55c   : > { %v5605_v2 = vsel %vm2547_vm6, %v11049_v47, 0.0 }
 0x55d   : > { %v5615_v4 = vadd.f32 %v5605_v2, %v5503_v6  ;;  %v5465_v6 = vsel %vm2518_vm5, %v11005_v7, %v11009_v55  ;;  %v5388_v55 = vmul.f32 %v10570_v60, %v12428_v12 }
 0x55f   : > { %v11056_v14 = vpop.permute.xlu0 %5122  ;;  %5654 = vrot.lane.b32.xlu0 %v5615_v4, %s6270_s10  ;;  %v11059_v23 = vpop.permute.xlu1 %5124  ;;  %v5385_v4 = vmul.f32 %v10554_v17, %v12427_v39  ;;  %v5468_v17 = vsel %vm2518_vm5, %v11019_v36, %v11023_v50  ;;  %v12430_v36 = vld [vmem:[#allocation25_spill] sm:$0xff] }
 0x560   : > { %v5063_v50 = vmul.f32 %v10460_v58, %v12430_v36  ;;  %v12431_v58 = vld [vmem:[#allocation34_spill] sm:$0xff] }
 0x563   : > { %v5225_v51 = vpop.permute.xlu0 %5224  ;;  %v5227_v62 = vpop.permute.xlu1 %5226 }
 0x564   : > { %v5246_v9 = vsel %vm2518_vm5, %v5225_v51, %v5227_v62  ;;  %v5497_v51 = vadd.f32 %v5465_v6, %v5385_v4 }
 0x565   : > { %v5280_v41 = vadd.f32 %v5246_v9, %v5168_v16 }
 0x567   : > { %v5229_v11 = vpop.permute.xlu0 %5228  ;;  %5320 = vrot.lane.b32.xlu1 %v5280_v41, %s6270_s10  ;;  %v11080_v43 = vpop.permute.xlu1 %5448 }
 0x568   : > { %v5247_v30 = vsel %vm2518_vm5, %v5227_v62, %v5229_v11  ;;  %v5248_v15 = vsel %vm2518_vm5, %v5229_v11, %v5231_v35  ;;  %v5384_v35 = vmul.f32 %v10550_v27, %v12427_v39  ;;  %v5500_v62 = vadd.f32 %v5467_v57, %v5388_v55 }
 0x569   : > { %v5281_v48 = vadd.f32 %v5247_v30, %v5169_v22  ;;  %v5282_v44 = vadd.f32 %v5248_v15, %v5170_v61  ;;  %v5175_v22 = vadd.f32 %v5159_v63, %v5063_v50  ;;  %v5494_v11 = vsel %vm2547_vm6, %v11041_v45, 0.0 }
 0x56a   : > { %v5496_v49 = vadd.f32 %v5464_v8, %v5384_v35 }
 0x56b   : > { %v11082_v10 = vpop.permute.xlu0 %5450  ;;  %5322 = vrot.lane.b32.xlu0 %v5281_v48, %s6270_s10  ;;  %5324 = vrot.lane.b32.xlu1 %v5282_v44, %s6270_s10  ;;  %v11086_v18 = vpop.permute.xlu1 %5452  ;;  %v5395_v48 = vmul.f32 %v12400_v20, %v12431_v58  ;;  %v5138_v20 = vsel %vm2518_vm5, %v11056_v14, %v11059_v23 }
 0x56c   : > { %v5471_v63 = vsel %vm2518_vm5, %v11082_v10, %v11086_v18  ;;  %v5472_v50 = vsel %vm2518_vm5, %v11086_v18, %v11041_v45 }
 0x56d   : > { %v5507_v8 = vadd.f32 %v5494_v11, %v5395_v48 }
 0x56f   : > { %v5545_v53 = vpop.permute.xlu0 %5544  ;;  %v5547_v2 = vpop.permute.xlu1 %5546 }
 0x570   : > { %v5576_v40 = vsel %vm2518_vm5, %v5545_v53, %v5547_v2  ;;  %v5137_v53 = vsel %vm2518_vm5, %v11054_v5, %v11056_v14  ;;  %v5139_v5 = vsel %vm2518_vm5, %v11059_v23, %v11034_v1 }
 0x571   : > { %v5608_v13 = vadd.f32 %v5576_v40, %v5496_v49  ;;  %v5061_v40 = vmul.f32 %v10888_v52, %v12430_v36 }
 0x573   : > { %v5549_v16 = vpop.permute.xlu0 %5548  ;;  %5640 = vrot.lane.b32.xlu0 %v5608_v13, %s6270_s10  ;;  %v5553_v7 = vpop.permute.xlu1 %5552 }
 0x574   : > { %v5577_v27 = vsel %vm2518_vm5, %v5547_v2, %v5549_v16  ;;  %v5578_v56 = vsel %vm2518_vm5, %v5549_v16, %v5551_v19  ;;  %v5501_v19 = vadd.f32 %v5468_v17, %v5389_v59  ;;  %v6219_v2 = vld [vmem:[#allocation4 + $0x160] sm:$0xff]  ;;  %v5173_v16 = vadd.f32 %v5138_v20, %v5061_v40 }
 0x575   : > { %v5609_v39 = vadd.f32 %v5577_v27, %v5497_v51  ;;  %v5610_v25 = vadd.f32 %v5578_v56, %v11017_v38  ;;  %v5060_v4 = vmul.f32 %v6219_v2, %v12430_v36  ;;  %v6220_v56 = vld [vmem:[#allocation4 + $0x170] sm:$0xff] }
 0x577   : > { %v5555_v28 = vpop.permute.xlu0 %5554  ;;  %5642 = vrot.lane.b32.xlu1 %v5609_v39, %s6270_s10  ;;  %5644 = vrot.lane.b32.xlu0 %v5610_v25, %s6270_s10  ;;  %v5557_v9 = vpop.permute.xlu1 %5556  ;;  %v5172_v13 = vadd.f32 %v5137_v53, %v5060_v4 }
 0x578   : > { %v5579_v60 = vsel %vm2518_vm5, %v5553_v7, %v5555_v28  ;;  %v5580_v41 = vsel %vm2518_vm5, %v5555_v28, %v5557_v9  ;;  %v5581_v0 = vsel %vm2518_vm5, %v5557_v9, %v11049_v47  ;;  %v5062_v7 = vmul.f32 %v6220_v56, %v12430_v36 }
 0x579   : > { %v5612_v38 = vadd.f32 %v5579_v60, %v5500_v62  ;;  %v5613_v12 = vadd.f32 %v5580_v41, %v5501_v19  ;;  %v5614_v44 = vadd.f32 %v5581_v0, %v11032_v37  ;;  %v5470_v62 = vsel %vm2518_vm5, %v11080_v43, %v11082_v10  ;;  %v12432_v10 = vld [vmem:[#allocation37_spill] sm:$0xff] }
 0x57a   : > { %v5174_v39 = vadd.f32 %v5139_v5, %v5062_v7  ;;  %v5392_v19 = vmul.f32 %v12415_v29, %v12431_v58  ;;  %v5393_v60 = vmul.f32 %v12419_v24, %v12431_v58  ;;  %v5394_v0 = vmul.f32 %v12420_v54, %v12431_v58 }
 0x57b   : > { %v5239_v61 = vpop.permute.xlu0 %5238  ;;  %5648 = vrot.lane.b32.xlu1 %v5612_v38, %s6270_s10  ;;  %5650 = vrot.lane.b32.xlu0 %v5613_v12, %s6270_s10  ;;  %v11128_v15 = vpop.permute.xlu1 %5462  ;;  %v5399_v12 = vmul.f32 %v12413_v3, %v12432_v10  ;;  %v5396_v3 = vmul.f32 %v12422_v26, %v12432_v10 }
 0x57c   : > { %v5271_v30 = vsel %vm2547_vm6, %v5239_v61, 0.0  ;;  %v5504_v9 = vadd.f32 %v5470_v62, %v5392_v19  ;;  %v5505_v38 = vadd.f32 %v5471_v63, %v5393_v60  ;;  %v5495_v43 = vsel %vm2547_vm6, %v11128_v15, 0.0  ;;  %v6224_v63 = vld [vmem:[#allocation4 + $0x1b8] sm:$0xff]  ;;  %v12434_v60 = vld [vmem:[#allocation11_spill] sm:$0xff] }
 0x57d   : > { %v5287_v47 = vadd.f32 %v5271_v30, %v5175_v22  ;;  %v5506_v45 = vadd.f32 %v5472_v50, %v5394_v0  ;;  %v5511_v18 = vadd.f32 %v5495_v43, %v5399_v12  ;;  %v4917_v62 = vsel %vm2547_vm6, %v10781_v42, 0.0 }
 0x57f   : > { %v5567_v35 = vpop.permute.xlu0 %5566  ;;  %5652 = vrot.lane.b32.xlu1 %v5614_v44, %s6270_s10  ;;  %5334 = vrot.lane.b32.xlu0 %v5287_v47, %s6270_s10  ;;  %v5233_v6 = vpop.permute.xlu1 %5232 }
 0x580   : > { %v5606_v49 = vsel %vm2547_vm6, %v5567_v35, 0.0 }
 0x581   : > { %v5619_v37 = vadd.f32 %v5606_v49, %v5507_v8 }
 0x583   : > { %v5235_v51 = vpop.permute.xlu0 %5234  ;;  %5662 = vrot.lane.b32.xlu1 %v5619_v37, %s6270_s10  ;;  %v5237_v27 = vpop.permute.xlu1 %5236  ;;  %v6222_v37 = vld [vmem:[#allocation4 + $0x1f0] sm:$0xff] }
 0x584   : > { %v5249_v57 = vsel %vm2518_vm5, %v5233_v6, %v5235_v51  ;;  %v5250_v55 = vsel %vm2518_vm5, %v5235_v51, %v5237_v27  ;;  %v5251_v52 = vsel %vm2518_vm5, %v5237_v27, %v5239_v61  ;;  %v5398_v40 = vmul.f32 %v6222_v37, %v12432_v10 }
 0x585   : > { %v5284_v14 = vadd.f32 %v5249_v57, %v5172_v13  ;;  %v5285_v17 = vadd.f32 %v5250_v55, %v5173_v16  ;;  %v5286_v23 = vadd.f32 %v5251_v52, %v5174_v39  ;;  %v6223_v39 = vld [vmem:[#allocation4 + $0x198] sm:$0xff]  ;;  %v4890_v37 = vsel %vm2518_vm5, %v10756_v31, %v10759_v34 }
 0x587   : > { %v5457_v25 = vpop.permute.xlu0 %5456  ;;  %5328 = vrot.lane.b32.xlu0 %v5284_v14, %s6270_s10  ;;  %5330 = vrot.lane.b32.xlu1 %v5285_v17, %s6270_s10  ;;  %v5459_v1 = vpop.permute.xlu1 %5458  ;;  %v4916_v17 = vsel %vm2547_vm6, %v10759_v34, 0.0 }
 0x588   : > { %v5473_v48 = vsel %vm2518_vm5, %v5457_v25, %v5459_v1  ;;  %v12433_v25 = vld [vmem:[#allocation9_spill] sm:$0xff] }
 0x589   : > { %v5508_v49 = vadd.f32 %v5473_v48, %v5396_v3 }
 0x58b   : > { %v5461_v59 = vpop.permute.xlu0 %5460  ;;  %5332 = vrot.lane.b32.xlu0 %v5286_v23, %s6270_s10  ;;  %v5561_v28 = vpop.permute.xlu1 %5560 }
 0x58c   : > { %v5474_v58 = vsel %vm2518_vm5, %v5459_v1, %v5461_v59  ;;  %v5475_v2 = vsel %vm2518_vm5, %v5461_v59, %v11128_v15  ;;  %v4811_v1 = vmul.f32 %v6223_v39, %v12433_v25 }
 0x58d   : > { %v5510_v57 = vadd.f32 %v5475_v2, %v5398_v40  ;;  %v6228_v2 = vld [vmem:[#allocation4 + $0x1a0] sm:$0xff]  ;;  %v12436_v40 = vld [vmem:[#allocation92_spill] sm:$0xff] }
 0x58e   : > { %v4923_v19 = vadd.f32 %v4916_v17, %v4811_v1  ;;  %v6230_v17 = vld [vmem:[#allocation4 + $0x1b0] sm:$0xff]  ;;  %v6231_v1 = vld [vmem:[#allocation4 + $0x1d8] sm:$0xff] }
 0x58f   : > { %v5563_v36 = vpop.permute.xlu0 %5562  ;;  %v5565_v29 = vpop.permute.xlu1 %5564  ;;  %v4814_v39 = vmul.f32 %v6230_v17, %v12434_v60 }
 0x590   : > { %v5582_v41 = vsel %vm2518_vm5, %v5561_v28, %v5563_v36  ;;  %v5583_v22 = vsel %vm2518_vm5, %v5563_v36, %v5565_v29  ;;  %v5584_v61 = vsel %vm2518_vm5, %v5565_v29, %v5567_v35  ;;  %v6221_v35 = vld [vmem:[#allocation4 + $0x1e8] sm:$0xff]  ;;  %v5028_v28 = vsel %vm2547_vm6, %v10850_v33, 0.0 }
 0x591   : > { %v5616_v24 = vadd.f32 %v5582_v41, %v5504_v9  ;;  %v5617_v11 = vadd.f32 %v5583_v22, %v5505_v38  ;;  %v5618_v47 = vadd.f32 %v5584_v61, %v5506_v45  ;;  %v5397_v53 = vmul.f32 %v6221_v35, %v12432_v10  ;;  %v6226_v35 = vld [vmem:[#allocation4 + $0x188] sm:$0xff] }
 0x592   : > { %v4815_v9 = vmul.f32 %v6224_v63, %v12434_v60  ;;  %v5029_v36 = vsel %vm2547_vm6, %v10870_v32, 0.0  ;;  %v5035_v43 = vadd.f32 %v5028_v28, %v4923_v19  ;;  %v12440_v19 = vld [vmem:[#allocation109_spill] sm:$0xff]  ;;  %v12441_v63 = vld [vmem:[#allocation120_spill] sm:$0xff] }
 0x593   : > { %v5575_v30 = vpop.permute.xlu0 %5574  ;;  %5656 = vrot.lane.b32.xlu1 %v5616_v24, %s6270_s10  ;;  %5658 = vrot.lane.b32.xlu0 %v5617_v11, %s6270_s10  ;;  %v5569_v54 = vpop.permute.xlu1 %5568  ;;  %v5509_v4 = vadd.f32 %v5474_v58, %v5397_v53  ;;  %v6225_v58 = vld [vmem:[#allocation4 + $0x180] sm:$0xff]  ;;  %v4809_v53 = vmul.f32 %v6226_v35, %v12433_v25  ;;  %v12445_v35 = vld [vmem:[#allocation139_spill] sm:$0xff] }
 0x594   : > { %v5607_v44 = vsel %vm2547_vm6, %v5575_v30, 0.0  ;;  %v4927_v38 = vadd.f32 %v4917_v62, %v4815_v9  ;;  %v12439_v62 = vld [vmem:[#allocation10_spill] sm:$0xff]  ;;  %v5000_v9 = vsel %vm2518_vm5, %v12441_v63, %v12440_v19 }
 0x595   : > { %v5623_v8 = vadd.f32 %v5607_v44, %v5511_v18  ;;  %v4819_v28 = vmul.f32 %v6231_v1, %v12439_v62 }
 0x596   : > { %v5039_v12 = vadd.f32 %v5029_v36, %v4927_v38  ;;  %v12442_v36 = vld [vmem:[#allocation125_spill] sm:$0xff] }
 0x597   : > { %v5571_v6 = vpop.permute.xlu0 %5570  ;;  %5660 = vrot.lane.b32.xlu1 %v5618_v47, %s6270_s10  ;;  %5670 = vrot.lane.b32.xlu0 %v5623_v8, %s6270_s10  ;;  %v5573_v26 = vpop.permute.xlu1 %5572  ;;  %v4808_v47 = vmul.f32 %v6225_v58, %v12433_v25  ;;  %v4888_v8 = vsel %vm2518_vm5, %v10746_v46, %v10748_v21  ;;  %v12435_v46 = vld [vmem:[#allocation97_spill] sm:$0xff] }
 0x598   : > { %v5585_v20 = vsel %vm2518_vm5, %v5569_v54, %v5571_v6  ;;  %v5586_v51 = vsel %vm2518_vm5, %v5571_v6, %v5573_v26  ;;  %v5587_v5 = vsel %vm2518_vm5, %v5573_v26, %v5575_v30  ;;  %v4889_v26 = vsel %vm2518_vm5, %v10748_v21, %v10756_v31  ;;  %v12438_v31 = vld [vmem:[#allocation107_spill] sm:$0xff] }
 0x599   : > { %v5620_v13 = vadd.f32 %v5585_v20, %v5508_v49  ;;  %v5621_v16 = vadd.f32 %v5586_v51, %v5509_v4  ;;  %v5622_v15 = vadd.f32 %v5587_v5, %v5510_v57  ;;  %v6227_v49 = vld [vmem:[#allocation4 + $0x190] sm:$0xff]  ;;  %v4812_v4 = vmul.f32 %v6228_v2, %v12434_v60  ;;  %v6229_v51 = vld [vmem:[#allocation4 + $0x1a8] sm:$0xff] }
 0x59a   : > { %v4810_v6 = vmul.f32 %v6227_v49, %v12433_v25  ;;  %v4813_v5 = vmul.f32 %v6229_v51, %v12434_v60  ;;  %v12437_v57 = vld [vmem:[#allocation103_spill] sm:$0xff]  ;;  %v4918_v34 = vsel %vm2547_vm6, %v12438_v31, 0.0  ;;  %v4920_v25 = vadd.f32 %v4888_v8, %v4808_v47  ;;  %v12446_v49 = vld [vmem:[#allocation145_spill] sm:$0xff] }
 0x59b   : > { %5664 = vrot.lane.b32.xlu1 %v5620_v13, %s6270_s10  ;;  %5666 = vrot.lane.b32.xlu0 %v5621_v16, %s6270_s10  ;;  %v4891_v13 = vsel %vm2518_vm5, %v12436_v40, %v12435_v46  ;;  %v4893_v21 = vsel %vm2518_vm5, %v12437_v57, %v10781_v42  ;;  %v4921_v60 = vadd.f32 %v4889_v26, %v4809_v53  ;;  %v12444_v42 = vld [vmem:[#allocation117_spill] sm:$0xff] }
 0x59c   : > { %v4922_v38 = vadd.f32 %v4890_v37, %v4810_v6  ;;  %v5030_v6 = vsel %vm2547_vm6, %v12446_v49, 0.0 }
 0x59f   : > { %5668 = vrot.lane.b32.xlu1 %v5622_v15, %s6270_s10  ;;  %v4892_v15 = vsel %vm2518_vm5, %v12435_v46, %v12437_v57 }
 0x5a1   : > { %v11197_v27 = vpop.permute.xlu0 %5310 }
 0x5a2   : > { %v5364_v50 = vsel %vm3163_vm8, %v11197_v27, 0.0 }
 0x5a3   : > { %v5371_v24 = vadd.f32 %v5364_v50, %v5035_v43  ;;  %v5001_v50 = vsel %vm2518_vm5, %v12440_v19, %v12442_v36  ;;  %v4924_v43 = vadd.f32 %v4891_v13, %v4812_v4 }
 0x5a5   : > { %v11199_v56 = vpop.permute.xlu1 %5318 }
 0x5a6   : > { %v5365_v0 = vsel %vm3163_vm8, %v11199_v56, 0.0 }
 0x5a7   : > { %v5375_v22 = vadd.f32 %v5365_v0, %v5039_v12  ;;  %v12443_v0 = vld [vmem:[#allocation121_spill] sm:$0xff] }
 0x5a8   : > { %v5004_v53 = vsel %vm2518_vm5, %v12443_v0, %v12445_v35 }
 0x5b1   : > { %v11201_v7 = vpop.permute.xlu0 %5304 }
 0x5b5   : > { %v11203_v14 = vpop.permute.xlu1 %5306  ;;  %v11205_v55 = vpop.permute.xlu0 %5308 }
 0x5b6   : > { %v5336_v58 = vsel %vm3134_vm7, %v11201_v7, %v11203_v14  ;;  %v5337_v7 = vsel %vm3134_vm7, %v11203_v14, %v11205_v55 }
 0x5b9   : > { %v11207_v52 = vpop.permute.xlu1 %5312  ;;  %v11212_v23 = vpop.permute.xlu0 %5314 }
 0x5ba   : > { %v5339_v47 = vsel %vm3134_vm7, %v11207_v52, %v11212_v23  ;;  %v5338_v52 = vsel %vm3134_vm7, %v11205_v55, %v11197_v27 }
 0x5bd   : > { %v11214_v59 = vpop.permute.xlu1 %5316 }
 0x5be   : > { %v5341_v40 = vsel %vm3134_vm7, %v11214_v59, %v11199_v56 }
 0x5c9   : > { %v11225_v41 = vpop.permute.xlu0 %5326 }
 0x5ca   : > { %v5366_v56 = vsel %vm3163_vm8, %v11225_v41, 0.0 }
 0x5cd   : > { %v11227_v29 = vpop.permute.xlu1 %5646 }
 0x5ce   : > { %v5700_v10 = vsel %vm3163_vm8, %v11227_v29, 0.0 }
 0x5cf   : > { %v5707_v61 = vadd.f32 %v5700_v10, %v5371_v24  ;;  %v5003_v10 = vsel %vm2518_vm5, %v12444_v42, %v12443_v0  ;;  %v4925_v24 = vadd.f32 %v4892_v15, %v4813_v5 }
 0x5d0   : > { %v5036_v8 = vadd.f32 %v5003_v10, %v4924_v43 }
 0x5d1   : > { %v11233_v11 = vpop.permute.xlu0 %5654  ;;  %v5747_v30 = vsel %vm541_vm0, %v5707_v61, 0.0  ;;  %v4931_v61 = vadd.f32 %v4918_v34, %v4819_v28  ;;  %v5037_v51 = vadd.f32 %v5004_v53, %v4925_v24  ;;  %v12447_v24 = vld [vmem:[#allocation110_spill] sm:$0xff] }
 0x5d2   : > { %v5701_v45 = vsel %vm3163_vm8, %v11233_v11, 0.0  ;;  %v5372_v46 = vadd.f32 %v5339_v47, %v5036_v8  ;;  %v12451_v8 = vld [vmem:[#allocation114_spill] sm:$0xff] }
 0x5d3   : > { %v5711_v18 = vadd.f32 %v5701_v45, %v5375_v22  ;;  %v4926_v22 = vadd.f32 %v4893_v21, %v4814_v39  ;;  %v5002_v45 = vsel %vm2518_vm5, %v12442_v36, %v10850_v33  ;;  %v5005_v33 = vsel %vm2518_vm5, %v12445_v35, %v10870_v32 }
 0x5d4   : > { %v5034_v2 = vadd.f32 %v5002_v45, %v4922_v38  ;;  %v5340_v32 = vsel %vm3134_vm7, %v11212_v23, %v11214_v59  ;;  %v5043_v5 = vadd.f32 %v5030_v6, %v4931_v61  ;;  %v6232_v61 = vld [vmem:[#allocation4 + $0x1c0] sm:$0xff]  ;;  %v4895_v35 = vsel %vm2518_vm5, %v12447_v24, %v12451_v8 }
 0x5d5   : > { %v5748_v48 = vsel %vm541_vm0, %v5711_v18, 0.0  ;;  %v5038_v14 = vadd.f32 %v5005_v33, %v4926_v22  ;;  %v5373_v23 = vadd.f32 %v5340_v32, %v5037_v51  ;;  %v12448_v22 = vld [vmem:[#allocation104_spill] sm:$0xff]  ;;  %v4816_v45 = vmul.f32 %v6232_v61, %v12439_v62  ;;  %v6233_v33 = vld [vmem:[#allocation4 + $0x1c8] sm:$0xff] }
 0x5d6   : > { %v11239_v44 = vadd.f32 %v5748_v48, %v5747_v30  ;;  %v5032_v30 = vadd.f32 %v5000_v9, %v4920_v25  ;;  %v5033_v48 = vadd.f32 %v5001_v50, %v4921_v60  ;;  %v5370_v39 = vadd.f32 %v5338_v52, %v5034_v2  ;;  %v6234_v2 = vld [vmem:[#allocation4 + $0x1d0] sm:$0xff] }
 0x5d7   : > { %v5374_v21 = vadd.f32 %v5341_v40, %v5038_v14  ;;  %v4817_v6 = vmul.f32 %v6233_v33, %v12439_v62  ;;  %v6235_v40 = vld [vmem:[#allocation4 + $0x1e0] sm:$0xff] }
 0x5d8   : > { %v5368_v37 = vadd.f32 %v5336_v58, %v5032_v30  ;;  %v5369_v17 = vadd.f32 %v5337_v7, %v5033_v48  ;;  %v12450_v30 = vld [vmem:[#allocation140_spill] sm:$0xff]  ;;  %v4818_v7 = vmul.f32 %v6234_v2, %v12439_v62 }
 0x5d9   : > { %v11241_v54 = vpop.permute.xlu1 %5320  ;;  %v12454_v62 = vld [vmem:[#allocation116_spill] sm:$0xff] }
 0x5dd   : > { %v11243_v3 = vpop.permute.xlu0 %5322  ;;  %v11252_v20 = vpop.permute.xlu1 %5324 }
 0x5de   : > { %v5342_v52 = vsel %vm3134_vm7, %v11241_v54, %v11243_v3 }
 0x5e5   : > { %v5641_v16 = vpop.permute.xlu0 %5640 }
 0x5e9   : > { %v5643_v12 = vpop.permute.xlu1 %5642  ;;  %v5645_v18 = vpop.permute.xlu0 %5644 }
 0x5ea   : > { %v5672_v4 = vsel %vm3134_vm7, %v5641_v16, %v5643_v12  ;;  %v5673_v55 = vsel %vm3134_vm7, %v5643_v12, %v5645_v18  ;;  %v5674_v16 = vsel %vm3134_vm7, %v5645_v18, %v11227_v29  ;;  %v5379_v29 = vadd.f32 %v5366_v56, %v5043_v5  ;;  %v12449_v18 = vld [vmem:[#allocation59_spill] sm:$0xff]  ;;  %v12455_v5 = vld [vmem:[#allocation58_spill] sm:$0xff] }
 0x5eb   : > { %v5704_v27 = vadd.f32 %v5672_v4, %v5368_v37  ;;  %v5705_v28 = vadd.f32 %v5673_v55, %v5369_v17  ;;  %v5706_v19 = vadd.f32 %v5674_v16, %v5370_v39  ;;  %v5006_v48 = vsel %vm2518_vm5, %v12450_v30, %v12449_v18  ;;  %v12457_v56 = vld [vmem:[#allocation127_spill] sm:$0xff] }
 0x5ec   : > { %v5344_v55 = vsel %vm3134_vm7, %v11252_v20, %v11225_v41 }
 0x5ed   : > { %v5649_v26 = vpop.permute.xlu1 %5648  ;;  %v5651_v13 = vpop.permute.xlu0 %5650 }
 0x5ee   : > { %v5675_v57 = vsel %vm3134_vm7, %v5649_v26, %v5651_v13  ;;  %v12452_v26 = vld [vmem:[#allocation165_spill] sm:$0xff] }
 0x5ef   : > { %v5708_v15 = vadd.f32 %v5675_v57, %v5372_v46  ;;  %v5007_v37 = vsel %vm2518_vm5, %v12449_v18, %v12452_v26  ;;  %v4929_v46 = vadd.f32 %v4895_v35, %v4817_v6  ;;  %v4897_v57 = vsel %vm2518_vm5, %v12455_v5, %v12454_v62  ;;  %v12460_v6 = vld [vmem:[#allocation118_spill] sm:$0xff] }
 0x5f1   : > { %v5653_v34 = vpop.permute.xlu1 %5652  ;;  %v5720_v59 = vadd.f32 %v5708_v15, %v5704_v27  ;;  %v5335_v0 = vpop.permute.xlu0 %5334  ;;  %v5343_v27 = vsel %vm3134_vm7, %v11243_v3, %v11252_v20  ;;  %v5041_v16 = vadd.f32 %v5007_v37, %v4929_v46 }
 0x5f2   : > { %v5676_v25 = vsel %vm3134_vm7, %v5651_v13, %v5653_v34  ;;  %v5677_v1 = vsel %vm3134_vm7, %v5653_v34, %v11233_v11  ;;  %v4894_v11 = vsel %vm2518_vm5, %v12448_v22, %v12447_v24  ;;  %v12453_v13 = vld [vmem:[#allocation13_spill] sm:$0xff]  ;;  %v5367_v17 = vsel %vm3163_vm8, %v5335_v0, 0.0  ;;  %v12456_v34 = vld [vmem:[#allocation144_spill] sm:$0xff] }
 0x5f3   : > { %v5709_v63 = vadd.f32 %v5676_v25, %v5373_v23  ;;  %v5710_v9 = vadd.f32 %v5677_v1, %v5374_v21  ;;  %v4928_v47 = vadd.f32 %v4894_v11, %v4816_v45  ;;  %v4820_v51 = vmul.f32 %v6235_v40, %v12453_v13 }
 0x5f4   : > { %v5009_v25 = vsel %vm2518_vm5, %v12457_v56, %v12456_v34  ;;  %v5377_v1 = vadd.f32 %v5343_v27, %v5041_v16 }
 0x5f5   : > { %v5729_v36 = vadd.f32 %v5709_v63, %v5705_v28  ;;  %v5738_v50 = vadd.f32 %v5710_v9, %v5706_v19  ;;  %v5663_v60 = vpop.permute.xlu1 %5662  ;;  %v5040_v4 = vadd.f32 %v5006_v48, %v4928_v47  ;;  %v4932_v21 = vadd.f32 %v4897_v57, %v4820_v51  ;;  %v12458_v19 = vld [vmem:[#allocation70_spill] sm:$0xff] }
 0x5f6   : > { %v5702_v38 = vsel %vm3163_vm8, %v5663_v60, 0.0  ;;  %v5383_v63 = vadd.f32 %v5367_v17, %v12458_v19 }
 0x5f7   : > { %v5715_v43 = vadd.f32 %v5702_v38, %v5379_v29  ;;  %v5376_v54 = vadd.f32 %v5342_v52, %v5040_v4  ;;  %v5044_v22 = vadd.f32 %v5009_v25, %v4932_v21 }
 0x5f9   : > { %v5750_v42 = vsel %vm541_vm0, %v5715_v43, 0.0  ;;  %v5329_v12 = vpop.permute.xlu0 %5328  ;;  %v5331_v58 = vpop.permute.xlu1 %5330 }
 0x5fa   : > { %v5751_v10 = vadd.f32 %v5750_v42, %v11239_v44  ;;  %v4896_v44 = vsel %vm2518_vm5, %v12451_v8, %v12438_v31  ;;  %v5008_v31 = vsel %vm2518_vm5, %v12452_v26, %v12446_v49  ;;  %v5345_v38 = vsel %vm3134_vm7, %v5329_v12, %v5331_v58 }
 0x5fb   : > { %v4930_v32 = vadd.f32 %v4896_v44, %v4818_v7  ;;  %v5380_v30 = vadd.f32 %v5345_v38, %v5044_v22  ;;  %v12459_v44 = vld [vmem:[#allocation129_spill] sm:$0xff] }
 0x5fc   : > { %v12464_v38 = vld [vmem:[#allocation105_spill] sm:$0xff] }
 0x5fd   : > { %v5333_v53 = vpop.permute.xlu0 %5332  ;;  %v5042_v15 = vadd.f32 %v5008_v31, %v4930_v32 }
 0x5fe   : > { %v5346_v48 = vsel %vm3134_vm7, %v5331_v58, %v5333_v53 }
 0x5ff   : > { %v5378_v28 = vadd.f32 %v5344_v55, %v5042_v15  ;;  %v5381_v33 = vadd.f32 %v5346_v48, %v12459_v44  ;;  %v12461_v15 = vld [vmem:[#allocation102_spill] sm:$0xff] }
 0x605   : > { %v5657_v14 = vpop.permute.xlu1 %5656  ;;  %v5659_v49 = vpop.permute.xlu0 %5658 }
 0x606   : > { %v5678_v39 = vsel %vm3134_vm7, %v5657_v14, %v5659_v49 }
 0x607   : > { %v5712_v23 = vadd.f32 %v5678_v39, %v5376_v54  ;;  %v5775_v54 = vstv %s278_s12 }
 0x609   : > { %v5661_v3 = vpop.permute.xlu1 %5660  ;;  %v5721_v9 = vadd.f32 %v5720_v59, %v5712_v23  ;;  %v5671_v29 = vpop.permute.xlu0 %5670  ;;  %v5347_v59 = vsel %vm3134_vm7, %v5333_v53, %v5335_v0 }
 0x60a   : > { %v5679_v41 = vsel %vm3134_vm7, %v5659_v49, %v5661_v3  ;;  %v5680_v20 = vsel %vm3134_vm7, %v5661_v3, %v5663_v60  ;;  %v5703_v24 = vsel %vm3163_vm8, %v5671_v29, 0.0  ;;  %v5382_v2 = vadd.f32 %v5347_v59, %v12460_v6 }
 0x60b   : > { %v5713_v43 = vadd.f32 %v5679_v41, %v5377_v1  ;;  %v5714_v42 = vadd.f32 %v5680_v20, %v5378_v28  ;;  %v5719_v11 = vadd.f32 %v5703_v24, %v5383_v63  ;;  %v12462_v28 = vld [vmem:[#allocation64_spill] sm:$0xff]  ;;  %v12463_v20 = vld [vmem:[#allocation98_spill] sm:$0xff] }
 0x60d   : > { %v5730_v61 = vadd.f32 %v5729_v36, %v5713_v43  ;;  %v5739_v45 = vadd.f32 %v5738_v50, %v5714_v42  ;;  %v5665_v18 = vpop.permute.xlu1 %5664  ;;  %v5752_v47 = vsel %vm541_vm0, %v5719_v11, 0.0  ;;  %v5667_v60 = vpop.permute.xlu0 %5666 }
 0x60e   : > { %v5753_v8 = vadd.f32 %v5752_v47, %v5751_v10  ;;  %v5681_v12 = vsel %vm3134_vm7, %v5665_v18, %v5667_v60 }
 0x60f   : > { %v5716_v35 = vadd.f32 %v5681_v12, %v5380_v30 }
 0x610   : > { %v5754_v7 = vrot.slane %v5753_v8, 4 }
 0x611   : > { %v5669_v36 = vpop.permute.xlu1 %5668  ;;  %v5722_v50 = vadd.f32 %v5721_v9, %v5716_v35 }
 0x612   : > { %v5682_v52 = vsel %vm3134_vm7, %v5667_v60, %v5669_v36  ;;  %v5683_v58 = vsel %vm3134_vm7, %v5669_v36, %v5671_v29  ;;  %v5755_v0 = vadd.f32 %v5754_v7, %v5753_v8 }
 0x613   : > { %v5717_v53 = vadd.f32 %v5682_v52, %v5381_v33  ;;  %v5718_v4 = vadd.f32 %v5683_v58, %v5382_v2  ;;  %v5723_v26 = vrot.slane %v5722_v50, 4 }
 0x614   : > { %v5756_v10 = vrot.slane %v5755_v0, 2 }
 0x615   : > { %v5731_v37 = vadd.f32 %v5730_v61, %v5717_v53  ;;  %v5740_v31 = vadd.f32 %v5739_v45, %v5718_v4  ;;  %v5724_v46 = vadd.f32 %v5723_v26, %v5722_v50 }
 0x616   : > { %v5757_v32 = vadd.f32 %v5756_v10, %v5755_v0 }
 0x617   : > { %v5732_v40 = vrot.slane %v5731_v37, 4  ;;  %v5741_v13 = vrot.slane %v5740_v31, 4  ;;  %v5725_v51 = vrot.slane %v5724_v46, 2 }
 0x618   : > { %v5758_v14 = vrot.slane %v5757_v32, 1 }
 0x619   : > { %v5733_v62 = vadd.f32 %v5732_v40, %v5731_v37  ;;  %v5742_v5 = vadd.f32 %v5741_v13, %v5740_v31  ;;  %v5726_v57 = vadd.f32 %v5725_v51, %v5724_v46 }
 0x61a   : > { %v5759_v27 = vadd.f32 %v5758_v14, %v5757_v32 }
 0x61b   : > { %v5734_v55 = vrot.slane %v5733_v62, 2  ;;  %v5743_v49 = vrot.slane %v5742_v5, 2  ;;  %v5727_v16 = vrot.slane %v5726_v57, 1 }
 0x61c   : > { %v5774_v17 = vsel %vm5770_vm11, %v12461_v15, %v5759_v27 }
 0x61d   : > { %v5735_v39 = vadd.f32 %v5734_v55, %v5733_v62  ;;  %v5744_v23 = vadd.f32 %v5743_v49, %v5742_v5  ;;  %v5779_v21 = vadd.f32 %v5775_v54, %v5774_v17  ;;  %v5728_v34 = vadd.f32 %v5727_v16, %v5726_v57 }
 0x61f   : > { %v5736_v56 = vrot.slane %v5735_v39, 1  ;;  %v5745_v25 = vrot.slane %v5744_v23, 1  ;;  %v6020_v1 = vmul.f32 -1.442695, %v5779_v21  ;;  %v5771_v3 = vsel %vm5770_vm11, %v12462_v28, %v5728_v34 }
 0x620   : > { %v5776_v19 = vadd.f32 %v5775_v54, %v5771_v3 }
 0x621   : > { %v5737_v63 = vadd.f32 %v5736_v56, %v5735_v39  ;;  %v5746_v9 = vadd.f32 %v5745_v25, %v5744_v23  ;;  %6052 = vpow2.f32 %v6020_v1 }
 0x622   : > { %v6017_v41 = vmul.f32 -1.442695, %v5776_v19 }
 0x623   : > { %v5772_v29 = vsel %vm5770_vm11, %v12463_v20, %v5737_v63  ;;  %v5773_v43 = vsel %vm5770_vm11, %v12464_v38, %v5746_v9 }
 0x624   : > { %v5777_v42 = vadd.f32 %v5775_v54, %v5772_v29  ;;  %v5778_v24 = vadd.f32 %v5775_v54, %v5773_v43  ;;  %6054 = vpow2.f32 %v6017_v41 }
 0x626   : > { %v6018_v22 = vmul.f32 -1.442695, %v5777_v42  ;;  %v6019_v11 = vmul.f32 -1.442695, %v5778_v24 }
 0x628   : > { %6056 = vpow2.f32 %v6018_v22 }
 0x629   : > { %6058 = vpow2.f32 %v6019_v11 }
 0x62e   : > { %v6053_v61 = vpop.eup %6052 }
 0x62f   : > { %v5795_v18 = vadd.f32 1.0, %v6053_v61 }
 0x631   : > { %v6055_v45 = vpop.eup %6054  ;;  %6060 = vrcp.f32 %v5795_v18 }
 0x632   : > { %v5792_v30 = vadd.f32 1.0, %v6055_v45 }
 0x634   : > { %6062 = vrcp.f32 %v5792_v30 }
 0x635   : > { %v6057_v48 = vpop.eup %6056 }
 0x636   : > { %v6059_v59 = vpop.eup %6058  ;;  %v5793_v47 = vadd.f32 1.0, %v6057_v48 }
 0x637   : > { %v5794_v60 = vadd.f32 1.0, %v6059_v59 }
 0x638   : > { %6064 = vrcp.f32 %v5793_v47 }
 0x639   : > { %6066 = vrcp.f32 %v5794_v60 }
 0x63e   : > { %v6061_v8 = vpop.eup %6060 }
 0x641   : > { %v6063_v12 = vpop.eup %6062 }
 0x645   : > { %v6065_v35 = vpop.eup %6064 }
 0x646   : > { %v6067_v44 = vpop.eup %6066  ;;  %v5808_v33 = vcombine.low %v6063_v12, %v6065_v35 }
 0x647   : > { %v5809_v6 = vcombine.low %v6067_v44, %v6061_v8 }
 0x648   : > { %5812 = vst [vmem:[%s273_s16] sm:$0xff] %v5808_v33 }
 0x649   : > { %5816 = vst.msk [vmem:[%s273_s16 + $0x8] sm:$0xff] %vm5815_vm14, %v5809_v6 }
 0x64a PF: > { %s19_s26 = sadd.s32 1, %s6261_s26  }
 0x64b   : > { %p16_p1 = scmp.ge.s32.totalorder %s19_s26, 4  }
 0x64d   :  { %18 = sbr.rel (!%p16_p1) target bundleno = 3 (0x3), region = 92 }
 0x652   :  { %5838 = vsyncpa [#allocation7], 1 }
 0x653   :  { %5840 = vsyncpa [#allocation7 + $0x1], 1 }

</bundles_post_ra>
